<compile_context>
chip_gen: v7x
topology: tpu7x:2x2x1
jax: 0.10.0
libtpu: 0.0.40
codegen_flags: <defaults>
</compile_context>

<pallas_src>
import functools

import jax
import jax.numpy as jnp
from jax.experimental import pallas as pl
from jax.experimental.pallas import tpu as pltpu

NUM_CLASS = 50
CFG = [(64, 3, 1), (128, 4, 2), (256, 6, 2), (512, 3, 2)]  # (cout, blocks, stride)
_VMEM_LIMIT = 32 * 1024 * 1024


def _round_up(x, m):
    return (x + m - 1) // m * m


# ---------------------------------------------------------------------------
# Fused conv kernel: accumulate tap-matmuls, then BN scale/bias (+res) (+ReLU)
# ---------------------------------------------------------------------------
def _conv_mm_kernel(a_ref, b_ref, s_ref, c_ref, o_ref, acc_ref, *, relu):
    t = pl.program_id(2)

    @pl.when(t == 0)
    def _():
        acc_ref[...] = jnp.zeros_like(acc_ref)

    acc_ref[...] += jnp.dot(a_ref[...], b_ref[...],
                            preferred_element_type=jnp.float32)

    @pl.when(t == pl.num_programs(2) - 1)
    def _():
        out = acc_ref[...] * s_ref[...] + c_ref[...]
        if relu:
            out = jnp.maximum(out, 0.0)
        o_ref[...] = out.astype(o_ref.dtype)


def _conv_mm_res_kernel(a_ref, b_ref, s_ref, c_ref, r_ref, o_ref, acc_ref, *,
                        relu):
    t = pl.program_id(2)

    @pl.when(t == 0)
    def _():
        acc_ref[...] = jnp.zeros_like(acc_ref)

    acc_ref[...] += jnp.dot(a_ref[...], b_ref[...],
                            preferred_element_type=jnp.float32)

    @pl.when(t == pl.num_programs(2) - 1)
    def _():
        out = (acc_ref[...] * s_ref[...] + c_ref[...]
               + r_ref[...].astype(jnp.float32))
        if relu:
            out = jnp.maximum(out, 0.0)
        o_ref[...] = out.astype(o_ref.dtype)


@functools.lru_cache(maxsize=None)
def _build_fused_conv_matmul(T, Mp, K, Nc, TM, TN, has_residual, relu):
    in_specs = [
        pl.BlockSpec((None, TM, K), lambda i, j, t: (t, i, 0)),   # act taps (bf16)
        pl.BlockSpec((None, K, TN), lambda i, j, t: (t, 0, j)),   # weights (bf16)
        pl.BlockSpec((1, TN), lambda i, j, t: (0, j)),            # bn scale (f32)
        pl.BlockSpec((1, TN), lambda i, j, t: (0, j)),            # bn bias  (f32)
    ]
    if has_residual:
        in_specs.append(pl.BlockSpec((TM, TN), lambda i, j, t: (i, j)))
        kernel = functools.partial(_conv_mm_res_kernel, relu=relu)
    else:
        kernel = functools.partial(_conv_mm_kernel, relu=relu)
    return pl.pallas_call(
        kernel,
        out_shape=jax.ShapeDtypeStruct((Mp, Nc), jnp.bfloat16),
        grid=(Mp // TM, Nc // TN, T),
        in_specs=in_specs,
        out_specs=pl.BlockSpec((TM, TN), lambda i, j, t: (i, j)),
        scratch_shapes=[pltpu.VMEM((TM, TN), jnp.float32)],
        compiler_params=pltpu.CompilerParams(
            dimension_semantics=("parallel", "parallel", "arbitrary"),
            vmem_limit_bytes=_VMEM_LIMIT),
    )


def _fused_conv_matmul(a, b, scale, bias, residual=None, relu=True):
    """a: (T, M, K) bf16, b: (T, K, Nc) bf16, scale/bias: (1, Nc) f32."""
    T, M, K = a.shape
    _, _, Nc = b.shape
    TM = min(128, _round_up(M, 8))
    Mp = _round_up(M, TM)
    if Nc >= 512:
        TN = 256
    elif Nc >= 128:
        TN = 128
    else:
        TN = Nc
    if Mp != M:
        a = jnp.pad(a, ((0, 0), (0, Mp - M), (0, 0)))
        if residual is not None:
            residual = jnp.pad(residual, ((0, Mp - M), (0, 0)))
    call = _build_fused_conv_matmul(T, Mp, K, Nc, TM, TN,
                                    residual is not None, relu)
    args = [a, b, scale, bias]
    if residual is not None:
        args.append(residual)
    out = call(*args)
    return out[:M] if Mp != M else out


# ---------------------------------------------------------------------------
# Conv + folded-BN wrapper (shifted/strided NHWC tap views, no im2col concat)
# ---------------------------------------------------------------------------
def conv_bn(x, w_packed, scale, bias, kh, kw, stride, pad,
            relu=True, residual=None):
    """x: NHWC bf16; w_packed: (T, K, Cout) bf16 (pre-packed at init)."""
    N, H, W, Cin = x.shape
    T, K, Cout = w_packed.shape
    xp = jnp.pad(x, ((0, 0), (pad, pad), (pad, pad), (0, 0))) if pad else x
    OH = (H + 2 * pad - kh) // stride + 1
    OW = (W + 2 * pad - kw) // stride + 1
    M = N * OH * OW
    taps = [xp[:, i:i + stride * (OH - 1) + 1:stride,
               j:j + stride * (OW - 1) + 1:stride, :]
            for i in range(kh) for j in range(kw)]
    if T == kh * kw:
        # Conv as a sum over taps: per-tap K = Cin.
        a = jnp.stack([t.reshape(M, Cin) for t in taps], axis=0)
    else:
        # Small-Cin stem: single full-K row (K pre-padded in the weights).
        a = jnp.concatenate(taps, axis=-1).reshape(1, M, kh * kw * Cin)
        if a.shape[-1] != K:
            a = jnp.pad(a, ((0, 0), (0, 0), (0, K - a.shape[-1])))
    r = residual.reshape(M, Cout) if residual is not None else None
    out = _fused_conv_matmul(a, w_packed, scale, bias, residual=r, relu=relu)
    return out.reshape(N, OH, OW, Cout)


# ---------------------------------------------------------------------------
# MaxPool2d(3, stride=2, padding=1): running max over 9 shifted taps
# ---------------------------------------------------------------------------
def _maxpool_kernel(x_ref, o_ref):
    t = pl.program_id(1)

    @pl.when(t == 0)
    def _():
        o_ref[...] = x_ref[...]

    @pl.when(t != 0)
    def _():
        o_ref[...] = jnp.maximum(o_ref[...], x_ref[...])


def maxpool_3x3_s2_p1(x):
    N, H, W, C = x.shape
    xp = jnp.pad(x, ((0, 0), (1, 1), (1, 1), (0, 0)),
                 constant_values=-jnp.inf)
    OH = (H + 2 - 3) // 2 + 1
    OW = (W + 2 - 3) // 2 + 1
    M = N * OH * OW
    taps = [xp[:, i:i + 2 * (OH - 1) + 1:2, j:j + 2 * (OW - 1) + 1:2, :]
            .reshape(M, C) for i in range(3) for j in range(3)]
    a = jnp.stack(taps, axis=0)                      # (9, M, C) bf16
    TM = min(128, _round_up(M, 8))
    Mp = _round_up(M, TM)
    if Mp != M:
        a = jnp.pad(a, ((0, 0), (0, Mp - M), (0, 0)))
    out = pl.pallas_call(
        _maxpool_kernel,
        out_shape=jax.ShapeDtypeStruct((Mp, C), x.dtype),
        grid=(Mp // TM, 9),
        in_specs=[pl.BlockSpec((None, TM, C), lambda i, t: (t, i, 0))],
        out_specs=pl.BlockSpec((TM, C), lambda i, t: (i, 0)),
        compiler_params=pltpu.CompilerParams(
            dimension_semantics=("parallel", "arbitrary"),
            vmem_limit_bytes=_VMEM_LIMIT),
    )(a)
    out = out[:M] if Mp != M else out
    return out.reshape(N, OH, OW, C)


# ---------------------------------------------------------------------------
# Fused AdaptiveAvgPool2d(1) + flatten + Linear(512, num_class) head
# ---------------------------------------------------------------------------
def _head_kernel(x_ref, w_ref, b_ref, o_ref):
    pooled = jnp.mean(x_ref[...].astype(jnp.float32), axis=1)   # (N, C)
    o_ref[...] = (jnp.dot(pooled, w_ref[...],
                          preferred_element_type=jnp.float32) + b_ref[...])


def head_avgpool_linear(x, w_p, b_p):
    """x: (N, S, C) bf16; w_p: (C, Np) f32 pre-padded; b_p: (1, Np) f32."""
    N, S, C = x.shape
    Np = w_p.shape[1]
    return pl.pallas_call(
        _head_kernel,
        out_shape=jax.ShapeDtypeStruct((N, Np), jnp.float32),
        grid=(1,),
        in_specs=[
            pl.BlockSpec((N, S, C), lambda i: (0, 0, 0)),
            pl.BlockSpec((C, Np), lambda i: (0, 0)),
            pl.BlockSpec((1, Np), lambda i: (0, 0)),
        ],
        out_specs=pl.BlockSpec((N, Np), lambda i: (0, 0)),
        compiler_params=pltpu.CompilerParams(vmem_limit_bytes=_VMEM_LIMIT),
    )(x, w_p, b_p)


# ---------------------------------------------------------------------------
# Parameters (deterministic synthetic init, pre-packed for the kernels)
# ---------------------------------------------------------------------------
def init_params(key):
    keys = iter(jax.random.split(key, 256))

    def conv_w(kh, kw, cin, cout):
        k = next(keys)
        return (jax.random.normal(k, (kh, kw, cin, cout), jnp.float32)
                * jnp.sqrt(2.0 / (kh * kw * cin)))

    def pack(w):
        """(KH,KW,Cin,Cout) -> (T, K, Cout) bf16; per-tap for Cin>=64 else full-K."""
        kh, kw, cin, cout = w.shape
        if cin >= 64:
            wp = w.reshape(kh * kw, cin, cout)
        else:
            k = kh * kw * cin
            kp = _round_up(k, 16)
            wp = jnp.pad(w.reshape(1, k, cout), ((0, 0), (0, kp - k), (0, 0)))
        return wp.astype(jnp.bfloat16)

    def bn(cout):
        gamma = 1.0 + 0.1 * jax.random.normal(next(keys), (cout,), jnp.float32)
        beta = 0.1 * jax.random.normal(next(keys), (cout,), jnp.float32)
        run_mean = jnp.zeros((cout,), jnp.float32)
        run_var = jnp.ones((cout,), jnp.float32)
        scale = gamma / jnp.sqrt(run_var + 1e-5)
        bias = beta - run_mean * scale
        return scale.reshape(1, cout), bias.reshape(1, cout)

    params = {"conv1": {"w": pack(conv_w(7, 7, 3, 64))}}
    params["conv1"]["s"], params["conv1"]["b"] = bn(64)

    layers = []
    cin = 64
    for cout, nblocks, stride in CFG:
        blocks = []
        for bi in range(nblocks):
            s = stride if bi == 0 else 1
            blk = {"w1": pack(conv_w(3, 3, cin, cout))}
            blk["s1"], blk["b1"] = bn(cout)
            blk["w2"] = pack(conv_w(3, 3, cout, cout))
            blk["s2"], blk["b2"] = bn(cout)
            if s != 1 or cin != cout:
                blk["down_w"] = pack(conv_w(1, 1, cin, cout))
                blk["down_s"], blk["down_b"] = bn(cout)
            blocks.append(blk)
            cin = cout
        layers.append(blocks)
    params["layers"] = layers

    np_cls = _round_up(NUM_CLASS, 128)
    fc_w = (jax.random.normal(next(keys), (512, NUM_CLASS), jnp.float32)
            / jnp.sqrt(512.0))
    fc_b = 0.01 * jax.random.normal(next(keys), (NUM_CLASS,), jnp.float32)
    params["fc_w"] = jnp.pad(fc_w, ((0, 0), (0, np_cls - NUM_CLASS)))
    params["fc_b"] = jnp.pad(fc_b, (0, np_cls - NUM_CLASS)).reshape(1, np_cls)
    return params


# ---------------------------------------------------------------------------
# Forward pass (backbone children[:9] + reshape(-1, 512) + classifier)
# ---------------------------------------------------------------------------
def forward(x_nchw, params):
    # Accept NCHW (PyTorch convention); compute internally in NHWC bf16.
    x = jnp.transpose(x_nchw, (0, 2, 3, 1)).astype(jnp.bfloat16)

    c1 = params["conv1"]
    x = conv_bn(x, c1["w"], c1["s"], c1["b"], 7, 7, stride=2, pad=3, relu=True)
    x = maxpool_3x3_s2_p1(x)

    for li, (cout, nblocks, stride) in enumerate(CFG):
        for bi in range(nblocks):
            blk = params["layers"][li][bi]
            s = stride if bi == 0 else 1
            identity = x
            if "down_w" in blk:
                identity = conv_bn(x, blk["down_w"], blk["down_s"],
                                   blk["down_b"], 1, 1, stride=s, pad=0,
                                   relu=False)
            y = conv_bn(x, blk["w1"], blk["s1"], blk["b1"], 3, 3,
                        stride=s, pad=1, relu=True)
            x = conv_bn(y, blk["w2"], blk["s2"], blk["b2"], 3, 3,
                        stride=1, pad=1, relu=True, residual=identity)

    # AdaptiveAvgPool2d(1) + reshape(-1, 512) + Linear(512, num_class)
    N, H, W, C = x.shape
    logits = head_avgpool_linear(x.reshape(N, H * W, C),
                                 params["fc_w"], params["fc_b"])
    return logits[:, :NUM_CLASS]


if __name__ == "__main__":
    key = jax.random.PRNGKey(0)
    pkey, xkey = jax.random.split(key)
    params = init_params(pkey)
    # Small NCHW input (batch=2, 3 channels, 64x64 so spatial survives /32).
    x = jax.random.normal(xkey, (2, 3, 64, 64), jnp.float32)
    fwd = jax.jit(forward)
    out = fwd(x, params)
    out = jax.block_until_ready(out)
    assert out.shape == (2, NUM_CLASS), out.shape
    assert bool(jnp.all(jnp.isfinite(out)))
    print("KERNEL_OK")
</pallas_src>

<mosaic_0001>
module attributes {stable_mosaic.version = 11 : i64} {
  func.func @_conv_mm_kernel(%arg0: i32, %arg1: i32, %arg2: i32, %arg3: memref<1x128x160xbf16, #tpu.memory_space<vmem>>, %arg4: memref<1x160x64xbf16, #tpu.memory_space<vmem>>, %arg5: memref<1x64xf32, #tpu.memory_space<vmem>>, %arg6: memref<1x64xf32, #tpu.memory_space<vmem>>, %arg7: memref<128x64xbf16, #tpu.memory_space<vmem>>, %arg8: memref<128x64xf32, #tpu.memory_space<vmem>>) attributes {dimension_semantics = [#tpu.dimension_semantics<parallel>, #tpu.dimension_semantics<parallel>, #tpu.dimension_semantics<arbitrary>], iteration_bounds = array<i64: 16, 1, 1>, scalar_prefetch = 0 : i64, scratch_operands = 1 : i64, tpu.core_type = #tpu.core_type<tc>, window_params = [{transform_indices = @transform_0, window_bounds = array<i64: 1, 128, 160>}, {transform_indices = @transform_1, window_bounds = array<i64: 1, 160, 64>}, {transform_indices = @transform_2, window_bounds = array<i64: 1, 64>}, {transform_indices = @transform_3, window_bounds = array<i64: 1, 64>}, {transform_indices = @transform_4, window_bounds = array<i64: 128, 64>}]} {
    %c0_i32 = arith.constant 0 : i32
    %0 = arith.cmpi eq, %arg2, %c0_i32 : i32
    %1 = arith.extui %0 : i1 to i32
    %c0_i32_0 = arith.constant 0 : i32
    %2 = arith.cmpi ne, %1, %c0_i32_0 : i32
    scf.if %2 {
      %cst_12 = arith.constant 0.000000e+00 : f32
      %14 = vector.broadcast %cst_12 : f32 to vector<128x64xf32>
      %c0_13 = arith.constant 0 : index
      %c0_14 = arith.constant 0 : index
      %15 = vector.load %arg8[%c0_13, %c0_14] : memref<128x64xf32, #tpu.memory_space<vmem>>, vector<128x64xf32>
      tpu.vector_store %arg8[%c0_13, %c0_14], %14 {strides = array<i32>} : memref<128x64xf32, #tpu.memory_space<vmem>>, vector<128x64xf32>,
    } else {
    }
    %c0 = arith.constant 0 : index
    %c0_1 = arith.constant 0 : index
    %3 = vector.load %arg8[%c0, %c0_1] : memref<128x64xf32, #tpu.memory_space<vmem>>, vector<128x64xf32>
    %c0_2 = arith.constant 0 : index
    %c0_3 = arith.constant 0 : index
    %c0_4 = arith.constant 0 : index
    %4 = vector.load %arg3[%c0_2, %c0_3, %c0_4] : memref<1x128x160xbf16, #tpu.memory_space<vmem>>, vector<1x128x160xbf16>
    %5 = vector.shape_cast %4 : vector<1x128x160xbf16> to vector<128x160xbf16>
    %c0_5 = arith.constant 0 : index
    %c0_6 = arith.constant 0 : index
    %c0_7 = arith.constant 0 : index
    %6 = vector.load %arg4[%c0_5, %c0_6, %c0_7] : memref<1x160x64xbf16, #tpu.memory_space<vmem>>, vector<1x160x64xbf16>
    %7 = vector.shape_cast %6 : vector<1x160x64xbf16> to vector<160x64xbf16>
    %cst = arith.constant dense<0.000000e+00> : vector<128x64xf32>
    %8 = tpu.matmul %5, %7, %cst {dimension_numbers = #tpu.dot_dimension_numbers<[1], [0], [0], [1], [0, 0, 1, 1], [], []>} : vector<128x160xbf16>, vector<160x64xbf16>, vector<128x64xf32> -> vector<128x64xf32>
    %9 = arith.addf %3, %8 : vector<128x64xf32>
    %c0_8 = arith.constant 0 : index
    %c0_9 = arith.constant 0 : index
    %10 = vector.load %arg8[%c0_8, %c0_9] : memref<128x64xf32, #tpu.memory_space<vmem>>, vector<128x64xf32>
    tpu.vector_store %arg8[%c0_8, %c0_9], %9 {strides = array<i32>} : memref<128x64xf32, #tpu.memory_space<vmem>>, vector<128x64xf32>,
    %c0_i32_10 = arith.constant 0 : i32
    %11 = arith.cmpi eq, %arg2, %c0_i32_10 : i32
    %12 = arith.extui %11 : i1 to i32
    %c0_i32_11 = arith.constant 0 : i32
    %13 = arith.cmpi ne, %12, %c0_i32_11 : i32
    scf.if %13 {
      %c0_12 = arith.constant 0 : index
      %c0_13 = arith.constant 0 : index
      %14 = vector.load %arg8[%c0_12, %c0_13] : memref<128x64xf32, #tpu.memory_space<vmem>>, vector<128x64xf32>
      %c0_14 = arith.constant 0 : index
      %c0_15 = arith.constant 0 : index
      %15 = vector.load %arg5[%c0_14, %c0_15] : memref<1x64xf32, #tpu.memory_space<vmem>>, vector<1x64xf32>
      %16 = vector.broadcast %15 : vector<1x64xf32> to vector<128x64xf32>
      %17 = arith.mulf %14, %16 : vector<128x64xf32>
      %c0_16 = arith.constant 0 : index
      %c0_17 = arith.constant 0 : index
      %18 = vector.load %arg6[%c0_16, %c0_17] : memref<1x64xf32, #tpu.memory_space<vmem>>, vector<1x64xf32>
      %19 = vector.broadcast %18 : vector<1x64xf32> to vector<128x64xf32>
      %20 = arith.addf %17, %19 : vector<128x64xf32>
      %cst_18 = arith.constant 0.000000e+00 : f32
      %21 = vector.broadcast %cst_18 : f32 to vector<128x64xf32>
      %22 = arith.maximumf %20, %21 : vector<128x64xf32>
      %23 = arith.truncf %22 : vector<128x64xf32> to vector<128x64xbf16>
      %c0_19 = arith.constant 0 : index
      %c0_20 = arith.constant 0 : index
      %24 = vector.load %arg7[%c0_19, %c0_20] : memref<128x64xbf16, #tpu.memory_space<vmem>>, vector<128x64xbf16>
      tpu.vector_store %arg7[%c0_19, %c0_20], %23 {strides = array<i32>} : memref<128x64xbf16, #tpu.memory_space<vmem>>, vector<128x64xbf16>,
    } else {
    }
    return
  }
  func.func @transform_0(%arg0: i32, %arg1: i32, %arg2: i32) -> (i32, i32, i32) {
    %c0_i32 = arith.constant 0 : i32
    %c0_i32_0 = arith.constant 0 : i32
    return %arg2, %arg0, %c0_i32 : i32, i32, i32
  }
  func.func @transform_1(%arg0: i32, %arg1: i32, %arg2: i32) -> (i32, i32, i32) {
    %c0_i32 = arith.constant 0 : i32
    %c0_i32_0 = arith.constant 0 : i32
    return %arg2, %c0_i32, %arg1 : i32, i32, i32
  }
  func.func @transform_2(%arg0: i32, %arg1: i32, %arg2: i32) -> (i32, i32) {
    %c0_i32 = arith.constant 0 : i32
    %c0_i32_0 = arith.constant 0 : i32
    return %c0_i32, %arg1 : i32, i32
  }
  func.func @transform_3(%arg0: i32, %arg1: i32, %arg2: i32) -> (i32, i32) {
    %c0_i32 = arith.constant 0 : i32
    %c0_i32_0 = arith.constant 0 : i32
    return %c0_i32, %arg1 : i32, i32
  }
  func.func @transform_4(%arg0: i32, %arg1: i32, %arg2: i32) -> (i32, i32) {
    %c0_i32 = arith.constant 0 : i32
    return %arg0, %arg1 : i32, i32
  }
}

module attributes {stable_mosaic.version = 11 : i64} {
  func.func @_maxpool_kernel(%arg0: i32, %arg1: i32, %arg2: memref<1x128x64xbf16, #tpu.memory_space<vmem>>, %arg3: memref<128x64xbf16, #tpu.memory_space<vmem>>) attributes {dimension_semantics = [#tpu.dimension_semantics<parallel>, #tpu.dimension_semantics<arbitrary>], iteration_bounds = array<i64: 4, 9>, scalar_prefetch = 0 : i64, scratch_operands = 0 : i64, tpu.core_type = #tpu.core_type<tc>, window_params = [{transform_indices = @transform_0, window_bounds = array<i64: 1, 128, 64>}, {transform_indices = @transform_1, window_bounds = array<i64: 128, 64>}]} {
    %c0_i32 = arith.constant 0 : i32
    %0 = arith.cmpi eq, %arg1, %c0_i32 : i32
    %1 = arith.extui %0 : i1 to i32
    %c0_i32_0 = arith.constant 0 : i32
    %2 = arith.cmpi ne, %1, %c0_i32_0 : i32
    scf.if %2 {
      %c0 = arith.constant 0 : index
      %c0_3 = arith.constant 0 : index
      %c0_4 = arith.constant 0 : index
      %6 = vector.load %arg2[%c0, %c0_3, %c0_4] : memref<1x128x64xbf16, #tpu.memory_space<vmem>>, vector<1x128x64xbf16>
      %7 = vector.shape_cast %6 : vector<1x128x64xbf16> to vector<128x64xbf16>
      %c0_5 = arith.constant 0 : index
      %c0_6 = arith.constant 0 : index
      %8 = vector.load %arg3[%c0_5, %c0_6] : memref<128x64xbf16, #tpu.memory_space<vmem>>, vector<128x64xbf16>
      tpu.vector_store %arg3[%c0_5, %c0_6], %7 {strides = array<i32>} : memref<128x64xbf16, #tpu.memory_space<vmem>>, vector<128x64xbf16>,
    } else {
    }
    %c0_i32_1 = arith.constant 0 : i32
    %3 = arith.cmpi ne, %arg1, %c0_i32_1 : i32
    %4 = arith.extui %3 : i1 to i32
    %c0_i32_2 = arith.constant 0 : i32
    %5 = arith.cmpi ne, %4, %c0_i32_2 : i32
    scf.if %5 {
      %c0 = arith.constant 0 : index
      %c0_3 = arith.constant 0 : index
      %6 = vector.load %arg3[%c0, %c0_3] : memref<128x64xbf16, #tpu.memory_space<vmem>>, vector<128x64xbf16>
      %c0_4 = arith.constant 0 : index
      %c0_5 = arith.constant 0 : index
      %c0_6 = arith.constant 0 : index
      %7 = vector.load %arg2[%c0_4, %c0_5, %c0_6] : memref<1x128x64xbf16, #tpu.memory_space<vmem>>, vector<1x128x64xbf16>
      %8 = vector.shape_cast %7 : vector<1x128x64xbf16> to vector<128x64xbf16>
      %9 = arith.maximumf %6, %8 : vector<128x64xbf16>
      %c0_7 = arith.constant 0 : index
      %c0_8 = arith.constant 0 : index
      %10 = vector.load %arg3[%c0_7, %c0_8] : memref<128x64xbf16, #tpu.memory_space<vmem>>, vector<128x64xbf16>
      tpu.vector_store %arg3[%c0_7, %c0_8], %9 {strides = array<i32>} : memref<128x64xbf16, #tpu.memory_space<vmem>>, vector<128x64xbf16>,
    } else {
    }
    return
  }
  func.func @transform_0(%arg0: i32, %arg1: i32) -> (i32, i32, i32) {
    %c0_i32 = arith.constant 0 : i32
    %c0_i32_0 = arith.constant 0 : i32
    return %arg1, %arg0, %c0_i32 : i32, i32, i32
  }
  func.func @transform_1(%arg0: i32, %arg1: i32) -> (i32, i32) {
    %c0_i32 = arith.constant 0 : i32
    %c0_i32_0 = arith.constant 0 : i32
    return %arg0, %c0_i32 : i32, i32
  }
}

module attributes {stable_mosaic.version = 11 : i64} {
  func.func @_conv_mm_kernel(%arg0: i32, %arg1: i32, %arg2: i32, %arg3: memref<1x128x64xbf16, #tpu.memory_space<vmem>>, %arg4: memref<1x64x64xbf16, #tpu.memory_space<vmem>>, %arg5: memref<1x64xf32, #tpu.memory_space<vmem>>, %arg6: memref<1x64xf32, #tpu.memory_space<vmem>>, %arg7: memref<128x64xbf16, #tpu.memory_space<vmem>>, %arg8: memref<128x64xf32, #tpu.memory_space<vmem>>) attributes {dimension_semantics = [#tpu.dimension_semantics<parallel>, #tpu.dimension_semantics<parallel>, #tpu.dimension_semantics<arbitrary>], iteration_bounds = array<i64: 4, 1, 9>, scalar_prefetch = 0 : i64, scratch_operands = 1 : i64, tpu.core_type = #tpu.core_type<tc>, window_params = [{transform_indices = @transform_0, window_bounds = array<i64: 1, 128, 64>}, {transform_indices = @transform_1, window_bounds = array<i64: 1, 64, 64>}, {transform_indices = @transform_2, window_bounds = array<i64: 1, 64>}, {transform_indices = @transform_3, window_bounds = array<i64: 1, 64>}, {transform_indices = @transform_4, window_bounds = array<i64: 128, 64>}]} {
    %c0_i32 = arith.constant 0 : i32
    %0 = arith.cmpi eq, %arg2, %c0_i32 : i32
    %1 = arith.extui %0 : i1 to i32
    %c0_i32_0 = arith.constant 0 : i32
    %2 = arith.cmpi ne, %1, %c0_i32_0 : i32
    scf.if %2 {
      %cst_11 = arith.constant 0.000000e+00 : f32
      %14 = vector.broadcast %cst_11 : f32 to vector<128x64xf32>
      %c0_12 = arith.constant 0 : index
      %c0_13 = arith.constant 0 : index
      %15 = vector.load %arg8[%c0_12, %c0_13] : memref<128x64xf32, #tpu.memory_space<vmem>>, vector<128x64xf32>
      tpu.vector_store %arg8[%c0_12, %c0_13], %14 {strides = array<i32>} : memref<128x64xf32, #tpu.memory_space<vmem>>, vector<128x64xf32>,
    } else {
    }
    %c0 = arith.constant 0 : index
    %c0_1 = arith.constant 0 : index
    %3 = vector.load %arg8[%c0, %c0_1] : memref<128x64xf32, #tpu.memory_space<vmem>>, vector<128x64xf32>
    %c0_2 = arith.constant 0 : index
    %c0_3 = arith.constant 0 : index
    %c0_4 = arith.constant 0 : index
    %4 = vector.load %arg3[%c0_2, %c0_3, %c0_4] : memref<1x128x64xbf16, #tpu.memory_space<vmem>>, vector<1x128x64xbf16>
    %5 = vector.shape_cast %4 : vector<1x128x64xbf16> to vector<128x64xbf16>
    %c0_5 = arith.constant 0 : index
    %c0_6 = arith.constant 0 : index
    %c0_7 = arith.constant 0 : index
    %6 = vector.load %arg4[%c0_5, %c0_6, %c0_7] : memref<1x64x64xbf16, #tpu.memory_space<vmem>>, vector<1x64x64xbf16>
    %7 = vector.shape_cast %6 : vector<1x64x64xbf16> to vector<64x64xbf16>
    %cst = arith.constant dense<0.000000e+00> : vector<128x64xf32>
    %8 = tpu.matmul %5, %7, %cst {dimension_numbers = #tpu.dot_dimension_numbers<[1], [0], [0], [1], [0, 0, 1, 1], [], []>} : vector<128x64xbf16>, vector<64x64xbf16>, vector<128x64xf32> -> vector<128x64xf32>
    %9 = arith.addf %3, %8 : vector<128x64xf32>
    %c0_8 = arith.constant 0 : index
    %c0_9 = arith.constant 0 : index
    %10 = vector.load %arg8[%c0_8, %c0_9] : memref<128x64xf32, #tpu.memory_space<vmem>>, vector<128x64xf32>
    tpu.vector_store %arg8[%c0_8, %c0_9], %9 {strides = array<i32>} : memref<128x64xf32, #tpu.memory_space<vmem>>, vector<128x64xf32>,
    %c8_i32 = arith.constant 8 : i32
    %11 = arith.cmpi eq, %arg2, %c8_i32 : i32
    %12 = arith.extui %11 : i1 to i32
    %c0_i32_10 = arith.constant 0 : i32
    %13 = arith.cmpi ne, %12, %c0_i32_10 : i32
    scf.if %13 {
      %c0_11 = arith.constant 0 : index
      %c0_12 = arith.constant 0 : index
      %14 = vector.load %arg8[%c0_11, %c0_12] : memref<128x64xf32, #tpu.memory_space<vmem>>, vector<128x64xf32>
      %c0_13 = arith.constant 0 : index
      %c0_14 = arith.constant 0 : index
      %15 = vector.load %arg5[%c0_13, %c0_14] : memref<1x64xf32, #tpu.memory_space<vmem>>, vector<1x64xf32>
      %16 = vector.broadcast %15 : vector<1x64xf32> to vector<128x64xf32>
      %17 = arith.mulf %14, %16 : vector<128x64xf32>
      %c0_15 = arith.constant 0 : index
      %c0_16 = arith.constant 0 : index
      %18 = vector.load %arg6[%c0_15, %c0_16] : memref<1x64xf32, #tpu.memory_space<vmem>>, vector<1x64xf32>
      %19 = vector.broadcast %18 : vector<1x64xf32> to vector<128x64xf32>
      %20 = arith.addf %17, %19 : vector<128x64xf32>
      %cst_17 = arith.constant 0.000000e+00 : f32
      %21 = vector.broadcast %cst_17 : f32 to vector<128x64xf32>
      %22 = arith.maximumf %20, %21 : vector<128x64xf32>
      %23 = arith.truncf %22 : vector<128x64xf32> to vector<128x64xbf16>
      %c0_18 = arith.constant 0 : index
      %c0_19 = arith.constant 0 : index
      %24 = vector.load %arg7[%c0_18, %c0_19] : memref<128x64xbf16, #tpu.memory_space<vmem>>, vector<128x64xbf16>
      tpu.vector_store %arg7[%c0_18, %c0_19], %23 {strides = array<i32>} : memref<128x64xbf16, #tpu.memory_space<vmem>>, vector<128x64xbf16>,
    } else {
    }
    return
  }
  func.func @transform_0(%arg0: i32, %arg1: i32, %arg2: i32) -> (i32, i32, i32) {
    %c0_i32 = arith.constant 0 : i32
    %c0_i32_0 = arith.constant 0 : i32
    return %arg2, %arg0, %c0_i32 : i32, i32, i32
  }
  func.func @transform_1(%arg0: i32, %arg1: i32, %arg2: i32) -> (i32, i32, i32) {
    %c0_i32 = arith.constant 0 : i32
    %c0_i32_0 = arith.constant 0 : i32
    return %arg2, %c0_i32, %arg1 : i32, i32, i32
  }
  func.func @transform_2(%arg0: i32, %arg1: i32, %arg2: i32) -> (i32, i32) {
    %c0_i32 = arith.constant 0 : i32
    %c0_i32_0 = arith.constant 0 : i32
    return %c0_i32, %arg1 : i32, i32
  }
  func.func @transform_3(%arg0: i32, %arg1: i32, %arg2: i32) -> (i32, i32) {
    %c0_i32 = arith.constant 0 : i32
    %c0_i32_0 = arith.constant 0 : i32
    return %c0_i32, %arg1 : i32, i32
  }
  func.func @transform_4(%arg0: i32, %arg1: i32, %arg2: i32) -> (i32, i32) {
    %c0_i32 = arith.constant 0 : i32
    return %arg0, %arg1 : i32, i32
  }
}

module attributes {stable_mosaic.version = 11 : i64} {
  func.func @_conv_mm_res_kernel(%arg0: i32, %arg1: i32, %arg2: i32, %arg3: memref<1x128x64xbf16, #tpu.memory_space<vmem>>, %arg4: memref<1x64x64xbf16, #tpu.memory_space<vmem>>, %arg5: memref<1x64xf32, #tpu.memory_space<vmem>>, %arg6: memref<1x64xf32, #tpu.memory_space<vmem>>, %arg7: memref<128x64xbf16, #tpu.memory_space<vmem>>, %arg8: memref<128x64xbf16, #tpu.memory_space<vmem>>, %arg9: memref<128x64xf32, #tpu.memory_space<vmem>>) attributes {dimension_semantics = [#tpu.dimension_semantics<parallel>, #tpu.dimension_semantics<parallel>, #tpu.dimension_semantics<arbitrary>], iteration_bounds = array<i64: 4, 1, 9>, scalar_prefetch = 0 : i64, scratch_operands = 1 : i64, tpu.core_type = #tpu.core_type<tc>, window_params = [{transform_indices = @transform_0, window_bounds = array<i64: 1, 128, 64>}, {transform_indices = @transform_1, window_bounds = array<i64: 1, 64, 64>}, {transform_indices = @transform_2, window_bounds = array<i64: 1, 64>}, {transform_indices = @transform_3, window_bounds = array<i64: 1, 64>}, {transform_indices = @transform_4, window_bounds = array<i64: 128, 64>}, {transform_indices = @transform_5, window_bounds = array<i64: 128, 64>}]} {
    %c0_i32 = arith.constant 0 : i32
    %0 = arith.cmpi eq, %arg2, %c0_i32 : i32
    %1 = arith.extui %0 : i1 to i32
    %c0_i32_0 = arith.constant 0 : i32
    %2 = arith.cmpi ne, %1, %c0_i32_0 : i32
    scf.if %2 {
      %cst_11 = arith.constant 0.000000e+00 : f32
      %14 = vector.broadcast %cst_11 : f32 to vector<128x64xf32>
      %c0_12 = arith.constant 0 : index
      %c0_13 = arith.constant 0 : index
      %15 = vector.load %arg9[%c0_12, %c0_13] : memref<128x64xf32, #tpu.memory_space<vmem>>, vector<128x64xf32>
      tpu.vector_store %arg9[%c0_12, %c0_13], %14 {strides = array<i32>} : memref<128x64xf32, #tpu.memory_space<vmem>>, vector<128x64xf32>,
    } else {
    }
    %c0 = arith.constant 0 : index
    %c0_1 = arith.constant 0 : index
    %3 = vector.load %arg9[%c0, %c0_1] : memref<128x64xf32, #tpu.memory_space<vmem>>, vector<128x64xf32>
    %c0_2 = arith.constant 0 : index
    %c0_3 = arith.constant 0 : index
    %c0_4 = arith.constant 0 : index
    %4 = vector.load %arg3[%c0_2, %c0_3, %c0_4] : memref<1x128x64xbf16, #tpu.memory_space<vmem>>, vector<1x128x64xbf16>
    %5 = vector.shape_cast %4 : vector<1x128x64xbf16> to vector<128x64xbf16>
    %c0_5 = arith.constant 0 : index
    %c0_6 = arith.constant 0 : index
    %c0_7 = arith.constant 0 : index
    %6 = vector.load %arg4[%c0_5, %c0_6, %c0_7] : memref<1x64x64xbf16, #tpu.memory_space<vmem>>, vector<1x64x64xbf16>
    %7 = vector.shape_cast %6 : vector<1x64x64xbf16> to vector<64x64xbf16>
    %cst = arith.constant dense<0.000000e+00> : vector<128x64xf32>
    %8 = tpu.matmul %5, %7, %cst {dimension_numbers = #tpu.dot_dimension_numbers<[1], [0], [0], [1], [0, 0, 1, 1], [], []>} : vector<128x64xbf16>, vector<64x64xbf16>, vector<128x64xf32> -> vector<128x64xf32>
    %9 = arith.addf %3, %8 : vector<128x64xf32>
    %c0_8 = arith.constant 0 : index
    %c0_9 = arith.constant 0 : index
    %10 = vector.load %arg9[%c0_8, %c0_9] : memref<128x64xf32, #tpu.memory_space<vmem>>, vector<128x64xf32>
    tpu.vector_store %arg9[%c0_8, %c0_9], %9 {strides = array<i32>} : memref<128x64xf32, #tpu.memory_space<vmem>>, vector<128x64xf32>,
    %c8_i32 = arith.constant 8 : i32
    %11 = arith.cmpi eq, %arg2, %c8_i32 : i32
    %12 = arith.extui %11 : i1 to i32
    %c0_i32_10 = arith.constant 0 : i32
    %13 = arith.cmpi ne, %12, %c0_i32_10 : i32
    scf.if %13 {
      %c0_11 = arith.constant 0 : index
      %c0_12 = arith.constant 0 : index
      %14 = vector.load %arg9[%c0_11, %c0_12] : memref<128x64xf32, #tpu.memory_space<vmem>>, vector<128x64xf32>
      %c0_13 = arith.constant 0 : index
      %c0_14 = arith.constant 0 : index
      %15 = vector.load %arg5[%c0_13, %c0_14] : memref<1x64xf32, #tpu.memory_space<vmem>>, vector<1x64xf32>
      %16 = vector.broadcast %15 : vector<1x64xf32> to vector<128x64xf32>
      %17 = arith.mulf %14, %16 : vector<128x64xf32>
      %c0_15 = arith.constant 0 : index
      %c0_16 = arith.constant 0 : index
      %18 = vector.load %arg6[%c0_15, %c0_16] : memref<1x64xf32, #tpu.memory_space<vmem>>, vector<1x64xf32>
      %19 = vector.broadcast %18 : vector<1x64xf32> to vector<128x64xf32>
      %20 = arith.addf %17, %19 : vector<128x64xf32>
      %c0_17 = arith.constant 0 : index
      %c0_18 = arith.constant 0 : index
      %21 = vector.load %arg7[%c0_17, %c0_18] : memref<128x64xbf16, #tpu.memory_space<vmem>>, vector<128x64xbf16>
      %22 = arith.extf %21 : vector<128x64xbf16> to vector<128x64xf32>
      %23 = arith.addf %20, %22 : vector<128x64xf32>
      %cst_19 = arith.constant 0.000000e+00 : f32
      %24 = vector.broadcast %cst_19 : f32 to vector<128x64xf32>
      %25 = arith.maximumf %23, %24 : vector<128x64xf32>
      %26 = arith.truncf %25 : vector<128x64xf32> to vector<128x64xbf16>
      %c0_20 = arith.constant 0 : index
      %c0_21 = arith.constant 0 : index
      %27 = vector.load %arg8[%c0_20, %c0_21] : memref<128x64xbf16, #tpu.memory_space<vmem>>, vector<128x64xbf16>
      tpu.vector_store %arg8[%c0_20, %c0_21], %26 {strides = array<i32>} : memref<128x64xbf16, #tpu.memory_space<vmem>>, vector<128x64xbf16>,
    } else {
    }
    return
  }
  func.func @transform_0(%arg0: i32, %arg1: i32, %arg2: i32) -> (i32, i32, i32) {
    %c0_i32 = arith.constant 0 : i32
    %c0_i32_0 = arith.constant 0 : i32
    return %arg2, %arg0, %c0_i32 : i32, i32, i32
  }
  func.func @transform_1(%arg0: i32, %arg1: i32, %arg2: i32) -> (i32, i32, i32) {
    %c0_i32 = arith.constant 0 : i32
    %c0_i32_0 = arith.constant 0 : i32
    return %arg2, %c0_i32, %arg1 : i32, i32, i32
  }
  func.func @transform_2(%arg0: i32, %arg1: i32, %arg2: i32) -> (i32, i32) {
    %c0_i32 = arith.constant 0 : i32
    %c0_i32_0 = arith.constant 0 : i32
    return %c0_i32, %arg1 : i32, i32
  }
  func.func @transform_3(%arg0: i32, %arg1: i32, %arg2: i32) -> (i32, i32) {
    %c0_i32 = arith.constant 0 : i32
    %c0_i32_0 = arith.constant 0 : i32
    return %c0_i32, %arg1 : i32, i32
  }
  func.func @transform_4(%arg0: i32, %arg1: i32, %arg2: i32) -> (i32, i32) {
    %c0_i32 = arith.constant 0 : i32
    return %arg0, %arg1 : i32, i32
  }
  func.func @transform_5(%arg0: i32, %arg1: i32, %arg2: i32) -> (i32, i32) {
    %c0_i32 = arith.constant 0 : i32
    return %arg0, %arg1 : i32, i32
  }
}

module attributes {stable_mosaic.version = 11 : i64} {
  func.func @_conv_mm_kernel(%arg0: i32, %arg1: i32, %arg2: i32, %arg3: memref<1x128x64xbf16, #tpu.memory_space<vmem>>, %arg4: memref<1x64x128xbf16, #tpu.memory_space<vmem>>, %arg5: memref<1x128xf32, #tpu.memory_space<vmem>>, %arg6: memref<1x128xf32, #tpu.memory_space<vmem>>, %arg7: memref<128x128xbf16, #tpu.memory_space<vmem>>, %arg8: memref<128x128xf32, #tpu.memory_space<vmem>>) attributes {dimension_semantics = [#tpu.dimension_semantics<parallel>, #tpu.dimension_semantics<parallel>, #tpu.dimension_semantics<arbitrary>], iteration_bounds = array<i64: 1, 1, 9>, scalar_prefetch = 0 : i64, scratch_operands = 1 : i64, tpu.core_type = #tpu.core_type<tc>, window_params = [{transform_indices = @transform_0, window_bounds = array<i64: 1, 128, 64>}, {transform_indices = @transform_1, window_bounds = array<i64: 1, 64, 128>}, {transform_indices = @transform_2, window_bounds = array<i64: 1, 128>}, {transform_indices = @transform_3, window_bounds = array<i64: 1, 128>}, {transform_indices = @transform_4, window_bounds = array<i64: 128, 128>}]} {
    %c0_i32 = arith.constant 0 : i32
    %0 = arith.cmpi eq, %arg2, %c0_i32 : i32
    %1 = arith.extui %0 : i1 to i32
    %c0_i32_0 = arith.constant 0 : i32
    %2 = arith.cmpi ne, %1, %c0_i32_0 : i32
    scf.if %2 {
      %cst_11 = arith.constant 0.000000e+00 : f32
      %14 = vector.broadcast %cst_11 : f32 to vector<128x128xf32>
      %c0_12 = arith.constant 0 : index
      %c0_13 = arith.constant 0 : index
      %15 = vector.load %arg8[%c0_12, %c0_13] : memref<128x128xf32, #tpu.memory_space<vmem>>, vector<128x128xf32>
      tpu.vector_store %arg8[%c0_12, %c0_13], %14 {strides = array<i32>} : memref<128x128xf32, #tpu.memory_space<vmem>>, vector<128x128xf32>,
    } else {
    }
    %c0 = arith.constant 0 : index
    %c0_1 = arith.constant 0 : index
    %3 = vector.load %arg8[%c0, %c0_1] : memref<128x128xf32, #tpu.memory_space<vmem>>, vector<128x128xf32>
    %c0_2 = arith.constant 0 : index
    %c0_3 = arith.constant 0 : index
    %c0_4 = arith.constant 0 : index
    %4 = vector.load %arg3[%c0_2, %c0_3, %c0_4] : memref<1x128x64xbf16, #tpu.memory_space<vmem>>, vector<1x128x64xbf16>
    %5 = vector.shape_cast %4 : vector<1x128x64xbf16> to vector<128x64xbf16>
    %c0_5 = arith.constant 0 : index
    %c0_6 = arith.constant 0 : index
    %c0_7 = arith.constant 0 : index
    %6 = vector.load %arg4[%c0_5, %c0_6, %c0_7] : memref<1x64x128xbf16, #tpu.memory_space<vmem>>, vector<1x64x128xbf16>
    %7 = vector.shape_cast %6 : vector<1x64x128xbf16> to vector<64x128xbf16>
    %cst = arith.constant dense<0.000000e+00> : vector<128x128xf32>
    %8 = tpu.matmul %5, %7, %cst {dimension_numbers = #tpu.dot_dimension_numbers<[1], [0], [0], [1], [0, 0, 1, 1], [], []>} : vector<128x64xbf16>, vector<64x128xbf16>, vector<128x128xf32> -> vector<128x128xf32>
    %9 = arith.addf %3, %8 : vector<128x128xf32>
    %c0_8 = arith.constant 0 : index
    %c0_9 = arith.constant 0 : index
    %10 = vector.load %arg8[%c0_8, %c0_9] : memref<128x128xf32, #tpu.memory_space<vmem>>, vector<128x128xf32>
    tpu.vector_store %arg8[%c0_8, %c0_9], %9 {strides = array<i32>} : memref<128x128xf32, #tpu.memory_space<vmem>>, vector<128x128xf32>,
    %c8_i32 = arith.constant 8 : i32
    %11 = arith.cmpi eq, %arg2, %c8_i32 : i32
    %12 = arith.extui %11 : i1 to i32
    %c0_i32_10 = arith.constant 0 : i32
    %13 = arith.cmpi ne, %12, %c0_i32_10 : i32
    scf.if %13 {
      %c0_11 = arith.constant 0 : index
      %c0_12 = arith.constant 0 : index
      %14 = vector.load %arg8[%c0_11, %c0_12] : memref<128x128xf32, #tpu.memory_space<vmem>>, vector<128x128xf32>
      %c0_13 = arith.constant 0 : index
      %c0_14 = arith.constant 0 : index
      %15 = vector.load %arg5[%c0_13, %c0_14] : memref<1x128xf32, #tpu.memory_space<vmem>>, vector<1x128xf32>
      %16 = vector.broadcast %15 : vector<1x128xf32> to vector<128x128xf32>
      %17 = arith.mulf %14, %16 : vector<128x128xf32>
      %c0_15 = arith.constant 0 : index
      %c0_16 = arith.constant 0 : index
      %18 = vector.load %arg6[%c0_15, %c0_16] : memref<1x128xf32, #tpu.memory_space<vmem>>, vector<1x128xf32>
      %19 = vector.broadcast %18 : vector<1x128xf32> to vector<128x128xf32>
      %20 = arith.addf %17, %19 : vector<128x128xf32>
      %cst_17 = arith.constant 0.000000e+00 : f32
      %21 = vector.broadcast %cst_17 : f32 to vector<128x128xf32>
      %22 = arith.maximumf %20, %21 : vector<128x128xf32>
      %23 = arith.truncf %22 : vector<128x128xf32> to vector<128x128xbf16>
      %c0_18 = arith.constant 0 : index
      %c0_19 = arith.constant 0 : index
      %24 = vector.load %arg7[%c0_18, %c0_19] : memref<128x128xbf16, #tpu.memory_space<vmem>>, vector<128x128xbf16>
      tpu.vector_store %arg7[%c0_18, %c0_19], %23 {strides = array<i32>} : memref<128x128xbf16, #tpu.memory_space<vmem>>, vector<128x128xbf16>,
    } else {
    }
    return
  }
  func.func @transform_0(%arg0: i32, %arg1: i32, %arg2: i32) -> (i32, i32, i32) {
    %c0_i32 = arith.constant 0 : i32
    %c0_i32_0 = arith.constant 0 : i32
    return %arg2, %arg0, %c0_i32 : i32, i32, i32
  }
  func.func @transform_1(%arg0: i32, %arg1: i32, %arg2: i32) -> (i32, i32, i32) {
    %c0_i32 = arith.constant 0 : i32
    %c0_i32_0 = arith.constant 0 : i32
    return %arg2, %c0_i32, %arg1 : i32, i32, i32
  }
  func.func @transform_2(%arg0: i32, %arg1: i32, %arg2: i32) -> (i32, i32) {
    %c0_i32 = arith.constant 0 : i32
    %c0_i32_0 = arith.constant 0 : i32
    return %c0_i32, %arg1 : i32, i32
  }
  func.func @transform_3(%arg0: i32, %arg1: i32, %arg2: i32) -> (i32, i32) {
    %c0_i32 = arith.constant 0 : i32
    %c0_i32_0 = arith.constant 0 : i32
    return %c0_i32, %arg1 : i32, i32
  }
  func.func @transform_4(%arg0: i32, %arg1: i32, %arg2: i32) -> (i32, i32) {
    %c0_i32 = arith.constant 0 : i32
    return %arg0, %arg1 : i32, i32
  }
}

module attributes {stable_mosaic.version = 11 : i64} {
  func.func @_conv_mm_kernel(%arg0: i32, %arg1: i32, %arg2: i32, %arg3: memref<1x128x128xbf16, #tpu.memory_space<vmem>>, %arg4: memref<1x128x128xbf16, #tpu.memory_space<vmem>>, %arg5: memref<1x128xf32, #tpu.memory_space<vmem>>, %arg6: memref<1x128xf32, #tpu.memory_space<vmem>>, %arg7: memref<128x128xbf16, #tpu.memory_space<vmem>>, %arg8: memref<128x128xf32, #tpu.memory_space<vmem>>) attributes {dimension_semantics = [#tpu.dimension_semantics<parallel>, #tpu.dimension_semantics<parallel>, #tpu.dimension_semantics<arbitrary>], iteration_bounds = array<i64: 1, 1, 9>, scalar_prefetch = 0 : i64, scratch_operands = 1 : i64, tpu.core_type = #tpu.core_type<tc>, window_params = [{transform_indices = @transform_0, window_bounds = array<i64: 1, 128, 128>}, {transform_indices = @transform_1, window_bounds = array<i64: 1, 128, 128>}, {transform_indices = @transform_2, window_bounds = array<i64: 1, 128>}, {transform_indices = @transform_3, window_bounds = array<i64: 1, 128>}, {transform_indices = @transform_4, window_bounds = array<i64: 128, 128>}]} {
    %c0_i32 = arith.constant 0 : i32
    %0 = arith.cmpi eq, %arg2, %c0_i32 : i32
    %1 = arith.extui %0 : i1 to i32
    %c0_i32_0 = arith.constant 0 : i32
    %2 = arith.cmpi ne, %1, %c0_i32_0 : i32
    scf.if %2 {
      %cst_11 = arith.constant 0.000000e+00 : f32
      %14 = vector.broadcast %cst_11 : f32 to vector<128x128xf32>
      %c0_12 = arith.constant 0 : index
      %c0_13 = arith.constant 0 : index
      %15 = vector.load %arg8[%c0_12, %c0_13] : memref<128x128xf32, #tpu.memory_space<vmem>>, vector<128x128xf32>
      tpu.vector_store %arg8[%c0_12, %c0_13], %14 {strides = array<i32>} : memref<128x128xf32, #tpu.memory_space<vmem>>, vector<128x128xf32>,
    } else {
    }
    %c0 = arith.constant 0 : index
    %c0_1 = arith.constant 0 : index
    %3 = vector.load %arg8[%c0, %c0_1] : memref<128x128xf32, #tpu.memory_space<vmem>>, vector<128x128xf32>
    %c0_2 = arith.constant 0 : index
    %c0_3 = arith.constant 0 : index
    %c0_4 = arith.constant 0 : index
    %4 = vector.load %arg3[%c0_2, %c0_3, %c0_4] : memref<1x128x128xbf16, #tpu.memory_space<vmem>>, vector<1x128x128xbf16>
    %5 = vector.shape_cast %4 : vector<1x128x128xbf16> to vector<128x128xbf16>
    %c0_5 = arith.constant 0 : index
    %c0_6 = arith.constant 0 : index
    %c0_7 = arith.constant 0 : index
    %6 = vector.load %arg4[%c0_5, %c0_6, %c0_7] : memref<1x128x128xbf16, #tpu.memory_space<vmem>>, vector<1x128x128xbf16>
    %7 = vector.shape_cast %6 : vector<1x128x128xbf16> to vector<128x128xbf16>
    %cst = arith.constant dense<0.000000e+00> : vector<128x128xf32>
    %8 = tpu.matmul %5, %7, %cst {dimension_numbers = #tpu.dot_dimension_numbers<[1], [0], [0], [1], [0, 0, 1, 1], [], []>} : vector<128x128xbf16>, vector<128x128xbf16>, vector<128x128xf32> -> vector<128x128xf32>
    %9 = arith.addf %3, %8 : vector<128x128xf32>
    %c0_8 = arith.constant 0 : index
    %c0_9 = arith.constant 0 : index
    %10 = vector.load %arg8[%c0_8, %c0_9] : memref<128x128xf32, #tpu.memory_space<vmem>>, vector<128x128xf32>
    tpu.vector_store %arg8[%c0_8, %c0_9], %9 {strides = array<i32>} : memref<128x128xf32, #tpu.memory_space<vmem>>, vector<128x128xf32>,
    %c8_i32 = arith.constant 8 : i32
    %11 = arith.cmpi eq, %arg2, %c8_i32 : i32
    %12 = arith.extui %11 : i1 to i32
    %c0_i32_10 = arith.constant 0 : i32
    %13 = arith.cmpi ne, %12, %c0_i32_10 : i32
    scf.if %13 {
      %c0_11 = arith.constant 0 : index
      %c0_12 = arith.constant 0 : index
      %14 = vector.load %arg8[%c0_11, %c0_12] : memref<128x128xf32, #tpu.memory_space<vmem>>, vector<128x128xf32>
      %c0_13 = arith.constant 0 : index
      %c0_14 = arith.constant 0 : index
      %15 = vector.load %arg5[%c0_13, %c0_14] : memref<1x128xf32, #tpu.memory_space<vmem>>, vector<1x128xf32>
      %16 = vector.broadcast %15 : vector<1x128xf32> to vector<128x128xf32>
      %17 = arith.mulf %14, %16 : vector<128x128xf32>
      %c0_15 = arith.constant 0 : index
      %c0_16 = arith.constant 0 : index
      %18 = vector.load %arg6[%c0_15, %c0_16] : memref<1x128xf32, #tpu.memory_space<vmem>>, vector<1x128xf32>
      %19 = vector.broadcast %18 : vector<1x128xf32> to vector<128x128xf32>
      %20 = arith.addf %17, %19 : vector<128x128xf32>
      %cst_17 = arith.constant 0.000000e+00 : f32
      %21 = vector.broadcast %cst_17 : f32 to vector<128x128xf32>
      %22 = arith.maximumf %20, %21 : vector<128x128xf32>
      %23 = arith.truncf %22 : vector<128x128xf32> to vector<128x128xbf16>
      %c0_18 = arith.constant 0 : index
      %c0_19 = arith.constant 0 : index
      %24 = vector.load %arg7[%c0_18, %c0_19] : memref<128x128xbf16, #tpu.memory_space<vmem>>, vector<128x128xbf16>
      tpu.vector_store %arg7[%c0_18, %c0_19], %23 {strides = array<i32>} : memref<128x128xbf16, #tpu.memory_space<vmem>>, vector<128x128xbf16>,
    } else {
    }
    return
  }
  func.func @transform_0(%arg0: i32, %arg1: i32, %arg2: i32) -> (i32, i32, i32) {
    %c0_i32 = arith.constant 0 : i32
    %c0_i32_0 = arith.constant 0 : i32
    return %arg2, %arg0, %c0_i32 : i32, i32, i32
  }
  func.func @transform_1(%arg0: i32, %arg1: i32, %arg2: i32) -> (i32, i32, i32) {
    %c0_i32 = arith.constant 0 : i32
    %c0_i32_0 = arith.constant 0 : i32
    return %arg2, %c0_i32, %arg1 : i32, i32, i32
  }
  func.func @transform_2(%arg0: i32, %arg1: i32, %arg2: i32) -> (i32, i32) {
    %c0_i32 = arith.constant 0 : i32
    %c0_i32_0 = arith.constant 0 : i32
    return %c0_i32, %arg1 : i32, i32
  }
  func.func @transform_3(%arg0: i32, %arg1: i32, %arg2: i32) -> (i32, i32) {
    %c0_i32 = arith.constant 0 : i32
    %c0_i32_0 = arith.constant 0 : i32
    return %c0_i32, %arg1 : i32, i32
  }
  func.func @transform_4(%arg0: i32, %arg1: i32, %arg2: i32) -> (i32, i32) {
    %c0_i32 = arith.constant 0 : i32
    return %arg0, %arg1 : i32, i32
  }
}

module attributes {stable_mosaic.version = 11 : i64} {
  func.func @_conv_mm_kernel(%arg0: i32, %arg1: i32, %arg2: i32, %arg3: memref<1x128x64xbf16, #tpu.memory_space<vmem>>, %arg4: memref<1x64x128xbf16, #tpu.memory_space<vmem>>, %arg5: memref<1x128xf32, #tpu.memory_space<vmem>>, %arg6: memref<1x128xf32, #tpu.memory_space<vmem>>, %arg7: memref<128x128xbf16, #tpu.memory_space<vmem>>, %arg8: memref<128x128xf32, #tpu.memory_space<vmem>>) attributes {dimension_semantics = [#tpu.dimension_semantics<parallel>, #tpu.dimension_semantics<parallel>, #tpu.dimension_semantics<arbitrary>], iteration_bounds = array<i64: 1, 1, 1>, scalar_prefetch = 0 : i64, scratch_operands = 1 : i64, tpu.core_type = #tpu.core_type<tc>, window_params = [{transform_indices = @transform_0, window_bounds = array<i64: 1, 128, 64>}, {transform_indices = @transform_1, window_bounds = array<i64: 1, 64, 128>}, {transform_indices = @transform_2, window_bounds = array<i64: 1, 128>}, {transform_indices = @transform_3, window_bounds = array<i64: 1, 128>}, {transform_indices = @transform_4, window_bounds = array<i64: 128, 128>}]} {
    %c0_i32 = arith.constant 0 : i32
    %0 = arith.cmpi eq, %arg2, %c0_i32 : i32
    %1 = arith.extui %0 : i1 to i32
    %c0_i32_0 = arith.constant 0 : i32
    %2 = arith.cmpi ne, %1, %c0_i32_0 : i32
    scf.if %2 {
      %cst_12 = arith.constant 0.000000e+00 : f32
      %14 = vector.broadcast %cst_12 : f32 to vector<128x128xf32>
      %c0_13 = arith.constant 0 : index
      %c0_14 = arith.constant 0 : index
      %15 = vector.load %arg8[%c0_13, %c0_14] : memref<128x128xf32, #tpu.memory_space<vmem>>, vector<128x128xf32>
      tpu.vector_store %arg8[%c0_13, %c0_14], %14 {strides = array<i32>} : memref<128x128xf32, #tpu.memory_space<vmem>>, vector<128x128xf32>,
    } else {
    }
    %c0 = arith.constant 0 : index
    %c0_1 = arith.constant 0 : index
    %3 = vector.load %arg8[%c0, %c0_1] : memref<128x128xf32, #tpu.memory_space<vmem>>, vector<128x128xf32>
    %c0_2 = arith.constant 0 : index
    %c0_3 = arith.constant 0 : index
    %c0_4 = arith.constant 0 : index
    %4 = vector.load %arg3[%c0_2, %c0_3, %c0_4] : memref<1x128x64xbf16, #tpu.memory_space<vmem>>, vector<1x128x64xbf16>
    %5 = vector.shape_cast %4 : vector<1x128x64xbf16> to vector<128x64xbf16>
    %c0_5 = arith.constant 0 : index
    %c0_6 = arith.constant 0 : index
    %c0_7 = arith.constant 0 : index
    %6 = vector.load %arg4[%c0_5, %c0_6, %c0_7] : memref<1x64x128xbf16, #tpu.memory_space<vmem>>, vector<1x64x128xbf16>
    %7 = vector.shape_cast %6 : vector<1x64x128xbf16> to vector<64x128xbf16>
    %cst = arith.constant dense<0.000000e+00> : vector<128x128xf32>
    %8 = tpu.matmul %5, %7, %cst {dimension_numbers = #tpu.dot_dimension_numbers<[1], [0], [0], [1], [0, 0, 1, 1], [], []>} : vector<128x64xbf16>, vector<64x128xbf16>, vector<128x128xf32> -> vector<128x128xf32>
    %9 = arith.addf %3, %8 : vector<128x128xf32>
    %c0_8 = arith.constant 0 : index
    %c0_9 = arith.constant 0 : index
    %10 = vector.load %arg8[%c0_8, %c0_9] : memref<128x128xf32, #tpu.memory_space<vmem>>, vector<128x128xf32>
    tpu.vector_store %arg8[%c0_8, %c0_9], %9 {strides = array<i32>} : memref<128x128xf32, #tpu.memory_space<vmem>>, vector<128x128xf32>,
    %c0_i32_10 = arith.constant 0 : i32
    %11 = arith.cmpi eq, %arg2, %c0_i32_10 : i32
    %12 = arith.extui %11 : i1 to i32
    %c0_i32_11 = arith.constant 0 : i32
    %13 = arith.cmpi ne, %12, %c0_i32_11 : i32
    scf.if %13 {
      %c0_12 = arith.constant 0 : index
      %c0_13 = arith.constant 0 : index
      %14 = vector.load %arg8[%c0_12, %c0_13] : memref<128x128xf32, #tpu.memory_space<vmem>>, vector<128x128xf32>
      %c0_14 = arith.constant 0 : index
      %c0_15 = arith.constant 0 : index
      %15 = vector.load %arg5[%c0_14, %c0_15] : memref<1x128xf32, #tpu.memory_space<vmem>>, vector<1x128xf32>
      %16 = vector.broadcast %15 : vector<1x128xf32> to vector<128x128xf32>
      %17 = arith.mulf %14, %16 : vector<128x128xf32>
      %c0_16 = arith.constant 0 : index
      %c0_17 = arith.constant 0 : index
      %18 = vector.load %arg6[%c0_16, %c0_17] : memref<1x128xf32, #tpu.memory_space<vmem>>, vector<1x128xf32>
      %19 = vector.broadcast %18 : vector<1x128xf32> to vector<128x128xf32>
      %20 = arith.addf %17, %19 : vector<128x128xf32>
      %21 = arith.truncf %20 : vector<128x128xf32> to vector<128x128xbf16>
      %c0_18 = arith.constant 0 : index
      %c0_19 = arith.constant 0 : index
      %22 = vector.load %arg7[%c0_18, %c0_19] : memref<128x128xbf16, #tpu.memory_space<vmem>>, vector<128x128xbf16>
      tpu.vector_store %arg7[%c0_18, %c0_19], %21 {strides = array<i32>} : memref<128x128xbf16, #tpu.memory_space<vmem>>, vector<128x128xbf16>,
    } else {
    }
    return
  }
  func.func @transform_0(%arg0: i32, %arg1: i32, %arg2: i32) -> (i32, i32, i32) {
    %c0_i32 = arith.constant 0 : i32
    %c0_i32_0 = arith.constant 0 : i32
    return %arg2, %arg0, %c0_i32 : i32, i32, i32
  }
  func.func @transform_1(%arg0: i32, %arg1: i32, %arg2: i32) -> (i32, i32, i32) {
    %c0_i32 = arith.constant 0 : i32
    %c0_i32_0 = arith.constant 0 : i32
    return %arg2, %c0_i32, %arg1 : i32, i32, i32
  }
  func.func @transform_2(%arg0: i32, %arg1: i32, %arg2: i32) -> (i32, i32) {
    %c0_i32 = arith.constant 0 : i32
    %c0_i32_0 = arith.constant 0 : i32
    return %c0_i32, %arg1 : i32, i32
  }
  func.func @transform_3(%arg0: i32, %arg1: i32, %arg2: i32) -> (i32, i32) {
    %c0_i32 = arith.constant 0 : i32
    %c0_i32_0 = arith.constant 0 : i32
    return %c0_i32, %arg1 : i32, i32
  }
  func.func @transform_4(%arg0: i32, %arg1: i32, %arg2: i32) -> (i32, i32) {
    %c0_i32 = arith.constant 0 : i32
    return %arg0, %arg1 : i32, i32
  }
}

module attributes {stable_mosaic.version = 11 : i64} {
  func.func @_conv_mm_res_kernel(%arg0: i32, %arg1: i32, %arg2: i32, %arg3: memref<1x128x128xbf16, #tpu.memory_space<vmem>>, %arg4: memref<1x128x128xbf16, #tpu.memory_space<vmem>>, %arg5: memref<1x128xf32, #tpu.memory_space<vmem>>, %arg6: memref<1x128xf32, #tpu.memory_space<vmem>>, %arg7: memref<128x128xbf16, #tpu.memory_space<vmem>>, %arg8: memref<128x128xbf16, #tpu.memory_space<vmem>>, %arg9: memref<128x128xf32, #tpu.memory_space<vmem>>) attributes {dimension_semantics = [#tpu.dimension_semantics<parallel>, #tpu.dimension_semantics<parallel>, #tpu.dimension_semantics<arbitrary>], iteration_bounds = array<i64: 1, 1, 9>, scalar_prefetch = 0 : i64, scratch_operands = 1 : i64, tpu.core_type = #tpu.core_type<tc>, window_params = [{transform_indices = @transform_0, window_bounds = array<i64: 1, 128, 128>}, {transform_indices = @transform_1, window_bounds = array<i64: 1, 128, 128>}, {transform_indices = @transform_2, window_bounds = array<i64: 1, 128>}, {transform_indices = @transform_3, window_bounds = array<i64: 1, 128>}, {transform_indices = @transform_4, window_bounds = array<i64: 128, 128>}, {transform_indices = @transform_5, window_bounds = array<i64: 128, 128>}]} {
    %c0_i32 = arith.constant 0 : i32
    %0 = arith.cmpi eq, %arg2, %c0_i32 : i32
    %1 = arith.extui %0 : i1 to i32
    %c0_i32_0 = arith.constant 0 : i32
    %2 = arith.cmpi ne, %1, %c0_i32_0 : i32
    scf.if %2 {
      %cst_11 = arith.constant 0.000000e+00 : f32
      %14 = vector.broadcast %cst_11 : f32 to vector<128x128xf32>
      %c0_12 = arith.constant 0 : index
      %c0_13 = arith.constant 0 : index
      %15 = vector.load %arg9[%c0_12, %c0_13] : memref<128x128xf32, #tpu.memory_space<vmem>>, vector<128x128xf32>
      tpu.vector_store %arg9[%c0_12, %c0_13], %14 {strides = array<i32>} : memref<128x128xf32, #tpu.memory_space<vmem>>, vector<128x128xf32>,
    } else {
    }
    %c0 = arith.constant 0 : index
    %c0_1 = arith.constant 0 : index
    %3 = vector.load %arg9[%c0, %c0_1] : memref<128x128xf32, #tpu.memory_space<vmem>>, vector<128x128xf32>
    %c0_2 = arith.constant 0 : index
    %c0_3 = arith.constant 0 : index
    %c0_4 = arith.constant 0 : index
    %4 = vector.load %arg3[%c0_2, %c0_3, %c0_4] : memref<1x128x128xbf16, #tpu.memory_space<vmem>>, vector<1x128x128xbf16>
    %5 = vector.shape_cast %4 : vector<1x128x128xbf16> to vector<128x128xbf16>
    %c0_5 = arith.constant 0 : index
    %c0_6 = arith.constant 0 : index
    %c0_7 = arith.constant 0 : index
    %6 = vector.load %arg4[%c0_5, %c0_6, %c0_7] : memref<1x128x128xbf16, #tpu.memory_space<vmem>>, vector<1x128x128xbf16>
    %7 = vector.shape_cast %6 : vector<1x128x128xbf16> to vector<128x128xbf16>
    %cst = arith.constant dense<0.000000e+00> : vector<128x128xf32>
    %8 = tpu.matmul %5, %7, %cst {dimension_numbers = #tpu.dot_dimension_numbers<[1], [0], [0], [1], [0, 0, 1, 1], [], []>} : vector<128x128xbf16>, vector<128x128xbf16>, vector<128x128xf32> -> vector<128x128xf32>
    %9 = arith.addf %3, %8 : vector<128x128xf32>
    %c0_8 = arith.constant 0 : index
    %c0_9 = arith.constant 0 : index
    %10 = vector.load %arg9[%c0_8, %c0_9] : memref<128x128xf32, #tpu.memory_space<vmem>>, vector<128x128xf32>
    tpu.vector_store %arg9[%c0_8, %c0_9], %9 {strides = array<i32>} : memref<128x128xf32, #tpu.memory_space<vmem>>, vector<128x128xf32>,
    %c8_i32 = arith.constant 8 : i32
    %11 = arith.cmpi eq, %arg2, %c8_i32 : i32
    %12 = arith.extui %11 : i1 to i32
    %c0_i32_10 = arith.constant 0 : i32
    %13 = arith.cmpi ne, %12, %c0_i32_10 : i32
    scf.if %13 {
      %c0_11 = arith.constant 0 : index
      %c0_12 = arith.constant 0 : index
      %14 = vector.load %arg9[%c0_11, %c0_12] : memref<128x128xf32, #tpu.memory_space<vmem>>, vector<128x128xf32>
      %c0_13 = arith.constant 0 : index
      %c0_14 = arith.constant 0 : index
      %15 = vector.load %arg5[%c0_13, %c0_14] : memref<1x128xf32, #tpu.memory_space<vmem>>, vector<1x128xf32>
      %16 = vector.broadcast %15 : vector<1x128xf32> to vector<128x128xf32>
      %17 = arith.mulf %14, %16 : vector<128x128xf32>
      %c0_15 = arith.constant 0 : index
      %c0_16 = arith.constant 0 : index
      %18 = vector.load %arg6[%c0_15, %c0_16] : memref<1x128xf32, #tpu.memory_space<vmem>>, vector<1x128xf32>
      %19 = vector.broadcast %18 : vector<1x128xf32> to vector<128x128xf32>
      %20 = arith.addf %17, %19 : vector<128x128xf32>
      %c0_17 = arith.constant 0 : index
      %c0_18 = arith.constant 0 : index
      %21 = vector.load %arg7[%c0_17, %c0_18] : memref<128x128xbf16, #tpu.memory_space<vmem>>, vector<128x128xbf16>
      %22 = arith.extf %21 : vector<128x128xbf16> to vector<128x128xf32>
      %23 = arith.addf %20, %22 : vector<128x128xf32>
      %cst_19 = arith.constant 0.000000e+00 : f32
      %24 = vector.broadcast %cst_19 : f32 to vector<128x128xf32>
      %25 = arith.maximumf %23, %24 : vector<128x128xf32>
      %26 = arith.truncf %25 : vector<128x128xf32> to vector<128x128xbf16>
      %c0_20 = arith.constant 0 : index
      %c0_21 = arith.constant 0 : index
      %27 = vector.load %arg8[%c0_20, %c0_21] : memref<128x128xbf16, #tpu.memory_space<vmem>>, vector<128x128xbf16>
      tpu.vector_store %arg8[%c0_20, %c0_21], %26 {strides = array<i32>} : memref<128x128xbf16, #tpu.memory_space<vmem>>, vector<128x128xbf16>,
    } else {
    }
    return
  }
  func.func @transform_0(%arg0: i32, %arg1: i32, %arg2: i32) -> (i32, i32, i32) {
    %c0_i32 = arith.constant 0 : i32
    %c0_i32_0 = arith.constant 0 : i32
    return %arg2, %arg0, %c0_i32 : i32, i32, i32
  }
  func.func @transform_1(%arg0: i32, %arg1: i32, %arg2: i32) -> (i32, i32, i32) {
    %c0_i32 = arith.constant 0 : i32
    %c0_i32_0 = arith.constant 0 : i32
    return %arg2, %c0_i32, %arg1 : i32, i32, i32
  }
  func.func @transform_2(%arg0: i32, %arg1: i32, %arg2: i32) -> (i32, i32) {
    %c0_i32 = arith.constant 0 : i32
    %c0_i32_0 = arith.constant 0 : i32
    return %c0_i32, %arg1 : i32, i32
  }
  func.func @transform_3(%arg0: i32, %arg1: i32, %arg2: i32) -> (i32, i32) {
    %c0_i32 = arith.constant 0 : i32
    %c0_i32_0 = arith.constant 0 : i32
    return %c0_i32, %arg1 : i32, i32
  }
  func.func @transform_4(%arg0: i32, %arg1: i32, %arg2: i32) -> (i32, i32) {
    %c0_i32 = arith.constant 0 : i32
    return %arg0, %arg1 : i32, i32
  }
  func.func @transform_5(%arg0: i32, %arg1: i32, %arg2: i32) -> (i32, i32) {
    %c0_i32 = arith.constant 0 : i32
    return %arg0, %arg1 : i32, i32
  }
}

module attributes {stable_mosaic.version = 11 : i64} {
  func.func @_conv_mm_kernel(%arg0: i32, %arg1: i32, %arg2: i32, %arg3: memref<1x32x128xbf16, #tpu.memory_space<vmem>>, %arg4: memref<1x128x128xbf16, #tpu.memory_space<vmem>>, %arg5: memref<1x128xf32, #tpu.memory_space<vmem>>, %arg6: memref<1x128xf32, #tpu.memory_space<vmem>>, %arg7: memref<32x128xbf16, #tpu.memory_space<vmem>>, %arg8: memref<32x128xf32, #tpu.memory_space<vmem>>) attributes {dimension_semantics = [#tpu.dimension_semantics<parallel>, #tpu.dimension_semantics<parallel>, #tpu.dimension_semantics<arbitrary>], iteration_bounds = array<i64: 1, 2, 9>, scalar_prefetch = 0 : i64, scratch_operands = 1 : i64, tpu.core_type = #tpu.core_type<tc>, window_params = [{transform_indices = @transform_0, window_bounds = array<i64: 1, 32, 128>}, {transform_indices = @transform_1, window_bounds = array<i64: 1, 128, 128>}, {transform_indices = @transform_2, window_bounds = array<i64: 1, 128>}, {transform_indices = @transform_3, window_bounds = array<i64: 1, 128>}, {transform_indices = @transform_4, window_bounds = array<i64: 32, 128>}]} {
    %c0_i32 = arith.constant 0 : i32
    %0 = arith.cmpi eq, %arg2, %c0_i32 : i32
    %1 = arith.extui %0 : i1 to i32
    %c0_i32_0 = arith.constant 0 : i32
    %2 = arith.cmpi ne, %1, %c0_i32_0 : i32
    scf.if %2 {
      %cst_11 = arith.constant 0.000000e+00 : f32
      %14 = vector.broadcast %cst_11 : f32 to vector<32x128xf32>
      %c0_12 = arith.constant 0 : index
      %c0_13 = arith.constant 0 : index
      %15 = vector.load %arg8[%c0_12, %c0_13] : memref<32x128xf32, #tpu.memory_space<vmem>>, vector<32x128xf32>
      tpu.vector_store %arg8[%c0_12, %c0_13], %14 {strides = array<i32>} : memref<32x128xf32, #tpu.memory_space<vmem>>, vector<32x128xf32>,
    } else {
    }
    %c0 = arith.constant 0 : index
    %c0_1 = arith.constant 0 : index
    %3 = vector.load %arg8[%c0, %c0_1] : memref<32x128xf32, #tpu.memory_space<vmem>>, vector<32x128xf32>
    %c0_2 = arith.constant 0 : index
    %c0_3 = arith.constant 0 : index
    %c0_4 = arith.constant 0 : index
    %4 = vector.load %arg3[%c0_2, %c0_3, %c0_4] : memref<1x32x128xbf16, #tpu.memory_space<vmem>>, vector<1x32x128xbf16>
    %5 = vector.shape_cast %4 : vector<1x32x128xbf16> to vector<32x128xbf16>
    %c0_5 = arith.constant 0 : index
    %c0_6 = arith.constant 0 : index
    %c0_7 = arith.constant 0 : index
    %6 = vector.load %arg4[%c0_5, %c0_6, %c0_7] : memref<1x128x128xbf16, #tpu.memory_space<vmem>>, vector<1x128x128xbf16>
    %7 = vector.shape_cast %6 : vector<1x128x128xbf16> to vector<128x128xbf16>
    %cst = arith.constant dense<0.000000e+00> : vector<32x128xf32>
    %8 = tpu.matmul %5, %7, %cst {dimension_numbers = #tpu.dot_dimension_numbers<[1], [0], [0], [1], [0, 0, 1, 1], [], []>} : vector<32x128xbf16>, vector<128x128xbf16>, vector<32x128xf32> -> vector<32x128xf32>
    %9 = arith.addf %3, %8 : vector<32x128xf32>
    %c0_8 = arith.constant 0 : index
    %c0_9 = arith.constant 0 : index
    %10 = vector.load %arg8[%c0_8, %c0_9] : memref<32x128xf32, #tpu.memory_space<vmem>>, vector<32x128xf32>
    tpu.vector_store %arg8[%c0_8, %c0_9], %9 {strides = array<i32>} : memref<32x128xf32, #tpu.memory_space<vmem>>, vector<32x128xf32>,
    %c8_i32 = arith.constant 8 : i32
    %11 = arith.cmpi eq, %arg2, %c8_i32 : i32
    %12 = arith.extui %11 : i1 to i32
    %c0_i32_10 = arith.constant 0 : i32
    %13 = arith.cmpi ne, %12, %c0_i32_10 : i32
    scf.if %13 {
      %c0_11 = arith.constant 0 : index
      %c0_12 = arith.constant 0 : index
      %14 = vector.load %arg8[%c0_11, %c0_12] : memref<32x128xf32, #tpu.memory_space<vmem>>, vector<32x128xf32>
      %c0_13 = arith.constant 0 : index
      %c0_14 = arith.constant 0 : index
      %15 = vector.load %arg5[%c0_13, %c0_14] : memref<1x128xf32, #tpu.memory_space<vmem>>, vector<1x128xf32>
      %16 = vector.broadcast %15 : vector<1x128xf32> to vector<32x128xf32>
      %17 = arith.mulf %14, %16 : vector<32x128xf32>
      %c0_15 = arith.constant 0 : index
      %c0_16 = arith.constant 0 : index
      %18 = vector.load %arg6[%c0_15, %c0_16] : memref<1x128xf32, #tpu.memory_space<vmem>>, vector<1x128xf32>
      %19 = vector.broadcast %18 : vector<1x128xf32> to vector<32x128xf32>
      %20 = arith.addf %17, %19 : vector<32x128xf32>
      %cst_17 = arith.constant 0.000000e+00 : f32
      %21 = vector.broadcast %cst_17 : f32 to vector<32x128xf32>
      %22 = arith.maximumf %20, %21 : vector<32x128xf32>
      %23 = arith.truncf %22 : vector<32x128xf32> to vector<32x128xbf16>
      %c0_18 = arith.constant 0 : index
      %c0_19 = arith.constant 0 : index
      %24 = vector.load %arg7[%c0_18, %c0_19] : memref<32x128xbf16, #tpu.memory_space<vmem>>, vector<32x128xbf16>
      tpu.vector_store %arg7[%c0_18, %c0_19], %23 {strides = array<i32>} : memref<32x128xbf16, #tpu.memory_space<vmem>>, vector<32x128xbf16>,
    } else {
    }
    return
  }
  func.func @transform_0(%arg0: i32, %arg1: i32, %arg2: i32) -> (i32, i32, i32) {
    %c0_i32 = arith.constant 0 : i32
    %c0_i32_0 = arith.constant 0 : i32
    return %arg2, %arg0, %c0_i32 : i32, i32, i32
  }
  func.func @transform_1(%arg0: i32, %arg1: i32, %arg2: i32) -> (i32, i32, i32) {
    %c0_i32 = arith.constant 0 : i32
    %c0_i32_0 = arith.constant 0 : i32
    return %arg2, %c0_i32, %arg1 : i32, i32, i32
  }
  func.func @transform_2(%arg0: i32, %arg1: i32, %arg2: i32) -> (i32, i32) {
    %c0_i32 = arith.constant 0 : i32
    %c0_i32_0 = arith.constant 0 : i32
    return %c0_i32, %arg1 : i32, i32
  }
  func.func @transform_3(%arg0: i32, %arg1: i32, %arg2: i32) -> (i32, i32) {
    %c0_i32 = arith.constant 0 : i32
    %c0_i32_0 = arith.constant 0 : i32
    return %c0_i32, %arg1 : i32, i32
  }
  func.func @transform_4(%arg0: i32, %arg1: i32, %arg2: i32) -> (i32, i32) {
    %c0_i32 = arith.constant 0 : i32
    return %arg0, %arg1 : i32, i32
  }
}

module attributes {stable_mosaic.version = 11 : i64} {
  func.func @_conv_mm_kernel(%arg0: i32, %arg1: i32, %arg2: i32, %arg3: memref<1x32x256xbf16, #tpu.memory_space<vmem>>, %arg4: memref<1x256x128xbf16, #tpu.memory_space<vmem>>, %arg5: memref<1x128xf32, #tpu.memory_space<vmem>>, %arg6: memref<1x128xf32, #tpu.memory_space<vmem>>, %arg7: memref<32x128xbf16, #tpu.memory_space<vmem>>, %arg8: memref<32x128xf32, #tpu.memory_space<vmem>>) attributes {dimension_semantics = [#tpu.dimension_semantics<parallel>, #tpu.dimension_semantics<parallel>, #tpu.dimension_semantics<arbitrary>], iteration_bounds = array<i64: 1, 2, 9>, scalar_prefetch = 0 : i64, scratch_operands = 1 : i64, tpu.core_type = #tpu.core_type<tc>, window_params = [{transform_indices = @transform_0, window_bounds = array<i64: 1, 32, 256>}, {transform_indices = @transform_1, window_bounds = array<i64: 1, 256, 128>}, {transform_indices = @transform_2, window_bounds = array<i64: 1, 128>}, {transform_indices = @transform_3, window_bounds = array<i64: 1, 128>}, {transform_indices = @transform_4, window_bounds = array<i64: 32, 128>}]} {
    %c0_i32 = arith.constant 0 : i32
    %0 = arith.cmpi eq, %arg2, %c0_i32 : i32
    %1 = arith.extui %0 : i1 to i32
    %c0_i32_0 = arith.constant 0 : i32
    %2 = arith.cmpi ne, %1, %c0_i32_0 : i32
    scf.if %2 {
      %cst_11 = arith.constant 0.000000e+00 : f32
      %14 = vector.broadcast %cst_11 : f32 to vector<32x128xf32>
      %c0_12 = arith.constant 0 : index
      %c0_13 = arith.constant 0 : index
      %15 = vector.load %arg8[%c0_12, %c0_13] : memref<32x128xf32, #tpu.memory_space<vmem>>, vector<32x128xf32>
      tpu.vector_store %arg8[%c0_12, %c0_13], %14 {strides = array<i32>} : memref<32x128xf32, #tpu.memory_space<vmem>>, vector<32x128xf32>,
    } else {
    }
    %c0 = arith.constant 0 : index
    %c0_1 = arith.constant 0 : index
    %3 = vector.load %arg8[%c0, %c0_1] : memref<32x128xf32, #tpu.memory_space<vmem>>, vector<32x128xf32>
    %c0_2 = arith.constant 0 : index
    %c0_3 = arith.constant 0 : index
    %c0_4 = arith.constant 0 : index
    %4 = vector.load %arg3[%c0_2, %c0_3, %c0_4] : memref<1x32x256xbf16, #tpu.memory_space<vmem>>, vector<1x32x256xbf16>
    %5 = vector.shape_cast %4 : vector<1x32x256xbf16> to vector<32x256xbf16>
    %c0_5 = arith.constant 0 : index
    %c0_6 = arith.constant 0 : index
    %c0_7 = arith.constant 0 : index
    %6 = vector.load %arg4[%c0_5, %c0_6, %c0_7] : memref<1x256x128xbf16, #tpu.memory_space<vmem>>, vector<1x256x128xbf16>
    %7 = vector.shape_cast %6 : vector<1x256x128xbf16> to vector<256x128xbf16>
    %cst = arith.constant dense<0.000000e+00> : vector<32x128xf32>
    %8 = tpu.matmul %5, %7, %cst {dimension_numbers = #tpu.dot_dimension_numbers<[1], [0], [0], [1], [0, 0, 1, 1], [], []>} : vector<32x256xbf16>, vector<256x128xbf16>, vector<32x128xf32> -> vector<32x128xf32>
    %9 = arith.addf %3, %8 : vector<32x128xf32>
    %c0_8 = arith.constant 0 : index
    %c0_9 = arith.constant 0 : index
    %10 = vector.load %arg8[%c0_8, %c0_9] : memref<32x128xf32, #tpu.memory_space<vmem>>, vector<32x128xf32>
    tpu.vector_store %arg8[%c0_8, %c0_9], %9 {strides = array<i32>} : memref<32x128xf32, #tpu.memory_space<vmem>>, vector<32x128xf32>,
    %c8_i32 = arith.constant 8 : i32
    %11 = arith.cmpi eq, %arg2, %c8_i32 : i32
    %12 = arith.extui %11 : i1 to i32
    %c0_i32_10 = arith.constant 0 : i32
    %13 = arith.cmpi ne, %12, %c0_i32_10 : i32
    scf.if %13 {
      %c0_11 = arith.constant 0 : index
      %c0_12 = arith.constant 0 : index
      %14 = vector.load %arg8[%c0_11, %c0_12] : memref<32x128xf32, #tpu.memory_space<vmem>>, vector<32x128xf32>
      %c0_13 = arith.constant 0 : index
      %c0_14 = arith.constant 0 : index
      %15 = vector.load %arg5[%c0_13, %c0_14] : memref<1x128xf32, #tpu.memory_space<vmem>>, vector<1x128xf32>
      %16 = vector.broadcast %15 : vector<1x128xf32> to vector<32x128xf32>
      %17 = arith.mulf %14, %16 : vector<32x128xf32>
      %c0_15 = arith.constant 0 : index
      %c0_16 = arith.constant 0 : index
      %18 = vector.load %arg6[%c0_15, %c0_16] : memref<1x128xf32, #tpu.memory_space<vmem>>, vector<1x128xf32>
      %19 = vector.broadcast %18 : vector<1x128xf32> to vector<32x128xf32>
      %20 = arith.addf %17, %19 : vector<32x128xf32>
      %cst_17 = arith.constant 0.000000e+00 : f32
      %21 = vector.broadcast %cst_17 : f32 to vector<32x128xf32>
      %22 = arith.maximumf %20, %21 : vector<32x128xf32>
      %23 = arith.truncf %22 : vector<32x128xf32> to vector<32x128xbf16>
      %c0_18 = arith.constant 0 : index
      %c0_19 = arith.constant 0 : index
      %24 = vector.load %arg7[%c0_18, %c0_19] : memref<32x128xbf16, #tpu.memory_space<vmem>>, vector<32x128xbf16>
      tpu.vector_store %arg7[%c0_18, %c0_19], %23 {strides = array<i32>} : memref<32x128xbf16, #tpu.memory_space<vmem>>, vector<32x128xbf16>,
    } else {
    }
    return
  }
  func.func @transform_0(%arg0: i32, %arg1: i32, %arg2: i32) -> (i32, i32, i32) {
    %c0_i32 = arith.constant 0 : i32
    %c0_i32_0 = arith.constant 0 : i32
    return %arg2, %arg0, %c0_i32 : i32, i32, i32
  }
  func.func @transform_1(%arg0: i32, %arg1: i32, %arg2: i32) -> (i32, i32, i32) {
    %c0_i32 = arith.constant 0 : i32
    %c0_i32_0 = arith.constant 0 : i32
    return %arg2, %c0_i32, %arg1 : i32, i32, i32
  }
  func.func @transform_2(%arg0: i32, %arg1: i32, %arg2: i32) -> (i32, i32) {
    %c0_i32 = arith.constant 0 : i32
    %c0_i32_0 = arith.constant 0 : i32
    return %c0_i32, %arg1 : i32, i32
  }
  func.func @transform_3(%arg0: i32, %arg1: i32, %arg2: i32) -> (i32, i32) {
    %c0_i32 = arith.constant 0 : i32
    %c0_i32_0 = arith.constant 0 : i32
    return %c0_i32, %arg1 : i32, i32
  }
  func.func @transform_4(%arg0: i32, %arg1: i32, %arg2: i32) -> (i32, i32) {
    %c0_i32 = arith.constant 0 : i32
    return %arg0, %arg1 : i32, i32
  }
}

module attributes {stable_mosaic.version = 11 : i64} {
  func.func @_conv_mm_kernel(%arg0: i32, %arg1: i32, %arg2: i32, %arg3: memref<1x32x128xbf16, #tpu.memory_space<vmem>>, %arg4: memref<1x128x128xbf16, #tpu.memory_space<vmem>>, %arg5: memref<1x128xf32, #tpu.memory_space<vmem>>, %arg6: memref<1x128xf32, #tpu.memory_space<vmem>>, %arg7: memref<32x128xbf16, #tpu.memory_space<vmem>>, %arg8: memref<32x128xf32, #tpu.memory_space<vmem>>) attributes {dimension_semantics = [#tpu.dimension_semantics<parallel>, #tpu.dimension_semantics<parallel>, #tpu.dimension_semantics<arbitrary>], iteration_bounds = array<i64: 1, 2, 1>, scalar_prefetch = 0 : i64, scratch_operands = 1 : i64, tpu.core_type = #tpu.core_type<tc>, window_params = [{transform_indices = @transform_0, window_bounds = array<i64: 1, 32, 128>}, {transform_indices = @transform_1, window_bounds = array<i64: 1, 128, 128>}, {transform_indices = @transform_2, window_bounds = array<i64: 1, 128>}, {transform_indices = @transform_3, window_bounds = array<i64: 1, 128>}, {transform_indices = @transform_4, window_bounds = array<i64: 32, 128>}]} {
    %c0_i32 = arith.constant 0 : i32
    %0 = arith.cmpi eq, %arg2, %c0_i32 : i32
    %1 = arith.extui %0 : i1 to i32
    %c0_i32_0 = arith.constant 0 : i32
    %2 = arith.cmpi ne, %1, %c0_i32_0 : i32
    scf.if %2 {
      %cst_12 = arith.constant 0.000000e+00 : f32
      %14 = vector.broadcast %cst_12 : f32 to vector<32x128xf32>
      %c0_13 = arith.constant 0 : index
      %c0_14 = arith.constant 0 : index
      %15 = vector.load %arg8[%c0_13, %c0_14] : memref<32x128xf32, #tpu.memory_space<vmem>>, vector<32x128xf32>
      tpu.vector_store %arg8[%c0_13, %c0_14], %14 {strides = array<i32>} : memref<32x128xf32, #tpu.memory_space<vmem>>, vector<32x128xf32>,
    } else {
    }
    %c0 = arith.constant 0 : index
    %c0_1 = arith.constant 0 : index
    %3 = vector.load %arg8[%c0, %c0_1] : memref<32x128xf32, #tpu.memory_space<vmem>>, vector<32x128xf32>
    %c0_2 = arith.constant 0 : index
    %c0_3 = arith.constant 0 : index
    %c0_4 = arith.constant 0 : index
    %4 = vector.load %arg3[%c0_2, %c0_3, %c0_4] : memref<1x32x128xbf16, #tpu.memory_space<vmem>>, vector<1x32x128xbf16>
    %5 = vector.shape_cast %4 : vector<1x32x128xbf16> to vector<32x128xbf16>
    %c0_5 = arith.constant 0 : index
    %c0_6 = arith.constant 0 : index
    %c0_7 = arith.constant 0 : index
    %6 = vector.load %arg4[%c0_5, %c0_6, %c0_7] : memref<1x128x128xbf16, #tpu.memory_space<vmem>>, vector<1x128x128xbf16>
    %7 = vector.shape_cast %6 : vector<1x128x128xbf16> to vector<128x128xbf16>
    %cst = arith.constant dense<0.000000e+00> : vector<32x128xf32>
    %8 = tpu.matmul %5, %7, %cst {dimension_numbers = #tpu.dot_dimension_numbers<[1], [0], [0], [1], [0, 0, 1, 1], [], []>} : vector<32x128xbf16>, vector<128x128xbf16>, vector<32x128xf32> -> vector<32x128xf32>
    %9 = arith.addf %3, %8 : vector<32x128xf32>
    %c0_8 = arith.constant 0 : index
    %c0_9 = arith.constant 0 : index
    %10 = vector.load %arg8[%c0_8, %c0_9] : memref<32x128xf32, #tpu.memory_space<vmem>>, vector<32x128xf32>
    tpu.vector_store %arg8[%c0_8, %c0_9], %9 {strides = array<i32>} : memref<32x128xf32, #tpu.memory_space<vmem>>, vector<32x128xf32>,
    %c0_i32_10 = arith.constant 0 : i32
    %11 = arith.cmpi eq, %arg2, %c0_i32_10 : i32
    %12 = arith.extui %11 : i1 to i32
    %c0_i32_11 = arith.constant 0 : i32
    %13 = arith.cmpi ne, %12, %c0_i32_11 : i32
    scf.if %13 {
      %c0_12 = arith.constant 0 : index
      %c0_13 = arith.constant 0 : index
      %14 = vector.load %arg8[%c0_12, %c0_13] : memref<32x128xf32, #tpu.memory_space<vmem>>, vector<32x128xf32>
      %c0_14 = arith.constant 0 : index
      %c0_15 = arith.constant 0 : index
      %15 = vector.load %arg5[%c0_14, %c0_15] : memref<1x128xf32, #tpu.memory_space<vmem>>, vector<1x128xf32>
      %16 = vector.broadcast %15 : vector<1x128xf32> to vector<32x128xf32>
      %17 = arith.mulf %14, %16 : vector<32x128xf32>
      %c0_16 = arith.constant 0 : index
      %c0_17 = arith.constant 0 : index
      %18 = vector.load %arg6[%c0_16, %c0_17] : memref<1x128xf32, #tpu.memory_space<vmem>>, vector<1x128xf32>
      %19 = vector.broadcast %18 : vector<1x128xf32> to vector<32x128xf32>
      %20 = arith.addf %17, %19 : vector<32x128xf32>
      %21 = arith.truncf %20 : vector<32x128xf32> to vector<32x128xbf16>
      %c0_18 = arith.constant 0 : index
      %c0_19 = arith.constant 0 : index
      %22 = vector.load %arg7[%c0_18, %c0_19] : memref<32x128xbf16, #tpu.memory_space<vmem>>, vector<32x128xbf16>
      tpu.vector_store %arg7[%c0_18, %c0_19], %21 {strides = array<i32>} : memref<32x128xbf16, #tpu.memory_space<vmem>>, vector<32x128xbf16>,
    } else {
    }
    return
  }
  func.func @transform_0(%arg0: i32, %arg1: i32, %arg2: i32) -> (i32, i32, i32) {
    %c0_i32 = arith.constant 0 : i32
    %c0_i32_0 = arith.constant 0 : i32
    return %arg2, %arg0, %c0_i32 : i32, i32, i32
  }
  func.func @transform_1(%arg0: i32, %arg1: i32, %arg2: i32) -> (i32, i32, i32) {
    %c0_i32 = arith.constant 0 : i32
    %c0_i32_0 = arith.constant 0 : i32
    return %arg2, %c0_i32, %arg1 : i32, i32, i32
  }
  func.func @transform_2(%arg0: i32, %arg1: i32, %arg2: i32) -> (i32, i32) {
    %c0_i32 = arith.constant 0 : i32
    %c0_i32_0 = arith.constant 0 : i32
    return %c0_i32, %arg1 : i32, i32
  }
  func.func @transform_3(%arg0: i32, %arg1: i32, %arg2: i32) -> (i32, i32) {
    %c0_i32 = arith.constant 0 : i32
    %c0_i32_0 = arith.constant 0 : i32
    return %c0_i32, %arg1 : i32, i32
  }
  func.func @transform_4(%arg0: i32, %arg1: i32, %arg2: i32) -> (i32, i32) {
    %c0_i32 = arith.constant 0 : i32
    return %arg0, %arg1 : i32, i32
  }
}

module attributes {stable_mosaic.version = 11 : i64} {
  func.func @_conv_mm_res_kernel(%arg0: i32, %arg1: i32, %arg2: i32, %arg3: memref<1x32x256xbf16, #tpu.memory_space<vmem>>, %arg4: memref<1x256x128xbf16, #tpu.memory_space<vmem>>, %arg5: memref<1x128xf32, #tpu.memory_space<vmem>>, %arg6: memref<1x128xf32, #tpu.memory_space<vmem>>, %arg7: memref<32x128xbf16, #tpu.memory_space<vmem>>, %arg8: memref<32x128xbf16, #tpu.memory_space<vmem>>, %arg9: memref<32x128xf32, #tpu.memory_space<vmem>>) attributes {dimension_semantics = [#tpu.dimension_semantics<parallel>, #tpu.dimension_semantics<parallel>, #tpu.dimension_semantics<arbitrary>], iteration_bounds = array<i64: 1, 2, 9>, scalar_prefetch = 0 : i64, scratch_operands = 1 : i64, tpu.core_type = #tpu.core_type<tc>, window_params = [{transform_indices = @transform_0, window_bounds = array<i64: 1, 32, 256>}, {transform_indices = @transform_1, window_bounds = array<i64: 1, 256, 128>}, {transform_indices = @transform_2, window_bounds = array<i64: 1, 128>}, {transform_indices = @transform_3, window_bounds = array<i64: 1, 128>}, {transform_indices = @transform_4, window_bounds = array<i64: 32, 128>}, {transform_indices = @transform_5, window_bounds = array<i64: 32, 128>}]} {
    %c0_i32 = arith.constant 0 : i32
    %0 = arith.cmpi eq, %arg2, %c0_i32 : i32
    %1 = arith.extui %0 : i1 to i32
    %c0_i32_0 = arith.constant 0 : i32
    %2 = arith.cmpi ne, %1, %c0_i32_0 : i32
    scf.if %2 {
      %cst_11 = arith.constant 0.000000e+00 : f32
      %14 = vector.broadcast %cst_11 : f32 to vector<32x128xf32>
      %c0_12 = arith.constant 0 : index
      %c0_13 = arith.constant 0 : index
      %15 = vector.load %arg9[%c0_12, %c0_13] : memref<32x128xf32, #tpu.memory_space<vmem>>, vector<32x128xf32>
      tpu.vector_store %arg9[%c0_12, %c0_13], %14 {strides = array<i32>} : memref<32x128xf32, #tpu.memory_space<vmem>>, vector<32x128xf32>,
    } else {
    }
    %c0 = arith.constant 0 : index
    %c0_1 = arith.constant 0 : index
    %3 = vector.load %arg9[%c0, %c0_1] : memref<32x128xf32, #tpu.memory_space<vmem>>, vector<32x128xf32>
    %c0_2 = arith.constant 0 : index
    %c0_3 = arith.constant 0 : index
    %c0_4 = arith.constant 0 : index
    %4 = vector.load %arg3[%c0_2, %c0_3, %c0_4] : memref<1x32x256xbf16, #tpu.memory_space<vmem>>, vector<1x32x256xbf16>
    %5 = vector.shape_cast %4 : vector<1x32x256xbf16> to vector<32x256xbf16>
    %c0_5 = arith.constant 0 : index
    %c0_6 = arith.constant 0 : index
    %c0_7 = arith.constant 0 : index
    %6 = vector.load %arg4[%c0_5, %c0_6, %c0_7] : memref<1x256x128xbf16, #tpu.memory_space<vmem>>, vector<1x256x128xbf16>
    %7 = vector.shape_cast %6 : vector<1x256x128xbf16> to vector<256x128xbf16>
    %cst = arith.constant dense<0.000000e+00> : vector<32x128xf32>
    %8 = tpu.matmul %5, %7, %cst {dimension_numbers = #tpu.dot_dimension_numbers<[1], [0], [0], [1], [0, 0, 1, 1], [], []>} : vector<32x256xbf16>, vector<256x128xbf16>, vector<32x128xf32> -> vector<32x128xf32>
    %9 = arith.addf %3, %8 : vector<32x128xf32>
    %c0_8 = arith.constant 0 : index
    %c0_9 = arith.constant 0 : index
    %10 = vector.load %arg9[%c0_8, %c0_9] : memref<32x128xf32, #tpu.memory_space<vmem>>, vector<32x128xf32>
    tpu.vector_store %arg9[%c0_8, %c0_9], %9 {strides = array<i32>} : memref<32x128xf32, #tpu.memory_space<vmem>>, vector<32x128xf32>,
    %c8_i32 = arith.constant 8 : i32
    %11 = arith.cmpi eq, %arg2, %c8_i32 : i32
    %12 = arith.extui %11 : i1 to i32
    %c0_i32_10 = arith.constant 0 : i32
    %13 = arith.cmpi ne, %12, %c0_i32_10 : i32
    scf.if %13 {
      %c0_11 = arith.constant 0 : index
      %c0_12 = arith.constant 0 : index
      %14 = vector.load %arg9[%c0_11, %c0_12] : memref<32x128xf32, #tpu.memory_space<vmem>>, vector<32x128xf32>
      %c0_13 = arith.constant 0 : index
      %c0_14 = arith.constant 0 : index
      %15 = vector.load %arg5[%c0_13, %c0_14] : memref<1x128xf32, #tpu.memory_space<vmem>>, vector<1x128xf32>
      %16 = vector.broadcast %15 : vector<1x128xf32> to vector<32x128xf32>
      %17 = arith.mulf %14, %16 : vector<32x128xf32>
      %c0_15 = arith.constant 0 : index
      %c0_16 = arith.constant 0 : index
      %18 = vector.load %arg6[%c0_15, %c0_16] : memref<1x128xf32, #tpu.memory_space<vmem>>, vector<1x128xf32>
      %19 = vector.broadcast %18 : vector<1x128xf32> to vector<32x128xf32>
      %20 = arith.addf %17, %19 : vector<32x128xf32>
      %c0_17 = arith.constant 0 : index
      %c0_18 = arith.constant 0 : index
      %21 = vector.load %arg7[%c0_17, %c0_18] : memref<32x128xbf16, #tpu.memory_space<vmem>>, vector<32x128xbf16>
      %22 = arith.extf %21 : vector<32x128xbf16> to vector<32x128xf32>
      %23 = arith.addf %20, %22 : vector<32x128xf32>
      %cst_19 = arith.constant 0.000000e+00 : f32
      %24 = vector.broadcast %cst_19 : f32 to vector<32x128xf32>
      %25 = arith.maximumf %23, %24 : vector<32x128xf32>
      %26 = arith.truncf %25 : vector<32x128xf32> to vector<32x128xbf16>
      %c0_20 = arith.constant 0 : index
      %c0_21 = arith.constant 0 : index
      %27 = vector.load %arg8[%c0_20, %c0_21] : memref<32x128xbf16, #tpu.memory_space<vmem>>, vector<32x128xbf16>
      tpu.vector_store %arg8[%c0_20, %c0_21], %26 {strides = array<i32>} : memref<32x128xbf16, #tpu.memory_space<vmem>>, vector<32x128xbf16>,
    } else {
    }
    return
  }
  func.func @transform_0(%arg0: i32, %arg1: i32, %arg2: i32) -> (i32, i32, i32) {
    %c0_i32 = arith.constant 0 : i32
    %c0_i32_0 = arith.constant 0 : i32
    return %arg2, %arg0, %c0_i32 : i32, i32, i32
  }
  func.func @transform_1(%arg0: i32, %arg1: i32, %arg2: i32) -> (i32, i32, i32) {
    %c0_i32 = arith.constant 0 : i32
    %c0_i32_0 = arith.constant 0 : i32
    return %arg2, %c0_i32, %arg1 : i32, i32, i32
  }
  func.func @transform_2(%arg0: i32, %arg1: i32, %arg2: i32) -> (i32, i32) {
    %c0_i32 = arith.constant 0 : i32
    %c0_i32_0 = arith.constant 0 : i32
    return %c0_i32, %arg1 : i32, i32
  }
  func.func @transform_3(%arg0: i32, %arg1: i32, %arg2: i32) -> (i32, i32) {
    %c0_i32 = arith.constant 0 : i32
    %c0_i32_0 = arith.constant 0 : i32
    return %c0_i32, %arg1 : i32, i32
  }
  func.func @transform_4(%arg0: i32, %arg1: i32, %arg2: i32) -> (i32, i32) {
    %c0_i32 = arith.constant 0 : i32
    return %arg0, %arg1 : i32, i32
  }
  func.func @transform_5(%arg0: i32, %arg1: i32, %arg2: i32) -> (i32, i32) {
    %c0_i32 = arith.constant 0 : i32
    return %arg0, %arg1 : i32, i32
  }
}

module attributes {stable_mosaic.version = 11 : i64} {
  func.func @_conv_mm_kernel(%arg0: i32, %arg1: i32, %arg2: i32, %arg3: memref<1x8x256xbf16, #tpu.memory_space<vmem>>, %arg4: memref<1x256x256xbf16, #tpu.memory_space<vmem>>, %arg5: memref<1x256xf32, #tpu.memory_space<vmem>>, %arg6: memref<1x256xf32, #tpu.memory_space<vmem>>, %arg7: memref<8x256xbf16, #tpu.memory_space<vmem>>, %arg8: memref<8x256xf32, #tpu.memory_space<vmem>>) attributes {dimension_semantics = [#tpu.dimension_semantics<parallel>, #tpu.dimension_semantics<parallel>, #tpu.dimension_semantics<arbitrary>], iteration_bounds = array<i64: 1, 2, 9>, scalar_prefetch = 0 : i64, scratch_operands = 1 : i64, tpu.core_type = #tpu.core_type<tc>, window_params = [{transform_indices = @transform_0, window_bounds = array<i64: 1, 8, 256>}, {transform_indices = @transform_1, window_bounds = array<i64: 1, 256, 256>}, {transform_indices = @transform_2, window_bounds = array<i64: 1, 256>}, {transform_indices = @transform_3, window_bounds = array<i64: 1, 256>}, {transform_indices = @transform_4, window_bounds = array<i64: 8, 256>}]} {
    %c0_i32 = arith.constant 0 : i32
    %0 = arith.cmpi eq, %arg2, %c0_i32 : i32
    %1 = arith.extui %0 : i1 to i32
    %c0_i32_0 = arith.constant 0 : i32
    %2 = arith.cmpi ne, %1, %c0_i32_0 : i32
    scf.if %2 {
      %cst_11 = arith.constant 0.000000e+00 : f32
      %14 = vector.broadcast %cst_11 : f32 to vector<8x256xf32>
      %c0_12 = arith.constant 0 : index
      %c0_13 = arith.constant 0 : index
      %15 = vector.load %arg8[%c0_12, %c0_13] : memref<8x256xf32, #tpu.memory_space<vmem>>, vector<8x256xf32>
      tpu.vector_store %arg8[%c0_12, %c0_13], %14 {strides = array<i32>} : memref<8x256xf32, #tpu.memory_space<vmem>>, vector<8x256xf32>,
    } else {
    }
    %c0 = arith.constant 0 : index
    %c0_1 = arith.constant 0 : index
    %3 = vector.load %arg8[%c0, %c0_1] : memref<8x256xf32, #tpu.memory_space<vmem>>, vector<8x256xf32>
    %c0_2 = arith.constant 0 : index
    %c0_3 = arith.constant 0 : index
    %c0_4 = arith.constant 0 : index
    %4 = vector.load %arg3[%c0_2, %c0_3, %c0_4] : memref<1x8x256xbf16, #tpu.memory_space<vmem>>, vector<1x8x256xbf16>
    %5 = vector.shape_cast %4 : vector<1x8x256xbf16> to vector<8x256xbf16>
    %c0_5 = arith.constant 0 : index
    %c0_6 = arith.constant 0 : index
    %c0_7 = arith.constant 0 : index
    %6 = vector.load %arg4[%c0_5, %c0_6, %c0_7] : memref<1x256x256xbf16, #tpu.memory_space<vmem>>, vector<1x256x256xbf16>
    %7 = vector.shape_cast %6 : vector<1x256x256xbf16> to vector<256x256xbf16>
    %cst = arith.constant dense<0.000000e+00> : vector<8x256xf32>
    %8 = tpu.matmul %5, %7, %cst {dimension_numbers = #tpu.dot_dimension_numbers<[1], [0], [0], [1], [0, 0, 1, 1], [], []>} : vector<8x256xbf16>, vector<256x256xbf16>, vector<8x256xf32> -> vector<8x256xf32>
    %9 = arith.addf %3, %8 : vector<8x256xf32>
    %c0_8 = arith.constant 0 : index
    %c0_9 = arith.constant 0 : index
    %10 = vector.load %arg8[%c0_8, %c0_9] : memref<8x256xf32, #tpu.memory_space<vmem>>, vector<8x256xf32>
    tpu.vector_store %arg8[%c0_8, %c0_9], %9 {strides = array<i32>} : memref<8x256xf32, #tpu.memory_space<vmem>>, vector<8x256xf32>,
    %c8_i32 = arith.constant 8 : i32
    %11 = arith.cmpi eq, %arg2, %c8_i32 : i32
    %12 = arith.extui %11 : i1 to i32
    %c0_i32_10 = arith.constant 0 : i32
    %13 = arith.cmpi ne, %12, %c0_i32_10 : i32
    scf.if %13 {
      %c0_11 = arith.constant 0 : index
      %c0_12 = arith.constant 0 : index
      %14 = vector.load %arg8[%c0_11, %c0_12] : memref<8x256xf32, #tpu.memory_space<vmem>>, vector<8x256xf32>
      %c0_13 = arith.constant 0 : index
      %c0_14 = arith.constant 0 : index
      %15 = vector.load %arg5[%c0_13, %c0_14] : memref<1x256xf32, #tpu.memory_space<vmem>>, vector<1x256xf32>
      %16 = vector.broadcast %15 : vector<1x256xf32> to vector<8x256xf32>
      %17 = arith.mulf %14, %16 : vector<8x256xf32>
      %c0_15 = arith.constant 0 : index
      %c0_16 = arith.constant 0 : index
      %18 = vector.load %arg6[%c0_15, %c0_16] : memref<1x256xf32, #tpu.memory_space<vmem>>, vector<1x256xf32>
      %19 = vector.broadcast %18 : vector<1x256xf32> to vector<8x256xf32>
      %20 = arith.addf %17, %19 : vector<8x256xf32>
      %cst_17 = arith.constant 0.000000e+00 : f32
      %21 = vector.broadcast %cst_17 : f32 to vector<8x256xf32>
      %22 = arith.maximumf %20, %21 : vector<8x256xf32>
      %23 = arith.truncf %22 : vector<8x256xf32> to vector<8x256xbf16>
      %c0_18 = arith.constant 0 : index
      %c0_19 = arith.constant 0 : index
      %24 = vector.load %arg7[%c0_18, %c0_19] : memref<8x256xbf16, #tpu.memory_space<vmem>>, vector<8x256xbf16>
      tpu.vector_store %arg7[%c0_18, %c0_19], %23 {strides = array<i32>} : memref<8x256xbf16, #tpu.memory_space<vmem>>, vector<8x256xbf16>,
    } else {
    }
    return
  }
  func.func @transform_0(%arg0: i32, %arg1: i32, %arg2: i32) -> (i32, i32, i32) {
    %c0_i32 = arith.constant 0 : i32
    %c0_i32_0 = arith.constant 0 : i32
    return %arg2, %arg0, %c0_i32 : i32, i32, i32
  }
  func.func @transform_1(%arg0: i32, %arg1: i32, %arg2: i32) -> (i32, i32, i32) {
    %c0_i32 = arith.constant 0 : i32
    %c0_i32_0 = arith.constant 0 : i32
    return %arg2, %c0_i32, %arg1 : i32, i32, i32
  }
  func.func @transform_2(%arg0: i32, %arg1: i32, %arg2: i32) -> (i32, i32) {
    %c0_i32 = arith.constant 0 : i32
    %c0_i32_0 = arith.constant 0 : i32
    return %c0_i32, %arg1 : i32, i32
  }
  func.func @transform_3(%arg0: i32, %arg1: i32, %arg2: i32) -> (i32, i32) {
    %c0_i32 = arith.constant 0 : i32
    %c0_i32_0 = arith.constant 0 : i32
    return %c0_i32, %arg1 : i32, i32
  }
  func.func @transform_4(%arg0: i32, %arg1: i32, %arg2: i32) -> (i32, i32) {
    %c0_i32 = arith.constant 0 : i32
    return %arg0, %arg1 : i32, i32
  }
}

module attributes {stable_mosaic.version = 11 : i64} {
  func.func @_conv_mm_kernel(%arg0: i32, %arg1: i32, %arg2: i32, %arg3: memref<1x8x256xbf16, #tpu.memory_space<vmem>>, %arg4: memref<1x256x256xbf16, #tpu.memory_space<vmem>>, %arg5: memref<1x256xf32, #tpu.memory_space<vmem>>, %arg6: memref<1x256xf32, #tpu.memory_space<vmem>>, %arg7: memref<8x256xbf16, #tpu.memory_space<vmem>>, %arg8: memref<8x256xf32, #tpu.memory_space<vmem>>) attributes {dimension_semantics = [#tpu.dimension_semantics<parallel>, #tpu.dimension_semantics<parallel>, #tpu.dimension_semantics<arbitrary>], iteration_bounds = array<i64: 1, 2, 1>, scalar_prefetch = 0 : i64, scratch_operands = 1 : i64, tpu.core_type = #tpu.core_type<tc>, window_params = [{transform_indices = @transform_0, window_bounds = array<i64: 1, 8, 256>}, {transform_indices = @transform_1, window_bounds = array<i64: 1, 256, 256>}, {transform_indices = @transform_2, window_bounds = array<i64: 1, 256>}, {transform_indices = @transform_3, window_bounds = array<i64: 1, 256>}, {transform_indices = @transform_4, window_bounds = array<i64: 8, 256>}]} {
    %c0_i32 = arith.constant 0 : i32
    %0 = arith.cmpi eq, %arg2, %c0_i32 : i32
    %1 = arith.extui %0 : i1 to i32
    %c0_i32_0 = arith.constant 0 : i32
    %2 = arith.cmpi ne, %1, %c0_i32_0 : i32
    scf.if %2 {
      %cst_12 = arith.constant 0.000000e+00 : f32
      %14 = vector.broadcast %cst_12 : f32 to vector<8x256xf32>
      %c0_13 = arith.constant 0 : index
      %c0_14 = arith.constant 0 : index
      %15 = vector.load %arg8[%c0_13, %c0_14] : memref<8x256xf32, #tpu.memory_space<vmem>>, vector<8x256xf32>
      tpu.vector_store %arg8[%c0_13, %c0_14], %14 {strides = array<i32>} : memref<8x256xf32, #tpu.memory_space<vmem>>, vector<8x256xf32>,
    } else {
    }
    %c0 = arith.constant 0 : index
    %c0_1 = arith.constant 0 : index
    %3 = vector.load %arg8[%c0, %c0_1] : memref<8x256xf32, #tpu.memory_space<vmem>>, vector<8x256xf32>
    %c0_2 = arith.constant 0 : index
    %c0_3 = arith.constant 0 : index
    %c0_4 = arith.constant 0 : index
    %4 = vector.load %arg3[%c0_2, %c0_3, %c0_4] : memref<1x8x256xbf16, #tpu.memory_space<vmem>>, vector<1x8x256xbf16>
    %5 = vector.shape_cast %4 : vector<1x8x256xbf16> to vector<8x256xbf16>
    %c0_5 = arith.constant 0 : index
    %c0_6 = arith.constant 0 : index
    %c0_7 = arith.constant 0 : index
    %6 = vector.load %arg4[%c0_5, %c0_6, %c0_7] : memref<1x256x256xbf16, #tpu.memory_space<vmem>>, vector<1x256x256xbf16>
    %7 = vector.shape_cast %6 : vector<1x256x256xbf16> to vector<256x256xbf16>
    %cst = arith.constant dense<0.000000e+00> : vector<8x256xf32>
    %8 = tpu.matmul %5, %7, %cst {dimension_numbers = #tpu.dot_dimension_numbers<[1], [0], [0], [1], [0, 0, 1, 1], [], []>} : vector<8x256xbf16>, vector<256x256xbf16>, vector<8x256xf32> -> vector<8x256xf32>
    %9 = arith.addf %3, %8 : vector<8x256xf32>
    %c0_8 = arith.constant 0 : index
    %c0_9 = arith.constant 0 : index
    %10 = vector.load %arg8[%c0_8, %c0_9] : memref<8x256xf32, #tpu.memory_space<vmem>>, vector<8x256xf32>
    tpu.vector_store %arg8[%c0_8, %c0_9], %9 {strides = array<i32>} : memref<8x256xf32, #tpu.memory_space<vmem>>, vector<8x256xf32>,
    %c0_i32_10 = arith.constant 0 : i32
    %11 = arith.cmpi eq, %arg2, %c0_i32_10 : i32
    %12 = arith.extui %11 : i1 to i32
    %c0_i32_11 = arith.constant 0 : i32
    %13 = arith.cmpi ne, %12, %c0_i32_11 : i32
    scf.if %13 {
      %c0_12 = arith.constant 0 : index
      %c0_13 = arith.constant 0 : index
      %14 = vector.load %arg8[%c0_12, %c0_13] : memref<8x256xf32, #tpu.memory_space<vmem>>, vector<8x256xf32>
      %c0_14 = arith.constant 0 : index
      %c0_15 = arith.constant 0 : index
      %15 = vector.load %arg5[%c0_14, %c0_15] : memref<1x256xf32, #tpu.memory_space<vmem>>, vector<1x256xf32>
      %16 = vector.broadcast %15 : vector<1x256xf32> to vector<8x256xf32>
      %17 = arith.mulf %14, %16 : vector<8x256xf32>
      %c0_16 = arith.constant 0 : index
      %c0_17 = arith.constant 0 : index
      %18 = vector.load %arg6[%c0_16, %c0_17] : memref<1x256xf32, #tpu.memory_space<vmem>>, vector<1x256xf32>
      %19 = vector.broadcast %18 : vector<1x256xf32> to vector<8x256xf32>
      %20 = arith.addf %17, %19 : vector<8x256xf32>
      %21 = arith.truncf %20 : vector<8x256xf32> to vector<8x256xbf16>
      %c0_18 = arith.constant 0 : index
      %c0_19 = arith.constant 0 : index
      %22 = vector.load %arg7[%c0_18, %c0_19] : memref<8x256xbf16, #tpu.memory_space<vmem>>, vector<8x256xbf16>
      tpu.vector_store %arg7[%c0_18, %c0_19], %21 {strides = array<i32>} : memref<8x256xbf16, #tpu.memory_space<vmem>>, vector<8x256xbf16>,
    } else {
    }
    return
  }
  func.func @transform_0(%arg0: i32, %arg1: i32, %arg2: i32) -> (i32, i32, i32) {
    %c0_i32 = arith.constant 0 : i32
    %c0_i32_0 = arith.constant 0 : i32
    return %arg2, %arg0, %c0_i32 : i32, i32, i32
  }
  func.func @transform_1(%arg0: i32, %arg1: i32, %arg2: i32) -> (i32, i32, i32) {
    %c0_i32 = arith.constant 0 : i32
    %c0_i32_0 = arith.constant 0 : i32
    return %arg2, %c0_i32, %arg1 : i32, i32, i32
  }
  func.func @transform_2(%arg0: i32, %arg1: i32, %arg2: i32) -> (i32, i32) {
    %c0_i32 = arith.constant 0 : i32
    %c0_i32_0 = arith.constant 0 : i32
    return %c0_i32, %arg1 : i32, i32
  }
  func.func @transform_3(%arg0: i32, %arg1: i32, %arg2: i32) -> (i32, i32) {
    %c0_i32 = arith.constant 0 : i32
    %c0_i32_0 = arith.constant 0 : i32
    return %c0_i32, %arg1 : i32, i32
  }
  func.func @transform_4(%arg0: i32, %arg1: i32, %arg2: i32) -> (i32, i32) {
    %c0_i32 = arith.constant 0 : i32
    return %arg0, %arg1 : i32, i32
  }
}

module attributes {stable_mosaic.version = 11 : i64} {
  func.func @_conv_mm_res_kernel(%arg0: i32, %arg1: i32, %arg2: i32, %arg3: memref<1x8x512xbf16, #tpu.memory_space<vmem>>, %arg4: memref<1x512x256xbf16, #tpu.memory_space<vmem>>, %arg5: memref<1x256xf32, #tpu.memory_space<vmem>>, %arg6: memref<1x256xf32, #tpu.memory_space<vmem>>, %arg7: memref<8x256xbf16, #tpu.memory_space<vmem>>, %arg8: memref<8x256xbf16, #tpu.memory_space<vmem>>, %arg9: memref<8x256xf32, #tpu.memory_space<vmem>>) attributes {dimension_semantics = [#tpu.dimension_semantics<parallel>, #tpu.dimension_semantics<parallel>, #tpu.dimension_semantics<arbitrary>], iteration_bounds = array<i64: 1, 2, 9>, scalar_prefetch = 0 : i64, scratch_operands = 1 : i64, tpu.core_type = #tpu.core_type<tc>, window_params = [{transform_indices = @transform_0, window_bounds = array<i64: 1, 8, 512>}, {transform_indices = @transform_1, window_bounds = array<i64: 1, 512, 256>}, {transform_indices = @transform_2, window_bounds = array<i64: 1, 256>}, {transform_indices = @transform_3, window_bounds = array<i64: 1, 256>}, {transform_indices = @transform_4, window_bounds = array<i64: 8, 256>}, {transform_indices = @transform_5, window_bounds = array<i64: 8, 256>}]} {
    %c0_i32 = arith.constant 0 : i32
    %0 = arith.cmpi eq, %arg2, %c0_i32 : i32
    %1 = arith.extui %0 : i1 to i32
    %c0_i32_0 = arith.constant 0 : i32
    %2 = arith.cmpi ne, %1, %c0_i32_0 : i32
    scf.if %2 {
      %cst_11 = arith.constant 0.000000e+00 : f32
      %14 = vector.broadcast %cst_11 : f32 to vector<8x256xf32>
      %c0_12 = arith.constant 0 : index
      %c0_13 = arith.constant 0 : index
      %15 = vector.load %arg9[%c0_12, %c0_13] : memref<8x256xf32, #tpu.memory_space<vmem>>, vector<8x256xf32>
      tpu.vector_store %arg9[%c0_12, %c0_13], %14 {strides = array<i32>} : memref<8x256xf32, #tpu.memory_space<vmem>>, vector<8x256xf32>,
    } else {
    }
    %c0 = arith.constant 0 : index
    %c0_1 = arith.constant 0 : index
    %3 = vector.load %arg9[%c0, %c0_1] : memref<8x256xf32, #tpu.memory_space<vmem>>, vector<8x256xf32>
    %c0_2 = arith.constant 0 : index
    %c0_3 = arith.constant 0 : index
    %c0_4 = arith.constant 0 : index
    %4 = vector.load %arg3[%c0_2, %c0_3, %c0_4] : memref<1x8x512xbf16, #tpu.memory_space<vmem>>, vector<1x8x512xbf16>
    %5 = vector.shape_cast %4 : vector<1x8x512xbf16> to vector<8x512xbf16>
    %c0_5 = arith.constant 0 : index
    %c0_6 = arith.constant 0 : index
    %c0_7 = arith.constant 0 : index
    %6 = vector.load %arg4[%c0_5, %c0_6, %c0_7] : memref<1x512x256xbf16, #tpu.memory_space<vmem>>, vector<1x512x256xbf16>
    %7 = vector.shape_cast %6 : vector<1x512x256xbf16> to vector<512x256xbf16>
    %cst = arith.constant dense<0.000000e+00> : vector<8x256xf32>
    %8 = tpu.matmul %5, %7, %cst {dimension_numbers = #tpu.dot_dimension_numbers<[1], [0], [0], [1], [0, 0, 1, 1], [], []>} : vector<8x512xbf16>, vector<512x256xbf16>, vector<8x256xf32> -> vector<8x256xf32>
    %9 = arith.addf %3, %8 : vector<8x256xf32>
    %c0_8 = arith.constant 0 : index
    %c0_9 = arith.constant 0 : index
    %10 = vector.load %arg9[%c0_8, %c0_9] : memref<8x256xf32, #tpu.memory_space<vmem>>, vector<8x256xf32>
    tpu.vector_store %arg9[%c0_8, %c0_9], %9 {strides = array<i32>} : memref<8x256xf32, #tpu.memory_space<vmem>>, vector<8x256xf32>,
    %c8_i32 = arith.constant 8 : i32
    %11 = arith.cmpi eq, %arg2, %c8_i32 : i32
    %12 = arith.extui %11 : i1 to i32
    %c0_i32_10 = arith.constant 0 : i32
    %13 = arith.cmpi ne, %12, %c0_i32_10 : i32
    scf.if %13 {
      %c0_11 = arith.constant 0 : index
      %c0_12 = arith.constant 0 : index
      %14 = vector.load %arg9[%c0_11, %c0_12] : memref<8x256xf32, #tpu.memory_space<vmem>>, vector<8x256xf32>
      %c0_13 = arith.constant 0 : index
      %c0_14 = arith.constant 0 : index
      %15 = vector.load %arg5[%c0_13, %c0_14] : memref<1x256xf32, #tpu.memory_space<vmem>>, vector<1x256xf32>
      %16 = vector.broadcast %15 : vector<1x256xf32> to vector<8x256xf32>
      %17 = arith.mulf %14, %16 : vector<8x256xf32>
      %c0_15 = arith.constant 0 : index
      %c0_16 = arith.constant 0 : index
      %18 = vector.load %arg6[%c0_15, %c0_16] : memref<1x256xf32, #tpu.memory_space<vmem>>, vector<1x256xf32>
      %19 = vector.broadcast %18 : vector<1x256xf32> to vector<8x256xf32>
      %20 = arith.addf %17, %19 : vector<8x256xf32>
      %c0_17 = arith.constant 0 : index
      %c0_18 = arith.constant 0 : index
      %21 = vector.load %arg7[%c0_17, %c0_18] : memref<8x256xbf16, #tpu.memory_space<vmem>>, vector<8x256xbf16>
      %22 = arith.extf %21 : vector<8x256xbf16> to vector<8x256xf32>
      %23 = arith.addf %20, %22 : vector<8x256xf32>
      %cst_19 = arith.constant 0.000000e+00 : f32
      %24 = vector.broadcast %cst_19 : f32 to vector<8x256xf32>
      %25 = arith.maximumf %23, %24 : vector<8x256xf32>
      %26 = arith.truncf %25 : vector<8x256xf32> to vector<8x256xbf16>
      %c0_20 = arith.constant 0 : index
      %c0_21 = arith.constant 0 : index
      %27 = vector.load %arg8[%c0_20, %c0_21] : memref<8x256xbf16, #tpu.memory_space<vmem>>, vector<8x256xbf16>
      tpu.vector_store %arg8[%c0_20, %c0_21], %26 {strides = array<i32>} : memref<8x256xbf16, #tpu.memory_space<vmem>>, vector<8x256xbf16>,
    } else {
    }
    return
  }
  func.func @transform_0(%arg0: i32, %arg1: i32, %arg2: i32) -> (i32, i32, i32) {
    %c0_i32 = arith.constant 0 : i32
    %c0_i32_0 = arith.constant 0 : i32
    return %arg2, %arg0, %c0_i32 : i32, i32, i32
  }
  func.func @transform_1(%arg0: i32, %arg1: i32, %arg2: i32) -> (i32, i32, i32) {
    %c0_i32 = arith.constant 0 : i32
    %c0_i32_0 = arith.constant 0 : i32
    return %arg2, %c0_i32, %arg1 : i32, i32, i32
  }
  func.func @transform_2(%arg0: i32, %arg1: i32, %arg2: i32) -> (i32, i32) {
    %c0_i32 = arith.constant 0 : i32
    %c0_i32_0 = arith.constant 0 : i32
    return %c0_i32, %arg1 : i32, i32
  }
  func.func @transform_3(%arg0: i32, %arg1: i32, %arg2: i32) -> (i32, i32) {
    %c0_i32 = arith.constant 0 : i32
    %c0_i32_0 = arith.constant 0 : i32
    return %c0_i32, %arg1 : i32, i32
  }
  func.func @transform_4(%arg0: i32, %arg1: i32, %arg2: i32) -> (i32, i32) {
    %c0_i32 = arith.constant 0 : i32
    return %arg0, %arg1 : i32, i32
  }
  func.func @transform_5(%arg0: i32, %arg1: i32, %arg2: i32) -> (i32, i32) {
    %c0_i32 = arith.constant 0 : i32
    return %arg0, %arg1 : i32, i32
  }
}

module attributes {stable_mosaic.version = 11 : i64} {
  func.func @_conv_mm_kernel(%arg0: i32, %arg1: i32, %arg2: i32, %arg3: memref<1x8x512xbf16, #tpu.memory_space<vmem>>, %arg4: memref<1x512x256xbf16, #tpu.memory_space<vmem>>, %arg5: memref<1x256xf32, #tpu.memory_space<vmem>>, %arg6: memref<1x256xf32, #tpu.memory_space<vmem>>, %arg7: memref<8x256xbf16, #tpu.memory_space<vmem>>, %arg8: memref<8x256xf32, #tpu.memory_space<vmem>>) attributes {dimension_semantics = [#tpu.dimension_semantics<parallel>, #tpu.dimension_semantics<parallel>, #tpu.dimension_semantics<arbitrary>], iteration_bounds = array<i64: 1, 2, 9>, scalar_prefetch = 0 : i64, scratch_operands = 1 : i64, tpu.core_type = #tpu.core_type<tc>, window_params = [{transform_indices = @transform_0, window_bounds = array<i64: 1, 8, 512>}, {transform_indices = @transform_1, window_bounds = array<i64: 1, 512, 256>}, {transform_indices = @transform_2, window_bounds = array<i64: 1, 256>}, {transform_indices = @transform_3, window_bounds = array<i64: 1, 256>}, {transform_indices = @transform_4, window_bounds = array<i64: 8, 256>}]} {
    %c0_i32 = arith.constant 0 : i32
    %0 = arith.cmpi eq, %arg2, %c0_i32 : i32
    %1 = arith.extui %0 : i1 to i32
    %c0_i32_0 = arith.constant 0 : i32
    %2 = arith.cmpi ne, %1, %c0_i32_0 : i32
    scf.if %2 {
      %cst_11 = arith.constant 0.000000e+00 : f32
      %14 = vector.broadcast %cst_11 : f32 to vector<8x256xf32>
      %c0_12 = arith.constant 0 : index
      %c0_13 = arith.constant 0 : index
      %15 = vector.load %arg8[%c0_12, %c0_13] : memref<8x256xf32, #tpu.memory_space<vmem>>, vector<8x256xf32>
      tpu.vector_store %arg8[%c0_12, %c0_13], %14 {strides = array<i32>} : memref<8x256xf32, #tpu.memory_space<vmem>>, vector<8x256xf32>,
    } else {
    }
    %c0 = arith.constant 0 : index
    %c0_1 = arith.constant 0 : index
    %3 = vector.load %arg8[%c0, %c0_1] : memref<8x256xf32, #tpu.memory_space<vmem>>, vector<8x256xf32>
    %c0_2 = arith.constant 0 : index
    %c0_3 = arith.constant 0 : index
    %c0_4 = arith.constant 0 : index
    %4 = vector.load %arg3[%c0_2, %c0_3, %c0_4] : memref<1x8x512xbf16, #tpu.memory_space<vmem>>, vector<1x8x512xbf16>
    %5 = vector.shape_cast %4 : vector<1x8x512xbf16> to vector<8x512xbf16>
    %c0_5 = arith.constant 0 : index
    %c0_6 = arith.constant 0 : index
    %c0_7 = arith.constant 0 : index
    %6 = vector.load %arg4[%c0_5, %c0_6, %c0_7] : memref<1x512x256xbf16, #tpu.memory_space<vmem>>, vector<1x512x256xbf16>
    %7 = vector.shape_cast %6 : vector<1x512x256xbf16> to vector<512x256xbf16>
    %cst = arith.constant dense<0.000000e+00> : vector<8x256xf32>
    %8 = tpu.matmul %5, %7, %cst {dimension_numbers = #tpu.dot_dimension_numbers<[1], [0], [0], [1], [0, 0, 1, 1], [], []>} : vector<8x512xbf16>, vector<512x256xbf16>, vector<8x256xf32> -> vector<8x256xf32>
    %9 = arith.addf %3, %8 : vector<8x256xf32>
    %c0_8 = arith.constant 0 : index
    %c0_9 = arith.constant 0 : index
    %10 = vector.load %arg8[%c0_8, %c0_9] : memref<8x256xf32, #tpu.memory_space<vmem>>, vector<8x256xf32>
    tpu.vector_store %arg8[%c0_8, %c0_9], %9 {strides = array<i32>} : memref<8x256xf32, #tpu.memory_space<vmem>>, vector<8x256xf32>,
    %c8_i32 = arith.constant 8 : i32
    %11 = arith.cmpi eq, %arg2, %c8_i32 : i32
    %12 = arith.extui %11 : i1 to i32
    %c0_i32_10 = arith.constant 0 : i32
    %13 = arith.cmpi ne, %12, %c0_i32_10 : i32
    scf.if %13 {
      %c0_11 = arith.constant 0 : index
      %c0_12 = arith.constant 0 : index
      %14 = vector.load %arg8[%c0_11, %c0_12] : memref<8x256xf32, #tpu.memory_space<vmem>>, vector<8x256xf32>
      %c0_13 = arith.constant 0 : index
      %c0_14 = arith.constant 0 : index
      %15 = vector.load %arg5[%c0_13, %c0_14] : memref<1x256xf32, #tpu.memory_space<vmem>>, vector<1x256xf32>
      %16 = vector.broadcast %15 : vector<1x256xf32> to vector<8x256xf32>
      %17 = arith.mulf %14, %16 : vector<8x256xf32>
      %c0_15 = arith.constant 0 : index
      %c0_16 = arith.constant 0 : index
      %18 = vector.load %arg6[%c0_15, %c0_16] : memref<1x256xf32, #tpu.memory_space<vmem>>, vector<1x256xf32>
      %19 = vector.broadcast %18 : vector<1x256xf32> to vector<8x256xf32>
      %20 = arith.addf %17, %19 : vector<8x256xf32>
      %cst_17 = arith.constant 0.000000e+00 : f32
      %21 = vector.broadcast %cst_17 : f32 to vector<8x256xf32>
      %22 = arith.maximumf %20, %21 : vector<8x256xf32>
      %23 = arith.truncf %22 : vector<8x256xf32> to vector<8x256xbf16>
      %c0_18 = arith.constant 0 : index
      %c0_19 = arith.constant 0 : index
      %24 = vector.load %arg7[%c0_18, %c0_19] : memref<8x256xbf16, #tpu.memory_space<vmem>>, vector<8x256xbf16>
      tpu.vector_store %arg7[%c0_18, %c0_19], %23 {strides = array<i32>} : memref<8x256xbf16, #tpu.memory_space<vmem>>, vector<8x256xbf16>,
    } else {
    }
    return
  }
  func.func @transform_0(%arg0: i32, %arg1: i32, %arg2: i32) -> (i32, i32, i32) {
    %c0_i32 = arith.constant 0 : i32
    %c0_i32_0 = arith.constant 0 : i32
    return %arg2, %arg0, %c0_i32 : i32, i32, i32
  }
  func.func @transform_1(%arg0: i32, %arg1: i32, %arg2: i32) -> (i32, i32, i32) {
    %c0_i32 = arith.constant 0 : i32
    %c0_i32_0 = arith.constant 0 : i32
    return %arg2, %c0_i32, %arg1 : i32, i32, i32
  }
  func.func @transform_2(%arg0: i32, %arg1: i32, %arg2: i32) -> (i32, i32) {
    %c0_i32 = arith.constant 0 : i32
    %c0_i32_0 = arith.constant 0 : i32
    return %c0_i32, %arg1 : i32, i32
  }
  func.func @transform_3(%arg0: i32, %arg1: i32, %arg2: i32) -> (i32, i32) {
    %c0_i32 = arith.constant 0 : i32
    %c0_i32_0 = arith.constant 0 : i32
    return %c0_i32, %arg1 : i32, i32
  }
  func.func @transform_4(%arg0: i32, %arg1: i32, %arg2: i32) -> (i32, i32) {
    %c0_i32 = arith.constant 0 : i32
    return %arg0, %arg1 : i32, i32
  }
}

module attributes {stable_mosaic.version = 11 : i64} {
  func.func @_head_kernel(%arg0: i32, %arg1: memref<2x4x512xbf16, #tpu.memory_space<vmem>>, %arg2: memref<512x128xf32, #tpu.memory_space<vmem>>, %arg3: memref<1x128xf32, #tpu.memory_space<vmem>>, %arg4: memref<2x128xf32, #tpu.memory_space<vmem>>) attributes {dimension_semantics = [#tpu.dimension_semantics<arbitrary>], iteration_bounds = array<i64: 1>, scalar_prefetch = 0 : i64, scratch_operands = 0 : i64, tpu.core_type = #tpu.core_type<tc>, window_params = [{pipeline_mode = #tpu.pipeline_mode<synchronous>, transform_indices = @transform_0, window_bounds = array<i64: 2, 4, 512>}, {pipeline_mode = #tpu.pipeline_mode<synchronous>, transform_indices = @transform_1, window_bounds = array<i64: 512, 128>}, {pipeline_mode = #tpu.pipeline_mode<synchronous>, transform_indices = @transform_2, window_bounds = array<i64: 1, 128>}, {pipeline_mode = #tpu.pipeline_mode<synchronous>, transform_indices = @transform_3, window_bounds = array<i64: 2, 128>}]} {
    %c0 = arith.constant 0 : index
    %c0_0 = arith.constant 0 : index
    %c0_1 = arith.constant 0 : index
    %0 = vector.load %arg1[%c0, %c0_0, %c0_1] : memref<2x4x512xbf16, #tpu.memory_space<vmem>>, vector<2x4x512xbf16>
    %1 = arith.extf %0 : vector<2x4x512xbf16> to vector<2x4x512xf32>
    %cst = arith.constant dense<0.000000e+00> : vector<2x512xf32>
    %2 = vector.multi_reduction <add>, %1, %cst [1] : vector<2x4x512xf32> to vector<2x512xf32>
    %cst_2 = arith.constant 4.000000e+00 : f32
    %3 = vector.broadcast %cst_2 : f32 to vector<2x512xf32>
    %4 = arith.divf %2, %3 : vector<2x512xf32>
    %c0_3 = arith.constant 0 : index
    %c0_4 = arith.constant 0 : index
    %5 = vector.load %arg2[%c0_3, %c0_4] : memref<512x128xf32, #tpu.memory_space<vmem>>, vector<512x128xf32>
    %cst_5 = arith.constant dense<0.000000e+00> : vector<2x128xf32>
    %6 = tpu.matmul %4, %5, %cst_5 {dimension_numbers = #tpu.dot_dimension_numbers<[1], [0], [0], [1], [0, 0, 1, 1], [], []>} : vector<2x512xf32>, vector<512x128xf32>, vector<2x128xf32> -> vector<2x128xf32>
    %c0_6 = arith.constant 0 : index
    %c0_7 = arith.constant 0 : index
    %7 = vector.load %arg3[%c0_6, %c0_7] : memref<1x128xf32, #tpu.memory_space<vmem>>, vector<1x128xf32>
    %8 = vector.broadcast %7 : vector<1x128xf32> to vector<2x128xf32>
    %9 = arith.addf %6, %8 : vector<2x128xf32>
    %c0_8 = arith.constant 0 : index
    %c0_9 = arith.constant 0 : index
    %10 = vector.load %arg4[%c0_8, %c0_9] : memref<2x128xf32, #tpu.memory_space<vmem>>, vector<2x128xf32>
    tpu.vector_store %arg4[%c0_8, %c0_9], %9 {strides = array<i32>} : memref<2x128xf32, #tpu.memory_space<vmem>>, vector<2x128xf32>,
    return
  }
  func.func @transform_0(%arg0: i32) -> (i32, i32, i32) {
    %c0_i32 = arith.constant 0 : i32
    %c0_i32_0 = arith.constant 0 : i32
    %c0_i32_1 = arith.constant 0 : i32
    %c0_i32_2 = arith.constant 0 : i32
    return %c0_i32, %c0_i32_0, %c0_i32_1 : i32, i32, i32
  }
  func.func @transform_1(%arg0: i32) -> (i32, i32) {
    %c0_i32 = arith.constant 0 : i32
    %c0_i32_0 = arith.constant 0 : i32
    %c0_i32_1 = arith.constant 0 : i32
    return %c0_i32, %c0_i32_0 : i32, i32
  }
  func.func @transform_2(%arg0: i32) -> (i32, i32) {
    %c0_i32 = arith.constant 0 : i32
    %c0_i32_0 = arith.constant 0 : i32
    %c0_i32_1 = arith.constant 0 : i32
    return %c0_i32, %c0_i32_0 : i32, i32
  }
  func.func @transform_3(%arg0: i32) -> (i32, i32) {
    %c0_i32 = arith.constant 0 : i32
    %c0_i32_0 = arith.constant 0 : i32
    %c0_i32_1 = arith.constant 0 : i32
    return %c0_i32, %c0_i32_0 : i32, i32
  }
}

</mosaic_0001>

<bundles_post_ra>
// kernel: forward.38
= control target key start
LH: loop header
LB: loop body
LE: loop exit
PB: predicated region body
PF: predicated region fallthrough
CT: control target
= control target key end

     0   :  { %s1174_s15 = smov 0   ;;  %s1176_s16 = smov 0   ;;  %s1395_s0 = inlined_call_operand.vmem [shape: bf16[1,2048,160], index: 0, kind: input, shape index: {}]   ;;  %s1396_s1 = inlined_call_operand.vmem [shape: bf16[1,160,64], index: 1, kind: input, shape index: {}]   ;;  %s1397_s2 = inlined_call_operand.vmem [shape: f32[1,64], index: 2, kind: input, shape index: {}]   ;;  %s1398_s3 = inlined_call_operand.vmem [shape: f32[1,64], index: 3, kind: input, shape index: {}]   ;;  %s1399_s4 = inlined_call_operand.vmem [shape: bf16[2048,64], index: 4, kind: output, shape index: {}]  }
   0x1   :  { %s1178_s17 = smov 0  }
   0x2 LB: > { %s33_s18 = sadd.s32 1, %s1141_s16  ;;  %p966_p0 = scmp.ge.s32.totalorder %s1145_s17, 1  ;;  %s1145_s17 = sphi %s1178_s17, %s14_s17   ;;  %s1141_s16 = sphi %s1176_s16, %s1401_s16   ;;  %s1137_s15 = sphi %s1174_s15, %s1400_s15  }
   0x3   : > { %p35_p1 = scmp.ge.s32.totalorder %s33_s18, 16  ;;  %p222_p2 = scmp.lt.s32.totalorder %s1145_s17, 17 }
   0x5   : > { %s1403_s18 = smov (%p35_p1, %s33_s18), 0  ;;  %p223_p3 = pnand %p966_p0, %p222_p2 }
   0x6   : > { %v1089_v0 = vld [vmem:[%s1396_s1] sm:$0xff] (!%p223_p3)   ;;  %v1147_v1 = vmov (!%p223_p3), 0   ;;  %s967_s21 = sshll.u32 (!%p223_p3), %s1137_s15, 4  ;;  %v1090_v2 = vld [vmem:[%s1396_s1 + $0x8] sm:$0xff] (!%p223_p3)   ;;  %v1091_v3 = vld [vmem:[%s1396_s1 + $0x10] sm:$0xff] (!%p223_p3)   ;;  %vm309_vm0 = vcmask (!%p223_p3), 523264  }
   0x7   : > { %226 = sbr.rel (%p223_p3) target bundleno = 307 (0x133), region = 36  ;;  %535 = vmatprep.subr.bf16.mxu0 (!%p223_p3), %v1147_v1  ;;  %1043 = vmatprep.subr.bf16.mxu1 (!%p223_p3), %v1147_v1  ;;  %p273_p4 = scmp.lt.s32.totalorder (!%p223_p3), %s967_s21, 255  ;;  %v1148_v4 = vmov (!%p223_p3), 0.0   ;;  %v1092_v5 = vld [vmem:[%s1396_s1 + $0x18] sm:$0xff] (!%p223_p3)   ;;  %vm510_vm1 = vcmask (!%p223_p3), 261120   ;;  %v1093_v8 = vld [vmem:[%s1396_s1 + $0x20] sm:$0xff] (!%p223_p3)  }
   0x8   : > { %536 = vmatpush1.bf16.msra.mxu0 (!%p223_p3), %v1089_v0  ;;  %1053 = vmatpush1.bf16.msra.mxu1 (!%p223_p3), %v1089_v0  ;;  %310 = vst.msk [vmem:[#allocation2] sm:$0xff] (!%p223_p3), %vm309_vm0, %v1148_v4  ;;  %311 = vst.msk [vmem:[#allocation2 + $0x8] sm:$0xff] (!%p223_p3), %vm309_vm0, %v1148_v4  ;;  %v1094_v9 = vld [vmem:[%s1396_s1 + $0x28] sm:$0xff] (!%p223_p3)   ;;  %v1095_v10 = vld [vmem:[%s1396_s1 + $0x30] sm:$0xff] (!%p223_p3)   ;;  %vm810_vm2 = vcmask (!%p223_p3), 519168  }
   0x9   : > { %537 = vmatprep.subr.bf16.mxu0 (!%p223_p3), %v1147_v1  ;;  %1044 = vmatprep.subr.bf16.mxu1 (!%p223_p3), %v1147_v1  ;;  %312 = vst.msk [vmem:[#allocation2 + $0x10] sm:$0xff] (!%p223_p3), %vm309_vm0, %v1148_v4  ;;  %313 = vst.msk [vmem:[#allocation2 + $0x18] sm:$0xff] (!%p223_p3), %vm309_vm0, %v1148_v4  ;;  %v1096_v11 = vld [vmem:[%s1396_s1 + $0x38] sm:$0xff] (!%p223_p3)   ;;  %v1097_v12 = vld [vmem:[%s1396_s1 + $0x40] sm:$0xff] (!%p223_p3)  }
   0xa   : > { %314 = vst.msk [vmem:[#allocation2 + $0x20] sm:$0xff] (!%p223_p3), %vm309_vm0, %v1148_v4  ;;  %315 = vst.msk [vmem:[#allocation2 + $0x28] sm:$0xff] (!%p223_p3), %vm309_vm0, %v1148_v4  ;;  %v1098_v13 = vld [vmem:[%s1396_s1 + $0x48] sm:$0xff] (!%p223_p3)   ;;  %v1297_v46 = vld [vmem:[%s1397_s2] ss:$0 sm:$0xff] (!%p223_p3) }
   0xb   : > { %316 = vst.msk [vmem:[#allocation2 + $0x30] sm:$0xff] (!%p223_p3), %vm309_vm0, %v1148_v4  ;;  %317 = vst.msk [vmem:[#allocation2 + $0x38] sm:$0xff] (!%p223_p3), %vm309_vm0, %v1148_v4  ;;  %v1302_v56 = vld [vmem:[%s1398_s3] ss:$0 sm:$0xff] (!%p223_p3) }
   0xc   : > { %538 = vmatpush1.bf16.msra.mxu0 (!%p223_p3), %v1090_v2  ;;  %1054 = vmatpush1.bf16.msra.mxu1 (!%p223_p3), %v1090_v2  ;;  %318 = vst.msk [vmem:[#allocation2 + $0x40] sm:$0xff] (!%p223_p3), %vm309_vm0, %v1148_v4  ;;  %319 = vst.msk [vmem:[#allocation2 + $0x48] sm:$0xff] (!%p223_p3), %vm309_vm0, %v1148_v4 }
   0xd   : > { %539 = vmatprep.subr.bf16.mxu0 (!%p223_p3), %v1147_v1  ;;  %1045 = vmatprep.subr.bf16.mxu1 (!%p223_p3), %v1147_v1  ;;  %320 = vst.msk [vmem:[#allocation2 + $0x50] sm:$0xff] (!%p223_p3), %vm309_vm0, %v1148_v4  ;;  %321 = vst.msk [vmem:[#allocation2 + $0x58] sm:$0xff] (!%p223_p3), %vm309_vm0, %v1148_v4 }
   0xe   : > { %s1405_s21 = smov (!%p273_p4, %s967_s21), 255  ;;  %322 = vst.msk [vmem:[#allocation2 + $0x60] sm:$0xff] %vm309_vm0, %v1148_v4  ;;  %323 = vst.msk [vmem:[#allocation2 + $0x68] sm:$0xff] %vm309_vm0, %v1148_v4 }
   0xf   : > { %s1026_s26 = sshll.u32 %s1405_s21, 3  ;;  %324 = vst.msk [vmem:[#allocation2 + $0x70] sm:$0xff] %vm309_vm0, %v1148_v4  ;;  %325 = vst.msk [vmem:[#allocation2 + $0x78] sm:$0xff] %vm309_vm0, %v1148_v4  ;;  %v326_v28 = vld [vmem:[#allocation2] sm:$0xff]  ;;  %v327_v32 = vld [vmem:[#allocation2 + $0x8] sm:$0xff] }
  0x10   : > { %s1213_s29 = scalar_lea.vmem %s1395_s0, %s1026_s26  ;;  %540 = vmatpush1.bf16.msra.mxu0 %v1091_v3  ;;  %1055 = vmatpush1.bf16.msra.mxu1 %v1091_v3  ;;  %v328_v44 = vld [vmem:[#allocation2 + $0x10] sm:$0xff]  ;;  %v329_v49 = vld [vmem:[#allocation2 + $0x18] sm:$0xff]  ;;  %s971_s26 = sshll.u32 %s1405_s21, 2 }
  0x11   : > { %541 = vmatprep.subr.bf16.mxu0 %v1147_v1  ;;  %1046 = vmatprep.subr.bf16.mxu1 %v1147_v1  ;;  %v1101_v6 = vld [vmem:[%s1213_s29 + $0x4] ss:$8 sps:$4 sm:$0xff]   ;;  %v1099_v14 = vld [vmem:[%s1213_s29] ss:$8 sps:$4 sm:$0xff]   ;;  %v1105_v16 = vld [vmem:[%s1213_s29 + $0x14] ss:$8 sps:$4 sm:$0xff]   ;;  %s1320_s28 = scalar_lea.vmem %s1399_s4, %s971_s26 }
  0x12   : > { %v1104_v7 = vld [vmem:[%s1213_s29 + $0x44] ss:$8 sps:$4 sm:$0xff]   ;;  %998 = vmatprep.mubr.msk.bf16.mxu0 %vm510_vm1, %v1101_v6  ;;  %v1102_v15 = vld [vmem:[%s1213_s29 + $0x40] ss:$8 sps:$4 sm:$0xff]   ;;  %v1107_v17 = vld [vmem:[%s1213_s29 + $0x54] ss:$8 sps:$4 sm:$0xff]  }
  0x13   : > { %1002 = vmatprep.mubr.msk.bf16.mxu1 %vm510_vm1, %v1104_v7  ;;  %v1109_v18 = vld [vmem:[%s1213_s29 + $0x10] ss:$8 sps:$4 sm:$0xff]   ;;  %v1111_v20 = vld [vmem:[%s1213_s29 + $0x24] ss:$8 sps:$4 sm:$0xff]   ;;  %v1115_v22 = vld [vmem:[%s1213_s29 + $0x20] ss:$8 sps:$4 sm:$0xff]  }
  0x14   : > { %542 = vmatpush1.bf16.msra.mxu0 %v1092_v5  ;;  %1056 = vmatpush1.bf16.msra.mxu1 %v1092_v5  ;;  %v1110_v19 = vld [vmem:[%s1213_s29 + $0x50] ss:$8 sps:$4 sm:$0xff]   ;;  %v1113_v21 = vld [vmem:[%s1213_s29 + $0x64] ss:$8 sps:$4 sm:$0xff]   ;;  %v1116_v23 = vld [vmem:[%s1213_s29 + $0x60] ss:$8 sps:$4 sm:$0xff]  }
  0x15   : > { %543 = vmatprep.subr.bf16.mxu0 %v1147_v1  ;;  %1047 = vmatprep.subr.bf16.mxu1 %v1147_v1  ;;  %v1117_v24 = vld [vmem:[%s1213_s29 + $0x34] ss:$8 sps:$4 sm:$0xff]   ;;  %v1121_v26 = vld [vmem:[%s1213_s29 + $0x30] ss:$8 sps:$4 sm:$0xff]   ;;  %v334_v29 = vld [vmem:[#allocation2 + $0x40] sm:$0xff] }
  0x16   : > { %v1119_v25 = vld [vmem:[%s1213_s29 + $0x74] ss:$8 sps:$4 sm:$0xff]   ;;  %v1122_v27 = vld [vmem:[%s1213_s29 + $0x70] ss:$8 sps:$4 sm:$0xff]   ;;  %v335_v33 = vld [vmem:[#allocation2 + $0x48] sm:$0xff] }
  0x17   : > { %v336_v45 = vld [vmem:[#allocation2 + $0x50] sm:$0xff]  ;;  %v337_v50 = vld [vmem:[#allocation2 + $0x58] sm:$0xff] }
  0x18   : > { %544 = vmatpush1.bf16.msra.mxu0 %v1093_v8  ;;  %1057 = vmatpush1.bf16.msra.mxu1 %v1093_v8 }
  0x19   : > { %545 = vmatprep.subr.bf16.mxu0 %v1147_v1  ;;  %1048 = vmatprep.subr.bf16.mxu1 %v1147_v1 }
  0x1c   : > { %546 = vmatpush1.bf16.msra.mxu0 %v1094_v9  ;;  %1058 = vmatpush1.bf16.msra.mxu1 %v1094_v9 }
  0x1d   : > { %547 = vmatprep.subr.bf16.mxu0 %v1147_v1  ;;  %1049 = vmatprep.subr.bf16.mxu1 %v1147_v1 }
  0x20   : > { %548 = vmatpush1.bf16.msra.mxu0 %v1095_v10  ;;  %1059 = vmatpush1.bf16.msra.mxu1 %v1095_v10 }
  0x21   : > { %549 = vmatprep.subr.bf16.mxu0 %v1147_v1  ;;  %1050 = vmatprep.subr.bf16.mxu1 %v1147_v1 }
  0x24   : > { %550 = vmatpush1.bf16.msra.mxu0 %v1096_v11  ;;  %1060 = vmatpush1.bf16.msra.mxu1 %v1096_v11 }
  0x25   : > { %551 = vmatprep.subr.bf16.mxu0 %v1147_v1  ;;  %1051 = vmatprep.subr.bf16.mxu1 %v1147_v1 }
  0x28   : > { %552 = vmatpush1.bf16.msra.mxu0 %v1097_v12  ;;  %1061 = vmatpush1.bf16.msra.mxu1 %v1097_v12  ;;  %v330_v12 = vld [vmem:[#allocation2 + $0x20] sm:$0xff] }
  0x29   : > { %553 = vmatprep.subr.bf16.mxu0 %v1147_v1  ;;  %1052 = vmatprep.subr.bf16.mxu1 %v1147_v1 }
  0x2c   : > { %554 = vmatpush1.bf16.msra.mxu0 %v1098_v13  ;;  %1062 = vmatpush1.bf16.msra.mxu1 %v1098_v13  ;;  %v338_v13 = vld [vmem:[#allocation2 + $0x60] sm:$0xff] }
  0x2f   : > { %568 = vmatmul.mubr.bf16.vlgmr.msra.gmra.mrb[0].mxu0 %v1099_v14  ;;  %600 = vmatmul.mubr.bf16.vlgmr.msra.gmra.mrb[0].mxu1 %v1102_v15 }
  0x30   : > { %999 = vmatprep.mubr.msk.bf16.mxu0 %vm510_vm1, %v1105_v16  ;;  %1003 = vmatprep.mubr.msk.bf16.mxu1 %vm510_vm1, %v1107_v17 }
  0x37   : > { %576 = vmatmul.mubr.bf16.gmra.mrb[4].mxu0 %v1109_v18  ;;  %608 = vmatmul.mubr.bf16.gmra.mrb[4].mxu1 %v1110_v19 }
  0x38   : > { %1000 = vmatprep.mubr.msk.bf16.mxu0 %vm510_vm1, %v1111_v20  ;;  %1004 = vmatprep.mubr.msk.bf16.mxu1 %vm510_vm1, %v1113_v21 }
  0x3f   : > { %584 = vmatmul.mubr.bf16.gmra.mrb[8].mxu0 %v1115_v22  ;;  %616 = vmatmul.mubr.bf16.gmra.mrb[8].mxu1 %v1116_v23  ;;  %v331_v22 = vld [vmem:[#allocation2 + $0x28] sm:$0xff] }
  0x40   : > { %1001 = vmatprep.mubr.msk.bf16.mxu0 %vm510_vm1, %v1117_v24  ;;  %1005 = vmatprep.mubr.msk.bf16.mxu1 %vm510_vm1, %v1119_v25  ;;  %v339_v23 = vld [vmem:[#allocation2 + $0x68] sm:$0xff] }
  0x47   : > { %592 = vmatmul.mubr.bf16.gmra.mrb[12].mxu0 %v1121_v26  ;;  %624 = vmatmul.mubr.bf16.gmra.mrb[12].mxu1 %v1122_v27 }
 0x102   : > { %v569_v30 = vpop.f32.mrb[0].mxu0  ;;  %v601_v31 = vpop.f32.mrb[0].mxu1 }
 0x103   : > { %v632_v34 = vadd.f32 %v569_v30, %v326_v28  ;;  %v640_v35 = vadd.f32 %v601_v31, %v334_v29  ;;  %v571_v36 = vpop.f32.mrb[1].mxu0  ;;  %v603_v37 = vpop.f32.mrb[1].mxu1 }
 0x104   : > { %v572_v38 = vpop.f32.mrb[2].mxu0  ;;  %v604_v39 = vpop.f32.mrb[2].mxu1 }
 0x105   : > { %649 = vst.msk [vmem:[#allocation2] sm:$0xff] %vm309_vm0, %v632_v34  ;;  %657 = vst.msk [vmem:[#allocation2 + $0x40] sm:$0xff] %vm309_vm0, %v640_v35  ;;  %v633_v40 = vadd.f32 %v572_v38, %v327_v32  ;;  %v641_v41 = vadd.f32 %v604_v39, %v335_v33  ;;  %v574_v42 = vpop.f32.mrb[3].mxu0  ;;  %v606_v43 = vpop.f32.mrb[3].mxu1 }
 0x107   : > { %650 = vst.msk [vmem:[#allocation2 + $0x8] sm:$0xff] %vm309_vm0, %v633_v40  ;;  %658 = vst.msk [vmem:[#allocation2 + $0x48] sm:$0xff] %vm309_vm0, %v641_v41 }
 0x10a   : > { %v577_v47 = vpop.f32.mrb[4].mxu0  ;;  %v609_v48 = vpop.f32.mrb[4].mxu1 }
 0x10b   : > { %v634_v51 = vadd.f32 %v577_v47, %v328_v44  ;;  %v642_v52 = vadd.f32 %v609_v48, %v336_v45  ;;  %v579_v53 = vpop.f32.mrb[5].mxu0  ;;  %v611_v54 = vpop.f32.mrb[5].mxu1 }
 0x10c   : > { %v668_v55 = vld [vmem:[#allocation2] sm:$0xff]  ;;  %v580_v58 = vpop.f32.mrb[6].mxu0  ;;  %v612_v59 = vpop.f32.mrb[6].mxu1  ;;  %v333_v53 = vld [vmem:[#allocation2 + $0x38] sm:$0xff] }
 0x10d   : > { %v676_v57 = vld [vmem:[#allocation2 + $0x40] sm:$0xff]  ;;  %v691_v60 = vmul.f32 %v1297_v46, %v668_v55  ;;  %651 = vst.msk [vmem:[#allocation2 + $0x10] sm:$0xff] %vm309_vm0, %v634_v51  ;;  %659 = vst.msk [vmem:[#allocation2 + $0x50] sm:$0xff] %vm309_vm0, %v642_v52  ;;  %v635_v62 = vadd.f32 %v580_v58, %v329_v49  ;;  %v643_v63 = vadd.f32 %v612_v59, %v337_v50  ;;  %v582_v0 = vpop.f32.mrb[7].mxu0  ;;  %v614_v1 = vpop.f32.mrb[7].mxu1  ;;  %v332_v49 = vld [vmem:[#allocation2 + $0x30] sm:$0xff] }
 0x10e   : > { %v699_v61 = vmul.f32 %v1297_v46, %v676_v57  ;;  %v669_v2 = vld [vmem:[#allocation2 + $0x8] sm:$0xff]  ;;  %v340_v50 = vld [vmem:[#allocation2 + $0x70] sm:$0xff]  ;;  %v341_v54 = vld [vmem:[#allocation2 + $0x78] sm:$0xff] }
 0x10f   : > { %v677_v3 = vld [vmem:[#allocation2 + $0x48] sm:$0xff]  ;;  %v714_v4 = vadd.f32 %v1302_v56, %v691_v60  ;;  %v692_v6 = vmul.f32 %v1297_v46, %v669_v2  ;;  %652 = vst.msk [vmem:[#allocation2 + $0x18] sm:$0xff] %vm309_vm0, %v635_v62  ;;  %660 = vst.msk [vmem:[#allocation2 + $0x58] sm:$0xff] %vm309_vm0, %v643_v63 }
 0x110   : > { %v722_v5 = vadd.f32 %v1302_v56, %v699_v61  ;;  %v700_v7 = vmul.f32 %v1297_v46, %v677_v3 }
 0x111   : > { %v730_v8 = vmax.f32 %v714_v4, 0.0  ;;  %v715_v10 = vadd.f32 %v1302_v56, %v692_v6 }
 0x112   : > { %v738_v9 = vmax.f32 %v722_v5, 0.0  ;;  %v723_v11 = vadd.f32 %v1302_v56, %v700_v7  ;;  %v585_v14 = vpop.f32.mrb[8].mxu0  ;;  %v617_v15 = vpop.f32.mrb[8].mxu1 }
 0x113   : > { %v1027_v16 = vpack.c.bf16 %v730_v8, %v730_v8  ;;  %v731_v18 = vmax.f32 %v715_v10, 0.0  ;;  %v587_v20 = vpop.f32.mrb[9].mxu0  ;;  %v619_v21 = vpop.f32.mrb[9].mxu1  ;;  %v636_v26 = vadd.f32 %v585_v14, %v330_v12  ;;  %v644_v27 = vadd.f32 %v617_v15, %v338_v13 }
 0x114   : > { %v1035_v17 = vpack.c.bf16 %v738_v9, %v738_v9  ;;  %v739_v19 = vmax.f32 %v723_v11, 0.0  ;;  %v670_v24 = vld [vmem:[#allocation2 + $0x10] sm:$0xff]  ;;  %v588_v28 = vpop.f32.mrb[10].mxu0  ;;  %v620_v29 = vpop.f32.mrb[10].mxu1 }
 0x115   : > { %v678_v25 = vld [vmem:[#allocation2 + $0x50] sm:$0xff]  ;;  %811 = vst.msk [vmem:[%s1320_s28] sm:$0xf] %vm810_vm2, %v1027_v16  ;;  %v1028_v30 = vpack.c.bf16 %v731_v18, %v731_v18  ;;  %v693_v32 = vmul.f32 %v1297_v46, %v670_v24  ;;  %v590_v34 = vpop.f32.mrb[11].mxu0  ;;  %v622_v35 = vpop.f32.mrb[11].mxu1  ;;  %v637_v38 = vadd.f32 %v588_v28, %v331_v22  ;;  %v645_v39 = vadd.f32 %v620_v29, %v339_v23 }
 0x116   : > { %819 = vst.msk [vmem:[%s1320_s28 + $0x20] sm:$0xf] %vm810_vm2, %v1035_v17  ;;  %v1036_v31 = vpack.c.bf16 %v739_v19, %v739_v19  ;;  %v701_v33 = vmul.f32 %v1297_v46, %v678_v25  ;;  %v671_v36 = vld [vmem:[#allocation2 + $0x18] sm:$0xff] }
 0x117   : > { %v679_v37 = vld [vmem:[#allocation2 + $0x58] sm:$0xff]  ;;  %653 = vst.msk [vmem:[#allocation2 + $0x20] sm:$0xff] %vm309_vm0, %v636_v26  ;;  %661 = vst.msk [vmem:[#allocation2 + $0x60] sm:$0xff] %vm309_vm0, %v644_v27  ;;  %v716_v40 = vadd.f32 %v1302_v56, %v693_v32  ;;  %v694_v42 = vmul.f32 %v1297_v46, %v671_v36 }
 0x118   : > { %812 = vst.msk [vmem:[%s1320_s28 + $0x4] sm:$0xf] %vm810_vm2, %v1028_v30  ;;  %820 = vst.msk [vmem:[%s1320_s28 + $0x24] sm:$0xf] %vm810_vm2, %v1036_v31  ;;  %v724_v41 = vadd.f32 %v1302_v56, %v701_v33  ;;  %v702_v43 = vmul.f32 %v1297_v46, %v679_v37 }
 0x119   : > { %654 = vst.msk [vmem:[#allocation2 + $0x28] sm:$0xff] %vm309_vm0, %v637_v38  ;;  %662 = vst.msk [vmem:[#allocation2 + $0x68] sm:$0xff] %vm309_vm0, %v645_v39  ;;  %v732_v44 = vmax.f32 %v716_v40, 0.0  ;;  %v717_v47 = vadd.f32 %v1302_v56, %v694_v42 }
 0x11a   : > { %v740_v45 = vmax.f32 %v724_v41, 0.0  ;;  %v725_v48 = vadd.f32 %v1302_v56, %v702_v43  ;;  %v593_v51 = vpop.f32.mrb[12].mxu0  ;;  %v625_v52 = vpop.f32.mrb[12].mxu1 }
 0x11b   : > { %v1029_v55 = vpack.c.bf16 %v732_v44, %v732_v44  ;;  %v733_v58 = vmax.f32 %v717_v47, 0.0  ;;  %v595_v60 = vpop.f32.mrb[13].mxu0  ;;  %v627_v61 = vpop.f32.mrb[13].mxu1  ;;  %v638_v62 = vadd.f32 %v593_v51, %v332_v49  ;;  %v646_v63 = vadd.f32 %v625_v52, %v340_v50 }
 0x11c   : > { %v1037_v57 = vpack.c.bf16 %v740_v45, %v740_v45  ;;  %v741_v59 = vmax.f32 %v725_v48, 0.0  ;;  %v596_v0 = vpop.f32.mrb[14].mxu0  ;;  %v628_v1 = vpop.f32.mrb[14].mxu1 }
 0x11d   : > { %813 = vst.msk [vmem:[%s1320_s28 + $0x8] sm:$0xf] %vm810_vm2, %v1029_v55  ;;  %v1030_v2 = vpack.c.bf16 %v733_v58, %v733_v58  ;;  %v639_v6 = vadd.f32 %v596_v0, %v333_v53  ;;  %v647_v7 = vadd.f32 %v628_v1, %v341_v54  ;;  %v598_v8 = vpop.f32.mrb[15].mxu0  ;;  %v630_v9 = vpop.f32.mrb[15].mxu1 }
 0x11e   : > { %821 = vst.msk [vmem:[%s1320_s28 + $0x28] sm:$0xf] %vm810_vm2, %v1037_v57  ;;  %v1038_v3 = vpack.c.bf16 %v741_v59, %v741_v59  ;;  %v672_v4 = vld [vmem:[#allocation2 + $0x20] sm:$0xff] }
 0x11f   : > { %v680_v5 = vld [vmem:[#allocation2 + $0x60] sm:$0xff]  ;;  %v695_v10 = vmul.f32 %v1297_v46, %v672_v4  ;;  %655 = vst.msk [vmem:[#allocation2 + $0x30] sm:$0xff] %vm309_vm0, %v638_v62  ;;  %663 = vst.msk [vmem:[#allocation2 + $0x70] sm:$0xff] %vm309_vm0, %v646_v63 }
 0x120   : > { %v703_v11 = vmul.f32 %v1297_v46, %v680_v5  ;;  %814 = vst.msk [vmem:[%s1320_s28 + $0xc] sm:$0xf] %vm810_vm2, %v1030_v2  ;;  %822 = vst.msk [vmem:[%s1320_s28 + $0x2c] sm:$0xf] %vm810_vm2, %v1038_v3  ;;  %v673_v12 = vld [vmem:[#allocation2 + $0x28] sm:$0xff] }
 0x121   : > { %v681_v13 = vld [vmem:[#allocation2 + $0x68] sm:$0xff]  ;;  %656 = vst.msk [vmem:[#allocation2 + $0x38] sm:$0xff] %vm309_vm0, %v639_v6  ;;  %664 = vst.msk [vmem:[#allocation2 + $0x78] sm:$0xff] %vm309_vm0, %v647_v7  ;;  %v718_v14 = vadd.f32 %v1302_v56, %v695_v10  ;;  %v696_v16 = vmul.f32 %v1297_v46, %v673_v12 }
 0x122   : > { %v726_v15 = vadd.f32 %v1302_v56, %v703_v11  ;;  %v704_v17 = vmul.f32 %v1297_v46, %v681_v13 }
 0x123   : > { %v734_v18 = vmax.f32 %v718_v14, 0.0  ;;  %v719_v20 = vadd.f32 %v1302_v56, %v696_v16 }
 0x124   : > { %v742_v19 = vmax.f32 %v726_v15, 0.0  ;;  %v727_v21 = vadd.f32 %v1302_v56, %v704_v17 }
 0x125   : > { %v1031_v22 = vpack.c.bf16 %v734_v18, %v734_v18  ;;  %v735_v24 = vmax.f32 %v719_v20, 0.0 }
 0x126   : > { %v1039_v23 = vpack.c.bf16 %v742_v19, %v742_v19  ;;  %v743_v25 = vmax.f32 %v727_v21, 0.0  ;;  %v674_v26 = vld [vmem:[#allocation2 + $0x30] sm:$0xff] }
 0x127   : > { %v682_v27 = vld [vmem:[#allocation2 + $0x70] sm:$0xff]  ;;  %815 = vst.msk [vmem:[%s1320_s28 + $0x10] sm:$0xf] %vm810_vm2, %v1031_v22  ;;  %v1032_v28 = vpack.c.bf16 %v735_v24, %v735_v24  ;;  %v697_v30 = vmul.f32 %v1297_v46, %v674_v26 }
 0x128   : > { %823 = vst.msk [vmem:[%s1320_s28 + $0x30] sm:$0xf] %vm810_vm2, %v1039_v23  ;;  %v1040_v29 = vpack.c.bf16 %v743_v25, %v743_v25  ;;  %v705_v31 = vmul.f32 %v1297_v46, %v682_v27  ;;  %v675_v32 = vld [vmem:[#allocation2 + $0x38] sm:$0xff] }
 0x129   : > { %v683_v33 = vld [vmem:[#allocation2 + $0x78] sm:$0xff]  ;;  %v698_v34 = vmul.f32 %v1297_v46, %v675_v32  ;;  %816 = vst.msk [vmem:[%s1320_s28 + $0x14] sm:$0xf] %vm810_vm2, %v1032_v28  ;;  %v720_v36 = vadd.f32 %v1302_v56, %v697_v30 }
 0x12a   : > { %v706_v35 = vmul.f32 %v1297_v46, %v683_v33  ;;  %824 = vst.msk [vmem:[%s1320_s28 + $0x34] sm:$0xf] %vm810_vm2, %v1040_v29  ;;  %v728_v37 = vadd.f32 %v1302_v56, %v705_v31 }
 0x12b   : > { %v721_v38 = vadd.f32 %v1302_v56, %v698_v34  ;;  %v736_v40 = vmax.f32 %v720_v36, 0.0 }
 0x12c   : > { %v729_v39 = vadd.f32 %v1302_v56, %v706_v35  ;;  %v744_v41 = vmax.f32 %v728_v37, 0.0 }
 0x12d   : > { %v737_v42 = vmax.f32 %v721_v38, 0.0  ;;  %v1033_v46 = vpack.c.bf16 %v736_v40, %v736_v40 }
 0x12e   : > { %v745_v43 = vmax.f32 %v729_v39, 0.0  ;;  %v1041_v44 = vpack.c.bf16 %v744_v41, %v744_v41 }
 0x12f   : > { %v1034_v45 = vpack.c.bf16 %v737_v42, %v737_v42  ;;  %817 = vst.msk [vmem:[%s1320_s28 + $0x18] sm:$0xf] %vm810_vm2, %v1033_v46 }
 0x130   : > { %v1042_v47 = vpack.c.bf16 %v745_v43, %v745_v43  ;;  %825 = vst.msk [vmem:[%s1320_s28 + $0x38] sm:$0xf] %vm810_vm2, %v1041_v44 }
 0x131   : > { %818 = vst.msk [vmem:[%s1320_s28 + $0x1c] sm:$0xf] %vm810_vm2, %v1034_v45 }
 0x132   : > { %826 = vst.msk [vmem:[%s1320_s28 + $0x3c] sm:$0xf] %vm810_vm2, %v1042_v47 }
 0x133 PF: > { %s14_s17 = sadd.s32 1, %s1145_s17   ;;  %s1400_s15 = smov %s1141_s16 }
 0x134   : > { %p11_p5 = scmp.ge.s32.totalorder %s14_s17, 18   ;;  %s1401_s16 = smov %s1403_s18 }
 0x136   :  { %13 = sbr.rel (!%p11_p5) target bundleno = 2 (0x2), region = 83 }

// kernel: forward.39
= control target key start
LH: loop header
LB: loop body
LE: loop exit
PB: predicated region body
PF: predicated region fallthrough
CT: control target
= control target key end

     0   :  { %s430_s6 = smov 0   ;;  %s432_s7 = smov 0   ;;  %s603_s0 = inlined_call_operand.vmem [shape: bf16[9,512,64], index: 0, kind: input, shape index: {}]   ;;  %s604_s1 = inlined_call_operand.vmem [shape: bf16[512,64], index: 1, kind: output, shape index: {}]  }
   0x1   :  { %s434_s8 = smov 0   ;;  %s436_s9 = smov 0  }
   0x2   :  { %s438_s10 = smov 0  }
   0x3 LB: > { %s20_s11 = sadd.s32 1, %s410_s8  ;;  %s23_s12 = sadd.s32 1, %s414_s9  ;;  %s418_s10 = sphi %s438_s10, %s11_s10   ;;  %s414_s9 = sphi %s436_s9, %s608_s9   ;;  %s410_s8 = sphi %s434_s8, %s607_s8   ;;  %s406_s7 = sphi %s432_s7, %s606_s7   ;;  %s402_s6 = sphi %s430_s6, %s605_s6  }
   0x4   : > { %p21_p0 = scmp.ge.s32.totalorder %s20_s11, 9  ;;  %p330_p1 = scmp.ge.s32.totalorder %s418_s10, 1 }
   0x5   : > { %p106_p2 = scmp.lt.s32.totalorder %s418_s10, 37 }
   0x6   : > { %s610_s11 = smov (%p21_p0, %s20_s11), 0  ;;  %s612_s12 = smov (!%p21_p0, %s23_s12), %s414_s9 }
   0x7   : > { %p107_p3 = pnand %p330_p1, %p106_p2  ;;  %p25_p4 = scmp.ge.s32.totalorder %s612_s12, 4 }
   0x8   : > { %s331_s13 = sshll.u32 (!%p107_p3), %s406_s7, 4  ;;  %p131_p5 = scmp.lt.s32.totalorder (!%p107_p3), %s402_s6, 8 }
   0x9   : > { %s614_s12 = smov (%p25_p4, %s612_s12), 0  ;;  %110 = sbr.rel (%p107_p3) target bundleno = 53 (0x35), region = 24 }
   0xa   : > { %p133_p6 = scmp.lt.s32.totalorder (!%p107_p3), %s331_s13, 63  ;;  %p336_p7 = scmp.ne.s32.totalorder (!%p107_p3), %s402_s6, 0 }
  0x10   : > { %s132_s14 = scalar_select %p131_p5, %s402_s6, 8 }
  0x11   : > { %s616_s13 = smov (!%p133_p6, %s331_s13), 63  ;;  %149 = sbr.rel (%p336_p7) target bundleno = 33 (0x21), region = 28 }
  0x12   : > { %s332_s15 = sshll.u32 %s132_s14, 6  ;;  %s335_s17 = sshll.u32 %s616_s13, 2  ;;  %vm166_vm0 = vcmask (!%p336_p7), 519168  }
  0x13   : > { %s136_s16 = sadd.s32 %s332_s15, %s616_s13  ;;  %s467_s21 = scalar_lea.vmem %s604_s1, %s335_s17 }
  0x14   : > { %s333_s18 = sshll.u32 %s136_s16, 2 }
  0x15   : > { %s472_s24 = scalar_lea.vmem %s603_s0, %s333_s18 }
  0x16   : > { %v150_v0 = vld [vmem:[%s472_s24] sm:$0xf] (!%p336_p7)  ;;  %v151_v1 = vld [vmem:[%s472_s24 + $0x4] sm:$0xf] (!%p336_p7)  ;;  %v152_v2 = vld [vmem:[%s472_s24 + $0x8] sm:$0xf] (!%p336_p7) }
  0x17   : > { %167 = vst.msk [vmem:[%s467_s21] sm:$0xf] (!%p336_p7), %vm166_vm0, %v150_v0  ;;  %168 = vst.msk [vmem:[%s467_s21 + $0x4] sm:$0xf] (!%p336_p7), %vm166_vm0, %v151_v1  ;;  %v153_v3 = vld [vmem:[%s472_s24 + $0xc] sm:$0xf] (!%p336_p7) }
  0x18   : > { %v154_v4 = vld [vmem:[%s472_s24 + $0x10] sm:$0xf]  ;;  %169 = vst.msk [vmem:[%s467_s21 + $0x8] sm:$0xf] %vm166_vm0, %v152_v2  ;;  %170 = vst.msk [vmem:[%s467_s21 + $0xc] sm:$0xf] %vm166_vm0, %v153_v3 }
  0x19   : > { %171 = vst.msk [vmem:[%s467_s21 + $0x10] sm:$0xf] %vm166_vm0, %v154_v4  ;;  %v155_v5 = vld [vmem:[%s472_s24 + $0x14] sm:$0xf]  ;;  %v156_v6 = vld [vmem:[%s472_s24 + $0x18] sm:$0xf] }
  0x1a   : > { %v157_v7 = vld [vmem:[%s472_s24 + $0x1c] sm:$0xf]  ;;  %172 = vst.msk [vmem:[%s467_s21 + $0x14] sm:$0xf] %vm166_vm0, %v155_v5  ;;  %173 = vst.msk [vmem:[%s467_s21 + $0x18] sm:$0xf] %vm166_vm0, %v156_v6 }
  0x1b   : > { %174 = vst.msk [vmem:[%s467_s21 + $0x1c] sm:$0xf] %vm166_vm0, %v157_v7  ;;  %v158_v8 = vld [vmem:[%s472_s24 + $0x20] sm:$0xf]  ;;  %v159_v9 = vld [vmem:[%s472_s24 + $0x24] sm:$0xf] }
  0x1c   : > { %v160_v10 = vld [vmem:[%s472_s24 + $0x28] sm:$0xf]  ;;  %175 = vst.msk [vmem:[%s467_s21 + $0x20] sm:$0xf] %vm166_vm0, %v158_v8  ;;  %176 = vst.msk [vmem:[%s467_s21 + $0x24] sm:$0xf] %vm166_vm0, %v159_v9 }
  0x1d   : > { %177 = vst.msk [vmem:[%s467_s21 + $0x28] sm:$0xf] %vm166_vm0, %v160_v10  ;;  %v161_v11 = vld [vmem:[%s472_s24 + $0x2c] sm:$0xf]  ;;  %v162_v12 = vld [vmem:[%s472_s24 + $0x30] sm:$0xf] }
  0x1e   : > { %v163_v13 = vld [vmem:[%s472_s24 + $0x34] sm:$0xf]  ;;  %178 = vst.msk [vmem:[%s467_s21 + $0x2c] sm:$0xf] %vm166_vm0, %v161_v11  ;;  %179 = vst.msk [vmem:[%s467_s21 + $0x30] sm:$0xf] %vm166_vm0, %v162_v12 }
  0x1f   : > { %180 = vst.msk [vmem:[%s467_s21 + $0x34] sm:$0xf] %vm166_vm0, %v163_v13  ;;  %v164_v14 = vld [vmem:[%s472_s24 + $0x38] sm:$0xf]  ;;  %v165_v15 = vld [vmem:[%s472_s24 + $0x3c] sm:$0xf] }
  0x20   : > { %181 = vst.msk [vmem:[%s467_s21 + $0x38] sm:$0xf] %vm166_vm0, %v164_v14  ;;  %182 = vst.msk [vmem:[%s467_s21 + $0x3c] sm:$0xf] %vm166_vm0, %v165_v15 }
  0x21 PF: > { %p337_p8 = scmp.eq.s32.totalorder %s402_s6, 0 }
  0x22   : > { %v203_v17 = vld [vmem:[%s472_s24] sm:$0xf] (!%p337_p8)  ;;  %vm235_vm1 = vcmask (!%p337_p8), 519168   ;;  %v204_v20 = vld [vmem:[%s472_s24 + $0x4] sm:$0xf] (!%p337_p8) }
  0x23   : > { %186 = sbr.rel (%p337_p8) target bundleno = 53 (0x35), region = 32  ;;  %v205_v23 = vld [vmem:[%s472_s24 + $0x8] sm:$0xf] (!%p337_p8)  ;;  %v206_v25 = vld [vmem:[%s472_s24 + $0xc] sm:$0xf] (!%p337_p8) }
  0x24   : > { %v191_v28 = vld [vmem:[%s467_s21 + $0x10] sm:$0xf] (!%p337_p8)  ;;  %v192_v30 = vld [vmem:[%s467_s21 + $0x14] sm:$0xf] (!%p337_p8)  ;;  %v193_v33 = vld [vmem:[%s467_s21 + $0x18] sm:$0xf] (!%p337_p8) }
  0x25   : > { %v207_v29 = vld [vmem:[%s472_s24 + $0x10] sm:$0xf] (!%p337_p8)  ;;  %v208_v32 = vld [vmem:[%s472_s24 + $0x14] sm:$0xf] (!%p337_p8)  ;;  %v209_v34 = vld [vmem:[%s472_s24 + $0x18] sm:$0xf] (!%p337_p8) }
  0x26   : > { %v223_v31 = vmax.bf16 (!%p337_p8), %v207_v29, %v191_v28  ;;  %v224_v35 = vmax.bf16 (!%p337_p8), %v208_v32, %v192_v30  ;;  %v225_v36 = vmax.bf16 (!%p337_p8), %v209_v34, %v193_v33  ;;  %v194_v37 = vld [vmem:[%s467_s21 + $0x1c] sm:$0xf] (!%p337_p8)  ;;  %v195_v39 = vld [vmem:[%s467_s21 + $0x20] sm:$0xf] (!%p337_p8)  ;;  %v196_v42 = vld [vmem:[%s467_s21 + $0x24] sm:$0xf] (!%p337_p8) }
  0x27   : > { %v187_v16 = vld [vmem:[%s467_s21] sm:$0xf] (!%p337_p8)  ;;  %v188_v19 = vld [vmem:[%s467_s21 + $0x4] sm:$0xf] (!%p337_p8)  ;;  %v210_v38 = vld [vmem:[%s472_s24 + $0x1c] sm:$0xf] (!%p337_p8) }
  0x28   : > { %v219_v18 = vmax.bf16 (!%p337_p8), %v203_v17, %v187_v16  ;;  %v189_v21 = vld [vmem:[%s467_s21 + $0x8] sm:$0xf] (!%p337_p8)  ;;  %v220_v22 = vmax.bf16 (!%p337_p8), %v204_v20, %v188_v19  ;;  %v190_v24 = vld [vmem:[%s467_s21 + $0xc] sm:$0xf] (!%p337_p8)  ;;  %240 = vst.msk [vmem:[%s467_s21 + $0x10] sm:$0xf] (!%p337_p8), %vm235_vm1, %v223_v31  ;;  %v226_v40 = vmax.bf16 (!%p337_p8), %v210_v38, %v194_v37 }
  0x29   : > { %v221_v26 = vmax.bf16 (!%p337_p8), %v205_v23, %v189_v21  ;;  %v222_v27 = vmax.bf16 (!%p337_p8), %v206_v25, %v190_v24  ;;  %v211_v41 = vld [vmem:[%s472_s24 + $0x20] sm:$0xf] (!%p337_p8)  ;;  %v212_v43 = vld [vmem:[%s472_s24 + $0x24] sm:$0xf] (!%p337_p8)  ;;  %241 = vst.msk [vmem:[%s467_s21 + $0x14] sm:$0xf] (!%p337_p8), %vm235_vm1, %v224_v35 }
  0x2a   : > { %236 = vst.msk [vmem:[%s467_s21] sm:$0xf] %vm235_vm1, %v219_v18  ;;  %237 = vst.msk [vmem:[%s467_s21 + $0x4] sm:$0xf] %vm235_vm1, %v220_v22  ;;  %v227_v44 = vmax.bf16 %v211_v41, %v195_v39  ;;  %v228_v45 = vmax.bf16 %v212_v43, %v196_v42  ;;  %v197_v46 = vld [vmem:[%s467_s21 + $0x28] sm:$0xf] }
  0x2b   : > { %238 = vst.msk [vmem:[%s467_s21 + $0x8] sm:$0xf] %vm235_vm1, %v221_v26  ;;  %239 = vst.msk [vmem:[%s467_s21 + $0xc] sm:$0xf] %vm235_vm1, %v222_v27  ;;  %v213_v47 = vld [vmem:[%s472_s24 + $0x28] sm:$0xf] }
  0x2c   : > { %242 = vst.msk [vmem:[%s467_s21 + $0x18] sm:$0xf] %vm235_vm1, %v225_v36  ;;  %v198_v48 = vld [vmem:[%s467_s21 + $0x2c] sm:$0xf]  ;;  %243 = vst.msk [vmem:[%s467_s21 + $0x1c] sm:$0xf] %vm235_vm1, %v226_v40  ;;  %v229_v49 = vmax.bf16 %v213_v47, %v197_v46 }
  0x2d   : > { %v214_v50 = vld [vmem:[%s472_s24 + $0x2c] sm:$0xf]  ;;  %v199_v51 = vld [vmem:[%s467_s21 + $0x30] sm:$0xf]  ;;  %244 = vst.msk [vmem:[%s467_s21 + $0x20] sm:$0xf] %vm235_vm1, %v227_v44 }
  0x2e   : > { %v215_v52 = vld [vmem:[%s472_s24 + $0x30] sm:$0xf]  ;;  %245 = vst.msk [vmem:[%s467_s21 + $0x24] sm:$0xf] %vm235_vm1, %v228_v45  ;;  %v230_v53 = vmax.bf16 %v214_v50, %v198_v48  ;;  %v200_v55 = vld [vmem:[%s467_s21 + $0x34] sm:$0xf] }
  0x2f   : > { %v231_v54 = vmax.bf16 %v215_v52, %v199_v51  ;;  %v216_v56 = vld [vmem:[%s472_s24 + $0x34] sm:$0xf]  ;;  %v201_v57 = vld [vmem:[%s467_s21 + $0x38] sm:$0xf]  ;;  %246 = vst.msk [vmem:[%s467_s21 + $0x28] sm:$0xf] %vm235_vm1, %v229_v49 }
  0x30   : > { %v232_v58 = vmax.bf16 %v216_v56, %v200_v55  ;;  %v217_v59 = vld [vmem:[%s472_s24 + $0x38] sm:$0xf]  ;;  %v202_v60 = vld [vmem:[%s467_s21 + $0x3c] sm:$0xf]  ;;  %247 = vst.msk [vmem:[%s467_s21 + $0x2c] sm:$0xf] %vm235_vm1, %v230_v53 }
  0x31   : > { %v218_v61 = vld [vmem:[%s472_s24 + $0x3c] sm:$0xf]  ;;  %248 = vst.msk [vmem:[%s467_s21 + $0x30] sm:$0xf] %vm235_vm1, %v231_v54  ;;  %v233_v62 = vmax.bf16 %v217_v59, %v201_v57 }
  0x32   : > { %v234_v63 = vmax.bf16 %v218_v61, %v202_v60  ;;  %249 = vst.msk [vmem:[%s467_s21 + $0x34] sm:$0xf] %vm235_vm1, %v232_v58 }
  0x33   : > { %250 = vst.msk [vmem:[%s467_s21 + $0x38] sm:$0xf] %vm235_vm1, %v233_v62 }
  0x34   : > { %251 = vst.msk [vmem:[%s467_s21 + $0x3c] sm:$0xf] %vm235_vm1, %v234_v63 }
  0x35 PF: > { %s11_s10 = sadd.s32 1, %s418_s10   ;;  %s605_s6 = smov %s410_s8 }
  0x36   : > { %p8_p9 = scmp.ge.s32.totalorder %s11_s10, 38   ;;  %s606_s7 = smov %s414_s9 }
  0x37   : > { %s607_s8 = smov %s610_s11  ;;  %s608_s9 = smov %s614_s12 }
  0x38   :  { %10 = sbr.rel (!%p8_p9) target bundleno = 3 (0x3), region = 62 }

// kernel: forward.40
= control target key start
LH: loop header
LB: loop body
LE: loop exit
PB: predicated region body
PF: predicated region fallthrough
CT: control target
= control target key end

     0   :  { %s1109_s15 = smov 0   ;;  %s1111_s16 = smov 0   ;;  %s1301_s0 = inlined_call_operand.vmem [shape: bf16[9,512,64], index: 0, kind: input, shape index: {}]   ;;  %s1302_s1 = inlined_call_operand.vmem [shape: bf16[9,64,64], index: 1, kind: input, shape index: {}]   ;;  %s1303_s2 = inlined_call_operand.vmem [shape: f32[1,64], index: 2, kind: input, shape index: {}]   ;;  %s1304_s3 = inlined_call_operand.vmem [shape: f32[1,64], index: 3, kind: input, shape index: {}]   ;;  %s1305_s4 = inlined_call_operand.vmem [shape: bf16[512,64], index: 4, kind: output, shape index: {}]  }
   0x1   :  { %s1113_s17 = smov 0   ;;  %s1115_s18 = smov 0  }
   0x2   :  { %s1117_s19 = smov 0  }
   0x3 LB: > { %s26_s20 = sadd.s32 1, %s1073_s17  ;;  %s33_s21 = sadd.s32 1, %s1077_s18  ;;  %s1081_s19 = sphi %s1117_s19, %s14_s19   ;;  %s1077_s18 = sphi %s1115_s18, %s1309_s18   ;;  %s1073_s17 = sphi %s1113_s17, %s1308_s17   ;;  %s1069_s16 = sphi %s1111_s16, %s1307_s16   ;;  %s1065_s15 = sphi %s1109_s15, %s1306_s15  }
   0x4   : > { %p27_p0 = scmp.ge.s32.totalorder %s26_s20, 9  ;;  %p879_p1 = scmp.ge.s32.totalorder %s1081_s19, 1 }
   0x5   : > { %p221_p2 = scmp.lt.s32.totalorder %s1081_s19, 37 }
   0x6   : > { %s1311_s20 = smov (%p27_p0, %s26_s20), 0  ;;  %s1313_s21 = smov (!%p27_p0, %s33_s21), %s1077_s18 }
   0x7   : > { %p222_p3 = pnand %p879_p1, %p221_p2  ;;  %p35_p4 = scmp.ge.s32.totalorder %s1313_s21, 4 }
   0x8   : > { %s880_s22 = sshll.u32 (!%p222_p3), %s1069_s16, 4  ;;  %p269_p5 = scmp.lt.s32.totalorder (!%p222_p3), %s1065_s15, 8 }
   0x9   : > { %s1315_s21 = smov (%p35_p4, %s1313_s21), 0  ;;  %225 = sbr.rel (%p222_p3) target bundleno = 288 (0x120), region = 36 }
   0xa   : > { %p271_p6 = scmp.lt.s32.totalorder (!%p222_p3), %s880_s22, 63  ;;  %p887_p7 = scmp.ne.s32.totalorder (!%p222_p3), %s1065_s15, 0 }
  0x10   : > { %s270_s23 = scalar_select %p269_p5, %s1065_s15, 8 }
  0x11   : > { %s1317_s22 = smov (!%p271_p6, %s880_s22), 63  ;;  %305 = sbr.rel (%p887_p7) target bundleno = 27 (0x1b), region = 40 }
  0x12   : > { %s881_s24 = sshll.u32 %s270_s23, 6  ;;  %s929_s25 = sshll.u32 %s270_s23, 5  ;;  %vm306_vm0 = vcmask (!%p887_p7), 523264   ;;  %v1083_v0 = vmov (!%p887_p7), 0.0  }
  0x13   : > { %s274_s26 = sadd.s32 %s881_s24, %s1317_s22  ;;  %s1146_s29 = scalar_lea.vmem %s1302_s1, %s929_s25  ;;  %307 = vst.msk [vmem:[#allocation2] sm:$0xff] (!%p887_p7), %vm306_vm0, %v1083_v0  ;;  %308 = vst.msk [vmem:[#allocation2 + $0x8] sm:$0xff] (!%p887_p7), %vm306_vm0, %v1083_v0 }
  0x14   : > { %s882_s30 = sshll.u32 %s274_s26, 2  ;;  %s886_s5 = sshll.u32 %s1317_s22, 2  ;;  %309 = vst.msk [vmem:[#allocation2 + $0x10] sm:$0xff] (!%p887_p7), %vm306_vm0, %v1083_v0  ;;  %310 = vst.msk [vmem:[#allocation2 + $0x18] sm:$0xff] (!%p887_p7), %vm306_vm0, %v1083_v0 }
  0x15   : > { %s1151_s8 = scalar_lea.vmem %s1301_s0, %s882_s30  ;;  %s1156_s11 = scalar_lea.vmem %s1305_s4, %s886_s5  ;;  %311 = vst.msk [vmem:[#allocation2 + $0x20] sm:$0xff] (!%p887_p7), %vm306_vm0, %v1083_v0  ;;  %312 = vst.msk [vmem:[#allocation2 + $0x28] sm:$0xff] (!%p887_p7), %vm306_vm0, %v1083_v0 }
  0x16   : > { %313 = vst.msk [vmem:[#allocation2 + $0x30] sm:$0xff] (!%p887_p7), %vm306_vm0, %v1083_v0  ;;  %314 = vst.msk [vmem:[#allocation2 + $0x38] sm:$0xff] (!%p887_p7), %vm306_vm0, %v1083_v0 }
  0x17   : > { %315 = vst.msk [vmem:[#allocation2 + $0x40] sm:$0xff] (!%p887_p7), %vm306_vm0, %v1083_v0  ;;  %316 = vst.msk [vmem:[#allocation2 + $0x48] sm:$0xff] (!%p887_p7), %vm306_vm0, %v1083_v0 }
  0x18   : > { %317 = vst.msk [vmem:[#allocation2 + $0x50] sm:$0xff] %vm306_vm0, %v1083_v0  ;;  %318 = vst.msk [vmem:[#allocation2 + $0x58] sm:$0xff] %vm306_vm0, %v1083_v0 }
  0x19   : > { %319 = vst.msk [vmem:[#allocation2 + $0x60] sm:$0xff] %vm306_vm0, %v1083_v0  ;;  %320 = vst.msk [vmem:[#allocation2 + $0x68] sm:$0xff] %vm306_vm0, %v1083_v0 }
  0x1a   : > { %321 = vst.msk [vmem:[#allocation2 + $0x70] sm:$0xff] %vm306_vm0, %v1083_v0  ;;  %322 = vst.msk [vmem:[#allocation2 + $0x78] sm:$0xff] %vm306_vm0, %v1083_v0 }
  0x1b PF: > { %v1031_v1 = vld [vmem:[%s1146_s29] sm:$0xff]   ;;  %v1032_v2 = vld [vmem:[%s1146_s29 + $0x8] sm:$0xff]   ;;  %v1033_v3 = vld [vmem:[%s1146_s29 + $0x10] sm:$0xff]   ;;  %vm427_vm1 = vcmask 523264   ;;  %p908_p8 = scmp.ne.s32.totalorder %s1065_s15, 8 }
  0x1c   : > { %958 = vmatprep.subr.bf16.mxu0 %v1031_v1  ;;  %982 = vmatprep.subr.bf16.mxu1 %v1031_v1  ;;  %v1035_v4 = vld [vmem:[%s1151_s8] sm:$0xff]   ;;  %v1034_v6 = vld [vmem:[%s1146_s29 + $0x18] sm:$0xff]   ;;  %v1037_v7 = vld [vmem:[%s1151_s8 + $0x8] sm:$0xff]   ;;  %vm727_vm2 = vcmask (!%p908_p8), 519168  }
  0x1d   : > { %959 = vmatpush3.bf16.msra.mxu0 %v1031_v1  ;;  %986 = vmatpush3.bf16.msra.mxu1 %v1031_v1  ;;  %v1036_v5 = vld [vmem:[%s1151_s8 + $0x20] sm:$0xff]   ;;  %v1038_v8 = vld [vmem:[%s1151_s8 + $0x28] sm:$0xff]   ;;  %v1039_v9 = vld [vmem:[%s1151_s8 + $0x10] sm:$0xff]  }
  0x1e   : > { %960 = vmatprep.subr.bf16.mxu0 %v1032_v2  ;;  %983 = vmatprep.subr.bf16.mxu1 %v1032_v2  ;;  %v1040_v10 = vld [vmem:[%s1151_s8 + $0x30] sm:$0xff]   ;;  %v1041_v11 = vld [vmem:[%s1151_s8 + $0x18] sm:$0xff]   ;;  %v323_v15 = vld [vmem:[#allocation2] sm:$0xff] }
  0x1f   : > { %966 = vmatprep.mubr.msk.bf16.mxu0 %vm427_vm1, %v1035_v4  ;;  %974 = vmatprep.mubr.msk.bf16.mxu1 %vm427_vm1, %v1036_v5  ;;  %v1042_v12 = vld [vmem:[%s1151_s8 + $0x38] sm:$0xff]   ;;  %v325_v13 = vld [vmem:[#allocation2 + $0x10] sm:$0xff]  ;;  %v324_v25 = vld [vmem:[#allocation2 + $0x8] sm:$0xff] }
  0x20   : > { %v326_v19 = vld [vmem:[#allocation2 + $0x18] sm:$0xff]  ;;  %v329_v37 = vld [vmem:[#allocation2 + $0x30] sm:$0xff]  ;;  %v327_v39 = vld [vmem:[#allocation2 + $0x20] sm:$0xff] }
  0x21   : > { %961 = vmatpush3.bf16.msra.mxu0 %v1032_v2  ;;  %987 = vmatpush3.bf16.msra.mxu1 %v1032_v2  ;;  %v331_v16 = vld [vmem:[#allocation2 + $0x40] sm:$0xff]  ;;  %v334_v20 = vld [vmem:[#allocation2 + $0x58] sm:$0xff]  ;;  %v332_v26 = vld [vmem:[#allocation2 + $0x48] sm:$0xff] }
  0x22   : > { %962 = vmatprep.subr.bf16.mxu0 %v1033_v3  ;;  %984 = vmatprep.subr.bf16.mxu1 %v1033_v3  ;;  %v333_v14 = vld [vmem:[#allocation2 + $0x50] sm:$0xff]  ;;  %v335_v40 = vld [vmem:[#allocation2 + $0x60] sm:$0xff]  ;;  %v330_v43 = vld [vmem:[#allocation2 + $0x38] sm:$0xff] }
  0x23   : > { %v337_v38 = vld [vmem:[#allocation2 + $0x70] sm:$0xff]  ;;  %v338_v44 = vld [vmem:[#allocation2 + $0x78] sm:$0xff]  ;;  %v328_v49 = vld [vmem:[#allocation2 + $0x28] sm:$0xff] }
  0x24   : > { %v336_v50 = vld [vmem:[#allocation2 + $0x68] sm:$0xff]  ;;  %v1215_v62 = vld [vmem:[%s1303_s2] ss:$0 sm:$0xff] (!%p908_p8) }
  0x25   : > { %963 = vmatpush3.bf16.msra.mxu0 %v1033_v3  ;;  %988 = vmatpush3.bf16.msra.mxu1 %v1033_v3  ;;  %v1220_v63 = vld [vmem:[%s1304_s3] ss:$0 sm:$0xff] (!%p908_p8) }
  0x26   : > { %964 = vmatprep.subr.bf16.mxu0 %v1034_v6  ;;  %985 = vmatprep.subr.bf16.mxu1 %v1034_v6 }
  0x29   : > { %965 = vmatpush3.bf16.msra.mxu0 %v1034_v6  ;;  %989 = vmatpush3.bf16.msra.mxu1 %v1034_v6 }
  0x2c   : > { %967 = vmatmul.mubr.msk.bf16.vlgmr.msra.gmra.mrb[0].mxu0 %vm427_vm1, %v1037_v7  ;;  %975 = vmatmul.mubr.msk.bf16.vlgmr.msra.gmra.mrb[0].mxu1 %vm427_vm1, %v1038_v8 }
  0x2d   : > { %970 = vmatprep.mubr.msk.bf16.mxu0 %vm427_vm1, %v1039_v9  ;;  %978 = vmatprep.mubr.msk.bf16.mxu1 %vm427_vm1, %v1040_v10 }
  0x34   : > { %971 = vmatmul.mubr.msk.bf16.gmra.mrb[4].mxu0 %vm427_vm1, %v1041_v11  ;;  %979 = vmatmul.mubr.msk.bf16.gmra.mrb[4].mxu1 %vm427_vm1, %v1042_v12 }
  0xff   : > { %v968_v17 = vpop.f32.mrb[0].mxu0  ;;  %v976_v18 = vpop.f32.mrb[0].mxu1 }
 0x100   : > { %v551_v21 = vadd.f32 %v968_v17, %v325_v13  ;;  %v559_v22 = vadd.f32 %v976_v18, %v333_v14  ;;  %v486_v23 = vpop.f32.mrb[1].mxu0  ;;  %v518_v24 = vpop.f32.mrb[1].mxu1 }
 0x101   : > { %v549_v27 = vadd.f32 %v486_v23, %v323_v15  ;;  %v557_v28 = vadd.f32 %v518_v24, %v331_v16  ;;  %v969_v29 = vpop.f32.mrb[2].mxu0  ;;  %v977_v30 = vpop.f32.mrb[2].mxu1 }
 0x102   : > { %567 = vst.msk [vmem:[#allocation2 + $0x10] sm:$0xff] %vm427_vm1, %v551_v21  ;;  %575 = vst.msk [vmem:[#allocation2 + $0x50] sm:$0xff] %vm427_vm1, %v559_v22  ;;  %v552_v31 = vadd.f32 %v969_v29, %v326_v19  ;;  %v560_v32 = vadd.f32 %v977_v30, %v334_v20  ;;  %v489_v33 = vpop.f32.mrb[3].mxu0  ;;  %v521_v34 = vpop.f32.mrb[3].mxu1 }
 0x103   : > { %565 = vst.msk [vmem:[#allocation2] sm:$0xff] %vm427_vm1, %v549_v27  ;;  %573 = vst.msk [vmem:[#allocation2 + $0x40] sm:$0xff] %vm427_vm1, %v557_v28  ;;  %v550_v35 = vadd.f32 %v489_v33, %v324_v25  ;;  %v558_v36 = vadd.f32 %v521_v34, %v332_v26 }
 0x104   : > { %568 = vst.msk [vmem:[#allocation2 + $0x18] sm:$0xff] %vm427_vm1, %v552_v31  ;;  %576 = vst.msk [vmem:[#allocation2 + $0x58] sm:$0xff] %vm427_vm1, %v560_v32 }
 0x105   : > { %566 = vst.msk [vmem:[#allocation2 + $0x8] sm:$0xff] %vm427_vm1, %v550_v35  ;;  %574 = vst.msk [vmem:[#allocation2 + $0x48] sm:$0xff] %vm427_vm1, %v558_v36 }
 0x107   : > { %v972_v41 = vpop.f32.mrb[4].mxu0  ;;  %v980_v42 = vpop.f32.mrb[4].mxu1  ;;  %584 = sbr.rel (%p908_p8) target bundleno = 288 (0x120), region = 44 }
 0x108   : > { %v555_v45 = vadd.f32 %v972_v41, %v329_v37  ;;  %v563_v46 = vadd.f32 %v980_v42, %v337_v38  ;;  %v502_v47 = vpop.f32.mrb[5].mxu0  ;;  %v534_v48 = vpop.f32.mrb[5].mxu1 }
 0x109   : > { %v553_v51 = vadd.f32 %v502_v47, %v327_v39  ;;  %v561_v52 = vadd.f32 %v534_v48, %v335_v40  ;;  %v973_v53 = vpop.f32.mrb[6].mxu0  ;;  %v981_v54 = vpop.f32.mrb[6].mxu1  ;;  %v587_v2 = vld [vmem:[#allocation2 + $0x10] sm:$0xff] (!%p908_p8) }
 0x10a   : > { %571 = vst.msk [vmem:[#allocation2 + $0x30] sm:$0xff] %vm427_vm1, %v555_v45  ;;  %579 = vst.msk [vmem:[#allocation2 + $0x70] sm:$0xff] %vm427_vm1, %v563_v46  ;;  %v556_v55 = vadd.f32 %v973_v53, %v330_v43  ;;  %v564_v56 = vadd.f32 %v981_v54, %v338_v44  ;;  %v505_v57 = vpop.f32.mrb[7].mxu0  ;;  %v537_v58 = vpop.f32.mrb[7].mxu1  ;;  %v585_v61 = vld [vmem:[#allocation2] sm:$0xff] (!%p908_p8)  ;;  %v610_v5 = vmul.f32 (!%p908_p8), %v1215_v62, %v587_v2  ;;  %v595_v33 = vld [vmem:[#allocation2 + $0x50] sm:$0xff] (!%p908_p8) }
 0x10b   : > { %569 = vst.msk [vmem:[#allocation2 + $0x20] sm:$0xff] %vm427_vm1, %v553_v51  ;;  %577 = vst.msk [vmem:[#allocation2 + $0x60] sm:$0xff] %vm427_vm1, %v561_v52  ;;  %v554_v59 = vadd.f32 %v505_v57, %v328_v49  ;;  %v562_v60 = vadd.f32 %v537_v58, %v336_v50  ;;  %v608_v0 = vmul.f32 (!%p908_p8), %v1215_v62, %v585_v61  ;;  %v588_v3 = vld [vmem:[#allocation2 + $0x18] sm:$0xff] (!%p908_p8)  ;;  %v593_v27 = vld [vmem:[#allocation2 + $0x40] sm:$0xff] (!%p908_p8) }
 0x10c   : > { %572 = vst.msk [vmem:[#allocation2 + $0x38] sm:$0xff] %vm427_vm1, %v556_v55  ;;  %580 = vst.msk [vmem:[#allocation2 + $0x78] sm:$0xff] %vm427_vm1, %v564_v56  ;;  %v586_v1 = vld [vmem:[#allocation2 + $0x8] sm:$0xff] (!%p908_p8)  ;;  %v611_v6 = vmul.f32 (!%p908_p8), %v1215_v62, %v588_v3  ;;  %v633_v16 = vadd.f32 (!%p908_p8), %v1220_v63, %v610_v5  ;;  %v596_v34 = vld [vmem:[#allocation2 + $0x58] sm:$0xff] (!%p908_p8)  ;;  %v616_v45 = vmul.f32 (!%p908_p8), %v1215_v62, %v593_v27 }
 0x10d   : > { %570 = vst.msk [vmem:[#allocation2 + $0x28] sm:$0xff] %vm427_vm1, %v554_v59  ;;  %578 = vst.msk [vmem:[#allocation2 + $0x68] sm:$0xff] %vm427_vm1, %v562_v60  ;;  %v609_v4 = vmul.f32 (!%p908_p8), %v1215_v62, %v586_v1  ;;  %v631_v10 = vadd.f32 (!%p908_p8), %v1220_v63, %v608_v0  ;;  %v594_v32 = vld [vmem:[#allocation2 + $0x48] sm:$0xff] (!%p908_p8)  ;;  %v618_v49 = vmul.f32 (!%p908_p8), %v1215_v62, %v595_v33 }
 0x10e   : > { %v634_v17 = vadd.f32 %v1220_v63, %v611_v6  ;;  %v649_v24 = vmax.f32 %v633_v16, 0.0  ;;  %v617_v48 = vmul.f32 %v1215_v62, %v594_v32  ;;  %v619_v50 = vmul.f32 %v1215_v62, %v596_v34 }
 0x10f   : > { %v632_v15 = vadd.f32 %v1220_v63, %v609_v4  ;;  %v647_v19 = vmax.f32 %v631_v10, 0.0  ;;  %v639_v51 = vadd.f32 %v1220_v63, %v616_v45  ;;  %v641_v56 = vadd.f32 %v1220_v63, %v618_v49 }
 0x110   : > { %v650_v25 = vmax.f32 %v634_v17, 0.0  ;;  %v932_v36 = vpack.c.bf16 %v649_v24, %v649_v24  ;;  %v640_v55 = vadd.f32 %v1220_v63, %v617_v48  ;;  %v642_v57 = vadd.f32 %v1220_v63, %v619_v50 }
 0x111   : > { %v591_v9 = vld [vmem:[#allocation2 + $0x30] sm:$0xff]  ;;  %v648_v23 = vmax.f32 %v632_v15, 0.0  ;;  %v930_v28 = vpack.c.bf16 %v647_v19, %v647_v19  ;;  %v655_v59 = vmax.f32 %v639_v51, 0.0  ;;  %v657_v2 = vmax.f32 %v641_v56, 0.0 }
 0x112   : > { %v589_v7 = vld [vmem:[#allocation2 + $0x20] sm:$0xff]  ;;  %v614_v13 = vmul.f32 %v1215_v62, %v591_v9  ;;  %v933_v37 = vpack.c.bf16 %v650_v25, %v650_v25  ;;  %v599_v41 = vld [vmem:[#allocation2 + $0x70] sm:$0xff]  ;;  %730 = vst.msk [vmem:[%s1156_s11 + $0x8] sm:$0xf] %vm727_vm2, %v932_v36  ;;  %v656_v1 = vmax.f32 %v640_v55, 0.0  ;;  %v658_v3 = vmax.f32 %v642_v57, 0.0 }
 0x113   : > { %v612_v11 = vmul.f32 %v1215_v62, %v589_v7  ;;  %v592_v14 = vld [vmem:[#allocation2 + $0x38] sm:$0xff]  ;;  %v931_v35 = vpack.c.bf16 %v648_v23, %v648_v23  ;;  %v597_v39 = vld [vmem:[#allocation2 + $0x60] sm:$0xff]  ;;  %728 = vst.msk [vmem:[%s1156_s11] sm:$0xf] %vm727_vm2, %v930_v28  ;;  %v622_v54 = vmul.f32 %v1215_v62, %v599_v41  ;;  %v938_v5 = vpack.c.bf16 %v655_v59, %v655_v59 }
 0x114   : > { %v590_v8 = vld [vmem:[#allocation2 + $0x28] sm:$0xff]  ;;  %v615_v18 = vmul.f32 %v1215_v62, %v592_v14  ;;  %v637_v22 = vadd.f32 %v1220_v63, %v614_v13  ;;  %v600_v46 = vld [vmem:[#allocation2 + $0x78] sm:$0xff]  ;;  %731 = vst.msk [vmem:[%s1156_s11 + $0xc] sm:$0xf] %vm727_vm2, %v933_v37  ;;  %v620_v52 = vmul.f32 %v1215_v62, %v597_v39  ;;  %v940_v9 = vpack.c.bf16 %v657_v2, %v657_v2 }
 0x115   : > { %v613_v12 = vmul.f32 %v1215_v62, %v590_v8  ;;  %v635_v20 = vadd.f32 %v1220_v63, %v612_v11  ;;  %v598_v40 = vld [vmem:[#allocation2 + $0x68] sm:$0xff]  ;;  %729 = vst.msk [vmem:[%s1156_s11 + $0x4] sm:$0xf] %vm727_vm2, %v931_v35  ;;  %v623_v58 = vmul.f32 %v1215_v62, %v600_v46  ;;  %v645_v0 = vadd.f32 %v1220_v63, %v622_v54 }
 0x116   : > { %v638_v26 = vadd.f32 %v1220_v63, %v615_v18  ;;  %v653_v31 = vmax.f32 %v637_v22, 0.0  ;;  %v621_v53 = vmul.f32 %v1215_v62, %v598_v40  ;;  %v643_v60 = vadd.f32 %v1220_v63, %v620_v52  ;;  %736 = vst.msk [vmem:[%s1156_s11 + $0x20] sm:$0xf] %vm727_vm2, %v938_v5  ;;  %738 = vst.msk [vmem:[%s1156_s11 + $0x28] sm:$0xf] %vm727_vm2, %v940_v9 }
 0x117   : > { %v636_v21 = vadd.f32 %v1220_v63, %v613_v12  ;;  %v651_v29 = vmax.f32 %v635_v20, 0.0  ;;  %v646_v4 = vadd.f32 %v1220_v63, %v623_v58  ;;  %v661_v7 = vmax.f32 %v645_v0, 0.0 }
 0x118   : > { %v654_v38 = vmax.f32 %v638_v26, 0.0  ;;  %v936_v44 = vpack.c.bf16 %v653_v31, %v653_v31  ;;  %v644_v61 = vadd.f32 %v1220_v63, %v621_v53  ;;  %v659_v6 = vmax.f32 %v643_v60, 0.0 }
 0x119   : > { %v652_v30 = vmax.f32 %v636_v21, 0.0  ;;  %v934_v42 = vpack.c.bf16 %v651_v29, %v651_v29  ;;  %v939_v8 = vpack.c.bf16 %v656_v1, %v656_v1  ;;  %v941_v10 = vpack.c.bf16 %v658_v3, %v658_v3 }
 0x11a   : > { %v937_v47 = vpack.c.bf16 %v654_v38, %v654_v38  ;;  %734 = vst.msk [vmem:[%s1156_s11 + $0x18] sm:$0xf] %vm727_vm2, %v936_v44  ;;  %v660_v62 = vmax.f32 %v644_v61, 0.0  ;;  %v662_v11 = vmax.f32 %v646_v4, 0.0  ;;  %v942_v12 = vpack.c.bf16 %v659_v6, %v659_v6 }
 0x11b   : > { %v935_v43 = vpack.c.bf16 %v652_v30, %v652_v30  ;;  %732 = vst.msk [vmem:[%s1156_s11 + $0x10] sm:$0xf] %vm727_vm2, %v934_v42  ;;  %v944_v14 = vpack.c.bf16 %v661_v7, %v661_v7  ;;  %737 = vst.msk [vmem:[%s1156_s11 + $0x24] sm:$0xf] %vm727_vm2, %v939_v8 }
 0x11c   : > { %735 = vst.msk [vmem:[%s1156_s11 + $0x1c] sm:$0xf] %vm727_vm2, %v937_v47  ;;  %v943_v13 = vpack.c.bf16 %v660_v62, %v660_v62  ;;  %739 = vst.msk [vmem:[%s1156_s11 + $0x2c] sm:$0xf] %vm727_vm2, %v941_v10  ;;  %v945_v63 = vpack.c.bf16 %v662_v11, %v662_v11 }
 0x11d   : > { %733 = vst.msk [vmem:[%s1156_s11 + $0x14] sm:$0xf] %vm727_vm2, %v935_v43  ;;  %740 = vst.msk [vmem:[%s1156_s11 + $0x30] sm:$0xf] %vm727_vm2, %v942_v12 }
 0x11e   : > { %741 = vst.msk [vmem:[%s1156_s11 + $0x34] sm:$0xf] %vm727_vm2, %v943_v13  ;;  %742 = vst.msk [vmem:[%s1156_s11 + $0x38] sm:$0xf] %vm727_vm2, %v944_v14 }
 0x11f   : > { %743 = vst.msk [vmem:[%s1156_s11 + $0x3c] sm:$0xf] %vm727_vm2, %v945_v63 }
 0x120 PF: > { %s14_s19 = sadd.s32 1, %s1081_s19   ;;  %s1306_s15 = smov %s1073_s17 }
 0x121   : > { %p11_p9 = scmp.ge.s32.totalorder %s14_s19, 38   ;;  %s1307_s16 = smov %s1077_s18 }
 0x122   : > { %s1308_s17 = smov %s1311_s20  ;;  %s1309_s18 = smov %s1315_s21 }
 0x123   :  { %13 = sbr.rel (!%p11_p9) target bundleno = 3 (0x3), region = 83 }

// kernel: forward.41
= control target key start
LH: loop header
LB: loop body
LE: loop exit
PB: predicated region body
PF: predicated region fallthrough
CT: control target
= control target key end

     0   :  { %s1278_s18 = smov 0   ;;  %s1280_s19 = smov 0   ;;  %s1483_s0 = inlined_call_operand.vmem [shape: bf16[9,512,64], index: 0, kind: input, shape index: {}]   ;;  %s1484_s1 = inlined_call_operand.vmem [shape: bf16[9,64,64], index: 1, kind: input, shape index: {}]   ;;  %s1485_s2 = inlined_call_operand.vmem [shape: f32[1,64], index: 2, kind: input, shape index: {}]   ;;  %s1486_s3 = inlined_call_operand.vmem [shape: f32[1,64], index: 3, kind: input, shape index: {}]   ;;  %s1487_s4 = inlined_call_operand.vmem [shape: bf16[512,64], index: 4, kind: input, shape index: {}]   ;;  %s1488_s5 = inlined_call_operand.vmem [shape: bf16[512,64], index: 5, kind: output, shape index: {}]  }
   0x1   :  { %s1282_s20 = smov 0   ;;  %s1284_s21 = smov 0  }
   0x2   :  { %s1286_s22 = smov 0  }
   0x3 LB: > { %s27_s23 = sadd.s32 1, %s1237_s20  ;;  %s34_s24 = sadd.s32 1, %s1241_s21  ;;  %s1245_s22 = sphi %s1286_s22, %s15_s22   ;;  %s1241_s21 = sphi %s1284_s21, %s1492_s21   ;;  %s1237_s20 = sphi %s1282_s20, %s1491_s20   ;;  %s1233_s19 = sphi %s1280_s19, %s1490_s19   ;;  %s1229_s18 = sphi %s1278_s18, %s1489_s18  }
   0x4   : > { %p28_p0 = scmp.ge.s32.totalorder %s27_s23, 9  ;;  %p1002_p1 = scmp.ge.s32.totalorder %s1245_s22, 1 }
   0x5   : > { %p262_p2 = scmp.lt.s32.totalorder %s1245_s22, 37 }
   0x6   : > { %s1494_s23 = smov (%p28_p0, %s27_s23), 0  ;;  %s1496_s24 = smov (!%p28_p0, %s34_s24), %s1241_s21 }
   0x7   : > { %p263_p3 = pnand %p1002_p1, %p262_p2  ;;  %p36_p4 = scmp.ge.s32.totalorder %s1496_s24, 4 }
   0x8   : > { %s1003_s25 = sshll.u32 (!%p263_p3), %s1233_s19, 4  ;;  %p320_p5 = scmp.lt.s32.totalorder (!%p263_p3), %s1229_s18, 8 }
   0x9   : > { %s1498_s24 = smov (%p36_p4, %s1496_s24), 0  ;;  %266 = sbr.rel (%p263_p3) target bundleno = 297 (0x129), region = 40 }
   0xa   : > { %p322_p6 = scmp.lt.s32.totalorder (!%p263_p3), %s1003_s25, 63  ;;  %p1012_p7 = scmp.ne.s32.totalorder (!%p263_p3), %s1229_s18, 0 }
  0x10   : > { %s321_s26 = scalar_select %p320_p5, %s1229_s18, 8 }
  0x11   : > { %s1500_s25 = smov (!%p322_p6, %s1003_s25), 63  ;;  %365 = sbr.rel (%p1012_p7) target bundleno = 27 (0x1b), region = 44 }
  0x12   : > { %s1004_s27 = sshll.u32 %s321_s26, 6  ;;  %s1054_s28 = sshll.u32 %s321_s26, 5  ;;  %vm366_vm0 = vcmask (!%p1012_p7), 523264   ;;  %v1247_v0 = vmov (!%p1012_p7), 0.0  }
  0x13   : > { %s325_s29 = sadd.s32 %s1004_s27, %s1500_s25  ;;  %s1315_s7 = scalar_lea.vmem %s1484_s1, %s1054_s28  ;;  %367 = vst.msk [vmem:[#allocation2] sm:$0xff] (!%p1012_p7), %vm366_vm0, %v1247_v0  ;;  %368 = vst.msk [vmem:[#allocation2 + $0x8] sm:$0xff] (!%p1012_p7), %vm366_vm0, %v1247_v0 }
  0x14   : > { %s1005_s8 = sshll.u32 %s325_s29, 2  ;;  %s1009_s9 = sshll.u32 %s1500_s25, 2  ;;  %369 = vst.msk [vmem:[#allocation2 + $0x10] sm:$0xff] (!%p1012_p7), %vm366_vm0, %v1247_v0  ;;  %370 = vst.msk [vmem:[#allocation2 + $0x18] sm:$0xff] (!%p1012_p7), %vm366_vm0, %v1247_v0 }
  0x15   : > { %s1320_s12 = scalar_lea.vmem %s1483_s0, %s1005_s8  ;;  %s1325_s15 = scalar_lea.vmem %s1487_s4, %s1009_s9  ;;  %371 = vst.msk [vmem:[#allocation2 + $0x20] sm:$0xff] (!%p1012_p7), %vm366_vm0, %v1247_v0  ;;  %372 = vst.msk [vmem:[#allocation2 + $0x28] sm:$0xff] (!%p1012_p7), %vm366_vm0, %v1247_v0 }
  0x16   : > { %s1330_s19 = scalar_lea.vmem %s1488_s5, %s1009_s9  ;;  %373 = vst.msk [vmem:[#allocation2 + $0x30] sm:$0xff] (!%p1012_p7), %vm366_vm0, %v1247_v0  ;;  %374 = vst.msk [vmem:[#allocation2 + $0x38] sm:$0xff] (!%p1012_p7), %vm366_vm0, %v1247_v0 }
  0x17   : > { %375 = vst.msk [vmem:[#allocation2 + $0x40] sm:$0xff] (!%p1012_p7), %vm366_vm0, %v1247_v0  ;;  %376 = vst.msk [vmem:[#allocation2 + $0x48] sm:$0xff] (!%p1012_p7), %vm366_vm0, %v1247_v0 }
  0x18   : > { %377 = vst.msk [vmem:[#allocation2 + $0x50] sm:$0xff] %vm366_vm0, %v1247_v0  ;;  %378 = vst.msk [vmem:[#allocation2 + $0x58] sm:$0xff] %vm366_vm0, %v1247_v0 }
  0x19   : > { %379 = vst.msk [vmem:[#allocation2 + $0x60] sm:$0xff] %vm366_vm0, %v1247_v0  ;;  %380 = vst.msk [vmem:[#allocation2 + $0x68] sm:$0xff] %vm366_vm0, %v1247_v0 }
  0x1a   : > { %381 = vst.msk [vmem:[#allocation2 + $0x70] sm:$0xff] %vm366_vm0, %v1247_v0  ;;  %382 = vst.msk [vmem:[#allocation2 + $0x78] sm:$0xff] %vm366_vm0, %v1247_v0 }
  0x1b PF: > { %v1195_v1 = vld [vmem:[%s1315_s7] sm:$0xff]   ;;  %v1196_v2 = vld [vmem:[%s1315_s7 + $0x8] sm:$0xff]   ;;  %v1197_v3 = vld [vmem:[%s1315_s7 + $0x10] sm:$0xff]   ;;  %vm487_vm1 = vcmask 523264   ;;  %p1033_p8 = scmp.ne.s32.totalorder %s1229_s18, 8 }
  0x1c   : > { %1122 = vmatprep.subr.bf16.mxu0 %v1195_v1  ;;  %1146 = vmatprep.subr.bf16.mxu1 %v1195_v1  ;;  %v1199_v4 = vld [vmem:[%s1320_s12] sm:$0xff]   ;;  %v1198_v6 = vld [vmem:[%s1315_s7 + $0x18] sm:$0xff]   ;;  %v1201_v7 = vld [vmem:[%s1320_s12 + $0x8] sm:$0xff]   ;;  %vm835_vm2 = vcmask (!%p1033_p8), 519168  }
  0x1d   : > { %1123 = vmatpush3.bf16.msra.mxu0 %v1195_v1  ;;  %1150 = vmatpush3.bf16.msra.mxu1 %v1195_v1  ;;  %v1200_v5 = vld [vmem:[%s1320_s12 + $0x20] sm:$0xff]   ;;  %v1202_v8 = vld [vmem:[%s1320_s12 + $0x28] sm:$0xff]   ;;  %v1203_v9 = vld [vmem:[%s1320_s12 + $0x10] sm:$0xff]  }
  0x1e   : > { %1124 = vmatprep.subr.bf16.mxu0 %v1196_v2  ;;  %1147 = vmatprep.subr.bf16.mxu1 %v1196_v2  ;;  %v1204_v10 = vld [vmem:[%s1320_s12 + $0x30] sm:$0xff]   ;;  %v1205_v11 = vld [vmem:[%s1320_s12 + $0x18] sm:$0xff]   ;;  %v383_v15 = vld [vmem:[#allocation2] sm:$0xff] }
  0x1f   : > { %1130 = vmatprep.mubr.msk.bf16.mxu0 %vm487_vm1, %v1199_v4  ;;  %1138 = vmatprep.mubr.msk.bf16.mxu1 %vm487_vm1, %v1200_v5  ;;  %v1206_v12 = vld [vmem:[%s1320_s12 + $0x38] sm:$0xff]   ;;  %v385_v13 = vld [vmem:[#allocation2 + $0x10] sm:$0xff]  ;;  %v384_v25 = vld [vmem:[#allocation2 + $0x8] sm:$0xff] }
  0x20   : > { %v386_v19 = vld [vmem:[#allocation2 + $0x18] sm:$0xff]  ;;  %v389_v37 = vld [vmem:[#allocation2 + $0x30] sm:$0xff]  ;;  %v387_v39 = vld [vmem:[#allocation2 + $0x20] sm:$0xff] }
  0x21   : > { %1125 = vmatpush3.bf16.msra.mxu0 %v1196_v2  ;;  %1151 = vmatpush3.bf16.msra.mxu1 %v1196_v2  ;;  %v391_v16 = vld [vmem:[#allocation2 + $0x40] sm:$0xff]  ;;  %v394_v20 = vld [vmem:[#allocation2 + $0x58] sm:$0xff]  ;;  %v392_v26 = vld [vmem:[#allocation2 + $0x48] sm:$0xff] }
  0x22   : > { %1126 = vmatprep.subr.bf16.mxu0 %v1197_v3  ;;  %1148 = vmatprep.subr.bf16.mxu1 %v1197_v3  ;;  %v393_v14 = vld [vmem:[#allocation2 + $0x50] sm:$0xff]  ;;  %v395_v40 = vld [vmem:[#allocation2 + $0x60] sm:$0xff]  ;;  %v390_v43 = vld [vmem:[#allocation2 + $0x38] sm:$0xff] }
  0x23   : > { %v397_v38 = vld [vmem:[#allocation2 + $0x70] sm:$0xff]  ;;  %v398_v44 = vld [vmem:[#allocation2 + $0x78] sm:$0xff]  ;;  %v388_v49 = vld [vmem:[#allocation2 + $0x28] sm:$0xff] }
  0x24   : > { %v396_v50 = vld [vmem:[#allocation2 + $0x68] sm:$0xff]  ;;  %v1389_v62 = vld [vmem:[%s1485_s2] ss:$0 sm:$0xff] (!%p1033_p8) }
  0x25   : > { %1127 = vmatpush3.bf16.msra.mxu0 %v1197_v3  ;;  %1152 = vmatpush3.bf16.msra.mxu1 %v1197_v3  ;;  %v1394_v63 = vld [vmem:[%s1486_s3] ss:$0 sm:$0xff] (!%p1033_p8) }
  0x26   : > { %1128 = vmatprep.subr.bf16.mxu0 %v1198_v6  ;;  %1149 = vmatprep.subr.bf16.mxu1 %v1198_v6  ;;  %v1072_v1 = vld [vmem:[%s1325_s15] sm:$0xff] (!%p1033_p8)  }
  0x27   : > { %v1073_v4 = vunpack.c.l.bf16 (!%p1033_p8), %v1072_v1 }
  0x29   : > { %1129 = vmatpush3.bf16.msra.mxu0 %v1198_v6  ;;  %1153 = vmatpush3.bf16.msra.mxu1 %v1198_v6  ;;  %v1074_v6 = vunpack.c.h.bf16 (!%p1033_p8), %v1072_v1 }
  0x2c   : > { %1131 = vmatmul.mubr.msk.bf16.vlgmr.msra.gmra.mrb[0].mxu0 %vm487_vm1, %v1201_v7  ;;  %1139 = vmatmul.mubr.msk.bf16.vlgmr.msra.gmra.mrb[0].mxu1 %vm487_vm1, %v1202_v8  ;;  %v1103_v8 = vld [vmem:[%s1325_s15 + $0x8] sm:$0xff] (!%p1033_p8)  }
  0x2d   : > { %1134 = vmatprep.mubr.msk.bf16.mxu0 %vm487_vm1, %v1203_v9  ;;  %1142 = vmatprep.mubr.msk.bf16.mxu1 %vm487_vm1, %v1204_v10 }
  0x34   : > { %1135 = vmatmul.mubr.msk.bf16.gmra.mrb[4].mxu0 %vm487_vm1, %v1205_v11  ;;  %1143 = vmatmul.mubr.msk.bf16.gmra.mrb[4].mxu1 %vm487_vm1, %v1206_v12  ;;  %v1077_v12 = vunpack.c.l.bf16 (!%p1033_p8), %v1103_v8 }
  0xff   : > { %v1132_v17 = vpop.f32.mrb[0].mxu0  ;;  %v1140_v18 = vpop.f32.mrb[0].mxu1 }
 0x100   : > { %v611_v21 = vadd.f32 %v1132_v17, %v385_v13  ;;  %v619_v22 = vadd.f32 %v1140_v18, %v393_v14  ;;  %v546_v23 = vpop.f32.mrb[1].mxu0  ;;  %v578_v24 = vpop.f32.mrb[1].mxu1  ;;  %v1078_v14 = vunpack.c.h.bf16 (!%p1033_p8), %v1103_v8 }
 0x101   : > { %v609_v27 = vadd.f32 %v546_v23, %v383_v15  ;;  %v617_v28 = vadd.f32 %v578_v24, %v391_v16  ;;  %v1133_v29 = vpop.f32.mrb[2].mxu0  ;;  %v1141_v30 = vpop.f32.mrb[2].mxu1  ;;  %v1104_v15 = vld [vmem:[%s1325_s15 + $0x10] sm:$0xff] (!%p1033_p8)  }
 0x102   : > { %627 = vst.msk [vmem:[#allocation2 + $0x10] sm:$0xff] %vm487_vm1, %v611_v21  ;;  %635 = vst.msk [vmem:[#allocation2 + $0x50] sm:$0xff] %vm487_vm1, %v619_v22  ;;  %v612_v31 = vadd.f32 %v1133_v29, %v386_v19  ;;  %v620_v32 = vadd.f32 %v1141_v30, %v394_v20  ;;  %v549_v33 = vpop.f32.mrb[3].mxu0  ;;  %v581_v34 = vpop.f32.mrb[3].mxu1  ;;  %v1081_v21 = vunpack.c.l.bf16 (!%p1033_p8), %v1104_v15  ;;  %v1105_v22 = vld [vmem:[%s1325_s15 + $0x18] sm:$0xff] (!%p1033_p8)  }
 0x103   : > { %625 = vst.msk [vmem:[#allocation2] sm:$0xff] %vm487_vm1, %v609_v27  ;;  %633 = vst.msk [vmem:[#allocation2 + $0x40] sm:$0xff] %vm487_vm1, %v617_v28  ;;  %v610_v35 = vadd.f32 %v549_v33, %v384_v25  ;;  %v618_v36 = vadd.f32 %v581_v34, %v392_v26  ;;  %v1082_v26 = vunpack.c.h.bf16 (!%p1033_p8), %v1104_v15 }
 0x104   : > { %628 = vst.msk [vmem:[#allocation2 + $0x18] sm:$0xff] %vm487_vm1, %v612_v31  ;;  %636 = vst.msk [vmem:[#allocation2 + $0x58] sm:$0xff] %vm487_vm1, %v620_v32 }
 0x105   : > { %626 = vst.msk [vmem:[#allocation2 + $0x8] sm:$0xff] %vm487_vm1, %v610_v35  ;;  %634 = vst.msk [vmem:[#allocation2 + $0x48] sm:$0xff] %vm487_vm1, %v618_v36  ;;  %v1085_v35 = vunpack.c.l.bf16 (!%p1033_p8), %v1105_v22 }
 0x107   : > { %v1136_v41 = vpop.f32.mrb[4].mxu0  ;;  %v1144_v42 = vpop.f32.mrb[4].mxu1  ;;  %644 = sbr.rel (%p1033_p8) target bundleno = 297 (0x129), region = 48 }
 0x108   : > { %v615_v45 = vadd.f32 %v1136_v41, %v389_v37  ;;  %v623_v46 = vadd.f32 %v1144_v42, %v397_v38  ;;  %v562_v47 = vpop.f32.mrb[5].mxu0  ;;  %v594_v48 = vpop.f32.mrb[5].mxu1 }
 0x109   : > { %v613_v51 = vadd.f32 %v562_v47, %v387_v39  ;;  %v621_v52 = vadd.f32 %v594_v48, %v395_v40  ;;  %v1137_v53 = vpop.f32.mrb[6].mxu0  ;;  %v1145_v54 = vpop.f32.mrb[6].mxu1  ;;  %v647_v3 = vld [vmem:[#allocation2 + $0x10] sm:$0xff] (!%p1033_p8) }
 0x10a   : > { %631 = vst.msk [vmem:[#allocation2 + $0x30] sm:$0xff] %vm487_vm1, %v615_v45  ;;  %639 = vst.msk [vmem:[#allocation2 + $0x70] sm:$0xff] %vm487_vm1, %v623_v46  ;;  %v616_v55 = vadd.f32 %v1137_v53, %v390_v43  ;;  %v624_v56 = vadd.f32 %v1145_v54, %v398_v44  ;;  %v565_v57 = vpop.f32.mrb[7].mxu0  ;;  %v597_v58 = vpop.f32.mrb[7].mxu1  ;;  %v645_v61 = vld [vmem:[#allocation2] sm:$0xff] (!%p1033_p8)  ;;  %v670_v7 = vmul.f32 (!%p1033_p8), %v1389_v62, %v647_v3  ;;  %v1086_v54 = vunpack.c.h.bf16 (!%p1033_p8), %v1105_v22 }
 0x10b   : > { %629 = vst.msk [vmem:[#allocation2 + $0x20] sm:$0xff] %vm487_vm1, %v613_v51  ;;  %637 = vst.msk [vmem:[#allocation2 + $0x60] sm:$0xff] %vm487_vm1, %v621_v52  ;;  %v614_v59 = vadd.f32 %v565_v57, %v388_v49  ;;  %v622_v60 = vadd.f32 %v597_v58, %v396_v50  ;;  %v668_v0 = vmul.f32 (!%p1033_p8), %v1389_v62, %v645_v61  ;;  %v648_v9 = vld [vmem:[#allocation2 + $0x18] sm:$0xff] (!%p1033_p8)  ;;  %v653_v44 = vld [vmem:[#allocation2 + $0x40] sm:$0xff] (!%p1033_p8) }
 0x10c   : > { %632 = vst.msk [vmem:[#allocation2 + $0x38] sm:$0xff] %vm487_vm1, %v616_v55  ;;  %640 = vst.msk [vmem:[#allocation2 + $0x78] sm:$0xff] %vm487_vm1, %v624_v56  ;;  %v646_v2 = vld [vmem:[#allocation2 + $0x8] sm:$0xff] (!%p1033_p8)  ;;  %v671_v13 = vmul.f32 (!%p1033_p8), %v1389_v62, %v648_v9  ;;  %v693_v19 = vadd.f32 (!%p1033_p8), %v1394_v63, %v670_v7  ;;  %v1106_v45 = vld [vmem:[%s1325_s15 + $0x20] sm:$0xff] (!%p1033_p8)  }
 0x10d   : > { %630 = vst.msk [vmem:[#allocation2 + $0x28] sm:$0xff] %vm487_vm1, %v614_v59  ;;  %638 = vst.msk [vmem:[#allocation2 + $0x68] sm:$0xff] %vm487_vm1, %v622_v60  ;;  %v669_v5 = vmul.f32 (!%p1033_p8), %v1389_v62, %v646_v2  ;;  %v691_v11 = vadd.f32 (!%p1033_p8), %v1394_v63, %v668_v0  ;;  %v654_v50 = vld [vmem:[#allocation2 + $0x48] sm:$0xff] (!%p1033_p8)  ;;  %v655_v55 = vld [vmem:[#allocation2 + $0x50] sm:$0xff] (!%p1033_p8)  ;;  %v676_v59 = vmul.f32 (!%p1033_p8), %v1389_v62, %v653_v44  ;;  %v1089_v60 = vunpack.c.l.bf16 (!%p1033_p8), %v1106_v45 }
 0x10e   : > { %v694_v24 = vadd.f32 %v1394_v63, %v671_v13  ;;  %v741_v28 = vadd.f32 %v1077_v12, %v693_v19  ;;  %v1107_v56 = vld [vmem:[%s1325_s15 + $0x28] sm:$0xff]   ;;  %v656_v61 = vld [vmem:[#allocation2 + $0x58] sm:$0xff]  ;;  %v677_v2 = vmul.f32 %v1389_v62, %v654_v50  ;;  %v1090_v3 = vunpack.c.h.bf16 %v1106_v45 }
 0x10f   : > { %v692_v18 = vadd.f32 %v1394_v63, %v669_v5  ;;  %v739_v23 = vadd.f32 %v1073_v4, %v691_v11  ;;  %v1108_v5 = vld [vmem:[%s1325_s15 + $0x30] sm:$0xff]   ;;  %v699_v7 = vadd.f32 %v1394_v63, %v676_v59  ;;  %v678_v8 = vmul.f32 %v1389_v62, %v655_v55 }
 0x110   : > { %v742_v33 = vadd.f32 %v1078_v14, %v694_v24  ;;  %v757_v37 = vmax.f32 %v741_v28, 0.0  ;;  %v1093_v9 = vunpack.c.l.bf16 %v1107_v56  ;;  %v700_v12 = vadd.f32 %v1394_v63, %v677_v2  ;;  %v1109_v24 = vld [vmem:[%s1325_s15 + $0x38] sm:$0xff]  }
 0x111   : > { %v651_v17 = vld [vmem:[#allocation2 + $0x30] sm:$0xff]  ;;  %v740_v27 = vadd.f32 %v1074_v6, %v692_v18  ;;  %v755_v32 = vmax.f32 %v739_v23, 0.0  ;;  %v679_v13 = vmul.f32 %v1389_v62, %v656_v61  ;;  %v1094_v14 = vunpack.c.h.bf16 %v1107_v56 }
 0x112   : > { %v649_v10 = vld [vmem:[#allocation2 + $0x20] sm:$0xff]  ;;  %v674_v30 = vmul.f32 %v1389_v62, %v651_v17  ;;  %v758_v41 = vmax.f32 %v742_v33, 0.0  ;;  %v1057_v47 = vpack.c.bf16 %v757_v37, %v757_v37  ;;  %v747_v15 = vadd.f32 %v1089_v60, %v699_v7  ;;  %v659_v19 = vld [vmem:[#allocation2 + $0x70] sm:$0xff] }
 0x113   : > { %v672_v20 = vmul.f32 %v1389_v62, %v649_v10  ;;  %v652_v31 = vld [vmem:[#allocation2 + $0x38] sm:$0xff]  ;;  %v756_v36 = vmax.f32 %v740_v27, 0.0  ;;  %v1055_v40 = vpack.c.bf16 %v755_v32, %v755_v32  ;;  %v657_v4 = vld [vmem:[#allocation2 + $0x60] sm:$0xff]  ;;  %v1097_v18 = vunpack.c.l.bf16 %v1108_v5 }
 0x114   : > { %v650_v16 = vld [vmem:[#allocation2 + $0x28] sm:$0xff]  ;;  %v697_v39 = vadd.f32 %v1394_v63, %v674_v30  ;;  %v675_v43 = vmul.f32 %v1389_v62, %v652_v31  ;;  %v1058_v51 = vpack.c.bf16 %v758_v41, %v758_v41  ;;  %838 = vst.msk [vmem:[%s1330_s19 + $0x8] sm:$0xf] %vm835_vm2, %v1057_v47  ;;  %v680_v17 = vmul.f32 %v1389_v62, %v657_v4  ;;  %v660_v33 = vld [vmem:[#allocation2 + $0x78] sm:$0xff] }
 0x115   : > { %v673_v25 = vmul.f32 %v1389_v62, %v650_v16  ;;  %v695_v29 = vadd.f32 %v1394_v63, %v672_v20  ;;  %v1056_v46 = vpack.c.bf16 %v756_v36, %v756_v36  ;;  %836 = vst.msk [vmem:[%s1330_s19] sm:$0xf] %vm835_vm2, %v1055_v40  ;;  %v658_v10 = vld [vmem:[#allocation2 + $0x68] sm:$0xff]  ;;  %v701_v16 = vadd.f32 %v1394_v63, %v678_v8 }
 0x116   : > { %v745_v49 = vadd.f32 %v1085_v35, %v697_v39  ;;  %v698_v53 = vadd.f32 %v1394_v63, %v675_v43  ;;  %839 = vst.msk [vmem:[%s1330_s19 + $0xc] sm:$0xf] %vm835_vm2, %v1058_v51  ;;  %v702_v22 = vadd.f32 %v1394_v63, %v679_v13  ;;  %v681_v23 = vmul.f32 %v1389_v62, %v658_v10 }
 0x117   : > { %v696_v34 = vadd.f32 %v1394_v63, %v673_v25  ;;  %v743_v38 = vadd.f32 %v1081_v21, %v695_v29  ;;  %837 = vst.msk [vmem:[%s1330_s19 + $0x4] sm:$0xf] %vm835_vm2, %v1056_v46  ;;  %v748_v21 = vadd.f32 %v1090_v3, %v700_v12  ;;  %v763_v25 = vmax.f32 %v747_v15, 0.0 }
 0x118   : > { %v761_v58 = vmax.f32 %v745_v49, 0.0  ;;  %v746_v1 = vadd.f32 %v1086_v54, %v698_v53  ;;  %v703_v27 = vadd.f32 %v1394_v63, %v680_v17  ;;  %v1098_v28 = vunpack.c.h.bf16 %v1108_v5 }
 0x119   : > { %v744_v42 = vadd.f32 %v1082_v26, %v696_v34  ;;  %v759_v48 = vmax.f32 %v743_v38, 0.0  ;;  %v749_v26 = vadd.f32 %v1093_v9, %v701_v16  ;;  %v764_v29 = vmax.f32 %v748_v21, 0.0 }
 0x11a   : > { %v1061_v6 = vpack.c.bf16 %v761_v58, %v761_v58  ;;  %v762_v11 = vmax.f32 %v746_v1, 0.0  ;;  %v750_v30 = vadd.f32 %v1094_v14, %v702_v22  ;;  %v704_v31 = vadd.f32 %v1394_v63, %v681_v23 }
 0x11b   : > { %v760_v52 = vmax.f32 %v744_v42, 0.0  ;;  %v1059_v57 = vpack.c.bf16 %v759_v48, %v759_v48  ;;  %v682_v32 = vmul.f32 %v1389_v62, %v659_v19  ;;  %v1063_v34 = vpack.c.bf16 %v763_v25, %v763_v25 }
 0x11c   : > { %842 = vst.msk [vmem:[%s1330_s19 + $0x18] sm:$0xf] %vm835_vm2, %v1061_v6  ;;  %v1062_v20 = vpack.c.bf16 %v762_v11, %v762_v11  ;;  %v765_v35 = vmax.f32 %v749_v26, 0.0  ;;  %v751_v36 = vadd.f32 %v1097_v18, %v703_v27  ;;  %v1101_v37 = vunpack.c.l.bf16 %v1109_v24 }
 0x11d   : > { %v1060_v0 = vpack.c.bf16 %v760_v52, %v760_v52  ;;  %840 = vst.msk [vmem:[%s1330_s19 + $0x10] sm:$0xf] %vm835_vm2, %v1059_v57  ;;  %v1064_v38 = vpack.c.bf16 %v764_v29, %v764_v29  ;;  %v766_v39 = vmax.f32 %v750_v30, 0.0  ;;  %v752_v40 = vadd.f32 %v1098_v28, %v704_v31  ;;  %844 = vst.msk [vmem:[%s1330_s19 + $0x20] sm:$0xf] %vm835_vm2, %v1063_v34 }
 0x11e   : > { %843 = vst.msk [vmem:[%s1330_s19 + $0x1c] sm:$0xf] %vm835_vm2, %v1062_v20  ;;  %v705_v41 = vadd.f32 %v1394_v63, %v682_v32  ;;  %v1065_v42 = vpack.c.bf16 %v765_v35, %v765_v35  ;;  %v767_v43 = vmax.f32 %v751_v36, 0.0  ;;  %v683_v44 = vmul.f32 %v1389_v62, %v660_v33 }
 0x11f   : > { %841 = vst.msk [vmem:[%s1330_s19 + $0x14] sm:$0xf] %vm835_vm2, %v1060_v0  ;;  %v1102_v45 = vunpack.c.h.bf16 %v1109_v24  ;;  %845 = vst.msk [vmem:[%s1330_s19 + $0x24] sm:$0xf] %vm835_vm2, %v1064_v38  ;;  %v1066_v46 = vpack.c.bf16 %v766_v39, %v766_v39  ;;  %v768_v47 = vmax.f32 %v752_v40, 0.0 }
 0x120   : > { %v753_v48 = vadd.f32 %v1101_v37, %v705_v41  ;;  %846 = vst.msk [vmem:[%s1330_s19 + $0x28] sm:$0xf] %vm835_vm2, %v1065_v42  ;;  %v1067_v49 = vpack.c.bf16 %v767_v43, %v767_v43  ;;  %v706_v50 = vadd.f32 %v1394_v63, %v683_v44 }
 0x121   : > { %847 = vst.msk [vmem:[%s1330_s19 + $0x2c] sm:$0xf] %vm835_vm2, %v1066_v46  ;;  %v1068_v51 = vpack.c.bf16 %v768_v47, %v768_v47 }
 0x122   : > { %v769_v52 = vmax.f32 %v753_v48, 0.0  ;;  %848 = vst.msk [vmem:[%s1330_s19 + $0x30] sm:$0xf] %vm835_vm2, %v1067_v49  ;;  %v754_v62 = vadd.f32 %v1102_v45, %v706_v50 }
 0x123   : > { %849 = vst.msk [vmem:[%s1330_s19 + $0x34] sm:$0xf] %vm835_vm2, %v1068_v51 }
 0x124   : > { %v1069_v53 = vpack.c.bf16 %v769_v52, %v769_v52  ;;  %v770_v54 = vmax.f32 %v754_v62, 0.0 }
 0x126   : > { %850 = vst.msk [vmem:[%s1330_s19 + $0x38] sm:$0xf] %vm835_vm2, %v1069_v53  ;;  %v1070_v55 = vpack.c.bf16 %v770_v54, %v770_v54 }
 0x128   : > { %851 = vst.msk [vmem:[%s1330_s19 + $0x3c] sm:$0xf] %vm835_vm2, %v1070_v55 }
 0x129 PF: > { %s15_s22 = sadd.s32 1, %s1245_s22   ;;  %s1489_s18 = smov %s1237_s20 }
 0x12a   : > { %p12_p9 = scmp.ge.s32.totalorder %s15_s22, 38   ;;  %s1490_s19 = smov %s1241_s21 }
 0x12b   : > { %s1491_s20 = smov %s1494_s23  ;;  %s1492_s21 = smov %s1498_s24 }
 0x12c   :  { %14 = sbr.rel (!%p12_p9) target bundleno = 3 (0x3), region = 90 }

// kernel: forward.47
= control target key start
LH: loop header
LB: loop body
LE: loop exit
PB: predicated region body
PF: predicated region fallthrough
CT: control target
= control target key end

     0   :  { %s1115_s15 = smov 0   ;;  %s1117_s16 = smov 0   ;;  %s1244_s0 = inlined_call_operand.vmem [shape: bf16[9,128,64], index: 0, kind: input, shape index: {}]   ;;  %s1245_s1 = inlined_call_operand.vmem [shape: bf16[9,64,128], index: 1, kind: input, shape index: {}]   ;;  %s1246_s2 = inlined_call_operand.vmem [shape: f32[1,128], index: 2, kind: input, shape index: {}]   ;;  %s1247_s3 = inlined_call_operand.vmem [shape: f32[1,128], index: 3, kind: input, shape index: {}]   ;;  %s1248_s4 = inlined_call_operand.vmem [shape: bf16[128,128], index: 4, kind: output, shape index: {}]  }
   0x1   :  { %s1119_s17 = smov 0  }
   0x2 LB: > { %s26_s18 = sadd.s32 1, %s1083_s16  ;;  %p870_p0 = scmp.ge.s32.totalorder %s1087_s17, 1  ;;  %s1087_s17 = sphi %s1119_s17, %s14_s17   ;;  %s1083_s16 = sphi %s1117_s16, %s1250_s16   ;;  %s1079_s15 = sphi %s1115_s15, %s1249_s15  }
   0x3   : > { %p27_p1 = scmp.ge.s32.totalorder %s26_s18, 9  ;;  %p221_p2 = scmp.lt.s32.totalorder %s1087_s17, 10 }
   0x5   : > { %s1252_s18 = smov (%p27_p1, %s26_s18), 0  ;;  %p222_p3 = pnand %p870_p0, %p221_p2 }
   0x6   : > { %p269_p4 = scmp.lt.s32.totalorder (!%p222_p3), %s1079_s15, 8  ;;  %p875_p5 = scmp.ne.s32.totalorder (!%p222_p3), %s1079_s15, 0 }
   0x7   : > { %225 = sbr.rel (%p222_p3) target bundleno = 284 (0x11c), region = 36 }
   0xe   : > { %s270_s19 = scalar_select %p269_p4, %s1079_s15, 8 }
   0xf   : > { %305 = sbr.rel (%p875_p5) target bundleno = 24 (0x18), region = 40  ;;  %v1089_v0 = vmov (!%p875_p5), 0.0  }
  0x10   : > { %s919_s20 = sshll.u32 %s270_s19, 6  ;;  %s920_s21 = sshll.u32 %s270_s19, 5  ;;  %306 = vst [vmem:[#allocation2] sm:$0xff] (!%p875_p5), %v1089_v0  ;;  %307 = vst [vmem:[#allocation2 + $0x8] sm:$0xff] (!%p875_p5), %v1089_v0 }
  0x11   : > { %s1140_s24 = scalar_lea.vmem %s1244_s0, %s919_s20  ;;  %s1145_s27 = scalar_lea.vmem %s1245_s1, %s920_s21  ;;  %308 = vst [vmem:[#allocation2 + $0x10] sm:$0xff] (!%p875_p5), %v1089_v0  ;;  %309 = vst [vmem:[#allocation2 + $0x18] sm:$0xff] (!%p875_p5), %v1089_v0 }
  0x12   : > { %310 = vst [vmem:[#allocation2 + $0x20] sm:$0xff] (!%p875_p5), %v1089_v0  ;;  %311 = vst [vmem:[#allocation2 + $0x28] sm:$0xff] (!%p875_p5), %v1089_v0 }
  0x13   : > { %312 = vst [vmem:[#allocation2 + $0x30] sm:$0xff] (!%p875_p5), %v1089_v0  ;;  %313 = vst [vmem:[#allocation2 + $0x38] sm:$0xff] (!%p875_p5), %v1089_v0 }
  0x14   : > { %314 = vst [vmem:[#allocation2 + $0x40] sm:$0xff] (!%p875_p5), %v1089_v0  ;;  %315 = vst [vmem:[#allocation2 + $0x48] sm:$0xff] (!%p875_p5), %v1089_v0 }
  0x15   : > { %316 = vst [vmem:[#allocation2 + $0x50] sm:$0xff] (!%p875_p5), %v1089_v0  ;;  %317 = vst [vmem:[#allocation2 + $0x58] sm:$0xff] (!%p875_p5), %v1089_v0 }
  0x16   : > { %318 = vst [vmem:[#allocation2 + $0x60] sm:$0xff] %v1089_v0  ;;  %319 = vst [vmem:[#allocation2 + $0x68] sm:$0xff] %v1089_v0 }
  0x17   : > { %320 = vst [vmem:[#allocation2 + $0x70] sm:$0xff] %v1089_v0  ;;  %321 = vst [vmem:[#allocation2 + $0x78] sm:$0xff] %v1089_v0 }
  0x18 PF: > { %v1053_v1 = vld [vmem:[%s1145_s27] sm:$0xff]   ;;  %v1054_v2 = vld [vmem:[%s1145_s27 + $0x8] sm:$0xff]   ;;  %v1055_v3 = vld [vmem:[%s1145_s27 + $0x10] sm:$0xff]   ;;  %vm426_vm0 = vcmask 523264   ;;  %p896_p6 = scmp.ne.s32.totalorder %s1079_s15, 8 }
  0x19   : > { %996 = vmatprep.subr.bf16.mxu0 %v1053_v1  ;;  %1020 = vmatprep.subr.bf16.mxu1 %v1053_v1  ;;  %v1057_v4 = vld [vmem:[%s1140_s24] sm:$0xff]   ;;  %v1056_v6 = vld [vmem:[%s1145_s27 + $0x18] sm:$0xff]   ;;  %v1059_v7 = vld [vmem:[%s1140_s24 + $0x8] sm:$0xff]  }
  0x1a   : > { %997 = vmatpush3.bf16.msra.mxu0 %v1053_v1  ;;  %1024 = vmatpush3.bf16.msra.mxu1 %v1053_v1  ;;  %v1058_v5 = vld [vmem:[%s1140_s24 + $0x20] sm:$0xff]   ;;  %v1060_v8 = vld [vmem:[%s1140_s24 + $0x28] sm:$0xff]   ;;  %v1061_v9 = vld [vmem:[%s1140_s24 + $0x10] sm:$0xff]  }
  0x1b   : > { %998 = vmatprep.subr.bf16.mxu0 %v1054_v2  ;;  %1021 = vmatprep.subr.bf16.mxu1 %v1054_v2  ;;  %v1062_v10 = vld [vmem:[%s1140_s24 + $0x30] sm:$0xff]   ;;  %v1063_v11 = vld [vmem:[%s1140_s24 + $0x18] sm:$0xff]   ;;  %v322_v15 = vld [vmem:[#allocation2] sm:$0xff] }
  0x1c   : > { %1004 = vmatprep.mubr.msk.bf16.mxu0 %vm426_vm0, %v1057_v4  ;;  %1012 = vmatprep.mubr.msk.bf16.mxu1 %vm426_vm0, %v1058_v5  ;;  %v1064_v12 = vld [vmem:[%s1140_s24 + $0x38] sm:$0xff]   ;;  %v324_v13 = vld [vmem:[#allocation2 + $0x10] sm:$0xff]  ;;  %v323_v25 = vld [vmem:[#allocation2 + $0x8] sm:$0xff] }
  0x1d   : > { %v330_v16 = vld [vmem:[#allocation2 + $0x40] sm:$0xff]  ;;  %v325_v19 = vld [vmem:[#allocation2 + $0x18] sm:$0xff]  ;;  %v331_v26 = vld [vmem:[#allocation2 + $0x48] sm:$0xff] }
  0x1e   : > { %999 = vmatpush3.bf16.msra.mxu0 %v1054_v2  ;;  %1025 = vmatpush3.bf16.msra.mxu1 %v1054_v2  ;;  %v332_v14 = vld [vmem:[#allocation2 + $0x50] sm:$0xff]  ;;  %v333_v20 = vld [vmem:[#allocation2 + $0x58] sm:$0xff]  ;;  %v326_v39 = vld [vmem:[#allocation2 + $0x20] sm:$0xff] }
  0x1f   : > { %1000 = vmatprep.subr.bf16.mxu0 %v1055_v3  ;;  %1022 = vmatprep.subr.bf16.mxu1 %v1055_v3  ;;  %v328_v37 = vld [vmem:[#allocation2 + $0x30] sm:$0xff]  ;;  %v334_v40 = vld [vmem:[#allocation2 + $0x60] sm:$0xff]  ;;  %v329_v43 = vld [vmem:[#allocation2 + $0x38] sm:$0xff] }
  0x20   : > { %v336_v38 = vld [vmem:[#allocation2 + $0x70] sm:$0xff]  ;;  %v337_v44 = vld [vmem:[#allocation2 + $0x78] sm:$0xff]  ;;  %v327_v49 = vld [vmem:[#allocation2 + $0x28] sm:$0xff] }
  0x21   : > { %v335_v50 = vld [vmem:[#allocation2 + $0x68] sm:$0xff]  ;;  %v1172_v63 = vld [vmem:[%s1246_s2] ss:$0 sm:$0xff] (!%p896_p6) }
  0x22   : > { %1001 = vmatpush3.bf16.msra.mxu0 %v1055_v3  ;;  %1026 = vmatpush3.bf16.msra.mxu1 %v1055_v3  ;;  %v1179_v2 = vld [vmem:[%s1247_s3] ss:$0 sm:$0xff] (!%p896_p6) }
  0x23   : > { %1002 = vmatprep.subr.bf16.mxu0 %v1056_v6  ;;  %1023 = vmatprep.subr.bf16.mxu1 %v1056_v6 }
  0x26   : > { %1003 = vmatpush3.bf16.msra.mxu0 %v1056_v6  ;;  %1027 = vmatpush3.bf16.msra.mxu1 %v1056_v6 }
  0x29   : > { %1005 = vmatmul.mubr.msk.bf16.vlgmr.msra.gmra.mrb[0].mxu0 %vm426_vm0, %v1059_v7  ;;  %1013 = vmatmul.mubr.msk.bf16.vlgmr.msra.gmra.mrb[0].mxu1 %vm426_vm0, %v1060_v8 }
  0x2a   : > { %1008 = vmatprep.mubr.msk.bf16.mxu0 %vm426_vm0, %v1061_v9  ;;  %1016 = vmatprep.mubr.msk.bf16.mxu1 %vm426_vm0, %v1062_v10 }
  0x31   : > { %1009 = vmatmul.mubr.msk.bf16.gmra.mrb[4].mxu0 %vm426_vm0, %v1063_v11  ;;  %1017 = vmatmul.mubr.msk.bf16.gmra.mrb[4].mxu1 %vm426_vm0, %v1064_v12 }
  0xfc   : > { %v1006_v17 = vpop.f32.mrb[0].mxu0  ;;  %v1014_v18 = vpop.f32.mrb[0].mxu1 }
  0xfd   : > { %v550_v21 = vadd.f32 %v1006_v17, %v324_v13  ;;  %v558_v22 = vadd.f32 %v1014_v18, %v332_v14  ;;  %v485_v23 = vpop.f32.mrb[1].mxu0  ;;  %v517_v24 = vpop.f32.mrb[1].mxu1 }
  0xfe   : > { %v548_v27 = vadd.f32 %v485_v23, %v322_v15  ;;  %v556_v28 = vadd.f32 %v517_v24, %v330_v16  ;;  %v1007_v29 = vpop.f32.mrb[2].mxu0  ;;  %v1015_v30 = vpop.f32.mrb[2].mxu1 }
  0xff   : > { %566 = vst [vmem:[#allocation2 + $0x10] sm:$0xff] %v550_v21  ;;  %574 = vst [vmem:[#allocation2 + $0x50] sm:$0xff] %v558_v22  ;;  %v551_v31 = vadd.f32 %v1007_v29, %v325_v19  ;;  %v559_v32 = vadd.f32 %v1015_v30, %v333_v20  ;;  %v488_v33 = vpop.f32.mrb[3].mxu0  ;;  %v520_v34 = vpop.f32.mrb[3].mxu1 }
 0x100   : > { %564 = vst [vmem:[#allocation2] sm:$0xff] %v548_v27  ;;  %572 = vst [vmem:[#allocation2 + $0x40] sm:$0xff] %v556_v28  ;;  %v549_v35 = vadd.f32 %v488_v33, %v323_v25  ;;  %v557_v36 = vadd.f32 %v520_v34, %v331_v26 }
 0x101   : > { %567 = vst [vmem:[#allocation2 + $0x18] sm:$0xff] %v551_v31  ;;  %575 = vst [vmem:[#allocation2 + $0x58] sm:$0xff] %v559_v32 }
 0x102   : > { %565 = vst [vmem:[#allocation2 + $0x8] sm:$0xff] %v549_v35  ;;  %573 = vst [vmem:[#allocation2 + $0x48] sm:$0xff] %v557_v36 }
 0x104   : > { %v1010_v41 = vpop.f32.mrb[4].mxu0  ;;  %v1018_v42 = vpop.f32.mrb[4].mxu1  ;;  %583 = sbr.rel (%p896_p6) target bundleno = 284 (0x11c), region = 44 }
 0x105   : > { %v554_v45 = vadd.f32 %v1010_v41, %v328_v37  ;;  %v562_v46 = vadd.f32 %v1018_v42, %v336_v38  ;;  %v501_v47 = vpop.f32.mrb[5].mxu0  ;;  %v533_v48 = vpop.f32.mrb[5].mxu1 }
 0x106   : > { %v552_v51 = vadd.f32 %v501_v47, %v326_v39  ;;  %v560_v52 = vadd.f32 %v533_v48, %v334_v40  ;;  %v1011_v53 = vpop.f32.mrb[6].mxu0  ;;  %v1019_v54 = vpop.f32.mrb[6].mxu1  ;;  %v586_v3 = vld [vmem:[#allocation2 + $0x10] sm:$0xff] (!%p896_p6) }
 0x107   : > { %570 = vst [vmem:[#allocation2 + $0x30] sm:$0xff] %v554_v45  ;;  %578 = vst [vmem:[#allocation2 + $0x70] sm:$0xff] %v562_v46  ;;  %v555_v55 = vadd.f32 %v1011_v53, %v329_v43  ;;  %v563_v56 = vadd.f32 %v1019_v54, %v337_v44  ;;  %v504_v57 = vpop.f32.mrb[7].mxu0  ;;  %v536_v58 = vpop.f32.mrb[7].mxu1  ;;  %v584_v61 = vld [vmem:[#allocation2] sm:$0xff] (!%p896_p6)  ;;  %v609_v5 = vmul.f32 (!%p896_p6), %v1172_v63, %v586_v3  ;;  %v594_v29 = vld [vmem:[#allocation2 + $0x50] sm:$0xff] (!%p896_p6) }
 0x108   : > { %568 = vst [vmem:[#allocation2 + $0x20] sm:$0xff] %v552_v51  ;;  %576 = vst [vmem:[#allocation2 + $0x60] sm:$0xff] %v560_v52  ;;  %v553_v59 = vadd.f32 %v504_v57, %v327_v49  ;;  %v561_v60 = vadd.f32 %v536_v58, %v335_v50  ;;  %v607_v0 = vmul.f32 (!%p896_p6), %v1172_v63, %v584_v61  ;;  %v587_v4 = vld [vmem:[#allocation2 + $0x18] sm:$0xff] (!%p896_p6)  ;;  %v592_v19 = vld [vmem:[#allocation2 + $0x40] sm:$0xff] (!%p896_p6) }
 0x109   : > { %571 = vst [vmem:[#allocation2 + $0x38] sm:$0xff] %v555_v55  ;;  %579 = vst [vmem:[#allocation2 + $0x78] sm:$0xff] %v563_v56  ;;  %v585_v62 = vld [vmem:[#allocation2 + $0x8] sm:$0xff] (!%p896_p6)  ;;  %v610_v6 = vmul.f32 (!%p896_p6), %v1172_v63, %v587_v4  ;;  %v632_v15 = vadd.f32 (!%p896_p6), %v1179_v2, %v609_v5  ;;  %v595_v30 = vld [vmem:[#allocation2 + $0x58] sm:$0xff] (!%p896_p6)  ;;  %v615_v34 = vmul.f32 (!%p896_p6), %v1172_v63, %v592_v19 }
 0x10a   : > { %569 = vst [vmem:[#allocation2 + $0x28] sm:$0xff] %v553_v59  ;;  %577 = vst [vmem:[#allocation2 + $0x68] sm:$0xff] %v561_v60  ;;  %v608_v1 = vmul.f32 (!%p896_p6), %v1172_v63, %v585_v62  ;;  %v630_v10 = vadd.f32 (!%p896_p6), %v1179_v2, %v607_v0  ;;  %v593_v24 = vld [vmem:[#allocation2 + $0x48] sm:$0xff] (!%p896_p6)  ;;  %v617_v44 = vmul.f32 (!%p896_p6), %v1172_v63, %v594_v29 }
 0x10b   : > { %v633_v16 = vadd.f32 %v1179_v2, %v610_v6  ;;  %v648_v25 = vmax.f32 %v632_v15, 0.0  ;;  %v616_v40 = vmul.f32 %v1172_v63, %v593_v24  ;;  %v638_v43 = vadd.f32 %v1179_v2, %v615_v34 }
 0x10c   : > { %v631_v11 = vadd.f32 %v1179_v2, %v608_v1  ;;  %v646_v20 = vmax.f32 %v630_v10, 0.0  ;;  %v618_v45 = vmul.f32 %v1172_v63, %v595_v30  ;;  %v640_v52 = vadd.f32 %v1179_v2, %v617_v44 }
 0x10d   : > { %v649_v26 = vmax.f32 %v633_v16, 0.0  ;;  %v639_v48 = vadd.f32 %v1179_v2, %v616_v40  ;;  %v654_v51 = vmax.f32 %v638_v43, 0.0 }
 0x10e   : > { %v590_v9 = vld [vmem:[#allocation2 + $0x30] sm:$0xff]  ;;  %v647_v21 = vmax.f32 %v631_v11, 0.0  ;;  %v641_v53 = vadd.f32 %v1179_v2, %v618_v45  ;;  %v656_v59 = vmax.f32 %v640_v52, 0.0 }
 0x10f   : > { %v588_v7 = vld [vmem:[#allocation2 + $0x20] sm:$0xff]  ;;  %v613_v17 = vmul.f32 %v1172_v63, %v590_v9  ;;  %v945_v37 = vpack.c.bf16 %v649_v26, %v648_v25  ;;  %v598_v41 = vld [vmem:[#allocation2 + $0x70] sm:$0xff]  ;;  %v655_v55 = vmax.f32 %v639_v48, 0.0 }
 0x110   : > { %v611_v12 = vmul.f32 %v1172_v63, %v588_v7  ;;  %v591_v14 = vld [vmem:[#allocation2 + $0x38] sm:$0xff]  ;;  %v940_v31 = vpack.c.bf16 %v647_v21, %v646_v20  ;;  %v596_v35 = vld [vmem:[#allocation2 + $0x60] sm:$0xff]  ;;  %v621_v54 = vmul.f32 %v1172_v63, %v598_v41  ;;  %v657_v60 = vmax.f32 %v641_v53, 0.0 }
 0x111   : > { %v589_v8 = vld [vmem:[#allocation2 + $0x28] sm:$0xff]  ;;  %v614_v18 = vmul.f32 %v1172_v63, %v591_v14  ;;  %v636_v27 = vadd.f32 %v1179_v2, %v613_v17  ;;  %v599_v46 = vld [vmem:[#allocation2 + $0x78] sm:$0xff]  ;;  %977 = vst [vmem:[%s1248_s4 + $0x8] sm:$0xff] %v945_v37   ;;  %v619_v49 = vmul.f32 %v1172_v63, %v596_v35  ;;  %v960_v62 = vpack.c.bf16 %v655_v55, %v654_v51 }
 0x112   : > { %v612_v13 = vmul.f32 %v1172_v63, %v589_v8  ;;  %v634_v22 = vadd.f32 %v1179_v2, %v611_v12  ;;  %v597_v36 = vld [vmem:[#allocation2 + $0x68] sm:$0xff]  ;;  %941 = vst [vmem:[%s1248_s4] sm:$0xff] %v940_v31   ;;  %v622_v58 = vmul.f32 %v1172_v63, %v599_v46  ;;  %v644_v61 = vadd.f32 %v1179_v2, %v621_v54 }
 0x113   : > { %v637_v28 = vadd.f32 %v1179_v2, %v614_v18  ;;  %v652_v38 = vmax.f32 %v636_v27, 0.0  ;;  %v620_v50 = vmul.f32 %v1172_v63, %v597_v36  ;;  %v642_v56 = vadd.f32 %v1179_v2, %v619_v49  ;;  %980 = vst [vmem:[%s1248_s4 + $0x20] sm:$0xff] %v960_v62  }
 0x114   : > { %v635_v23 = vadd.f32 %v1179_v2, %v612_v13  ;;  %v650_v32 = vmax.f32 %v634_v22, 0.0  ;;  %v645_v3 = vadd.f32 %v1179_v2, %v622_v58  ;;  %v965_v4 = vpack.c.bf16 %v657_v60, %v656_v59 }
 0x115   : > { %v653_v39 = vmax.f32 %v637_v28, 0.0  ;;  %v643_v57 = vadd.f32 %v1179_v2, %v620_v50  ;;  %v658_v0 = vmax.f32 %v642_v56, 0.0  ;;  %v660_v5 = vmax.f32 %v644_v61, 0.0 }
 0x116   : > { %v651_v33 = vmax.f32 %v635_v23, 0.0  ;;  %v661_v7 = vmax.f32 %v645_v3, 0.0  ;;  %981 = vst [vmem:[%s1248_s4 + $0x28] sm:$0xff] %v965_v4  }
 0x117   : > { %v955_v47 = vpack.c.bf16 %v653_v39, %v652_v38  ;;  %v659_v1 = vmax.f32 %v643_v57, 0.0 }
 0x118   : > { %v950_v42 = vpack.c.bf16 %v651_v33, %v650_v32  ;;  %v975_v63 = vpack.c.bf16 %v661_v7, %v660_v5 }
 0x119   : > { %979 = vst [vmem:[%s1248_s4 + $0x18] sm:$0xff] %v955_v47   ;;  %v970_v6 = vpack.c.bf16 %v659_v1, %v658_v0 }
 0x11a   : > { %978 = vst [vmem:[%s1248_s4 + $0x10] sm:$0xff] %v950_v42   ;;  %983 = vst [vmem:[%s1248_s4 + $0x38] sm:$0xff] %v975_v63  }
 0x11b   : > { %982 = vst [vmem:[%s1248_s4 + $0x30] sm:$0xff] %v970_v6  }
 0x11c PF: > { %s14_s17 = sadd.s32 1, %s1087_s17   ;;  %s1249_s15 = smov %s1083_s16 }
 0x11d   : > { %p11_p7 = scmp.ge.s32.totalorder %s14_s17, 11   ;;  %s1250_s16 = smov %s1252_s18 }
 0x11f   :  { %13 = sbr.rel (!%p11_p7) target bundleno = 2 (0x2), region = 83 }

// kernel: forward.49
= control target key start
LH: loop header
LB: loop body
LE: loop exit
PB: predicated region body
PF: predicated region fallthrough
CT: control target
= control target key end

     0   :  { %s1150_s15 = smov 0   ;;  %s1152_s16 = smov 0   ;;  %s1275_s0 = inlined_call_operand.vmem [shape: bf16[9,128,128], index: 0, kind: input, shape index: {}]   ;;  %s1276_s1 = inlined_call_operand.vmem [shape: bf16[9,128,128], index: 1, kind: input, shape index: {}]   ;;  %s1277_s2 = inlined_call_operand.vmem [shape: f32[1,128], index: 2, kind: input, shape index: {}]   ;;  %s1278_s3 = inlined_call_operand.vmem [shape: f32[1,128], index: 3, kind: input, shape index: {}]   ;;  %s1279_s4 = inlined_call_operand.vmem [shape: bf16[128,128], index: 4, kind: output, shape index: {}]  }
   0x1   :  { %s1154_s17 = smov 0  }
   0x2 LB: > { %s26_s18 = sadd.s32 1, %s1118_s16  ;;  %p885_p0 = scmp.ge.s32.totalorder %s1122_s17, 1  ;;  %s1122_s17 = sphi %s1154_s17, %s14_s17   ;;  %s1118_s16 = sphi %s1152_s16, %s1281_s16   ;;  %s1114_s15 = sphi %s1150_s15, %s1280_s15  }
   0x3   : > { %p27_p1 = scmp.ge.s32.totalorder %s26_s18, 9  ;;  %p221_p2 = scmp.lt.s32.totalorder %s1122_s17, 10 }
   0x5   : > { %s1283_s18 = smov (%p27_p1, %s26_s18), 0  ;;  %p222_p3 = pnand %p885_p0, %p221_p2 }
   0x6   : > { %p269_p4 = scmp.lt.s32.totalorder (!%p222_p3), %s1114_s15, 8  ;;  %p890_p5 = scmp.ne.s32.totalorder (!%p222_p3), %s1114_s15, 0 }
   0x7   : > { %225 = sbr.rel (%p222_p3) target bundleno = 300 (0x12c), region = 36 }
   0xe   : > { %s270_s19 = scalar_select %p269_p4, %s1114_s15, 8 }
   0xf   : > { %305 = sbr.rel (%p890_p5) target bundleno = 24 (0x18), region = 40  ;;  %v1124_v0 = vmov (!%p890_p5), 0.0  }
  0x10   : > { %s930_s20 = sshll.u32 %s270_s19, 6  ;;  %306 = vst [vmem:[#allocation2] sm:$0xff] (!%p890_p5), %v1124_v0  ;;  %307 = vst [vmem:[#allocation2 + $0x8] sm:$0xff] (!%p890_p5), %v1124_v0 }
  0x11   : > { %s1175_s23 = scalar_lea.vmem %s1275_s0, %s930_s20  ;;  %s1180_s26 = scalar_lea.vmem %s1276_s1, %s930_s20  ;;  %308 = vst [vmem:[#allocation2 + $0x10] sm:$0xff] (!%p890_p5), %v1124_v0  ;;  %309 = vst [vmem:[#allocation2 + $0x18] sm:$0xff] (!%p890_p5), %v1124_v0 }
  0x12   : > { %310 = vst [vmem:[#allocation2 + $0x20] sm:$0xff] (!%p890_p5), %v1124_v0  ;;  %311 = vst [vmem:[#allocation2 + $0x28] sm:$0xff] (!%p890_p5), %v1124_v0 }
  0x13   : > { %312 = vst [vmem:[#allocation2 + $0x30] sm:$0xff] (!%p890_p5), %v1124_v0  ;;  %313 = vst [vmem:[#allocation2 + $0x38] sm:$0xff] (!%p890_p5), %v1124_v0 }
  0x14   : > { %314 = vst [vmem:[#allocation2 + $0x40] sm:$0xff] (!%p890_p5), %v1124_v0  ;;  %315 = vst [vmem:[#allocation2 + $0x48] sm:$0xff] (!%p890_p5), %v1124_v0 }
  0x15   : > { %316 = vst [vmem:[#allocation2 + $0x50] sm:$0xff] (!%p890_p5), %v1124_v0  ;;  %317 = vst [vmem:[#allocation2 + $0x58] sm:$0xff] (!%p890_p5), %v1124_v0 }
  0x16   : > { %318 = vst [vmem:[#allocation2 + $0x60] sm:$0xff] %v1124_v0  ;;  %319 = vst [vmem:[#allocation2 + $0x68] sm:$0xff] %v1124_v0 }
  0x17   : > { %320 = vst [vmem:[#allocation2 + $0x70] sm:$0xff] %v1124_v0  ;;  %321 = vst [vmem:[#allocation2 + $0x78] sm:$0xff] %v1124_v0 }
  0x18 PF: > { %v1084_v1 = vld [vmem:[%s1180_s26] sm:$0xff]   ;;  %v1085_v2 = vld [vmem:[%s1180_s26 + $0x8] sm:$0xff]   ;;  %v1086_v3 = vld [vmem:[%s1180_s26 + $0x10] sm:$0xff]   ;;  %p907_p6 = scmp.ne.s32.totalorder %s1114_s15, 8 }
  0x19   : > { %1011 = vmatprep.subr.bf16.mxu0 %v1084_v1  ;;  %1043 = vmatprep.subr.bf16.mxu1 %v1084_v1  ;;  %v1087_v4 = vld [vmem:[%s1180_s26 + $0x18] sm:$0xff]   ;;  %v1092_v5 = vld [vmem:[%s1175_s23] sm:$0xff]   ;;  %v1089_v8 = vld [vmem:[%s1180_s26 + $0x28] sm:$0xff]  }
  0x1a   : > { %1012 = vmatpush3.bf16.msra.mxu0 %v1084_v1  ;;  %1051 = vmatpush3.bf16.msra.mxu1 %v1084_v1  ;;  %v1093_v6 = vld [vmem:[%s1175_s23 + $0x20] sm:$0xff]   ;;  %v1090_v9 = vld [vmem:[%s1180_s26 + $0x30] sm:$0xff]   ;;  %v1091_v10 = vld [vmem:[%s1180_s26 + $0x38] sm:$0xff]  }
  0x1b   : > { %1013 = vmatprep.subr.bf16.mxu0 %v1085_v2  ;;  %1044 = vmatprep.subr.bf16.mxu1 %v1085_v2  ;;  %v1088_v7 = vld [vmem:[%s1180_s26 + $0x20] sm:$0xff]   ;;  %v1094_v11 = vld [vmem:[%s1175_s23 + $0x8] sm:$0xff]   ;;  %v1096_v13 = vld [vmem:[%s1175_s23 + $0x10] sm:$0xff]  }
  0x1c   : > { %1027 = vmatprep.mubr.bf16.mxu0 %v1092_v5  ;;  %1035 = vmatprep.mubr.bf16.mxu1 %v1093_v6  ;;  %v1095_v12 = vld [vmem:[%s1175_s23 + $0x28] sm:$0xff]   ;;  %v1097_v14 = vld [vmem:[%s1175_s23 + $0x30] sm:$0xff]   ;;  %v1098_v15 = vld [vmem:[%s1175_s23 + $0x18] sm:$0xff]  }
  0x1d   : > { %v1099_v16 = vld [vmem:[%s1175_s23 + $0x38] sm:$0xff]   ;;  %v324_v17 = vld [vmem:[#allocation2 + $0x10] sm:$0xff]  ;;  %v322_v19 = vld [vmem:[#allocation2] sm:$0xff] }
  0x1e   : > { %1014 = vmatpush3.bf16.msra.mxu0 %v1085_v2  ;;  %1052 = vmatpush3.bf16.msra.mxu1 %v1085_v2  ;;  %v332_v18 = vld [vmem:[#allocation2 + $0x50] sm:$0xff]  ;;  %v330_v20 = vld [vmem:[#allocation2 + $0x40] sm:$0xff]  ;;  %v325_v23 = vld [vmem:[#allocation2 + $0x18] sm:$0xff] }
  0x1f   : > { %1015 = vmatprep.subr.bf16.mxu0 %v1086_v3  ;;  %1045 = vmatprep.subr.bf16.mxu1 %v1086_v3  ;;  %v333_v24 = vld [vmem:[#allocation2 + $0x58] sm:$0xff]  ;;  %v323_v29 = vld [vmem:[#allocation2 + $0x8] sm:$0xff]  ;;  %v328_v41 = vld [vmem:[#allocation2 + $0x30] sm:$0xff] }
  0x20   : > { %v331_v30 = vld [vmem:[#allocation2 + $0x48] sm:$0xff]  ;;  %v336_v42 = vld [vmem:[#allocation2 + $0x70] sm:$0xff]  ;;  %v326_v43 = vld [vmem:[#allocation2 + $0x20] sm:$0xff] }
  0x21   : > { %v334_v44 = vld [vmem:[#allocation2 + $0x60] sm:$0xff]  ;;  %v329_v47 = vld [vmem:[#allocation2 + $0x38] sm:$0xff]  ;;  %v327_v53 = vld [vmem:[#allocation2 + $0x28] sm:$0xff] }
  0x22   : > { %1016 = vmatpush3.bf16.msra.mxu0 %v1086_v3  ;;  %1053 = vmatpush3.bf16.msra.mxu1 %v1086_v3  ;;  %v337_v48 = vld [vmem:[#allocation2 + $0x78] sm:$0xff]  ;;  %v335_v54 = vld [vmem:[#allocation2 + $0x68] sm:$0xff]  ;;  %v1203_v3 = vld [vmem:[%s1277_s2] ss:$0 sm:$0xff] (!%p907_p6) }
  0x23   : > { %1017 = vmatprep.subr.bf16.mxu0 %v1087_v4  ;;  %1046 = vmatprep.subr.bf16.mxu1 %v1087_v4  ;;  %v1210_v6 = vld [vmem:[%s1278_s3] ss:$0 sm:$0xff] (!%p907_p6) }
  0x26   : > { %1018 = vmatpush3.bf16.msra.mxu0 %v1087_v4  ;;  %1054 = vmatpush3.bf16.msra.mxu1 %v1087_v4 }
  0x27   : > { %1019 = vmatprep.subr.bf16.mxu0 %v1088_v7  ;;  %1047 = vmatprep.subr.bf16.mxu1 %v1088_v7 }
  0x2a   : > { %1020 = vmatpush3.bf16.msra.mxu0 %v1088_v7  ;;  %1055 = vmatpush3.bf16.msra.mxu1 %v1088_v7 }
  0x2b   : > { %1021 = vmatprep.subr.bf16.mxu0 %v1089_v8  ;;  %1048 = vmatprep.subr.bf16.mxu1 %v1089_v8 }
  0x2e   : > { %1022 = vmatpush3.bf16.msra.mxu0 %v1089_v8  ;;  %1056 = vmatpush3.bf16.msra.mxu1 %v1089_v8 }
  0x2f   : > { %1023 = vmatprep.subr.bf16.mxu0 %v1090_v9  ;;  %1049 = vmatprep.subr.bf16.mxu1 %v1090_v9 }
  0x32   : > { %1024 = vmatpush3.bf16.msra.mxu0 %v1090_v9  ;;  %1057 = vmatpush3.bf16.msra.mxu1 %v1090_v9 }
  0x33   : > { %1025 = vmatprep.subr.bf16.mxu0 %v1091_v10  ;;  %1050 = vmatprep.subr.bf16.mxu1 %v1091_v10 }
  0x36   : > { %1026 = vmatpush3.bf16.msra.mxu0 %v1091_v10  ;;  %1058 = vmatpush3.bf16.msra.mxu1 %v1091_v10 }
  0x39   : > { %1028 = vmatmul.mubr.bf16.vlgmr.msra.gmra.mrb[0].mxu0 %v1094_v11  ;;  %1036 = vmatmul.mubr.bf16.vlgmr.msra.gmra.mrb[0].mxu1 %v1095_v12 }
  0x3a   : > { %1031 = vmatprep.mubr.bf16.mxu0 %v1096_v13  ;;  %1039 = vmatprep.mubr.bf16.mxu1 %v1097_v14 }
  0x41   : > { %1032 = vmatmul.mubr.bf16.gmra.mrb[4].mxu0 %v1098_v15  ;;  %1040 = vmatmul.mubr.bf16.gmra.mrb[4].mxu1 %v1099_v16 }
 0x10c   : > { %v1029_v21 = vpop.f32.mrb[0].mxu0  ;;  %v1037_v22 = vpop.f32.mrb[0].mxu1 }
 0x10d   : > { %v565_v25 = vadd.f32 %v1029_v21, %v324_v17  ;;  %v573_v26 = vadd.f32 %v1037_v22, %v332_v18  ;;  %v500_v27 = vpop.f32.mrb[1].mxu0  ;;  %v532_v28 = vpop.f32.mrb[1].mxu1 }
 0x10e   : > { %v563_v31 = vadd.f32 %v500_v27, %v322_v19  ;;  %v571_v32 = vadd.f32 %v532_v28, %v330_v20  ;;  %v1030_v33 = vpop.f32.mrb[2].mxu0  ;;  %v1038_v34 = vpop.f32.mrb[2].mxu1 }
 0x10f   : > { %581 = vst [vmem:[#allocation2 + $0x10] sm:$0xff] %v565_v25  ;;  %589 = vst [vmem:[#allocation2 + $0x50] sm:$0xff] %v573_v26  ;;  %v566_v35 = vadd.f32 %v1030_v33, %v325_v23  ;;  %v574_v36 = vadd.f32 %v1038_v34, %v333_v24  ;;  %v503_v37 = vpop.f32.mrb[3].mxu0  ;;  %v535_v38 = vpop.f32.mrb[3].mxu1 }
 0x110   : > { %579 = vst [vmem:[#allocation2] sm:$0xff] %v563_v31  ;;  %587 = vst [vmem:[#allocation2 + $0x40] sm:$0xff] %v571_v32  ;;  %v564_v39 = vadd.f32 %v503_v37, %v323_v29  ;;  %v572_v40 = vadd.f32 %v535_v38, %v331_v30 }
 0x111   : > { %582 = vst [vmem:[#allocation2 + $0x18] sm:$0xff] %v566_v35  ;;  %590 = vst [vmem:[#allocation2 + $0x58] sm:$0xff] %v574_v36 }
 0x112   : > { %580 = vst [vmem:[#allocation2 + $0x8] sm:$0xff] %v564_v39  ;;  %588 = vst [vmem:[#allocation2 + $0x48] sm:$0xff] %v572_v40 }
 0x114   : > { %v1033_v45 = vpop.f32.mrb[4].mxu0  ;;  %v1041_v46 = vpop.f32.mrb[4].mxu1  ;;  %598 = sbr.rel (%p907_p6) target bundleno = 300 (0x12c), region = 44 }
 0x115   : > { %v569_v49 = vadd.f32 %v1033_v45, %v328_v41  ;;  %v577_v50 = vadd.f32 %v1041_v46, %v336_v42  ;;  %v516_v51 = vpop.f32.mrb[5].mxu0  ;;  %v548_v52 = vpop.f32.mrb[5].mxu1 }
 0x116   : > { %v567_v55 = vadd.f32 %v516_v51, %v326_v43  ;;  %v575_v56 = vadd.f32 %v548_v52, %v334_v44  ;;  %v1034_v57 = vpop.f32.mrb[6].mxu0  ;;  %v1042_v58 = vpop.f32.mrb[6].mxu1  ;;  %v601_v7 = vld [vmem:[#allocation2 + $0x10] sm:$0xff] (!%p907_p6) }
 0x117   : > { %585 = vst [vmem:[#allocation2 + $0x30] sm:$0xff] %v569_v49  ;;  %593 = vst [vmem:[#allocation2 + $0x70] sm:$0xff] %v577_v50  ;;  %v570_v59 = vadd.f32 %v1034_v57, %v329_v47  ;;  %v578_v60 = vadd.f32 %v1042_v58, %v337_v48  ;;  %v519_v61 = vpop.f32.mrb[7].mxu0  ;;  %v551_v62 = vpop.f32.mrb[7].mxu1  ;;  %v599_v1 = vld [vmem:[#allocation2] sm:$0xff] (!%p907_p6)  ;;  %v624_v9 = vmul.f32 (!%p907_p6), %v1203_v3, %v601_v7  ;;  %v609_v33 = vld [vmem:[#allocation2 + $0x50] sm:$0xff] (!%p907_p6) }
 0x118   : > { %583 = vst [vmem:[#allocation2 + $0x20] sm:$0xff] %v567_v55  ;;  %591 = vst [vmem:[#allocation2 + $0x60] sm:$0xff] %v575_v56  ;;  %v568_v63 = vadd.f32 %v519_v61, %v327_v53  ;;  %v576_v0 = vadd.f32 %v551_v62, %v335_v54  ;;  %v622_v4 = vmul.f32 (!%p907_p6), %v1203_v3, %v599_v1  ;;  %v602_v8 = vld [vmem:[#allocation2 + $0x18] sm:$0xff] (!%p907_p6)  ;;  %v607_v23 = vld [vmem:[#allocation2 + $0x40] sm:$0xff] (!%p907_p6) }
 0x119   : > { %586 = vst [vmem:[#allocation2 + $0x38] sm:$0xff] %v570_v59  ;;  %594 = vst [vmem:[#allocation2 + $0x78] sm:$0xff] %v578_v60  ;;  %v600_v2 = vld [vmem:[#allocation2 + $0x8] sm:$0xff] (!%p907_p6)  ;;  %v625_v10 = vmul.f32 (!%p907_p6), %v1203_v3, %v602_v8  ;;  %v647_v19 = vadd.f32 (!%p907_p6), %v1210_v6, %v624_v9  ;;  %v610_v34 = vld [vmem:[#allocation2 + $0x58] sm:$0xff] (!%p907_p6)  ;;  %v630_v38 = vmul.f32 (!%p907_p6), %v1203_v3, %v607_v23 }
 0x11a   : > { %584 = vst [vmem:[#allocation2 + $0x28] sm:$0xff] %v568_v63  ;;  %592 = vst [vmem:[#allocation2 + $0x68] sm:$0xff] %v576_v0  ;;  %v623_v5 = vmul.f32 (!%p907_p6), %v1203_v3, %v600_v2  ;;  %v645_v14 = vadd.f32 (!%p907_p6), %v1210_v6, %v622_v4  ;;  %v608_v28 = vld [vmem:[#allocation2 + $0x48] sm:$0xff] (!%p907_p6)  ;;  %v632_v48 = vmul.f32 (!%p907_p6), %v1203_v3, %v609_v33 }
 0x11b   : > { %v648_v20 = vadd.f32 %v1210_v6, %v625_v10  ;;  %v663_v29 = vmax.f32 %v647_v19, 0.0  ;;  %v631_v44 = vmul.f32 %v1203_v3, %v608_v28  ;;  %v653_v47 = vadd.f32 %v1210_v6, %v630_v38 }
 0x11c   : > { %v646_v15 = vadd.f32 %v1210_v6, %v623_v5  ;;  %v661_v24 = vmax.f32 %v645_v14, 0.0  ;;  %v633_v49 = vmul.f32 %v1203_v3, %v610_v34  ;;  %v655_v56 = vadd.f32 %v1210_v6, %v632_v48 }
 0x11d   : > { %v664_v30 = vmax.f32 %v648_v20, 0.0  ;;  %v654_v52 = vadd.f32 %v1210_v6, %v631_v44  ;;  %v669_v55 = vmax.f32 %v653_v47, 0.0 }
 0x11e   : > { %v605_v13 = vld [vmem:[#allocation2 + $0x30] sm:$0xff]  ;;  %v662_v25 = vmax.f32 %v646_v15, 0.0  ;;  %v656_v57 = vadd.f32 %v1210_v6, %v633_v49  ;;  %v671_v63 = vmax.f32 %v655_v56, 0.0 }
 0x11f   : > { %v603_v11 = vld [vmem:[#allocation2 + $0x20] sm:$0xff]  ;;  %v628_v21 = vmul.f32 %v1203_v3, %v605_v13  ;;  %v956_v41 = vpack.c.bf16 %v664_v30, %v663_v29  ;;  %v613_v45 = vld [vmem:[#allocation2 + $0x70] sm:$0xff]  ;;  %v670_v59 = vmax.f32 %v654_v52, 0.0 }
 0x120   : > { %v626_v16 = vmul.f32 %v1203_v3, %v603_v11  ;;  %v606_v18 = vld [vmem:[#allocation2 + $0x38] sm:$0xff]  ;;  %v951_v35 = vpack.c.bf16 %v662_v25, %v661_v24  ;;  %v611_v39 = vld [vmem:[#allocation2 + $0x60] sm:$0xff]  ;;  %v636_v58 = vmul.f32 %v1203_v3, %v613_v45  ;;  %v672_v0 = vmax.f32 %v656_v57, 0.0 }
 0x121   : > { %v604_v12 = vld [vmem:[#allocation2 + $0x28] sm:$0xff]  ;;  %v629_v22 = vmul.f32 %v1203_v3, %v606_v18  ;;  %v651_v31 = vadd.f32 %v1210_v6, %v628_v21  ;;  %v614_v50 = vld [vmem:[#allocation2 + $0x78] sm:$0xff]  ;;  %988 = vst [vmem:[%s1279_s4 + $0x8] sm:$0xff] %v956_v41   ;;  %v634_v53 = vmul.f32 %v1203_v3, %v611_v39  ;;  %v971_v2 = vpack.c.bf16 %v670_v59, %v669_v55 }
 0x122   : > { %v627_v17 = vmul.f32 %v1203_v3, %v604_v12  ;;  %v649_v26 = vadd.f32 %v1210_v6, %v626_v16  ;;  %v612_v40 = vld [vmem:[#allocation2 + $0x68] sm:$0xff]  ;;  %952 = vst [vmem:[%s1279_s4] sm:$0xff] %v951_v35   ;;  %v637_v62 = vmul.f32 %v1203_v3, %v614_v50  ;;  %v659_v1 = vadd.f32 %v1210_v6, %v636_v58 }
 0x123   : > { %v652_v32 = vadd.f32 %v1210_v6, %v629_v22  ;;  %v667_v42 = vmax.f32 %v651_v31, 0.0  ;;  %v635_v54 = vmul.f32 %v1203_v3, %v612_v40  ;;  %v657_v60 = vadd.f32 %v1210_v6, %v634_v53  ;;  %991 = vst [vmem:[%s1279_s4 + $0x20] sm:$0xff] %v971_v2  }
 0x124   : > { %v650_v27 = vadd.f32 %v1210_v6, %v627_v17  ;;  %v665_v36 = vmax.f32 %v649_v26, 0.0  ;;  %v660_v7 = vadd.f32 %v1210_v6, %v637_v62  ;;  %v976_v8 = vpack.c.bf16 %v672_v0, %v671_v63 }
 0x125   : > { %v668_v43 = vmax.f32 %v652_v32, 0.0  ;;  %v658_v61 = vadd.f32 %v1210_v6, %v635_v54  ;;  %v673_v4 = vmax.f32 %v657_v60, 0.0  ;;  %v675_v9 = vmax.f32 %v659_v1, 0.0 }
 0x126   : > { %v666_v37 = vmax.f32 %v650_v27, 0.0  ;;  %v676_v11 = vmax.f32 %v660_v7, 0.0  ;;  %992 = vst [vmem:[%s1279_s4 + $0x28] sm:$0xff] %v976_v8  }
 0x127   : > { %v966_v51 = vpack.c.bf16 %v668_v43, %v667_v42  ;;  %v674_v5 = vmax.f32 %v658_v61, 0.0 }
 0x128   : > { %v961_v46 = vpack.c.bf16 %v666_v37, %v665_v36  ;;  %v986_v3 = vpack.c.bf16 %v676_v11, %v675_v9 }
 0x129   : > { %990 = vst [vmem:[%s1279_s4 + $0x18] sm:$0xff] %v966_v51   ;;  %v981_v10 = vpack.c.bf16 %v674_v5, %v673_v4 }
 0x12a   : > { %989 = vst [vmem:[%s1279_s4 + $0x10] sm:$0xff] %v961_v46   ;;  %994 = vst [vmem:[%s1279_s4 + $0x38] sm:$0xff] %v986_v3  }
 0x12b   : > { %993 = vst [vmem:[%s1279_s4 + $0x30] sm:$0xff] %v981_v10  }
 0x12c PF: > { %s14_s17 = sadd.s32 1, %s1122_s17   ;;  %s1280_s15 = smov %s1118_s16 }
 0x12d   : > { %p11_p7 = scmp.ge.s32.totalorder %s14_s17, 11   ;;  %s1281_s16 = smov %s1283_s18 }
 0x12f   :  { %13 = sbr.rel (!%p11_p7) target bundleno = 2 (0x2), region = 83 }

// kernel: forward.46
= control target key start
LH: loop header
LB: loop body
LE: loop exit
PB: predicated region body
PF: predicated region fallthrough
CT: control target
= control target key end

     0   :  { %vm142_vm0 = vcmask 523264   ;;  %s701_s1 = inlined_call_operand.vmem [shape: bf16[1,64,128], index: 1, kind: input, shape index: {}]   ;;  %s702_s0 = inlined_call_operand.vmem [shape: bf16[1,128,64], index: 0, kind: input, shape index: {}]   ;;  %s703_s2 = inlined_call_operand.vmem [shape: f32[1,128], index: 2, kind: input, shape index: {}]   ;;  %s704_s3 = inlined_call_operand.vmem [shape: f32[1,128], index: 3, kind: input, shape index: {}]   ;;  %s705_s4 = inlined_call_operand.vmem [shape: bf16[128,128], index: 4, kind: output, shape index: {}]  }
   0x1   :  { %v590_v0 = vld [vmem:[%s701_s1] sm:$0xff]   ;;  %v591_v1 = vld [vmem:[%s701_s1 + $0x8] sm:$0xff]   ;;  %v592_v2 = vld [vmem:[%s701_s1 + $0x10] sm:$0xff]  }
   0x2   :  { %558 = vmatprep.subr.bf16.mxu0 %v590_v0  ;;  %582 = vmatprep.subr.bf16.mxu1 %v590_v0  ;;  %v594_v3 = vld [vmem:[%s702_s0] sm:$0xff]   ;;  %v593_v5 = vld [vmem:[%s701_s1 + $0x18] sm:$0xff]   ;;  %v596_v6 = vld [vmem:[%s702_s0 + $0x8] sm:$0xff]  }
   0x3   :  { %559 = vmatpush3.bf16.msra.mxu0 %v590_v0  ;;  %586 = vmatpush3.bf16.msra.mxu1 %v590_v0  ;;  %v595_v4 = vld [vmem:[%s702_s0 + $0x20] sm:$0xff]   ;;  %v597_v7 = vld [vmem:[%s702_s0 + $0x28] sm:$0xff]   ;;  %v598_v8 = vld [vmem:[%s702_s0 + $0x10] sm:$0xff]  }
   0x4   :  { %560 = vmatprep.subr.bf16.mxu0 %v591_v1  ;;  %583 = vmatprep.subr.bf16.mxu1 %v591_v1  ;;  %v599_v9 = vld [vmem:[%s702_s0 + $0x30] sm:$0xff]   ;;  %v600_v10 = vld [vmem:[%s702_s0 + $0x18] sm:$0xff]   ;;  %v465_v12 = vld [vmem:[%s703_s2] ss:$0 sm:$0xff] }
   0x5   :  { %566 = vmatprep.mubr.msk.bf16.mxu0 %vm142_vm0, %v594_v3  ;;  %574 = vmatprep.mubr.msk.bf16.mxu1 %vm142_vm0, %v595_v4  ;;  %v601_v11 = vld [vmem:[%s702_s0 + $0x38] sm:$0xff]   ;;  %v466_v19 = vld [vmem:[%s704_s3] ss:$0 sm:$0xff] }
   0x7   :  { %561 = vmatpush3.bf16.msra.mxu0 %v591_v1  ;;  %587 = vmatpush3.bf16.msra.mxu1 %v591_v1 }
   0x8   :  { %562 = vmatprep.subr.bf16.mxu0 %v592_v2  ;;  %584 = vmatprep.subr.bf16.mxu1 %v592_v2 }
   0xb   :  { %563 = vmatpush3.bf16.msra.mxu0 %v592_v2  ;;  %588 = vmatpush3.bf16.msra.mxu1 %v592_v2 }
   0xc   :  { %564 = vmatprep.subr.bf16.mxu0 %v593_v5  ;;  %585 = vmatprep.subr.bf16.mxu1 %v593_v5 }
   0xf   :  { %565 = vmatpush3.bf16.msra.mxu0 %v593_v5  ;;  %589 = vmatpush3.bf16.msra.mxu1 %v593_v5 }
  0x12   :  { %567 = vmatmul.mubr.msk.bf16.vlgmr.msra.gmra.mrb[0].mxu0 %vm142_vm0, %v596_v6  ;;  %575 = vmatmul.mubr.msk.bf16.vlgmr.msra.gmra.mrb[0].mxu1 %vm142_vm0, %v597_v7 }
  0x13   :  { %570 = vmatprep.mubr.msk.bf16.mxu0 %vm142_vm0, %v598_v8  ;;  %578 = vmatprep.mubr.msk.bf16.mxu1 %vm142_vm0, %v599_v9 }
  0x1a   :  { %571 = vmatmul.mubr.msk.bf16.gmra.mrb[4].mxu0 %vm142_vm0, %v600_v10  ;;  %579 = vmatmul.mubr.msk.bf16.gmra.mrb[4].mxu1 %vm142_vm0, %v601_v11 }
  0xe5   :  { %v568_v13 = vpop.f32.mrb[0].mxu0  ;;  %v576_v14 = vpop.f32.mrb[0].mxu1 }
  0xe6   :  { %v324_v15 = vmul.f32 %v568_v13, %v465_v12  ;;  %v332_v16 = vmul.f32 %v576_v14, %v465_v12  ;;  %v201_v17 = vpop.f32.mrb[1].mxu0  ;;  %v233_v18 = vpop.f32.mrb[1].mxu1 }
  0xe7   :  { %v322_v20 = vmul.f32 %v465_v12, %v201_v17  ;;  %v330_v21 = vmul.f32 %v465_v12, %v233_v18  ;;  %v569_v22 = vpop.f32.mrb[2].mxu0  ;;  %v577_v23 = vpop.f32.mrb[2].mxu1 }
  0xe8   :  { %v325_v24 = vmul.f32 %v569_v22, %v465_v12  ;;  %v333_v25 = vmul.f32 %v577_v23, %v465_v12  ;;  %v204_v26 = vpop.f32.mrb[3].mxu0  ;;  %v236_v27 = vpop.f32.mrb[3].mxu1  ;;  %v347_v30 = vadd.f32 %v466_v19, %v324_v15  ;;  %v355_v31 = vadd.f32 %v466_v19, %v332_v16 }
  0xe9   :  { %v323_v28 = vmul.f32 %v465_v12, %v204_v26  ;;  %v331_v29 = vmul.f32 %v465_v12, %v236_v27  ;;  %v345_v34 = vadd.f32 %v466_v19, %v322_v20  ;;  %v353_v35 = vadd.f32 %v466_v19, %v330_v21 }
  0xea   :  { %v348_v32 = vadd.f32 %v466_v19, %v325_v24  ;;  %v356_v33 = vadd.f32 %v466_v19, %v333_v25 }
  0xeb   :  { %v346_v36 = vadd.f32 %v466_v19, %v323_v28  ;;  %v354_v37 = vadd.f32 %v466_v19, %v331_v29 }
  0xec   :  { %v507_v38 = vpack.c.bf16 %v348_v32, %v347_v30  ;;  %v527_v39 = vpack.c.bf16 %v356_v33, %v355_v31 }
  0xed   :  { %v502_v40 = vpack.c.bf16 %v346_v36, %v345_v34  ;;  %v522_v41 = vpack.c.bf16 %v354_v37, %v353_v35  ;;  %v572_v42 = vpop.f32.mrb[4].mxu0  ;;  %v580_v43 = vpop.f32.mrb[4].mxu1 }
  0xee   :  { %539 = vst [vmem:[%s705_s4 + $0x8] sm:$0xff] %v507_v38   ;;  %543 = vst [vmem:[%s705_s4 + $0x28] sm:$0xff] %v527_v39   ;;  %v328_v44 = vmul.f32 %v572_v42, %v465_v12  ;;  %v336_v45 = vmul.f32 %v580_v43, %v465_v12  ;;  %v217_v46 = vpop.f32.mrb[5].mxu0  ;;  %v249_v47 = vpop.f32.mrb[5].mxu1 }
  0xef   :  { %503 = vst [vmem:[%s705_s4] sm:$0xff] %v502_v40   ;;  %542 = vst [vmem:[%s705_s4 + $0x20] sm:$0xff] %v522_v41   ;;  %v326_v48 = vmul.f32 %v465_v12, %v217_v46  ;;  %v334_v49 = vmul.f32 %v465_v12, %v249_v47  ;;  %v573_v50 = vpop.f32.mrb[6].mxu0  ;;  %v581_v51 = vpop.f32.mrb[6].mxu1 }
  0xf0   :  { %v329_v52 = vmul.f32 %v573_v50, %v465_v12  ;;  %v337_v53 = vmul.f32 %v581_v51, %v465_v12  ;;  %v220_v54 = vpop.f32.mrb[7].mxu0  ;;  %v252_v55 = vpop.f32.mrb[7].mxu1  ;;  %v351_v58 = vadd.f32 %v466_v19, %v328_v44  ;;  %v359_v59 = vadd.f32 %v466_v19, %v336_v45 }
  0xf1   :  { %v327_v56 = vmul.f32 %v465_v12, %v220_v54  ;;  %v335_v57 = vmul.f32 %v465_v12, %v252_v55  ;;  %v349_v62 = vadd.f32 %v466_v19, %v326_v48  ;;  %v357_v63 = vadd.f32 %v466_v19, %v334_v49 }
  0xf2   :  { %v352_v60 = vadd.f32 %v466_v19, %v329_v52  ;;  %v360_v61 = vadd.f32 %v466_v19, %v337_v53 }
  0xf3   :  { %v350_v0 = vadd.f32 %v466_v19, %v327_v56  ;;  %v358_v1 = vadd.f32 %v466_v19, %v335_v57 }
  0xf4   :  { %v517_v2 = vpack.c.bf16 %v352_v60, %v351_v58  ;;  %v537_v3 = vpack.c.bf16 %v360_v61, %v359_v59 }
  0xf5   :  { %v512_v4 = vpack.c.bf16 %v350_v0, %v349_v62  ;;  %v532_v5 = vpack.c.bf16 %v358_v1, %v357_v63 }
  0xf6   :  { %541 = vst [vmem:[%s705_s4 + $0x18] sm:$0xff] %v517_v2   ;;  %545 = vst [vmem:[%s705_s4 + $0x38] sm:$0xff] %v537_v3  }
  0xf7   :  { %540 = vst [vmem:[%s705_s4 + $0x10] sm:$0xff] %v512_v4   ;;  %544 = vst [vmem:[%s705_s4 + $0x30] sm:$0xff] %v532_v5  }

// kernel: forward.48
= control target key start
LH: loop header
LB: loop body
LE: loop exit
PB: predicated region body
PF: predicated region fallthrough
CT: control target
= control target key end

     0   :  { %s1321_s18 = smov 0   ;;  %s1323_s19 = smov 0   ;;  %s1470_s0 = inlined_call_operand.vmem [shape: bf16[9,128,128], index: 0, kind: input, shape index: {}]   ;;  %s1471_s1 = inlined_call_operand.vmem [shape: bf16[9,128,128], index: 1, kind: input, shape index: {}]   ;;  %s1472_s2 = inlined_call_operand.vmem [shape: f32[1,128], index: 2, kind: input, shape index: {}]   ;;  %s1473_s3 = inlined_call_operand.vmem [shape: f32[1,128], index: 3, kind: input, shape index: {}]   ;;  %s1474_s4 = inlined_call_operand.vmem [shape: bf16[128,128], index: 4, kind: input, shape index: {}]   ;;  %s1475_s5 = inlined_call_operand.vmem [shape: bf16[128,128], index: 5, kind: output, shape index: {}]  }
   0x1   :  { %s1325_s20 = smov 0  }
   0x2 LB: > { %s27_s21 = sadd.s32 1, %s1284_s19  ;;  %p1012_p0 = scmp.ge.s32.totalorder %s1288_s20, 1  ;;  %s1288_s20 = sphi %s1325_s20, %s15_s20   ;;  %s1284_s19 = sphi %s1323_s19, %s1477_s19   ;;  %s1280_s18 = sphi %s1321_s18, %s1476_s18  }
   0x3   : > { %p28_p1 = scmp.ge.s32.totalorder %s27_s21, 9  ;;  %p262_p2 = scmp.lt.s32.totalorder %s1288_s20, 10 }
   0x5   : > { %s1479_s21 = smov (%p28_p1, %s27_s21), 0  ;;  %p263_p3 = pnand %p1012_p0, %p262_p2 }
   0x6   : > { %p320_p4 = scmp.lt.s32.totalorder (!%p263_p3), %s1280_s18, 8  ;;  %p1017_p5 = scmp.ne.s32.totalorder (!%p263_p3), %s1280_s18, 0 }
   0x7   : > { %266 = sbr.rel (%p263_p3) target bundleno = 307 (0x133), region = 40 }
   0xe   : > { %s321_s22 = scalar_select %p320_p4, %s1280_s18, 8 }
   0xf   : > { %365 = sbr.rel (%p1017_p5) target bundleno = 24 (0x18), region = 44  ;;  %v1290_v0 = vmov (!%p1017_p5), 0.0  }
  0x10   : > { %s1057_s23 = sshll.u32 %s321_s22, 6  ;;  %366 = vst [vmem:[#allocation2] sm:$0xff] (!%p1017_p5), %v1290_v0  ;;  %367 = vst [vmem:[#allocation2 + $0x8] sm:$0xff] (!%p1017_p5), %v1290_v0 }
  0x11   : > { %s1346_s26 = scalar_lea.vmem %s1470_s0, %s1057_s23  ;;  %s1351_s29 = scalar_lea.vmem %s1471_s1, %s1057_s23  ;;  %368 = vst [vmem:[#allocation2 + $0x10] sm:$0xff] (!%p1017_p5), %v1290_v0  ;;  %369 = vst [vmem:[#allocation2 + $0x18] sm:$0xff] (!%p1017_p5), %v1290_v0 }
  0x12   : > { %370 = vst [vmem:[#allocation2 + $0x20] sm:$0xff] (!%p1017_p5), %v1290_v0  ;;  %371 = vst [vmem:[#allocation2 + $0x28] sm:$0xff] (!%p1017_p5), %v1290_v0 }
  0x13   : > { %372 = vst [vmem:[#allocation2 + $0x30] sm:$0xff] (!%p1017_p5), %v1290_v0  ;;  %373 = vst [vmem:[#allocation2 + $0x38] sm:$0xff] (!%p1017_p5), %v1290_v0 }
  0x14   : > { %374 = vst [vmem:[#allocation2 + $0x40] sm:$0xff] (!%p1017_p5), %v1290_v0  ;;  %375 = vst [vmem:[#allocation2 + $0x48] sm:$0xff] (!%p1017_p5), %v1290_v0 }
  0x15   : > { %376 = vst [vmem:[#allocation2 + $0x50] sm:$0xff] (!%p1017_p5), %v1290_v0  ;;  %377 = vst [vmem:[#allocation2 + $0x58] sm:$0xff] (!%p1017_p5), %v1290_v0 }
  0x16   : > { %378 = vst [vmem:[#allocation2 + $0x60] sm:$0xff] %v1290_v0  ;;  %379 = vst [vmem:[#allocation2 + $0x68] sm:$0xff] %v1290_v0 }
  0x17   : > { %380 = vst [vmem:[#allocation2 + $0x70] sm:$0xff] %v1290_v0  ;;  %381 = vst [vmem:[#allocation2 + $0x78] sm:$0xff] %v1290_v0 }
  0x18 PF: > { %v1250_v1 = vld [vmem:[%s1351_s29] sm:$0xff]   ;;  %v1251_v2 = vld [vmem:[%s1351_s29 + $0x8] sm:$0xff]   ;;  %v1252_v3 = vld [vmem:[%s1351_s29 + $0x10] sm:$0xff]   ;;  %p1034_p6 = scmp.ne.s32.totalorder %s1280_s18, 8 }
  0x19   : > { %1177 = vmatprep.subr.bf16.mxu0 %v1250_v1  ;;  %1209 = vmatprep.subr.bf16.mxu1 %v1250_v1  ;;  %v1253_v4 = vld [vmem:[%s1351_s29 + $0x18] sm:$0xff]   ;;  %v1258_v5 = vld [vmem:[%s1346_s26] sm:$0xff]   ;;  %v1255_v8 = vld [vmem:[%s1351_s29 + $0x28] sm:$0xff]  }
  0x1a   : > { %1178 = vmatpush3.bf16.msra.mxu0 %v1250_v1  ;;  %1217 = vmatpush3.bf16.msra.mxu1 %v1250_v1  ;;  %v1259_v6 = vld [vmem:[%s1346_s26 + $0x20] sm:$0xff]   ;;  %v1256_v9 = vld [vmem:[%s1351_s29 + $0x30] sm:$0xff]   ;;  %v1257_v10 = vld [vmem:[%s1351_s29 + $0x38] sm:$0xff]  }
  0x1b   : > { %1179 = vmatprep.subr.bf16.mxu0 %v1251_v2  ;;  %1210 = vmatprep.subr.bf16.mxu1 %v1251_v2  ;;  %v1254_v7 = vld [vmem:[%s1351_s29 + $0x20] sm:$0xff]   ;;  %v1260_v11 = vld [vmem:[%s1346_s26 + $0x8] sm:$0xff]   ;;  %v1262_v13 = vld [vmem:[%s1346_s26 + $0x10] sm:$0xff]  }
  0x1c   : > { %1193 = vmatprep.mubr.bf16.mxu0 %v1258_v5  ;;  %1201 = vmatprep.mubr.bf16.mxu1 %v1259_v6  ;;  %v1261_v12 = vld [vmem:[%s1346_s26 + $0x28] sm:$0xff]   ;;  %v1263_v14 = vld [vmem:[%s1346_s26 + $0x30] sm:$0xff]   ;;  %v1264_v15 = vld [vmem:[%s1346_s26 + $0x18] sm:$0xff]  }
  0x1d   : > { %v1265_v16 = vld [vmem:[%s1346_s26 + $0x38] sm:$0xff]   ;;  %v384_v17 = vld [vmem:[#allocation2 + $0x10] sm:$0xff]  ;;  %v382_v19 = vld [vmem:[#allocation2] sm:$0xff] }
  0x1e   : > { %1180 = vmatpush3.bf16.msra.mxu0 %v1251_v2  ;;  %1218 = vmatpush3.bf16.msra.mxu1 %v1251_v2  ;;  %v392_v18 = vld [vmem:[#allocation2 + $0x50] sm:$0xff]  ;;  %v390_v20 = vld [vmem:[#allocation2 + $0x40] sm:$0xff]  ;;  %v385_v23 = vld [vmem:[#allocation2 + $0x18] sm:$0xff] }
  0x1f   : > { %1181 = vmatprep.subr.bf16.mxu0 %v1252_v3  ;;  %1211 = vmatprep.subr.bf16.mxu1 %v1252_v3  ;;  %v393_v24 = vld [vmem:[#allocation2 + $0x58] sm:$0xff]  ;;  %v383_v29 = vld [vmem:[#allocation2 + $0x8] sm:$0xff]  ;;  %v388_v41 = vld [vmem:[#allocation2 + $0x30] sm:$0xff] }
  0x20   : > { %v391_v30 = vld [vmem:[#allocation2 + $0x48] sm:$0xff]  ;;  %v396_v42 = vld [vmem:[#allocation2 + $0x70] sm:$0xff]  ;;  %v386_v43 = vld [vmem:[#allocation2 + $0x20] sm:$0xff] }
  0x21   : > { %v394_v44 = vld [vmem:[#allocation2 + $0x60] sm:$0xff]  ;;  %v389_v47 = vld [vmem:[#allocation2 + $0x38] sm:$0xff]  ;;  %v387_v53 = vld [vmem:[#allocation2 + $0x28] sm:$0xff] }
  0x22   : > { %1182 = vmatpush3.bf16.msra.mxu0 %v1252_v3  ;;  %1219 = vmatpush3.bf16.msra.mxu1 %v1252_v3  ;;  %v397_v48 = vld [vmem:[#allocation2 + $0x78] sm:$0xff]  ;;  %v395_v54 = vld [vmem:[#allocation2 + $0x68] sm:$0xff]  ;;  %v1374_v3 = vld [vmem:[%s1472_s2] ss:$0 sm:$0xff] (!%p1034_p6) }
  0x23   : > { %1183 = vmatprep.subr.bf16.mxu0 %v1253_v4  ;;  %1212 = vmatprep.subr.bf16.mxu1 %v1253_v4  ;;  %v1381_v6 = vld [vmem:[%s1473_s3] ss:$0 sm:$0xff] (!%p1034_p6) }
  0x26   : > { %1184 = vmatpush3.bf16.msra.mxu0 %v1253_v4  ;;  %1220 = vmatpush3.bf16.msra.mxu1 %v1253_v4 }
  0x27   : > { %1185 = vmatprep.subr.bf16.mxu0 %v1254_v7  ;;  %1213 = vmatprep.subr.bf16.mxu1 %v1254_v7 }
  0x2a   : > { %1186 = vmatpush3.bf16.msra.mxu0 %v1254_v7  ;;  %1221 = vmatpush3.bf16.msra.mxu1 %v1254_v7  ;;  %v1076_v7 = vld [vmem:[%s1474_s4] sm:$0xff] (!%p1034_p6)  }
  0x2b   : > { %1187 = vmatprep.subr.bf16.mxu0 %v1255_v8  ;;  %1214 = vmatprep.subr.bf16.mxu1 %v1255_v8 }
  0x2e   : > { %1188 = vmatpush3.bf16.msra.mxu0 %v1255_v8  ;;  %1222 = vmatpush3.bf16.msra.mxu1 %v1255_v8 }
  0x2f   : > { %1189 = vmatprep.subr.bf16.mxu0 %v1256_v9  ;;  %1215 = vmatprep.subr.bf16.mxu1 %v1256_v9 }
  0x32   : > { %1190 = vmatpush3.bf16.msra.mxu0 %v1256_v9  ;;  %1223 = vmatpush3.bf16.msra.mxu1 %v1256_v9  ;;  %v1077_v9 = vunpack.c.l.bf16 (!%p1034_p6), %v1076_v7 }
  0x33   : > { %1191 = vmatprep.subr.bf16.mxu0 %v1257_v10  ;;  %1216 = vmatprep.subr.bf16.mxu1 %v1257_v10 }
  0x36   : > { %1192 = vmatpush3.bf16.msra.mxu0 %v1257_v10  ;;  %1224 = vmatpush3.bf16.msra.mxu1 %v1257_v10  ;;  %v1078_v10 = vunpack.c.h.bf16 (!%p1034_p6), %v1076_v7 }
  0x39   : > { %1194 = vmatmul.mubr.bf16.vlgmr.msra.gmra.mrb[0].mxu0 %v1260_v11  ;;  %1202 = vmatmul.mubr.bf16.vlgmr.msra.gmra.mrb[0].mxu1 %v1261_v12 }
  0x3a   : > { %1197 = vmatprep.mubr.bf16.mxu0 %v1262_v13  ;;  %1205 = vmatprep.mubr.bf16.mxu1 %v1263_v14  ;;  %v1147_v13 = vld [vmem:[%s1474_s4 + $0x8] sm:$0xff] (!%p1034_p6)  }
  0x41   : > { %1198 = vmatmul.mubr.bf16.gmra.mrb[4].mxu0 %v1264_v15  ;;  %1206 = vmatmul.mubr.bf16.gmra.mrb[4].mxu1 %v1265_v16 }
 0x10c   : > { %v1195_v21 = vpop.f32.mrb[0].mxu0  ;;  %v1203_v22 = vpop.f32.mrb[0].mxu1 }
 0x10d   : > { %v625_v25 = vadd.f32 %v1195_v21, %v384_v17  ;;  %v633_v26 = vadd.f32 %v1203_v22, %v392_v18  ;;  %v560_v27 = vpop.f32.mrb[1].mxu0  ;;  %v592_v28 = vpop.f32.mrb[1].mxu1  ;;  %v1081_v18 = vunpack.c.l.bf16 (!%p1034_p6), %v1147_v13  ;;  %v1082_v22 = vunpack.c.h.bf16 (!%p1034_p6), %v1147_v13 }
 0x10e   : > { %v623_v31 = vadd.f32 %v560_v27, %v382_v19  ;;  %v631_v32 = vadd.f32 %v592_v28, %v390_v20  ;;  %v1196_v33 = vpop.f32.mrb[2].mxu0  ;;  %v1204_v34 = vpop.f32.mrb[2].mxu1  ;;  %v1148_v20 = vld [vmem:[%s1474_s4 + $0x10] sm:$0xff] (!%p1034_p6)  }
 0x10f   : > { %641 = vst [vmem:[#allocation2 + $0x10] sm:$0xff] %v625_v25  ;;  %649 = vst [vmem:[#allocation2 + $0x50] sm:$0xff] %v633_v26  ;;  %v626_v35 = vadd.f32 %v1196_v33, %v385_v23  ;;  %v634_v36 = vadd.f32 %v1204_v34, %v393_v24  ;;  %v563_v37 = vpop.f32.mrb[3].mxu0  ;;  %v595_v38 = vpop.f32.mrb[3].mxu1  ;;  %v1086_v34 = vunpack.c.h.bf16 (!%p1034_p6), %v1148_v20 }
 0x110   : > { %639 = vst [vmem:[#allocation2] sm:$0xff] %v623_v31  ;;  %647 = vst [vmem:[#allocation2 + $0x40] sm:$0xff] %v631_v32  ;;  %v624_v39 = vadd.f32 %v563_v37, %v383_v29  ;;  %v632_v40 = vadd.f32 %v595_v38, %v391_v30  ;;  %v1085_v29 = vunpack.c.l.bf16 (!%p1034_p6), %v1148_v20 }
 0x111   : > { %642 = vst [vmem:[#allocation2 + $0x18] sm:$0xff] %v626_v35  ;;  %650 = vst [vmem:[#allocation2 + $0x58] sm:$0xff] %v634_v36  ;;  %v1149_v35 = vld [vmem:[%s1474_s4 + $0x18] sm:$0xff] (!%p1034_p6)  }
 0x112   : > { %640 = vst [vmem:[#allocation2 + $0x8] sm:$0xff] %v624_v39  ;;  %648 = vst [vmem:[#allocation2 + $0x48] sm:$0xff] %v632_v40 }
 0x114   : > { %v1199_v45 = vpop.f32.mrb[4].mxu0  ;;  %v1207_v46 = vpop.f32.mrb[4].mxu1  ;;  %658 = sbr.rel (%p1034_p6) target bundleno = 307 (0x133), region = 48 }
 0x115   : > { %v629_v49 = vadd.f32 %v1199_v45, %v388_v41  ;;  %v637_v50 = vadd.f32 %v1207_v46, %v396_v42  ;;  %v576_v51 = vpop.f32.mrb[5].mxu0  ;;  %v608_v52 = vpop.f32.mrb[5].mxu1 }
 0x116   : > { %v627_v55 = vadd.f32 %v576_v51, %v386_v43  ;;  %v635_v56 = vadd.f32 %v608_v52, %v394_v44  ;;  %v1200_v57 = vpop.f32.mrb[6].mxu0  ;;  %v1208_v58 = vpop.f32.mrb[6].mxu1  ;;  %v661_v8 = vld [vmem:[#allocation2 + $0x10] sm:$0xff] (!%p1034_p6) }
 0x117   : > { %645 = vst [vmem:[#allocation2 + $0x30] sm:$0xff] %v629_v49  ;;  %653 = vst [vmem:[#allocation2 + $0x70] sm:$0xff] %v637_v50  ;;  %v630_v59 = vadd.f32 %v1200_v57, %v389_v47  ;;  %v638_v60 = vadd.f32 %v1208_v58, %v397_v48  ;;  %v579_v61 = vpop.f32.mrb[7].mxu0  ;;  %v611_v62 = vpop.f32.mrb[7].mxu1  ;;  %v659_v1 = vld [vmem:[#allocation2] sm:$0xff] (!%p1034_p6)  ;;  %v684_v12 = vmul.f32 (!%p1034_p6), %v1374_v3, %v661_v8  ;;  %v1089_v49 = vunpack.c.l.bf16 (!%p1034_p6), %v1149_v35 }
 0x118   : > { %643 = vst [vmem:[#allocation2 + $0x20] sm:$0xff] %v627_v55  ;;  %651 = vst [vmem:[#allocation2 + $0x60] sm:$0xff] %v635_v56  ;;  %v628_v63 = vadd.f32 %v579_v61, %v387_v53  ;;  %v636_v0 = vadd.f32 %v611_v62, %v395_v54  ;;  %v682_v4 = vmul.f32 (!%p1034_p6), %v1374_v3, %v659_v1  ;;  %v662_v11 = vld [vmem:[#allocation2 + $0x18] sm:$0xff] (!%p1034_p6)  ;;  %v667_v44 = vld [vmem:[#allocation2 + $0x40] sm:$0xff] (!%p1034_p6)  ;;  %v1090_v54 = vunpack.c.h.bf16 (!%p1034_p6), %v1149_v35 }
 0x119   : > { %646 = vst [vmem:[#allocation2 + $0x38] sm:$0xff] %v630_v59  ;;  %654 = vst [vmem:[#allocation2 + $0x78] sm:$0xff] %v638_v60  ;;  %v660_v2 = vld [vmem:[#allocation2 + $0x8] sm:$0xff] (!%p1034_p6)  ;;  %v685_v17 = vmul.f32 (!%p1034_p6), %v1374_v3, %v662_v11  ;;  %v707_v21 = vadd.f32 (!%p1034_p6), %v1381_v6, %v684_v12  ;;  %v1150_v50 = vld [vmem:[%s1474_s4 + $0x20] sm:$0xff] (!%p1034_p6)   ;;  %v690_v58 = vmul.f32 (!%p1034_p6), %v1374_v3, %v667_v44 }
 0x11a   : > { %644 = vst [vmem:[#allocation2 + $0x28] sm:$0xff] %v628_v63  ;;  %652 = vst [vmem:[#allocation2 + $0x68] sm:$0xff] %v636_v0  ;;  %v683_v5 = vmul.f32 (!%p1034_p6), %v1374_v3, %v660_v2  ;;  %v705_v15 = vadd.f32 (!%p1034_p6), %v1381_v6, %v682_v4  ;;  %v668_v45 = vld [vmem:[#allocation2 + $0x48] sm:$0xff] (!%p1034_p6)  ;;  %v669_v55 = vld [vmem:[#allocation2 + $0x50] sm:$0xff] (!%p1034_p6)  ;;  %v1093_v0 = vunpack.c.l.bf16 (!%p1034_p6), %v1150_v50  ;;  %v1094_v1 = vunpack.c.h.bf16 (!%p1034_p6), %v1150_v50 }
 0x11b   : > { %v708_v28 = vadd.f32 %v1381_v6, %v685_v17  ;;  %v755_v31 = vadd.f32 %v1081_v18, %v707_v21  ;;  %v691_v59 = vmul.f32 %v1374_v3, %v668_v45  ;;  %v670_v60 = vld [vmem:[#allocation2 + $0x58] sm:$0xff]  ;;  %v1151_v61 = vld [vmem:[%s1474_s4 + $0x28] sm:$0xff]   ;;  %v692_v8 = vmul.f32 %v1374_v3, %v669_v55 }
 0x11c   : > { %v706_v16 = vadd.f32 %v1381_v6, %v683_v5  ;;  %v753_v26 = vadd.f32 %v1077_v9, %v705_v15  ;;  %v713_v5 = vadd.f32 %v1381_v6, %v690_v58  ;;  %v693_v12 = vmul.f32 %v1374_v3, %v670_v60 }
 0x11d   : > { %v756_v38 = vadd.f32 %v1082_v22, %v708_v28  ;;  %v771_v40 = vmax.f32 %v755_v31, 0.0  ;;  %v714_v7 = vadd.f32 %v1381_v6, %v691_v59  ;;  %v1097_v13 = vunpack.c.l.bf16 %v1151_v61 }
 0x11e   : > { %v665_v25 = vld [vmem:[#allocation2 + $0x30] sm:$0xff]  ;;  %v754_v27 = vadd.f32 %v1078_v10, %v706_v16  ;;  %v769_v36 = vmax.f32 %v753_v26, 0.0  ;;  %v761_v15 = vadd.f32 %v1093_v0, %v713_v5  ;;  %v715_v17 = vadd.f32 %v1381_v6, %v692_v8 }
 0x11f   : > { %v663_v14 = vld [vmem:[#allocation2 + $0x20] sm:$0xff]  ;;  %v688_v39 = vmul.f32 %v1374_v3, %v665_v25  ;;  %v772_v47 = vmax.f32 %v756_v38, 0.0  ;;  %v1152_v10 = vld [vmem:[%s1474_s4 + $0x30] sm:$0xff]   ;;  %v762_v16 = vadd.f32 %v1094_v1, %v714_v7  ;;  %v716_v21 = vadd.f32 %v1381_v6, %v693_v12 }
 0x120   : > { %v686_v23 = vmul.f32 %v1374_v3, %v663_v14  ;;  %v666_v30 = vld [vmem:[#allocation2 + $0x38] sm:$0xff]  ;;  %v770_v37 = vmax.f32 %v754_v27, 0.0  ;;  %v671_v2 = vld [vmem:[#allocation2 + $0x60] sm:$0xff]  ;;  %v1098_v14 = vunpack.c.h.bf16 %v1151_v61  ;;  %v777_v25 = vmax.f32 %v761_v15, 0.0 }
 0x121   : > { %v664_v19 = vld [vmem:[#allocation2 + $0x28] sm:$0xff]  ;;  %v689_v43 = vmul.f32 %v1374_v3, %v666_v30  ;;  %v711_v48 = vadd.f32 %v1381_v6, %v688_v39  ;;  %v1115_v56 = vpack.c.bf16 %v772_v47, %v771_v40  ;;  %v694_v18 = vmul.f32 %v1374_v3, %v671_v2 }
 0x122   : > { %v687_v24 = vmul.f32 %v1374_v3, %v664_v19  ;;  %v709_v32 = vadd.f32 %v1381_v6, %v686_v23  ;;  %v1110_v46 = vpack.c.bf16 %v770_v37, %v769_v36  ;;  %v672_v9 = vld [vmem:[#allocation2 + $0x68] sm:$0xff]  ;;  %v673_v19 = vld [vmem:[#allocation2 + $0x70] sm:$0xff]  ;;  %v1101_v23 = vunpack.c.l.bf16 %v1152_v10 }
 0x123   : > { %v712_v53 = vadd.f32 %v1381_v6, %v689_v43  ;;  %v759_v57 = vadd.f32 %v1089_v49, %v711_v48  ;;  %1154 = vst [vmem:[%s1475_s5 + $0x8] sm:$0xff] %v1115_v56   ;;  %v695_v22 = vmul.f32 %v1374_v3, %v672_v9  ;;  %v778_v26 = vmax.f32 %v762_v16, 0.0 }
 0x124   : > { %v710_v33 = vadd.f32 %v1381_v6, %v687_v24  ;;  %v757_v41 = vadd.f32 %v1085_v29, %v709_v32  ;;  %1111 = vst [vmem:[%s1475_s5] sm:$0xff] %v1110_v46   ;;  %v674_v24 = vld [vmem:[#allocation2 + $0x78] sm:$0xff]  ;;  %v763_v27 = vadd.f32 %v1097_v13, %v715_v17  ;;  %v717_v28 = vadd.f32 %v1381_v6, %v694_v18 }
 0x125   : > { %v760_v63 = vadd.f32 %v1090_v54, %v712_v53  ;;  %v775_v4 = vmax.f32 %v759_v57, 0.0  ;;  %v1153_v29 = vld [vmem:[%s1474_s4 + $0x38] sm:$0xff]   ;;  %v764_v30 = vadd.f32 %v1098_v14, %v716_v21  ;;  %v718_v31 = vadd.f32 %v1381_v6, %v695_v22 }
 0x126   : > { %v758_v42 = vadd.f32 %v1086_v34, %v710_v33  ;;  %v773_v51 = vmax.f32 %v757_v41, 0.0  ;;  %v1102_v32 = vunpack.c.h.bf16 %v1152_v10  ;;  %v696_v33 = vmul.f32 %v1374_v3, %v673_v19 }
 0x127   : > { %v776_v11 = vmax.f32 %v760_v63, 0.0  ;;  %v1130_v34 = vpack.c.bf16 %v778_v26, %v777_v25  ;;  %v779_v35 = vmax.f32 %v763_v27, 0.0  ;;  %v765_v36 = vadd.f32 %v1101_v23, %v717_v28 }
 0x128   : > { %v774_v52 = vmax.f32 %v758_v42, 0.0  ;;  %v697_v37 = vmul.f32 %v1374_v3, %v674_v24  ;;  %v780_v38 = vmax.f32 %v764_v30, 0.0  ;;  %v766_v39 = vadd.f32 %v1102_v32, %v718_v31 }
 0x129   : > { %v1125_v20 = vpack.c.bf16 %v776_v11, %v775_v4  ;;  %v719_v40 = vadd.f32 %v1381_v6, %v696_v33  ;;  %v1105_v41 = vunpack.c.l.bf16 %v1153_v29  ;;  %1157 = vst [vmem:[%s1475_s5 + $0x20] sm:$0xff] %v1130_v34   ;;  %v781_v42 = vmax.f32 %v765_v36, 0.0 }
 0x12a   : > { %v1120_v62 = vpack.c.bf16 %v774_v52, %v773_v51  ;;  %v720_v43 = vadd.f32 %v1381_v6, %v697_v37  ;;  %v1106_v44 = vunpack.c.h.bf16 %v1153_v29  ;;  %v1135_v45 = vpack.c.bf16 %v780_v38, %v779_v35 }
 0x12b   : > { %1156 = vst [vmem:[%s1475_s5 + $0x18] sm:$0xff] %v1125_v20   ;;  %v782_v46 = vmax.f32 %v766_v39, 0.0  ;;  %v767_v47 = vadd.f32 %v1105_v41, %v719_v40 }
 0x12c   : > { %1155 = vst [vmem:[%s1475_s5 + $0x10] sm:$0xff] %v1120_v62   ;;  %v768_v48 = vadd.f32 %v1106_v44, %v720_v43  ;;  %1158 = vst [vmem:[%s1475_s5 + $0x28] sm:$0xff] %v1135_v45  }
 0x12d   : > { %v1140_v3 = vpack.c.bf16 %v782_v46, %v781_v42  ;;  %v783_v49 = vmax.f32 %v767_v47, 0.0 }
 0x12e   : > { %v784_v50 = vmax.f32 %v768_v48, 0.0 }
 0x12f   : > { %1159 = vst [vmem:[%s1475_s5 + $0x30] sm:$0xff] %v1140_v3  }
 0x130   : > { %v1145_v51 = vpack.c.bf16 %v784_v50, %v783_v49 }
 0x132   : > { %1160 = vst [vmem:[%s1475_s5 + $0x38] sm:$0xff] %v1145_v51  }
 0x133 PF: > { %s15_s20 = sadd.s32 1, %s1288_s20   ;;  %s1476_s18 = smov %s1284_s19 }
 0x134   : > { %p12_p7 = scmp.ge.s32.totalorder %s15_s20, 11   ;;  %s1477_s19 = smov %s1479_s21 }
 0x136   :  { %14 = sbr.rel (!%p12_p7) target bundleno = 2 (0x2), region = 90 }

// kernel: forward.56
= control target key start
LH: loop header
LB: loop body
LE: loop exit
PB: predicated region body
PF: predicated region fallthrough
CT: control target
= control target key end

     0   :  { %s1215_s0 = inlined_call_operand.vmem [shape: bf16[9,32,128], index: 0, kind: input, shape index: {}]   ;;  %s1216_s1 = inlined_call_operand.vmem [shape: bf16[9,128,256], index: 1, kind: input, shape index: {}]   ;;  %s1217_s2 = inlined_call_operand.vmem [shape: f32[1,256], index: 2, kind: input, shape index: {}]   ;;  %s1218_s3 = inlined_call_operand.vmem [shape: f32[1,256], index: 3, kind: input, shape index: {}]   ;;  %s1219_s4 = inlined_call_operand.vmem [shape: bf16[32,256], index: 4, kind: output, shape index: {}]  }
   0x1   :  { %1221 = sst [smem:[#allocation6_spill]] %s1216_s1 }
   0x2   :  { %s1022_s15 = smov 0   ;;  %s1024_s16 = smov 0  }
   0x3   :  { %s1026_s17 = smov 0   ;;  %s1028_s18 = smov 0  }
   0x4   :  { %s1030_s19 = smov 0   ;;  %s1032_s20 = smov 0  }
   0x5   :  { %s1034_s21 = smov 0   ;;  %s1036_s22 = smov 0  }
   0x6   :  { %s1038_s23 = smov 0  }
   0x7 LB: > { %s26_s24 = sadd.s32 1, %s986_s21  ;;  %s29_s25 = sadd.s32 1, %s990_s22  ;;  %s994_s23 = sphi %s1038_s23, %s14_s23   ;;  %s990_s22 = sphi %s1036_s22, %s1234_s22   ;;  %s986_s21 = sphi %s1034_s21, %s1233_s21   ;;  %s982_s20 = sphi %s1032_s20, %s1232_s20   ;;  %s978_s19 = sphi %s1030_s19, %s1231_s19   ;;  %s974_s18 = sphi %s1028_s18, %s1230_s18   ;;  %s970_s17 = sphi %s1026_s17, %s1229_s17   ;;  %s966_s16 = sphi %s1024_s16, %s1228_s16   ;;  %s962_s15 = sphi %s1022_s15, %s1227_s15  }
   0x8   : > { %p27_p0 = scmp.ge.s32.totalorder %s26_s24, 9  ;;  %p77_p1 = scmp.ne.s32.totalorder %s974_s18, %s970_s17 }
   0x9   : > { %s761_s26 = sadd.s32 4294967295, %s994_s23   ;;  %p78_p2 = scmp.eq.s32.totalorder %s994_s23, 0 }
   0xa   : > { %s1236_s24 = smov (%p27_p0, %s26_s24), 0  ;;  %s1238_s25 = smov (!%p27_p0, %s29_s25), %s990_s22 }
   0xb   : > { %p31_p3 = scmp.ge.s32.totalorder %s1238_s25, 2  ;;  %s65_s27 = ssub.s32 %s986_s21, %s1236_s24 }
   0xc   : > { %p1078_p4 = por %p78_p2, %p77_p1  ;;  %p160_p5 = scmp.ne.s32.totalorder %s966_s16, %s962_s15 }
   0xd   : > { %s1240_s25 = smov (%p31_p3, %s1238_s25), 0  ;;  %s70_s29 = sadd.s32 1, %s974_s18 }
   0xe   : > { %1223 = sst [smem:[#allocation5_spill]] %s1240_s25  ;;  %p161_p6 = scmp.eq.s32.totalorder %s761_s26, 17 }
   0xf   : > { %s66_s30 = ssub.s32 %s990_s22, %s1240_s25  ;;  %s150_s5 = sadd.s32 1, %s966_s16 }
  0x10   : > { %s67_s6 = sor.u32 %s66_s30, %s65_s27  ;;  %p148_p7 = scmp.eq.s32.totalorder %s66_s30, 0 }
  0x11   : > { %p68_p8 = scmp.eq.s32.totalorder %s67_s6, 0  ;;  %p1090_p9 = por %p161_p6, %p160_p5 }
  0x12   : > { %s1095_s8 = scalar_select %p148_p7, %s966_s16, %s150_s5  }
  0x13   : > { %s1098_s9 = scalar_select %p68_p8, %s974_s18, %s70_s29  }
  0x14   : > { %p764_p10 = scmp.ge.s32.totalorder %s994_s23, 18 }
  0x16   : > { %183 = sbr.rel (%p764_p10) target bundleno = 49 (0x31), region = 16 }
  0x1d   : > { %199 = sbr.rel (!%p1078_p4) target bundleno = 49 (0x31), region = 24  ;;  %s201_s10 = sand.u32 (%p1078_p4), 1, %s974_s18  }
  0x1e   : > { %s766_s11 = sshll.u32 (%p1078_p4), %s986_s21, 5  ;;  %s765_s12 = sshll.u32 (%p1078_p4), %s201_s10, 6 }
  0x1f   : > { %s205_s13 = sadd.s32 (%p1078_p4), %s990_s22, %s766_s11  ;;  %s1225_s1 = sld [smem:[#allocation6_spill]] (%p1078_p4) }
  0x20   : > { %s767_s14 = sshll.u32 (%p1078_p4), %s205_s13, 2  ;;  %s203_s28 = scalar_lea.vmem (%p1078_p4), [#allocation3], %s765_s12 }
  0x25   : > { %s1109_s30 = scalar_lea.vmem %s1225_s1, %s767_s14 }
  0x26   : > { %v223_v0 = vld [vmem:[%s1109_s30] sm:$0xf]  ;;  %v225_v1 = vld [vmem:[%s1109_s30 + $0x8] sm:$0xf]  ;;  %v227_v2 = vld [vmem:[%s1109_s30 + $0x10] sm:$0xf] }
  0x27   : > { %224 = vst [vmem:[%s203_s28] sm:$0xf] %v223_v0  ;;  %226 = vst [vmem:[%s203_s28 + $0x4] sm:$0xf] %v225_v1  ;;  %v229_v3 = vld [vmem:[%s1109_s30 + $0x18] sm:$0xf] }
  0x28   : > { %228 = vst [vmem:[%s203_s28 + $0x8] sm:$0xf] %v227_v2  ;;  %v231_v4 = vld [vmem:[%s1109_s30 + $0x20] sm:$0xf]  ;;  %v233_v5 = vld [vmem:[%s1109_s30 + $0x28] sm:$0xf] }
  0x29   : > { %230 = vst [vmem:[%s203_s28 + $0xc] sm:$0xf] %v229_v3  ;;  %232 = vst [vmem:[%s203_s28 + $0x10] sm:$0xf] %v231_v4  ;;  %v235_v6 = vld [vmem:[%s1109_s30 + $0x30] sm:$0xf] }
  0x2a   : > { %234 = vst [vmem:[%s203_s28 + $0x14] sm:$0xf] %v233_v5  ;;  %v237_v7 = vld [vmem:[%s1109_s30 + $0x38] sm:$0xf]  ;;  %v239_v8 = vld [vmem:[%s1109_s30 + $0x40] sm:$0xf] }
  0x2b   : > { %236 = vst [vmem:[%s203_s28 + $0x18] sm:$0xf] %v235_v6  ;;  %238 = vst [vmem:[%s203_s28 + $0x1c] sm:$0xf] %v237_v7  ;;  %v241_v9 = vld [vmem:[%s1109_s30 + $0x48] sm:$0xf] }
  0x2c   : > { %240 = vst [vmem:[%s203_s28 + $0x20] sm:$0xf] %v239_v8  ;;  %v243_v10 = vld [vmem:[%s1109_s30 + $0x50] sm:$0xf]  ;;  %v245_v11 = vld [vmem:[%s1109_s30 + $0x58] sm:$0xf] }
  0x2d   : > { %242 = vst [vmem:[%s203_s28 + $0x24] sm:$0xf] %v241_v9  ;;  %244 = vst [vmem:[%s203_s28 + $0x28] sm:$0xf] %v243_v10  ;;  %v247_v12 = vld [vmem:[%s1109_s30 + $0x60] sm:$0xf] }
  0x2e   : > { %246 = vst [vmem:[%s203_s28 + $0x2c] sm:$0xf] %v245_v11  ;;  %v249_v13 = vld [vmem:[%s1109_s30 + $0x68] sm:$0xf]  ;;  %v251_v14 = vld [vmem:[%s1109_s30 + $0x70] sm:$0xf] }
  0x2f   : > { %248 = vst [vmem:[%s203_s28 + $0x30] sm:$0xf] %v247_v12  ;;  %250 = vst [vmem:[%s203_s28 + $0x34] sm:$0xf] %v249_v13  ;;  %v253_v15 = vld [vmem:[%s1109_s30 + $0x78] sm:$0xf] }
  0x30   : > { %252 = vst [vmem:[%s203_s28 + $0x38] sm:$0xf] %v251_v14  ;;  %254 = vst [vmem:[%s203_s28 + $0x3c] sm:$0xf] %v253_v15 }
  0x31 PF: > { %p768_p11 = scmp.ge.s32.totalorder %s994_s23, 1  ;;  %p320_p12 = scmp.lt.s32.totalorder %s994_s23, 19 }
  0x33   : > { %p321_p13 = pnand %p768_p11, %p320_p12 }
  0x34   : > { %s327_s29 = sand.u32 (!%p321_p13), 1, %s970_s17   ;;  %s363_s5 = sand.u32 (!%p321_p13), 1, %s962_s15  }
  0x35   : > { %324 = sbr.rel (%p321_p13) target bundleno = 345 (0x159), region = 73  ;;  %s769_s6 = sshll.u32 (!%p321_p13), %s327_s29, 6 }
  0x36   : > { %s770_s10 = sshll.u32 (!%p321_p13), %s363_s5, 4  ;;  %p367_p0 = scmp.lt.s32.totalorder (!%p321_p13), %s978_s19, 8 }
  0x37   : > { %p376_p1 = scmp.lt.s32.totalorder (!%p321_p13), %s982_s20, 1  ;;  %s1150_s1 = scalar_lea.vmem (!%p321_p13), [#allocation3], %s769_s6 }
  0x38   : > { %s1152_s25 = scalar_lea.vmem (!%p321_p13), [#allocation4], %s770_s10  ;;  %p773_p2 = scmp.ne.s32.totalorder (!%p321_p13), %s978_s19, 0 }
  0x3c   : > { %s368_s11 = scalar_select %p367_p0, %s978_s19, 8 }
  0x3d   : > { %s1135_s12 = scalar_select %p376_p1, %s982_s20, 1 }
  0x3e   : > { %s795_s13 = sshll.u32 %s368_s11, 4  ;;  %387 = sbr.rel (%p773_p2) target bundleno = 69 (0x45), region = 81  ;;  %v996_v16 = vmov (!%p773_p2), 0.0  }
  0x3f   : > { %s1140_s27 = scalar_lea.vmem %s1215_s0, %s795_s13  ;;  %s378_s17 = scalar_lea.vmem %s1217_s2, %s1135_s12  ;;  %388 = vst [vmem:[#allocation2] sm:$0xff] (!%p773_p2), %v996_v16  ;;  %389 = vst [vmem:[#allocation2 + $0x8] sm:$0xff] (!%p773_p2), %v996_v16 }
  0x40   : > { %s381_s5 = scalar_lea.vmem %s1218_s3, %s1135_s12  ;;  %390 = vst [vmem:[#allocation2 + $0x10] sm:$0xff] (!%p773_p2), %v996_v16  ;;  %391 = vst [vmem:[#allocation2 + $0x18] sm:$0xff] (!%p773_p2), %v996_v16 }
  0x45 PF: > { %v914_v17 = vld [vmem:[%s1150_s1] sm:$0xff]   ;;  %v915_v18 = vld [vmem:[%s1150_s1 + $0x8] sm:$0xff]   ;;  %v916_v19 = vld [vmem:[%s1150_s1 + $0x10] sm:$0xff]   ;;  %p784_p3 = scmp.ne.s32.totalorder %s978_s19, 8 }
  0x46   : > { %821 = vmatprep.subr.bf16.mxu0 %v914_v17  ;;  %v917_v20 = vld [vmem:[%s1150_s1 + $0x18] sm:$0xff]   ;;  %v922_v21 = vld [vmem:[%s1140_s27] sm:$0xff]   ;;  %v919_v23 = vld [vmem:[%s1150_s1 + $0x28] sm:$0xff]  }
  0x47   : > { %822 = vmatpush3.bf16.msra.mxu0 %v914_v17  ;;  %837 = vmatprep.mubr.bf16.mxu0 %v922_v21  ;;  %v918_v22 = vld [vmem:[%s1150_s1 + $0x20] sm:$0xff]   ;;  %v920_v24 = vld [vmem:[%s1150_s1 + $0x30] sm:$0xff]   ;;  %v921_v25 = vld [vmem:[%s1150_s1 + $0x38] sm:$0xff]  }
  0x48   : > { %823 = vmatprep.subr.bf16.mxu0 %v915_v18  ;;  %v923_v26 = vld [vmem:[%s1140_s27 + $0x8] sm:$0xff]   ;;  %v394_v27 = vld [vmem:[#allocation2 + $0x10] sm:$0xff]  ;;  %v392_v28 = vld [vmem:[#allocation2] sm:$0xff] }
  0x49   : > { %v395_v30 = vld [vmem:[#allocation2 + $0x18] sm:$0xff]  ;;  %v393_v33 = vld [vmem:[#allocation2 + $0x8] sm:$0xff]  ;;  %v785_v41 = vld [vmem:[%s378_s17] ss:$0 sm:$0xff] (!%p784_p3) }
  0x4a   : > { %v786_v44 = vld [vmem:[%s381_s5] ss:$0 sm:$0xff] (!%p784_p3) }
  0x4b   : > { %824 = vmatpush3.bf16.msra.mxu0 %v915_v18 }
  0x4c   : > { %825 = vmatprep.subr.bf16.mxu0 %v916_v19 }
  0x4f   : > { %826 = vmatpush3.bf16.msra.mxu0 %v916_v19 }
  0x50   : > { %827 = vmatprep.subr.bf16.mxu0 %v917_v20 }
  0x53   : > { %828 = vmatpush3.bf16.msra.mxu0 %v917_v20 }
  0x54   : > { %829 = vmatprep.subr.bf16.mxu0 %v918_v22 }
  0x57   : > { %830 = vmatpush3.bf16.msra.mxu0 %v918_v22 }
  0x58   : > { %831 = vmatprep.subr.bf16.mxu0 %v919_v23 }
  0x5b   : > { %832 = vmatpush3.bf16.msra.mxu0 %v919_v23 }
  0x5c   : > { %833 = vmatprep.subr.bf16.mxu0 %v920_v24 }
  0x5f   : > { %834 = vmatpush3.bf16.msra.mxu0 %v920_v24 }
  0x60   : > { %835 = vmatprep.subr.bf16.mxu0 %v921_v25 }
  0x63   : > { %836 = vmatpush3.bf16.msra.mxu0 %v921_v25 }
  0x66   : > { %838 = vmatmul.mubr.bf16.vlgmr.msra.gmra.mrb[0].mxu0 %v923_v26 }
 0x139   : > { %v839_v29 = vpop.f32.mrb[0].mxu0  ;;  %536 = sbr.rel (%p784_p3) target bundleno = 336 (0x150), region = 85 }
 0x13a   : > { %v527_v31 = vadd.f32 %v839_v29, %v394_v27  ;;  %v510_v32 = vpop.f32.mrb[1].mxu0 }
 0x13b   : > { %v525_v34 = vadd.f32 %v510_v32, %v392_v28  ;;  %v840_v35 = vpop.f32.mrb[2].mxu0 }
 0x13c   : > { %531 = vst [vmem:[#allocation2 + $0x10] sm:$0xff] %v527_v31  ;;  %v528_v36 = vadd.f32 %v840_v35, %v395_v30  ;;  %v513_v37 = vpop.f32.mrb[3].mxu0 }
 0x13d   : > { %529 = vst [vmem:[#allocation2] sm:$0xff] %v525_v34  ;;  %v526_v38 = vadd.f32 %v513_v37, %v393_v33 }
 0x13e   : > { %532 = vst [vmem:[#allocation2 + $0x18] sm:$0xff] %v528_v36 }
 0x13f   : > { %530 = vst [vmem:[#allocation2 + $0x8] sm:$0xff] %v526_v38 }
 0x143   : > { %v539_v45 = vld [vmem:[#allocation2 + $0x10] sm:$0xff] }
 0x144   : > { %v537_v39 = vld [vmem:[#allocation2] sm:$0xff]  ;;  %v550_v47 = vmul.f32 %v785_v41, %v539_v45 }
 0x145   : > { %v548_v42 = vmul.f32 %v785_v41, %v537_v39  ;;  %v540_v46 = vld [vmem:[#allocation2 + $0x18] sm:$0xff] }
 0x146   : > { %v538_v40 = vld [vmem:[#allocation2 + $0x8] sm:$0xff]  ;;  %v551_v48 = vmul.f32 %v785_v41, %v540_v46  ;;  %v561_v51 = vadd.f32 %v786_v44, %v550_v47 }
 0x147   : > { %v549_v43 = vmul.f32 %v785_v41, %v538_v40  ;;  %v559_v49 = vadd.f32 %v786_v44, %v548_v42 }
 0x148   : > { %v562_v52 = vadd.f32 %v786_v44, %v551_v48  ;;  %v565_v55 = vmax.f32 %v561_v51, 0.0 }
 0x149   : > { %v560_v50 = vadd.f32 %v786_v44, %v549_v43  ;;  %v563_v53 = vmax.f32 %v559_v49, 0.0 }
 0x14a   : > { %v566_v56 = vmax.f32 %v562_v52, 0.0 }
 0x14b   : > { %v564_v54 = vmax.f32 %v560_v50, 0.0 }
 0x14c   : > { %v808_v58 = vpack.c.bf16 %v566_v56, %v565_v55 }
 0x14d   : > { %v803_v57 = vpack.c.bf16 %v564_v54, %v563_v53 }
 0x14e   : > { %810 = vst [vmem:[%s1152_s25 + $0x8] sm:$0xff] %v808_v58  }
 0x14f   : > { %804 = vst [vmem:[%s1152_s25] sm:$0xff] %v803_v57  }
 0x150 PF: > { %593 = sbr.rel (!%p1090_p9) target bundleno = 345 (0x159), region = 89  ;;  %s792_s19 = sshll.u32 (%p1090_p9), %s982_s20, 2 }
 0x151   : > { %s598_s14 = scalar_lea.vmem (%p1090_p9), %s1219_s4, %s792_s19 }
 0x155   : > { %v618_v61 = vld [vmem:[%s1152_s25 + $0x8] sm:$0xf] (%p1090_p9)  ;;  %v620_v62 = vld [vmem:[%s1152_s25 + $0xc] sm:$0xf] (%p1090_p9) }
 0x156   : > { %v614_v59 = vld [vmem:[%s1152_s25] sm:$0xf] (%p1090_p9)  ;;  %v616_v60 = vld [vmem:[%s1152_s25 + $0x4] sm:$0xf] (%p1090_p9)  ;;  %619 = vst [vmem:[%s598_s14 + $0x10] sm:$0xf] (%p1090_p9), %v618_v61 }
 0x157   : > { %615 = vst [vmem:[%s598_s14] sm:$0xf] %v614_v59  ;;  %617 = vst [vmem:[%s598_s14 + $0x8] sm:$0xf] %v616_v60 }
 0x158   : > { %621 = vst [vmem:[%s598_s14 + $0x18] sm:$0xf] %v620_v62 }
 0x159 PF: > { %s14_s23 = sadd.s32 1, %s994_s23   ;;  %s1226_s7 = sld [smem:[#allocation5_spill]] }
 0x15a   : > { %p11_p4 = scmp.ge.s32.totalorder %s14_s23, 20   ;;  %s1227_s15 = smov %s966_s16 }
 0x15b   : > { %s1228_s16 = smov %s1095_s8  ;;  %s1229_s17 = smov %s974_s18 }
 0x15c   : > { %s1230_s18 = smov %s1098_s9  ;;  %s1231_s19 = smov %s986_s21 }
 0x15d   : > { %s1232_s20 = smov %s990_s22  ;;  %s1233_s21 = smov %s1236_s24 }
 0x15e   :  { %13 = sbr.rel (!%p11_p4) target bundleno = 7 (0x7), region = 170 }
 0x15f   : > { %s1234_s22 = smov %s1226_s7 }

// kernel: forward.58
= control target key start
LH: loop header
LB: loop body
LE: loop exit
PB: predicated region body
PF: predicated region fallthrough
CT: control target
= control target key end

     0   :  { %s1453_s0 = inlined_call_operand.vmem [shape: bf16[9,32,256], index: 0, kind: input, shape index: {}]   ;;  %s1454_s1 = inlined_call_operand.vmem [shape: bf16[9,256,256], index: 1, kind: input, shape index: {}]   ;;  %s1455_s2 = inlined_call_operand.vmem [shape: f32[1,256], index: 2, kind: input, shape index: {}]   ;;  %s1456_s3 = inlined_call_operand.vmem [shape: f32[1,256], index: 3, kind: input, shape index: {}]   ;;  %s1457_s4 = inlined_call_operand.vmem [shape: bf16[32,256], index: 4, kind: output, shape index: {}]  }
   0x1   :  { %1459 = sst [smem:[#allocation6_spill]] %s1454_s1 }
   0x2   :  { %s1200_s15 = smov 0   ;;  %s1202_s16 = smov 0  }
   0x3   :  { %s1204_s17 = smov 0   ;;  %s1206_s18 = smov 0  }
   0x4   :  { %s1208_s19 = smov 0   ;;  %s1210_s20 = smov 0  }
   0x5   :  { %s1212_s21 = smov 0   ;;  %s1214_s22 = smov 0  }
   0x6   :  { %s1216_s23 = smov 0  }
   0x7 LB: > { %s26_s24 = sadd.s32 1, %s1164_s21  ;;  %s29_s25 = sadd.s32 1, %s1168_s22  ;;  %s1172_s23 = sphi %s1216_s23, %s14_s23   ;;  %s1168_s22 = sphi %s1214_s22, %s1472_s22   ;;  %s1164_s21 = sphi %s1212_s21, %s1471_s21   ;;  %s1160_s20 = sphi %s1210_s20, %s1470_s20   ;;  %s1156_s19 = sphi %s1208_s19, %s1469_s19   ;;  %s1152_s18 = sphi %s1206_s18, %s1468_s18   ;;  %s1148_s17 = sphi %s1204_s17, %s1467_s17   ;;  %s1144_s16 = sphi %s1202_s16, %s1466_s16   ;;  %s1140_s15 = sphi %s1200_s15, %s1465_s15  }
   0x8   : > { %p27_p0 = scmp.ge.s32.totalorder %s26_s24, 9  ;;  %p77_p1 = scmp.ne.s32.totalorder %s1152_s18, %s1148_s17 }
   0x9   : > { %s903_s26 = sadd.s32 4294967295, %s1172_s23   ;;  %p78_p2 = scmp.eq.s32.totalorder %s1172_s23, 0 }
   0xa   : > { %s1474_s24 = smov (%p27_p0, %s26_s24), 0  ;;  %s1476_s25 = smov (!%p27_p0, %s29_s25), %s1168_s22 }
   0xb   : > { %p31_p3 = scmp.ge.s32.totalorder %s1476_s25, 2  ;;  %s65_s27 = ssub.s32 %s1164_s21, %s1474_s24 }
   0xc   : > { %p1256_p4 = por %p78_p2, %p77_p1  ;;  %p160_p5 = scmp.ne.s32.totalorder %s1144_s16, %s1140_s15 }
   0xd   : > { %s1478_s25 = smov (%p31_p3, %s1476_s25), 0  ;;  %s70_s29 = sadd.s32 1, %s1152_s18 }
   0xe   : > { %1461 = sst [smem:[#allocation5_spill]] %s1478_s25  ;;  %p161_p6 = scmp.eq.s32.totalorder %s903_s26, 17 }
   0xf   : > { %s66_s30 = ssub.s32 %s1168_s22, %s1478_s25  ;;  %s150_s5 = sadd.s32 1, %s1144_s16 }
  0x10   : > { %s67_s6 = sor.u32 %s66_s30, %s65_s27  ;;  %p148_p7 = scmp.eq.s32.totalorder %s66_s30, 0 }
  0x11   : > { %p68_p8 = scmp.eq.s32.totalorder %s67_s6, 0  ;;  %p1268_p9 = por %p161_p6, %p160_p5 }
  0x12   : > { %s1273_s8 = scalar_select %p148_p7, %s1144_s16, %s150_s5  }
  0x13   : > { %s1276_s9 = scalar_select %p68_p8, %s1152_s18, %s70_s29  }
  0x14   : > { %p906_p10 = scmp.ge.s32.totalorder %s1172_s23, 18 }
  0x16   : > { %183 = sbr.rel (%p906_p10) target bundleno = 60 (0x3c), region = 16 }
  0x1d   : > { %200 = sbr.rel (!%p1256_p4) target bundleno = 60 (0x3c), region = 24  ;;  %s202_s10 = sand.u32 (%p1256_p4), 1, %s1152_s18  }
  0x1e   : > { %s908_s11 = sshll.u32 (%p1256_p4), %s1164_s21, 6  ;;  %s907_s12 = sshll.u32 (%p1256_p4), %s202_s10, 7 }
  0x1f   : > { %s206_s13 = sadd.s32 (%p1256_p4), %s1168_s22, %s908_s11  ;;  %s1463_s1 = sld [smem:[#allocation6_spill]] (%p1256_p4) }
  0x20   : > { %s909_s14 = sshll.u32 (%p1256_p4), %s206_s13, 2  ;;  %s1292_s28 = scalar_lea.vmem (%p1256_p4), [#allocation3], %s907_s12 }
  0x25   : > { %s1287_s30 = scalar_lea.vmem %s1463_s1, %s909_s14 }
  0x26   : > { %v224_v0 = vld [vmem:[%s1287_s30] sm:$0xf]  ;;  %v226_v1 = vld [vmem:[%s1287_s30 + $0x8] sm:$0xf]  ;;  %v228_v2 = vld [vmem:[%s1287_s30 + $0x10] sm:$0xf] }
  0x27   : > { %225 = vst [vmem:[%s1292_s28] sm:$0xf] %v224_v0  ;;  %227 = vst [vmem:[%s1292_s28 + $0x4] sm:$0xf] %v226_v1  ;;  %v230_v3 = vld [vmem:[%s1287_s30 + $0x18] sm:$0xf] }
  0x28   : > { %229 = vst [vmem:[%s1292_s28 + $0x8] sm:$0xf] %v228_v2  ;;  %v232_v4 = vld [vmem:[%s1287_s30 + $0x20] sm:$0xf]  ;;  %v234_v5 = vld [vmem:[%s1287_s30 + $0x28] sm:$0xf] }
  0x29   : > { %231 = vst [vmem:[%s1292_s28 + $0xc] sm:$0xf] %v230_v3  ;;  %233 = vst [vmem:[%s1292_s28 + $0x10] sm:$0xf] %v232_v4  ;;  %v236_v6 = vld [vmem:[%s1287_s30 + $0x30] sm:$0xf] }
  0x2a   : > { %235 = vst [vmem:[%s1292_s28 + $0x14] sm:$0xf] %v234_v5  ;;  %v238_v7 = vld [vmem:[%s1287_s30 + $0x38] sm:$0xf]  ;;  %v240_v8 = vld [vmem:[%s1287_s30 + $0x40] sm:$0xf] }
  0x2b   : > { %237 = vst [vmem:[%s1292_s28 + $0x18] sm:$0xf] %v236_v6  ;;  %239 = vst [vmem:[%s1292_s28 + $0x1c] sm:$0xf] %v238_v7  ;;  %v242_v9 = vld [vmem:[%s1287_s30 + $0x48] sm:$0xf] }
  0x2c   : > { %241 = vst [vmem:[%s1292_s28 + $0x20] sm:$0xf] %v240_v8  ;;  %v244_v10 = vld [vmem:[%s1287_s30 + $0x50] sm:$0xf]  ;;  %v246_v11 = vld [vmem:[%s1287_s30 + $0x58] sm:$0xf] }
  0x2d   : > { %243 = vst [vmem:[%s1292_s28 + $0x24] sm:$0xf] %v242_v9  ;;  %245 = vst [vmem:[%s1292_s28 + $0x28] sm:$0xf] %v244_v10  ;;  %v248_v12 = vld [vmem:[%s1287_s30 + $0x60] sm:$0xf] }
  0x2e   : > { %247 = vst [vmem:[%s1292_s28 + $0x2c] sm:$0xf] %v246_v11  ;;  %v250_v13 = vld [vmem:[%s1287_s30 + $0x68] sm:$0xf]  ;;  %v252_v14 = vld [vmem:[%s1287_s30 + $0x70] sm:$0xf] }
  0x2f   : > { %249 = vst [vmem:[%s1292_s28 + $0x30] sm:$0xf] %v248_v12  ;;  %251 = vst [vmem:[%s1292_s28 + $0x34] sm:$0xf] %v250_v13  ;;  %v254_v15 = vld [vmem:[%s1287_s30 + $0x78] sm:$0xf] }
  0x30   : > { %253 = vst [vmem:[%s1292_s28 + $0x38] sm:$0xf] %v252_v14  ;;  %v256_v16 = vld [vmem:[%s1287_s30 + $0x80] sm:$0xf]  ;;  %v258_v17 = vld [vmem:[%s1287_s30 + $0x88] sm:$0xf] }
  0x31   : > { %255 = vst [vmem:[%s1292_s28 + $0x3c] sm:$0xf] %v254_v15  ;;  %257 = vst [vmem:[%s1292_s28 + $0x40] sm:$0xf] %v256_v16  ;;  %v260_v18 = vld [vmem:[%s1287_s30 + $0x90] sm:$0xf] }
  0x32   : > { %259 = vst [vmem:[%s1292_s28 + $0x44] sm:$0xf] %v258_v17  ;;  %v262_v19 = vld [vmem:[%s1287_s30 + $0x98] sm:$0xf]  ;;  %v264_v20 = vld [vmem:[%s1287_s30 + $0xa0] sm:$0xf] }
  0x33   : > { %261 = vst [vmem:[%s1292_s28 + $0x48] sm:$0xf] %v260_v18  ;;  %263 = vst [vmem:[%s1292_s28 + $0x4c] sm:$0xf] %v262_v19  ;;  %v266_v21 = vld [vmem:[%s1287_s30 + $0xa8] sm:$0xf] }
  0x34   : > { %265 = vst [vmem:[%s1292_s28 + $0x50] sm:$0xf] %v264_v20  ;;  %v268_v22 = vld [vmem:[%s1287_s30 + $0xb0] sm:$0xf]  ;;  %v270_v23 = vld [vmem:[%s1287_s30 + $0xb8] sm:$0xf] }
  0x35   : > { %267 = vst [vmem:[%s1292_s28 + $0x54] sm:$0xf] %v266_v21  ;;  %269 = vst [vmem:[%s1292_s28 + $0x58] sm:$0xf] %v268_v22  ;;  %v272_v24 = vld [vmem:[%s1287_s30 + $0xc0] sm:$0xf] }
  0x36   : > { %271 = vst [vmem:[%s1292_s28 + $0x5c] sm:$0xf] %v270_v23  ;;  %v274_v25 = vld [vmem:[%s1287_s30 + $0xc8] sm:$0xf]  ;;  %v276_v26 = vld [vmem:[%s1287_s30 + $0xd0] sm:$0xf] }
  0x37   : > { %273 = vst [vmem:[%s1292_s28 + $0x60] sm:$0xf] %v272_v24  ;;  %275 = vst [vmem:[%s1292_s28 + $0x64] sm:$0xf] %v274_v25  ;;  %v278_v27 = vld [vmem:[%s1287_s30 + $0xd8] sm:$0xf] }
  0x38   : > { %277 = vst [vmem:[%s1292_s28 + $0x68] sm:$0xf] %v276_v26  ;;  %v280_v28 = vld [vmem:[%s1287_s30 + $0xe0] sm:$0xf]  ;;  %v282_v29 = vld [vmem:[%s1287_s30 + $0xe8] sm:$0xf] }
  0x39   : > { %279 = vst [vmem:[%s1292_s28 + $0x6c] sm:$0xf] %v278_v27  ;;  %281 = vst [vmem:[%s1292_s28 + $0x70] sm:$0xf] %v280_v28  ;;  %v284_v30 = vld [vmem:[%s1287_s30 + $0xf0] sm:$0xf] }
  0x3a   : > { %283 = vst [vmem:[%s1292_s28 + $0x74] sm:$0xf] %v282_v29  ;;  %v286_v31 = vld [vmem:[%s1287_s30 + $0xf8] sm:$0xf]  ;;  %285 = vst [vmem:[%s1292_s28 + $0x78] sm:$0xf] %v284_v30 }
  0x3b   : > { %287 = vst [vmem:[%s1292_s28 + $0x7c] sm:$0xf] %v286_v31 }
  0x3c PF: > { %p910_p11 = scmp.ge.s32.totalorder %s1172_s23, 1  ;;  %p385_p12 = scmp.lt.s32.totalorder %s1172_s23, 19 }
  0x3e   : > { %p386_p13 = pnand %p910_p11, %p385_p12 }
  0x3f   : > { %s392_s29 = sand.u32 (!%p386_p13), 1, %s1148_s17   ;;  %s429_s5 = sand.u32 (!%p386_p13), 1, %s1140_s15  }
  0x40   : > { %389 = sbr.rel (%p386_p13) target bundleno = 358 (0x166), region = 73  ;;  %s911_s6 = sshll.u32 (!%p386_p13), %s392_s29, 7 }
  0x41   : > { %s912_s10 = sshll.u32 (!%p386_p13), %s429_s5, 4  ;;  %p433_p0 = scmp.lt.s32.totalorder (!%p386_p13), %s1156_s19, 8 }
  0x42   : > { %p443_p1 = scmp.lt.s32.totalorder (!%p386_p13), %s1160_s20, 1  ;;  %s1378_s1 = scalar_lea.vmem (!%p386_p13), [#allocation3], %s911_s6 }
  0x43   : > { %s1380_s25 = scalar_lea.vmem (!%p386_p13), [#allocation4], %s912_s10  ;;  %p915_p2 = scmp.ne.s32.totalorder (!%p386_p13), %s1156_s19, 0 }
  0x47   : > { %s434_s11 = scalar_select %p433_p0, %s1156_s19, 8 }
  0x48   : > { %s1363_s12 = scalar_select %p443_p1, %s1160_s20, 1 }
  0x49   : > { %s947_s13 = sshll.u32 %s434_s11, 5  ;;  %454 = sbr.rel (%p915_p2) target bundleno = 80 (0x50), region = 81  ;;  %v1174_v32 = vmov (!%p915_p2), 0.0  }
  0x4a   : > { %s1368_s27 = scalar_lea.vmem %s1453_s0, %s947_s13  ;;  %s445_s17 = scalar_lea.vmem %s1455_s2, %s1363_s12  ;;  %455 = vst [vmem:[#allocation2] sm:$0xff] (!%p915_p2), %v1174_v32  ;;  %456 = vst [vmem:[#allocation2 + $0x8] sm:$0xff] (!%p915_p2), %v1174_v32 }
  0x4b   : > { %s448_s5 = scalar_lea.vmem %s1456_s3, %s1363_s12  ;;  %457 = vst [vmem:[#allocation2 + $0x10] sm:$0xff] (!%p915_p2), %v1174_v32  ;;  %458 = vst [vmem:[#allocation2 + $0x18] sm:$0xff] (!%p915_p2), %v1174_v32 }
  0x50 PF: > { %v1080_v33 = vld [vmem:[%s1378_s1 + $0x40] sm:$0xff]   ;;  %v1082_v35 = vld [vmem:[%s1378_s1 + $0x48] sm:$0xff]   ;;  %v1084_v37 = vld [vmem:[%s1378_s1 + $0x50] sm:$0xff]   ;;  %p936_p3 = scmp.ne.s32.totalorder %s1156_s19, 8 }
  0x51   : > { %v1081_v34 = vld [vmem:[%s1378_s1] sm:$0xff]   ;;  %963 = vmatprep.subr.bf16.mxu0 %v1080_v33  ;;  %991 = vmatprep.subr.bf16.mxu1 %v1080_v33  ;;  %v1083_v36 = vld [vmem:[%s1378_s1 + $0x8] sm:$0xff]   ;;  %v1085_v38 = vld [vmem:[%s1378_s1 + $0x10] sm:$0xff]  }
  0x52   : > { %964 = vmatpush3.bf16.msra.mxu0 %v1081_v34  ;;  %999 = vmatpush3.bf16.msra.mxu1 %v1081_v34  ;;  %v1086_v39 = vld [vmem:[%s1378_s1 + $0x58] sm:$0xff]   ;;  %v1088_v41 = vld [vmem:[%s1378_s1 + $0x60] sm:$0xff]   ;;  %v1090_v43 = vld [vmem:[%s1378_s1 + $0x68] sm:$0xff]  }
  0x53   : > { %965 = vmatprep.subr.bf16.mxu0 %v1082_v35  ;;  %992 = vmatprep.subr.bf16.mxu1 %v1082_v35  ;;  %v1087_v40 = vld [vmem:[%s1378_s1 + $0x18] sm:$0xff]   ;;  %v1089_v42 = vld [vmem:[%s1378_s1 + $0x20] sm:$0xff]   ;;  %v1091_v46 = vld [vmem:[%s1378_s1 + $0x28] sm:$0xff]  }
  0x54   : > { %v1098_v44 = vld [vmem:[%s1368_s27 + $0x4] ss:$8 sps:$4 sm:$0xff]   ;;  %v1101_v45 = vld [vmem:[%s1368_s27 + $0x14] ss:$8 sps:$4 sm:$0xff]   ;;  %v1096_v51 = vld [vmem:[%s1368_s27] ss:$8 sps:$4 sm:$0xff]  }
  0x55   : > { %v1092_v47 = vld [vmem:[%s1378_s1 + $0x70] sm:$0xff]   ;;  %647 = vmatprep.mubr.bf16.mxu0 %v1098_v44  ;;  %655 = vmatprep.mubr.bf16.mxu1 %v1101_v45  ;;  %v1094_v49 = vld [vmem:[%s1378_s1 + $0x78] sm:$0xff]   ;;  %v459_v55 = vld [vmem:[#allocation2] sm:$0xff] }
  0x56   : > { %966 = vmatpush3.bf16.msra.mxu0 %v1083_v36  ;;  %1000 = vmatpush3.bf16.msra.mxu1 %v1083_v36  ;;  %v1093_v48 = vld [vmem:[%s1378_s1 + $0x30] sm:$0xff]   ;;  %v1095_v50 = vld [vmem:[%s1378_s1 + $0x38] sm:$0xff]   ;;  %v460_v63 = vld [vmem:[#allocation2 + $0x8] sm:$0xff] }
  0x57   : > { %967 = vmatprep.subr.bf16.mxu0 %v1084_v37  ;;  %993 = vmatprep.subr.bf16.mxu1 %v1084_v37  ;;  %v1099_v52 = vld [vmem:[%s1368_s27 + $0x10] ss:$8 sps:$4 sm:$0xff]   ;;  %v937_v11 = vld [vmem:[%s445_s17] ss:$0 sm:$0xff] (!%p936_p3) }
  0x58   : > { %v461_v57 = vld [vmem:[#allocation2 + $0x10] sm:$0xff]  ;;  %v462_v1 = vld [vmem:[#allocation2 + $0x18] sm:$0xff]  ;;  %v938_v14 = vld [vmem:[%s448_s5] ss:$0 sm:$0xff] (!%p936_p3) }
  0x5a   : > { %968 = vmatpush3.bf16.msra.mxu0 %v1085_v38  ;;  %1001 = vmatpush3.bf16.msra.mxu1 %v1085_v38 }
  0x5b   : > { %969 = vmatprep.subr.bf16.mxu0 %v1086_v39  ;;  %994 = vmatprep.subr.bf16.mxu1 %v1086_v39 }
  0x5e   : > { %970 = vmatpush3.bf16.msra.mxu0 %v1087_v40  ;;  %1002 = vmatpush3.bf16.msra.mxu1 %v1087_v40 }
  0x5f   : > { %971 = vmatprep.subr.bf16.mxu0 %v1088_v41  ;;  %995 = vmatprep.subr.bf16.mxu1 %v1088_v41 }
  0x62   : > { %972 = vmatpush3.bf16.msra.mxu0 %v1089_v42  ;;  %1003 = vmatpush3.bf16.msra.mxu1 %v1089_v42 }
  0x63   : > { %973 = vmatprep.subr.bf16.mxu0 %v1090_v43  ;;  %996 = vmatprep.subr.bf16.mxu1 %v1090_v43 }
  0x66   : > { %974 = vmatpush3.bf16.msra.mxu0 %v1091_v46  ;;  %1004 = vmatpush3.bf16.msra.mxu1 %v1091_v46 }
  0x67   : > { %975 = vmatprep.subr.bf16.mxu0 %v1092_v47  ;;  %997 = vmatprep.subr.bf16.mxu1 %v1092_v47 }
  0x6a   : > { %976 = vmatpush3.bf16.msra.mxu0 %v1093_v48  ;;  %1005 = vmatpush3.bf16.msra.mxu1 %v1093_v48 }
  0x6b   : > { %977 = vmatprep.subr.bf16.mxu0 %v1094_v49  ;;  %998 = vmatprep.subr.bf16.mxu1 %v1094_v49 }
  0x6e   : > { %978 = vmatpush3.bf16.msra.mxu0 %v1095_v50  ;;  %1006 = vmatpush3.bf16.msra.mxu1 %v1095_v50 }
  0x71   : > { %648 = vmatmul.mubr.bf16.vlgmr.msra.gmra.mrb[0].mxu0 %v1096_v51  ;;  %656 = vmatmul.mubr.bf16.vlgmr.msra.gmra.mrb[0].mxu1 %v1099_v52 }
 0x144   : > { %v979_v53 = vpop.f32.mrb[0].mxu0  ;;  %v985_v54 = vpop.f32.mrb[0].mxu1 }
 0x145   : > { %v980_v56 = vpop.f32.mrb[1].mxu0  ;;  %v986_v58 = vpop.f32.mrb[1].mxu1 }
 0x146   : > { %v981_v59 = vadd.f32 %v980_v56, %v979_v53  ;;  %v987_v60 = vadd.f32 %v986_v58, %v985_v54  ;;  %v982_v61 = vpop.f32.mrb[2].mxu0  ;;  %v988_v62 = vpop.f32.mrb[2].mxu1  ;;  %675 = sbr.rel (%p936_p3) target bundleno = 349 (0x15d), region = 85 }
 0x147   : > { %v983_v0 = vpop.f32.mrb[3].mxu0  ;;  %v989_v2 = vpop.f32.mrb[3].mxu1 }
 0x148   : > { %v664_v3 = vadd.f32 %v981_v59, %v459_v55  ;;  %v666_v4 = vadd.f32 %v987_v60, %v461_v57  ;;  %v984_v5 = vadd.f32 %v983_v0, %v982_v61  ;;  %v990_v6 = vadd.f32 %v989_v2, %v988_v62 }
 0x14a   : > { %668 = vst [vmem:[#allocation2] sm:$0xff] %v664_v3  ;;  %670 = vst [vmem:[#allocation2 + $0x10] sm:$0xff] %v666_v4  ;;  %v665_v7 = vadd.f32 %v984_v5, %v460_v63  ;;  %v667_v8 = vadd.f32 %v990_v6, %v462_v1 }
 0x14c   : > { %669 = vst [vmem:[#allocation2 + $0x8] sm:$0xff] %v665_v7  ;;  %671 = vst [vmem:[#allocation2 + $0x18] sm:$0xff] %v667_v8 }
 0x151   : > { %v676_v9 = vld [vmem:[#allocation2] sm:$0xff]  ;;  %v678_v15 = vld [vmem:[#allocation2 + $0x10] sm:$0xff] }
 0x152   : > { %v687_v12 = vmul.f32 %v937_v11, %v676_v9  ;;  %v689_v17 = vmul.f32 %v937_v11, %v678_v15 }
 0x153   : > { %v677_v10 = vld [vmem:[#allocation2 + $0x8] sm:$0xff]  ;;  %v679_v16 = vld [vmem:[#allocation2 + $0x18] sm:$0xff] }
 0x154   : > { %v688_v13 = vmul.f32 %v937_v11, %v677_v10  ;;  %v690_v18 = vmul.f32 %v937_v11, %v679_v16  ;;  %v698_v19 = vadd.f32 %v938_v14, %v687_v12  ;;  %v700_v21 = vadd.f32 %v938_v14, %v689_v17 }
 0x156   : > { %v699_v20 = vadd.f32 %v938_v14, %v688_v13  ;;  %v701_v22 = vadd.f32 %v938_v14, %v690_v18  ;;  %v702_v23 = vmax.f32 %v698_v19, 0.0  ;;  %v704_v25 = vmax.f32 %v700_v21, 0.0 }
 0x158   : > { %v703_v24 = vmax.f32 %v699_v20, 0.0  ;;  %v705_v26 = vmax.f32 %v701_v22, 0.0 }
 0x15a   : > { %v955_v27 = vpack.c.bf16 %v703_v24, %v702_v23  ;;  %v960_v28 = vpack.c.bf16 %v705_v26, %v704_v25 }
 0x15c   : > { %956 = vst [vmem:[%s1380_s25] sm:$0xff] %v955_v27   ;;  %962 = vst [vmem:[%s1380_s25 + $0x8] sm:$0xff] %v960_v28  }
 0x15d PF: > { %732 = sbr.rel (!%p1268_p9) target bundleno = 358 (0x166), region = 89  ;;  %s944_s19 = sshll.u32 (%p1268_p9), %s1160_s20, 2 }
 0x15e   : > { %s737_s14 = scalar_lea.vmem (%p1268_p9), %s1457_s4, %s944_s19 }
 0x163   : > { %v753_v29 = vld [vmem:[%s1380_s25] sm:$0xf] (%p1268_p9)  ;;  %v755_v30 = vld [vmem:[%s1380_s25 + $0x4] sm:$0xf] (%p1268_p9)  ;;  %v757_v31 = vld [vmem:[%s1380_s25 + $0x8] sm:$0xf] (%p1268_p9) }
 0x164   : > { %v759_v32 = vld [vmem:[%s1380_s25 + $0xc] sm:$0xf]  ;;  %754 = vst [vmem:[%s737_s14] sm:$0xf] %v753_v29  ;;  %756 = vst [vmem:[%s737_s14 + $0x8] sm:$0xf] %v755_v30 }
 0x165   : > { %758 = vst [vmem:[%s737_s14 + $0x10] sm:$0xf] %v757_v31  ;;  %760 = vst [vmem:[%s737_s14 + $0x18] sm:$0xf] %v759_v32 }
 0x166 PF: > { %s14_s23 = sadd.s32 1, %s1172_s23   ;;  %s1464_s7 = sld [smem:[#allocation5_spill]] }
 0x167   : > { %p11_p4 = scmp.ge.s32.totalorder %s14_s23, 20   ;;  %s1465_s15 = smov %s1144_s16 }
 0x168   : > { %s1466_s16 = smov %s1273_s8  ;;  %s1467_s17 = smov %s1152_s18 }
 0x169   : > { %s1468_s18 = smov %s1276_s9  ;;  %s1469_s19 = smov %s1164_s21 }
 0x16a   : > { %s1470_s20 = smov %s1168_s22  ;;  %s1471_s21 = smov %s1474_s24 }
 0x16b   :  { %13 = sbr.rel (!%p11_p4) target bundleno = 7 (0x7), region = 170 }
 0x16c   : > { %s1472_s22 = smov %s1464_s7 }

// kernel: forward.55
= control target key start
LH: loop header
LB: loop body
LE: loop exit
PB: predicated region body
PF: predicated region fallthrough
CT: control target
= control target key end

     0   :  { %s946_s15 = smov 0   ;;  %s948_s16 = smov 0   ;;  %s1054_s0 = inlined_call_operand.vmem [shape: bf16[1,32,128], index: 0, kind: input, shape index: {}]   ;;  %s1055_s1 = inlined_call_operand.vmem [shape: bf16[1,128,256], index: 1, kind: input, shape index: {}]   ;;  %s1056_s2 = inlined_call_operand.vmem [shape: f32[1,256], index: 2, kind: input, shape index: {}]   ;;  %s1057_s3 = inlined_call_operand.vmem [shape: f32[1,256], index: 3, kind: input, shape index: {}]   ;;  %s1058_s4 = inlined_call_operand.vmem [shape: bf16[32,256], index: 4, kind: output, shape index: {}]  }
   0x1   :  { %s950_s17 = smov 0   ;;  %s952_s18 = smov 0  }
   0x2   :  { %s954_s19 = smov 0  }
   0x3 LB: > { %s29_s20 = sadd.s32 1, %s915_s18  ;;  %s756_s21 = sadd.s32 4294967295, %s919_s19   ;;  %s919_s19 = sphi %s954_s19, %s14_s19   ;;  %s915_s18 = sphi %s952_s18, %s1063_s18   ;;  %s911_s17 = sphi %s950_s17, %s1062_s17   ;;  %s907_s16 = sphi %s948_s16, %s1061_s16   ;;  %s903_s15 = sphi %s946_s15, %s1060_s15  }
   0x4   : > { %p31_p0 = scmp.ge.s32.totalorder %s29_s20, 2  ;;  %p77_p1 = scmp.ne.s32.totalorder %s907_s16, %s903_s15 }
   0x5   : > { %p78_p2 = scmp.eq.s32.totalorder %s919_s19, 0  ;;  %p161_p4 = scmp.eq.s32.totalorder %s756_s21, 1 }
   0x6   : > { %s1065_s20 = smov (%p31_p0, %s29_s20), 0  ;;  %s70_s23 = sadd.s32 1, %s907_s16 }
   0x7   : > { %p79_p3 = por %p78_p2, %p77_p1  ;;  %s66_s22 = ssub.s32 %s915_s18, %s1065_s20 }
   0x8   : > { %p68_p5 = scmp.eq.s32.totalorder %s66_s22, 0  ;;  %p981_p6 = por %p161_p4, %p77_p1 }
   0x9   : > { %p760_p7 = scmp.ge.s32.totalorder %s919_s19, 2 }
   0xa   : > { %s986_s25 = scalar_select %p68_p5, %s907_s16, %s70_s23  }
   0xb   : > { %196 = sbr.rel (%p760_p7) target bundleno = 32 (0x20), region = 20 }
  0x12   : > { %199 = sbr.rel (!%p79_p3) target bundleno = 32 (0x20), region = 24  ;;  %s201_s26 = sand.u32 (%p79_p3), 1, %s907_s16  }
  0x13   : > { %s762_s27 = sshll.u32 (%p79_p3), %s915_s18, 2  ;;  %s761_s28 = sshll.u32 (%p79_p3), %s201_s26, 6 }
  0x14   : > { %s994_s5 = scalar_lea.vmem (%p79_p3), %s1055_s1, %s762_s27  ;;  %s203_s6 = scalar_lea.vmem (%p79_p3), [#allocation3], %s761_s28 }
  0x15   : > { %v223_v0 = vld [vmem:[%s994_s5] sm:$0xf] (%p79_p3)  ;;  %v225_v1 = vld [vmem:[%s994_s5 + $0x8] sm:$0xf] (%p79_p3)  ;;  %v227_v2 = vld [vmem:[%s994_s5 + $0x10] sm:$0xf] (%p79_p3) }
  0x16   : > { %224 = vst [vmem:[%s203_s6] sm:$0xf] (%p79_p3), %v223_v0  ;;  %226 = vst [vmem:[%s203_s6 + $0x4] sm:$0xf] (%p79_p3), %v225_v1  ;;  %v229_v3 = vld [vmem:[%s994_s5 + $0x18] sm:$0xf] (%p79_p3) }
  0x17   : > { %v231_v4 = vld [vmem:[%s994_s5 + $0x20] sm:$0xf] (%p79_p3)  ;;  %228 = vst [vmem:[%s203_s6 + $0x8] sm:$0xf] (%p79_p3), %v227_v2  ;;  %230 = vst [vmem:[%s203_s6 + $0xc] sm:$0xf] (%p79_p3), %v229_v3 }
  0x18   : > { %232 = vst [vmem:[%s203_s6 + $0x10] sm:$0xf] (%p79_p3), %v231_v4  ;;  %v233_v5 = vld [vmem:[%s994_s5 + $0x28] sm:$0xf] (%p79_p3)  ;;  %v235_v6 = vld [vmem:[%s994_s5 + $0x30] sm:$0xf] (%p79_p3) }
  0x19   : > { %v237_v7 = vld [vmem:[%s994_s5 + $0x38] sm:$0xf]  ;;  %234 = vst [vmem:[%s203_s6 + $0x14] sm:$0xf] %v233_v5  ;;  %236 = vst [vmem:[%s203_s6 + $0x18] sm:$0xf] %v235_v6 }
  0x1a   : > { %238 = vst [vmem:[%s203_s6 + $0x1c] sm:$0xf] %v237_v7  ;;  %v239_v8 = vld [vmem:[%s994_s5 + $0x40] sm:$0xf]  ;;  %v241_v9 = vld [vmem:[%s994_s5 + $0x48] sm:$0xf] }
  0x1b   : > { %v243_v10 = vld [vmem:[%s994_s5 + $0x50] sm:$0xf]  ;;  %240 = vst [vmem:[%s203_s6 + $0x20] sm:$0xf] %v239_v8  ;;  %242 = vst [vmem:[%s203_s6 + $0x24] sm:$0xf] %v241_v9 }
  0x1c   : > { %244 = vst [vmem:[%s203_s6 + $0x28] sm:$0xf] %v243_v10  ;;  %v245_v11 = vld [vmem:[%s994_s5 + $0x58] sm:$0xf]  ;;  %v247_v12 = vld [vmem:[%s994_s5 + $0x60] sm:$0xf] }
  0x1d   : > { %v249_v13 = vld [vmem:[%s994_s5 + $0x68] sm:$0xf]  ;;  %246 = vst [vmem:[%s203_s6 + $0x2c] sm:$0xf] %v245_v11  ;;  %248 = vst [vmem:[%s203_s6 + $0x30] sm:$0xf] %v247_v12 }
  0x1e   : > { %250 = vst [vmem:[%s203_s6 + $0x34] sm:$0xf] %v249_v13  ;;  %v251_v14 = vld [vmem:[%s994_s5 + $0x70] sm:$0xf]  ;;  %v253_v15 = vld [vmem:[%s994_s5 + $0x78] sm:$0xf] }
  0x1f   : > { %252 = vst [vmem:[%s203_s6 + $0x38] sm:$0xf] %v251_v14  ;;  %254 = vst [vmem:[%s203_s6 + $0x3c] sm:$0xf] %v253_v15 }
  0x20 PF: > { %p763_p8 = scmp.ge.s32.totalorder %s919_s19, 1  ;;  %p320_p9 = scmp.lt.s32.totalorder %s919_s19, 3 }
  0x22   : > { %p321_p10 = pnand %p763_p8, %p320_p9 }
  0x23   : > { %s327_s7 = sand.u32 (!%p321_p10), 1, %s903_s15   ;;  %v879_v16 = vld [vmem:[%s1054_s0] sm:$0xff] (!%p321_p10)   ;;  %v880_v25 = vld [vmem:[%s1054_s0 + $0x8] sm:$0xff] (!%p321_p10)   ;;  %p376_p11 = scmp.lt.s32.totalorder (!%p321_p10), %s911_s17, 1 }
  0x24   : > { %324 = sbr.rel (%p321_p10) target bundleno = 302 (0x12e), region = 73  ;;  %s764_s10 = sshll.u32 (!%p321_p10), %s327_s7, 6  ;;  %827 = vmatprep.mubr.bf16.mxu0 (!%p321_p10), %v879_v16 }
  0x25   : > { %s329_s11 = scalar_lea.vmem (!%p321_p10), [#allocation3], %s764_s10  ;;  %s765_s29 = sshll.u32 (!%p321_p10), %s327_s7, 4 }
  0x26   : > { %v871_v17 = vld [vmem:[%s329_s11] sm:$0xff] (!%p321_p10)   ;;  %v872_v18 = vld [vmem:[%s329_s11 + $0x8] sm:$0xff] (!%p321_p10)   ;;  %v873_v19 = vld [vmem:[%s329_s11 + $0x10] sm:$0xff] (!%p321_p10)   ;;  %s365_s30 = scalar_lea.vmem (!%p321_p10), [#allocation4], %s765_s29 }
  0x27   : > { %811 = vmatprep.subr.bf16.mxu0 (!%p321_p10), %v871_v17  ;;  %v874_v20 = vld [vmem:[%s329_s11 + $0x18] sm:$0xff] (!%p321_p10)   ;;  %v875_v21 = vld [vmem:[%s329_s11 + $0x20] sm:$0xff] (!%p321_p10)   ;;  %v876_v22 = vld [vmem:[%s329_s11 + $0x28] sm:$0xff] (!%p321_p10)  }
  0x28   : > { %812 = vmatpush3.bf16.msra.mxu0 (!%p321_p10), %v871_v17  ;;  %v877_v23 = vld [vmem:[%s329_s11 + $0x30] sm:$0xff] (!%p321_p10)   ;;  %v878_v24 = vld [vmem:[%s329_s11 + $0x38] sm:$0xff] (!%p321_p10)  }
  0x29   : > { %813 = vmatprep.subr.bf16.mxu0 (!%p321_p10), %v872_v18 }
  0x2b   : > { %s377_s14 = scalar_select %p376_p11, %s911_s17, 1 }
  0x2c   : > { %814 = vmatpush3.bf16.msra.mxu0 %v872_v18  ;;  %s783_s5 = sshll.u32 (%p981_p6), %s911_s17, 2 }
  0x2d   : > { %815 = vmatprep.subr.bf16.mxu0 %v873_v19  ;;  %s378_s23 = scalar_lea.vmem %s1056_s2, %s377_s14  ;;  %s381_s28 = scalar_lea.vmem %s1057_s3, %s377_s14 }
  0x2e   : > { %v776_v26 = vld [vmem:[%s378_s23] ss:$0 sm:$0xff]  ;;  %s593_s7 = scalar_lea.vmem (%p981_p6), %s1058_s4, %s783_s5 }
  0x2f   : > { %v777_v30 = vld [vmem:[%s381_s28] ss:$0 sm:$0xff] }
  0x30   : > { %816 = vmatpush3.bf16.msra.mxu0 %v873_v19 }
  0x31   : > { %817 = vmatprep.subr.bf16.mxu0 %v874_v20 }
  0x34   : > { %818 = vmatpush3.bf16.msra.mxu0 %v874_v20 }
  0x35   : > { %819 = vmatprep.subr.bf16.mxu0 %v875_v21 }
  0x38   : > { %820 = vmatpush3.bf16.msra.mxu0 %v875_v21 }
  0x39   : > { %821 = vmatprep.subr.bf16.mxu0 %v876_v22 }
  0x3c   : > { %822 = vmatpush3.bf16.msra.mxu0 %v876_v22 }
  0x3d   : > { %823 = vmatprep.subr.bf16.mxu0 %v877_v23 }
  0x40   : > { %824 = vmatpush3.bf16.msra.mxu0 %v877_v23 }
  0x41   : > { %825 = vmatprep.subr.bf16.mxu0 %v878_v24 }
  0x44   : > { %826 = vmatpush3.bf16.msra.mxu0 %v878_v24 }
  0x47   : > { %828 = vmatmul.mubr.bf16.vlgmr.msra.gmra.mrb[0].mxu0 %v880_v25 }
 0x11a   : > { %v829_v27 = vpop.f32.mrb[0].mxu0 }
 0x11b   : > { %v549_v28 = vmul.f32 %v829_v27, %v776_v26  ;;  %v510_v29 = vpop.f32.mrb[1].mxu0 }
 0x11c   : > { %v547_v31 = vmul.f32 %v776_v26, %v510_v29  ;;  %v830_v32 = vpop.f32.mrb[2].mxu0 }
 0x11d   : > { %v550_v33 = vmul.f32 %v830_v32, %v776_v26  ;;  %v513_v34 = vpop.f32.mrb[3].mxu0  ;;  %v560_v36 = vadd.f32 %v777_v30, %v549_v28 }
 0x11e   : > { %v548_v35 = vmul.f32 %v776_v26, %v513_v34  ;;  %v558_v38 = vadd.f32 %v777_v30, %v547_v31  ;;  %588 = sbr.rel (!%p981_p6) target bundleno = 302 (0x12e), region = 89 }
 0x11f   : > { %v561_v37 = vadd.f32 %v777_v30, %v550_v33 }
 0x120   : > { %v559_v39 = vadd.f32 %v777_v30, %v548_v35 }
 0x121   : > { %v798_v40 = vpack.c.bf16 %v561_v37, %v560_v36 }
 0x122   : > { %v793_v41 = vpack.c.bf16 %v559_v39, %v558_v38 }
 0x123   : > { %800 = vst [vmem:[%s365_s30 + $0x8] sm:$0xff] %v798_v40  }
 0x124   : > { %794 = vst [vmem:[%s365_s30] sm:$0xff] %v793_v41  }
 0x12a   : > { %v613_v44 = vld [vmem:[%s365_s30 + $0x8] sm:$0xf]  ;;  %v615_v45 = vld [vmem:[%s365_s30 + $0xc] sm:$0xf] }
 0x12b   : > { %v609_v42 = vld [vmem:[%s365_s30] sm:$0xf]  ;;  %v611_v43 = vld [vmem:[%s365_s30 + $0x4] sm:$0xf]  ;;  %614 = vst [vmem:[%s593_s7 + $0x10] sm:$0xf] %v613_v44 }
 0x12c   : > { %610 = vst [vmem:[%s593_s7] sm:$0xf] %v609_v42  ;;  %612 = vst [vmem:[%s593_s7 + $0x8] sm:$0xf] %v611_v43 }
 0x12d   : > { %616 = vst [vmem:[%s593_s7 + $0x18] sm:$0xf] %v615_v45 }
 0x12e PF: > { %s14_s19 = sadd.s32 1, %s919_s19   ;;  %s1060_s15 = smov %s907_s16 }
 0x12f   : > { %p11_p12 = scmp.ge.s32.totalorder %s14_s19, 4   ;;  %s1061_s16 = smov %s986_s25 }
 0x130   : > { %s1062_s17 = smov %s915_s18  ;;  %s1063_s18 = smov %s1065_s20 }
 0x131   :  { %13 = sbr.rel (!%p11_p12) target bundleno = 3 (0x3), region = 170 }

// kernel: forward.57
= control target key start
LH: loop header
LB: loop body
LE: loop exit
PB: predicated region body
PF: predicated region fallthrough
CT: control target
= control target key end

     0   :  { %s1627_s0 = inlined_call_operand.vmem [shape: bf16[9,32,256], index: 0, kind: input, shape index: {}]   ;;  %s1628_s1 = inlined_call_operand.vmem [shape: bf16[9,256,256], index: 1, kind: input, shape index: {}]   ;;  %s1629_s2 = inlined_call_operand.vmem [shape: f32[1,256], index: 2, kind: input, shape index: {}]   ;;  %s1630_s3 = inlined_call_operand.vmem [shape: f32[1,256], index: 3, kind: input, shape index: {}]   ;;  %s1631_s4 = inlined_call_operand.vmem [shape: bf16[32,256], index: 4, kind: input, shape index: {}]   ;;  %s1632_s5 = inlined_call_operand.vmem [shape: bf16[32,256], index: 5, kind: output, shape index: {}]  }
   0x1   :  { %1635 = sst [smem:[#allocation8_spill]] %s1628_s1 }
   0x2   :  { %1636 = sst [smem:[#allocation9_spill]] %s1631_s4 }
   0x3   :  { %s1355_s18 = smov 0   ;;  %s1357_s19 = smov 0  }
   0x4   :  { %s1359_s20 = smov 0   ;;  %s1361_s21 = smov 0  }
   0x5   :  { %s1363_s22 = smov 0   ;;  %s1365_s23 = smov 0  }
   0x6   :  { %s1367_s24 = smov 0   ;;  %s1369_s25 = smov 0  }
   0x7   :  { %s1371_s26 = smov 0  }
   0x8 LB: > { %s27_s27 = sadd.s32 1, %s1314_s24  ;;  %s30_s28 = sadd.s32 1, %s1318_s25  ;;  %s1322_s26 = sphi %s1371_s26, %s15_s26   ;;  %s1318_s25 = sphi %s1369_s25, %s1653_s25   ;;  %s1314_s24 = sphi %s1367_s24, %s1652_s24   ;;  %s1310_s23 = sphi %s1365_s23, %s1651_s23   ;;  %s1306_s22 = sphi %s1363_s22, %s1650_s22   ;;  %s1302_s21 = sphi %s1361_s21, %s1649_s21   ;;  %s1298_s20 = sphi %s1359_s20, %s1648_s20   ;;  %s1294_s19 = sphi %s1357_s19, %s1647_s19   ;;  %s1290_s18 = sphi %s1355_s18, %s1646_s18  }
   0x9   : > { %p28_p0 = scmp.ge.s32.totalorder %s27_s27, 9  ;;  %s1041_s29 = sadd.s32 4294967295, %s1322_s26  }
   0xa   : > { %p78_p1 = scmp.ne.s32.totalorder %s1302_s21, %s1298_s20  ;;  %s71_s30 = sadd.s32 1, %s1302_s21 }
   0xb   : > { %s1655_s27 = smov (%p28_p0, %s27_s27), 0  ;;  %s1657_s28 = smov (!%p28_p0, %s30_s28), %s1318_s25 }
   0xc   : > { %1637 = sst [smem:[#allocation6_spill]] %s1655_s27  ;;  %p79_p2 = scmp.eq.s32.totalorder %s1322_s26, 0 }
   0xd   : > { %p32_p3 = scmp.ge.s32.totalorder %s1657_s28, 2  ;;  %s66_s6 = ssub.s32 %s1314_s24, %s1655_s27 }
   0xe   : > { %p1412_p4 = por %p79_p2, %p78_p1  ;;  %p158_p5 = scmp.ne.s32.totalorder %s1294_s19, %s1290_s18 }
   0xf   : > { %s1659_s28 = smov (%p32_p3, %s1657_s28), 0  ;;  %p190_p7 = scmp.eq.s32.totalorder %s1041_s29, 17 }
  0x10   : > { %1639 = sst [smem:[#allocation7_spill]] %s1659_s28  ;;  %p1420_p6 = por %p158_p5, %p79_p2 }
  0x11   : > { %s67_s9 = ssub.s32 %s1318_s25, %s1659_s28  ;;  %s151_s10 = sadd.s32 1, %s1294_s19 }
  0x12   : > { %s68_s11 = sor.u32 %s67_s9, %s66_s6  ;;  %p149_p8 = scmp.eq.s32.totalorder %s67_s9, 0 }
  0x13   : > { %p69_p9 = scmp.eq.s32.totalorder %s68_s11, 0  ;;  %p1427_p10 = por %p190_p7, %p158_p5 }
  0x14   : > { %s1432_s13 = scalar_select %p149_p8, %s1294_s19, %s151_s10  }
  0x15   : > { %s1435_s14 = scalar_select %p69_p9, %s1302_s21, %s71_s30  }
  0x16   : > { %p1044_p11 = scmp.ge.s32.totalorder %s1322_s26, 18 }
  0x18   : > { %212 = sbr.rel (%p1044_p11) target bundleno = 74 (0x4a), region = 16 }
  0x1f   : > { %229 = sbr.rel (!%p1412_p4) target bundleno = 62 (0x3e), region = 24  ;;  %s231_s15 = sand.u32 (%p1412_p4), 1, %s1302_s21  }
  0x20   : > { %s1046_s16 = sshll.u32 (%p1412_p4), %s1314_s24, 6  ;;  %s1045_s17 = sshll.u32 (%p1412_p4), %s231_s15, 7 }
  0x21   : > { %s235_s29 = sadd.s32 (%p1412_p4), %s1318_s25, %s1046_s16  ;;  %s1642_s1 = sld [smem:[#allocation8_spill]] (%p1412_p4) }
  0x22   : > { %s1047_s6 = sshll.u32 (%p1412_p4), %s235_s29, 2  ;;  %s1451_s30 = scalar_lea.vmem (%p1412_p4), [#allocation3], %s1045_s17 }
  0x27   : > { %s1446_s10 = scalar_lea.vmem %s1642_s1, %s1047_s6 }
  0x28   : > { %v253_v0 = vld [vmem:[%s1446_s10] sm:$0xf]  ;;  %v255_v1 = vld [vmem:[%s1446_s10 + $0x8] sm:$0xf]  ;;  %v257_v2 = vld [vmem:[%s1446_s10 + $0x10] sm:$0xf] }
  0x29   : > { %254 = vst [vmem:[%s1451_s30] sm:$0xf] %v253_v0  ;;  %256 = vst [vmem:[%s1451_s30 + $0x4] sm:$0xf] %v255_v1  ;;  %v259_v3 = vld [vmem:[%s1446_s10 + $0x18] sm:$0xf] }
  0x2a   : > { %258 = vst [vmem:[%s1451_s30 + $0x8] sm:$0xf] %v257_v2  ;;  %v261_v4 = vld [vmem:[%s1446_s10 + $0x20] sm:$0xf]  ;;  %v263_v5 = vld [vmem:[%s1446_s10 + $0x28] sm:$0xf] }
  0x2b   : > { %260 = vst [vmem:[%s1451_s30 + $0xc] sm:$0xf] %v259_v3  ;;  %262 = vst [vmem:[%s1451_s30 + $0x10] sm:$0xf] %v261_v4  ;;  %v265_v6 = vld [vmem:[%s1446_s10 + $0x30] sm:$0xf] }
  0x2c   : > { %264 = vst [vmem:[%s1451_s30 + $0x14] sm:$0xf] %v263_v5  ;;  %v267_v7 = vld [vmem:[%s1446_s10 + $0x38] sm:$0xf]  ;;  %v269_v8 = vld [vmem:[%s1446_s10 + $0x40] sm:$0xf] }
  0x2d   : > { %266 = vst [vmem:[%s1451_s30 + $0x18] sm:$0xf] %v265_v6  ;;  %268 = vst [vmem:[%s1451_s30 + $0x1c] sm:$0xf] %v267_v7  ;;  %v271_v9 = vld [vmem:[%s1446_s10 + $0x48] sm:$0xf] }
  0x2e   : > { %270 = vst [vmem:[%s1451_s30 + $0x20] sm:$0xf] %v269_v8  ;;  %v273_v10 = vld [vmem:[%s1446_s10 + $0x50] sm:$0xf]  ;;  %v275_v11 = vld [vmem:[%s1446_s10 + $0x58] sm:$0xf] }
  0x2f   : > { %272 = vst [vmem:[%s1451_s30 + $0x24] sm:$0xf] %v271_v9  ;;  %274 = vst [vmem:[%s1451_s30 + $0x28] sm:$0xf] %v273_v10  ;;  %v277_v12 = vld [vmem:[%s1446_s10 + $0x60] sm:$0xf] }
  0x30   : > { %276 = vst [vmem:[%s1451_s30 + $0x2c] sm:$0xf] %v275_v11  ;;  %v279_v13 = vld [vmem:[%s1446_s10 + $0x68] sm:$0xf]  ;;  %v281_v14 = vld [vmem:[%s1446_s10 + $0x70] sm:$0xf] }
  0x31   : > { %278 = vst [vmem:[%s1451_s30 + $0x30] sm:$0xf] %v277_v12  ;;  %280 = vst [vmem:[%s1451_s30 + $0x34] sm:$0xf] %v279_v13  ;;  %v283_v15 = vld [vmem:[%s1446_s10 + $0x78] sm:$0xf] }
  0x32   : > { %282 = vst [vmem:[%s1451_s30 + $0x38] sm:$0xf] %v281_v14  ;;  %v285_v16 = vld [vmem:[%s1446_s10 + $0x80] sm:$0xf]  ;;  %v287_v17 = vld [vmem:[%s1446_s10 + $0x88] sm:$0xf] }
  0x33   : > { %284 = vst [vmem:[%s1451_s30 + $0x3c] sm:$0xf] %v283_v15  ;;  %286 = vst [vmem:[%s1451_s30 + $0x40] sm:$0xf] %v285_v16  ;;  %v289_v18 = vld [vmem:[%s1446_s10 + $0x90] sm:$0xf] }
  0x34   : > { %288 = vst [vmem:[%s1451_s30 + $0x44] sm:$0xf] %v287_v17  ;;  %v291_v19 = vld [vmem:[%s1446_s10 + $0x98] sm:$0xf]  ;;  %v293_v20 = vld [vmem:[%s1446_s10 + $0xa0] sm:$0xf] }
  0x35   : > { %290 = vst [vmem:[%s1451_s30 + $0x48] sm:$0xf] %v289_v18  ;;  %292 = vst [vmem:[%s1451_s30 + $0x4c] sm:$0xf] %v291_v19  ;;  %v295_v21 = vld [vmem:[%s1446_s10 + $0xa8] sm:$0xf] }
  0x36   : > { %294 = vst [vmem:[%s1451_s30 + $0x50] sm:$0xf] %v293_v20  ;;  %v297_v22 = vld [vmem:[%s1446_s10 + $0xb0] sm:$0xf]  ;;  %v299_v23 = vld [vmem:[%s1446_s10 + $0xb8] sm:$0xf] }
  0x37   : > { %296 = vst [vmem:[%s1451_s30 + $0x54] sm:$0xf] %v295_v21  ;;  %298 = vst [vmem:[%s1451_s30 + $0x58] sm:$0xf] %v297_v22  ;;  %v301_v24 = vld [vmem:[%s1446_s10 + $0xc0] sm:$0xf] }
  0x38   : > { %300 = vst [vmem:[%s1451_s30 + $0x5c] sm:$0xf] %v299_v23  ;;  %v303_v25 = vld [vmem:[%s1446_s10 + $0xc8] sm:$0xf]  ;;  %v305_v26 = vld [vmem:[%s1446_s10 + $0xd0] sm:$0xf] }
  0x39   : > { %302 = vst [vmem:[%s1451_s30 + $0x60] sm:$0xf] %v301_v24  ;;  %304 = vst [vmem:[%s1451_s30 + $0x64] sm:$0xf] %v303_v25  ;;  %v307_v27 = vld [vmem:[%s1446_s10 + $0xd8] sm:$0xf] }
  0x3a   : > { %306 = vst [vmem:[%s1451_s30 + $0x68] sm:$0xf] %v305_v26  ;;  %v309_v28 = vld [vmem:[%s1446_s10 + $0xe0] sm:$0xf]  ;;  %v311_v29 = vld [vmem:[%s1446_s10 + $0xe8] sm:$0xf] }
  0x3b   : > { %308 = vst [vmem:[%s1451_s30 + $0x6c] sm:$0xf] %v307_v27  ;;  %310 = vst [vmem:[%s1451_s30 + $0x70] sm:$0xf] %v309_v28  ;;  %v313_v30 = vld [vmem:[%s1446_s10 + $0xf0] sm:$0xf] }
  0x3c   : > { %312 = vst [vmem:[%s1451_s30 + $0x74] sm:$0xf] %v311_v29  ;;  %v315_v31 = vld [vmem:[%s1446_s10 + $0xf8] sm:$0xf]  ;;  %314 = vst [vmem:[%s1451_s30 + $0x78] sm:$0xf] %v313_v30 }
  0x3d   : > { %316 = vst [vmem:[%s1451_s30 + $0x7c] sm:$0xf] %v315_v31 }
  0x3e PF: > { %415 = sbr.rel (!%p1420_p6) target bundleno = 74 (0x4a), region = 73  ;;  %s417_s7 = sand.u32 (%p1420_p6), 1, %s1294_s19  }
  0x3f   : > { %s1049_s15 = sshll.u32 (%p1420_p6), %s1318_s25, 2  ;;  %s1048_s16 = sshll.u32 (%p1420_p6), %s417_s7, 4 }
  0x40   : > { %s1643_s4 = sld [smem:[#allocation9_spill]] (%p1420_p6)  ;;  %s419_s9 = scalar_lea.vmem (%p1420_p6), [#allocation4], %s1048_s16 }
  0x46   : > { %s424_s6 = scalar_lea.vmem %s1643_s4, %s1049_s15 }
  0x47   : > { %v440_v32 = vld [vmem:[%s424_s6] sm:$0xf]  ;;  %v442_v33 = vld [vmem:[%s424_s6 + $0x8] sm:$0xf]  ;;  %v444_v34 = vld [vmem:[%s424_s6 + $0x10] sm:$0xf] }
  0x48   : > { %441 = vst [vmem:[%s419_s9] sm:$0xf] %v440_v32  ;;  %443 = vst [vmem:[%s419_s9 + $0x4] sm:$0xf] %v442_v33  ;;  %v446_v35 = vld [vmem:[%s424_s6 + $0x18] sm:$0xf] }
  0x49   : > { %445 = vst [vmem:[%s419_s9 + $0x8] sm:$0xf] %v444_v34  ;;  %447 = vst [vmem:[%s419_s9 + $0xc] sm:$0xf] %v446_v35 }
  0x4a PF: > { %p1050_p12 = scmp.ge.s32.totalorder %s1322_s26, 1  ;;  %p477_p13 = scmp.lt.s32.totalorder %s1322_s26, 19 }
  0x4c   : > { %p478_p0 = pnand %p1050_p12, %p477_p13 }
  0x4d   : > { %s484_s8 = sand.u32 (!%p478_p0), 1, %s1298_s20   ;;  %s491_s11 = sand.u32 (!%p478_p0), 1, %s1290_s18  }
  0x4e   : > { %481 = sbr.rel (%p478_p0) target bundleno = 374 (0x176), region = 114  ;;  %s1051_s10 = sshll.u32 (!%p478_p0), %s484_s8, 7 }
  0x4f   : > { %s1525_s30 = sshll.u32 (!%p478_p0), %s491_s11, 4  ;;  %p538_p1 = scmp.lt.s32.totalorder (!%p478_p0), %s1306_s22, 8 }
  0x50   : > { %p548_p2 = scmp.lt.s32.totalorder (!%p478_p0), %s1310_s23, 1  ;;  %s1546_s4 = scalar_lea.vmem (!%p478_p0), [#allocation3], %s1051_s10 }
  0x51   : > { %s493_s28 = scalar_lea.vmem (!%p478_p0), [#allocation4], %s1525_s30  ;;  %s1550_s27 = scalar_lea.vmem (!%p478_p0), [#allocation5], %s1525_s30 }
  0x52   : > { %p1056_p3 = scmp.ne.s32.totalorder (!%p478_p0), %s1306_s22, 0 }
  0x55   : > { %s539_s7 = scalar_select %p538_p1, %s1306_s22, 8 }
  0x56   : > { %s1531_s15 = scalar_select %p548_p2, %s1310_s23, 1 }
  0x57   : > { %s1088_s16 = sshll.u32 %s539_s7, 5  ;;  %560 = sbr.rel (%p1056_p3) target bundleno = 94 (0x5e), region = 126  ;;  %v1324_v36 = vmov (!%p1056_p3), 0.0  }
  0x58   : > { %s1536_s6 = scalar_lea.vmem %s1627_s0, %s1088_s16  ;;  %s550_s9 = scalar_lea.vmem %s1629_s2, %s1531_s15  ;;  %561 = vst [vmem:[#allocation2] sm:$0xff] (!%p1056_p3), %v1324_v36  ;;  %562 = vst [vmem:[#allocation2 + $0x8] sm:$0xff] (!%p1056_p3), %v1324_v36 }
  0x59   : > { %s553_s1 = scalar_lea.vmem %s1630_s3, %s1531_s15  ;;  %563 = vst [vmem:[#allocation2 + $0x10] sm:$0xff] (!%p1056_p3), %v1324_v36  ;;  %564 = vst [vmem:[#allocation2 + $0x18] sm:$0xff] (!%p1056_p3), %v1324_v36 }
  0x5e PF: > { %v1230_v37 = vld [vmem:[%s1546_s4 + $0x40] sm:$0xff]   ;;  %v1232_v39 = vld [vmem:[%s1546_s4 + $0x48] sm:$0xff]   ;;  %v1234_v41 = vld [vmem:[%s1546_s4 + $0x50] sm:$0xff]   ;;  %p1077_p4 = scmp.ne.s32.totalorder %s1306_s22, 8 }
  0x5f   : > { %v1231_v38 = vld [vmem:[%s1546_s4] sm:$0xff]   ;;  %1113 = vmatprep.subr.bf16.mxu0 %v1230_v37  ;;  %1141 = vmatprep.subr.bf16.mxu1 %v1230_v37  ;;  %v1233_v40 = vld [vmem:[%s1546_s4 + $0x8] sm:$0xff]   ;;  %v1235_v42 = vld [vmem:[%s1546_s4 + $0x10] sm:$0xff]  }
  0x60   : > { %1114 = vmatpush3.bf16.msra.mxu0 %v1231_v38  ;;  %1149 = vmatpush3.bf16.msra.mxu1 %v1231_v38  ;;  %v1236_v43 = vld [vmem:[%s1546_s4 + $0x58] sm:$0xff]   ;;  %v1238_v45 = vld [vmem:[%s1546_s4 + $0x60] sm:$0xff]   ;;  %v1240_v47 = vld [vmem:[%s1546_s4 + $0x68] sm:$0xff]  }
  0x61   : > { %1115 = vmatprep.subr.bf16.mxu0 %v1232_v39  ;;  %1142 = vmatprep.subr.bf16.mxu1 %v1232_v39  ;;  %v1237_v44 = vld [vmem:[%s1546_s4 + $0x18] sm:$0xff]   ;;  %v1239_v46 = vld [vmem:[%s1546_s4 + $0x20] sm:$0xff]   ;;  %v1241_v50 = vld [vmem:[%s1546_s4 + $0x28] sm:$0xff]  }
  0x62   : > { %v1248_v48 = vld [vmem:[%s1536_s6 + $0x4] ss:$8 sps:$4 sm:$0xff]   ;;  %v1251_v49 = vld [vmem:[%s1536_s6 + $0x14] ss:$8 sps:$4 sm:$0xff]   ;;  %v1246_v55 = vld [vmem:[%s1536_s6] ss:$8 sps:$4 sm:$0xff]  }
  0x63   : > { %v1242_v51 = vld [vmem:[%s1546_s4 + $0x70] sm:$0xff]   ;;  %753 = vmatprep.mubr.bf16.mxu0 %v1248_v48  ;;  %761 = vmatprep.mubr.bf16.mxu1 %v1251_v49  ;;  %v1244_v53 = vld [vmem:[%s1546_s4 + $0x78] sm:$0xff]   ;;  %v565_v59 = vld [vmem:[#allocation2] sm:$0xff] }
  0x64   : > { %1116 = vmatpush3.bf16.msra.mxu0 %v1233_v40  ;;  %1150 = vmatpush3.bf16.msra.mxu1 %v1233_v40  ;;  %v1243_v52 = vld [vmem:[%s1546_s4 + $0x30] sm:$0xff]   ;;  %v1245_v54 = vld [vmem:[%s1546_s4 + $0x38] sm:$0xff]   ;;  %v566_v3 = vld [vmem:[#allocation2 + $0x8] sm:$0xff] }
  0x65   : > { %1117 = vmatprep.subr.bf16.mxu0 %v1234_v41  ;;  %1143 = vmatprep.subr.bf16.mxu1 %v1234_v41  ;;  %v1249_v56 = vld [vmem:[%s1536_s6 + $0x10] ss:$8 sps:$4 sm:$0xff]   ;;  %v1078_v15 = vld [vmem:[%s550_s9] ss:$0 sm:$0xff] (!%p1077_p4) }
  0x66   : > { %v567_v61 = vld [vmem:[#allocation2 + $0x10] sm:$0xff]  ;;  %v568_v5 = vld [vmem:[#allocation2 + $0x18] sm:$0xff]  ;;  %v1079_v18 = vld [vmem:[%s553_s1] ss:$0 sm:$0xff] (!%p1077_p4) }
  0x67   : > { %v1094_v19 = vld [vmem:[%s493_s28] sm:$0xff] (!%p1077_p4)   ;;  %v1111_v25 = vld [vmem:[%s493_s28 + $0x8] sm:$0xff] (!%p1077_p4)  }
  0x68   : > { %1118 = vmatpush3.bf16.msra.mxu0 %v1235_v42  ;;  %1151 = vmatpush3.bf16.msra.mxu1 %v1235_v42  ;;  %v1095_v21 = vunpack.c.l.bf16 (!%p1077_p4), %v1094_v19  ;;  %v1096_v22 = vunpack.c.h.bf16 (!%p1077_p4), %v1094_v19  ;;  %v1099_v29 = vunpack.c.l.bf16 (!%p1077_p4), %v1111_v25  ;;  %v1100_v31 = vunpack.c.h.bf16 (!%p1077_p4), %v1111_v25 }
  0x69   : > { %1119 = vmatprep.subr.bf16.mxu0 %v1236_v43  ;;  %1144 = vmatprep.subr.bf16.mxu1 %v1236_v43 }
  0x6c   : > { %1120 = vmatpush3.bf16.msra.mxu0 %v1237_v44  ;;  %1152 = vmatpush3.bf16.msra.mxu1 %v1237_v44 }
  0x6d   : > { %1121 = vmatprep.subr.bf16.mxu0 %v1238_v45  ;;  %1145 = vmatprep.subr.bf16.mxu1 %v1238_v45 }
  0x70   : > { %1122 = vmatpush3.bf16.msra.mxu0 %v1239_v46  ;;  %1153 = vmatpush3.bf16.msra.mxu1 %v1239_v46 }
  0x71   : > { %1123 = vmatprep.subr.bf16.mxu0 %v1240_v47  ;;  %1146 = vmatprep.subr.bf16.mxu1 %v1240_v47 }
  0x74   : > { %1124 = vmatpush3.bf16.msra.mxu0 %v1241_v50  ;;  %1154 = vmatpush3.bf16.msra.mxu1 %v1241_v50 }
  0x75   : > { %1125 = vmatprep.subr.bf16.mxu0 %v1242_v51  ;;  %1147 = vmatprep.subr.bf16.mxu1 %v1242_v51 }
  0x78   : > { %1126 = vmatpush3.bf16.msra.mxu0 %v1243_v52  ;;  %1155 = vmatpush3.bf16.msra.mxu1 %v1243_v52 }
  0x79   : > { %1127 = vmatprep.subr.bf16.mxu0 %v1244_v53  ;;  %1148 = vmatprep.subr.bf16.mxu1 %v1244_v53 }
  0x7c   : > { %1128 = vmatpush3.bf16.msra.mxu0 %v1245_v54  ;;  %1156 = vmatpush3.bf16.msra.mxu1 %v1245_v54 }
  0x7f   : > { %754 = vmatmul.mubr.bf16.vlgmr.msra.gmra.mrb[0].mxu0 %v1246_v55  ;;  %762 = vmatmul.mubr.bf16.vlgmr.msra.gmra.mrb[0].mxu1 %v1249_v56 }
 0x152   : > { %v1129_v57 = vpop.f32.mrb[0].mxu0  ;;  %v1135_v58 = vpop.f32.mrb[0].mxu1 }
 0x153   : > { %v1130_v60 = vpop.f32.mrb[1].mxu0  ;;  %v1136_v62 = vpop.f32.mrb[1].mxu1 }
 0x154   : > { %v1131_v63 = vadd.f32 %v1130_v60, %v1129_v57  ;;  %v1137_v0 = vadd.f32 %v1136_v62, %v1135_v58  ;;  %v1132_v1 = vpop.f32.mrb[2].mxu0  ;;  %v1138_v2 = vpop.f32.mrb[2].mxu1  ;;  %781 = sbr.rel (%p1077_p4) target bundleno = 365 (0x16d), region = 130 }
 0x155   : > { %v1133_v4 = vpop.f32.mrb[3].mxu0  ;;  %v1139_v6 = vpop.f32.mrb[3].mxu1 }
 0x156   : > { %v770_v7 = vadd.f32 %v1131_v63, %v565_v59  ;;  %v772_v8 = vadd.f32 %v1137_v0, %v567_v61  ;;  %v1134_v9 = vadd.f32 %v1133_v4, %v1132_v1  ;;  %v1140_v10 = vadd.f32 %v1139_v6, %v1138_v2 }
 0x158   : > { %774 = vst [vmem:[#allocation2] sm:$0xff] %v770_v7  ;;  %776 = vst [vmem:[#allocation2 + $0x10] sm:$0xff] %v772_v8  ;;  %v771_v11 = vadd.f32 %v1134_v9, %v566_v3  ;;  %v773_v12 = vadd.f32 %v1140_v10, %v568_v5 }
 0x15a   : > { %775 = vst [vmem:[#allocation2 + $0x8] sm:$0xff] %v771_v11  ;;  %777 = vst [vmem:[#allocation2 + $0x18] sm:$0xff] %v773_v12 }
 0x15f   : > { %v782_v13 = vld [vmem:[#allocation2] sm:$0xff]  ;;  %v784_v20 = vld [vmem:[#allocation2 + $0x10] sm:$0xff] }
 0x160   : > { %v793_v16 = vmul.f32 %v1078_v15, %v782_v13  ;;  %v795_v24 = vmul.f32 %v1078_v15, %v784_v20 }
 0x161   : > { %v783_v14 = vld [vmem:[#allocation2 + $0x8] sm:$0xff]  ;;  %v785_v23 = vld [vmem:[#allocation2 + $0x18] sm:$0xff] }
 0x162   : > { %v794_v17 = vmul.f32 %v1078_v15, %v783_v14  ;;  %v804_v26 = vadd.f32 %v1079_v18, %v793_v16  ;;  %v796_v28 = vmul.f32 %v1078_v15, %v785_v23  ;;  %v806_v30 = vadd.f32 %v1079_v18, %v795_v24 }
 0x164   : > { %v805_v27 = vadd.f32 %v1079_v18, %v794_v17  ;;  %v816_v32 = vadd.f32 %v1095_v21, %v804_v26  ;;  %v807_v34 = vadd.f32 %v1079_v18, %v796_v28  ;;  %v818_v35 = vadd.f32 %v1099_v29, %v806_v30 }
 0x166   : > { %v817_v33 = vadd.f32 %v1096_v22, %v805_v27  ;;  %v820_v36 = vmax.f32 %v816_v32, 0.0  ;;  %v819_v38 = vadd.f32 %v1100_v31, %v807_v34  ;;  %v822_v39 = vmax.f32 %v818_v35, 0.0 }
 0x168   : > { %v821_v37 = vmax.f32 %v817_v33, 0.0  ;;  %v823_v41 = vmax.f32 %v819_v38, 0.0 }
 0x16a   : > { %v1104_v40 = vpack.c.bf16 %v821_v37, %v820_v36  ;;  %v1109_v42 = vpack.c.bf16 %v823_v41, %v822_v39 }
 0x16c   : > { %1105 = vst [vmem:[%s1550_s27] sm:$0xff] %v1104_v40   ;;  %1112 = vst [vmem:[%s1550_s27 + $0x8] sm:$0xff] %v1109_v42  }
 0x16d PF: > { %850 = sbr.rel (!%p1427_p10) target bundleno = 374 (0x176), region = 134  ;;  %s1085_s1 = sshll.u32 (%p1427_p10), %s1310_s23, 2 }
 0x16e   : > { %s855_s30 = scalar_lea.vmem (%p1427_p10), %s1632_s5, %s1085_s1 }
 0x173   : > { %v871_v43 = vld [vmem:[%s1550_s27] sm:$0xf] (%p1427_p10)  ;;  %v873_v44 = vld [vmem:[%s1550_s27 + $0x4] sm:$0xf] (%p1427_p10)  ;;  %v875_v45 = vld [vmem:[%s1550_s27 + $0x8] sm:$0xf] (%p1427_p10) }
 0x174   : > { %v877_v46 = vld [vmem:[%s1550_s27 + $0xc] sm:$0xf]  ;;  %872 = vst [vmem:[%s855_s30] sm:$0xf] %v871_v43  ;;  %874 = vst [vmem:[%s855_s30 + $0x8] sm:$0xf] %v873_v44 }
 0x175   : > { %876 = vst [vmem:[%s855_s30 + $0x10] sm:$0xf] %v875_v45  ;;  %878 = vst [vmem:[%s855_s30 + $0x18] sm:$0xf] %v877_v46 }
 0x176 PF: > { %s15_s26 = sadd.s32 1, %s1322_s26   ;;  %s1644_s12 = sld [smem:[#allocation6_spill]] }
 0x177   : > { %p12_p5 = scmp.ge.s32.totalorder %s15_s26, 20   ;;  %s1645_s15 = sld [smem:[#allocation7_spill]] }
 0x178   : > { %s1646_s18 = smov %s1294_s19  ;;  %s1647_s19 = smov %s1432_s13 }
 0x179   : > { %s1648_s20 = smov %s1302_s21  ;;  %s1649_s21 = smov %s1435_s14 }
 0x17a   : > { %s1650_s22 = smov %s1314_s24  ;;  %s1651_s23 = smov %s1318_s25 }
 0x17b   :  { %14 = sbr.rel (!%p12_p5) target bundleno = 8 (0x8), region = 223 }
 0x17c   : > { %s1652_s24 = smov %s1644_s12 }
 0x17d   : > { %s1653_s25 = smov %s1645_s15 }

// kernel: forward.69
= control target key start
LH: loop header
LB: loop body
LE: loop exit
PB: predicated region body
PF: predicated region fallthrough
CT: control target
= control target key end

     0   :  { %s1143_s15 = smov 0   ;;  %s1145_s16 = smov 0   ;;  %s1367_s0 = inlined_call_operand.vmem [shape: bf16[9,8,256], index: 0, kind: input, shape index: {}]   ;;  %s1368_s1 = inlined_call_operand.vmem [shape: bf16[9,256,512], index: 1, kind: input, shape index: {}]   ;;  %s1369_s2 = inlined_call_operand.vmem [shape: f32[1,512], index: 2, kind: input, shape index: {}]   ;;  %s1370_s3 = inlined_call_operand.vmem [shape: f32[1,512], index: 3, kind: input, shape index: {}]   ;;  %s1371_s4 = inlined_call_operand.vmem [shape: bf16[8,512], index: 4, kind: output, shape index: {}]  }
   0x1   :  { %s1147_s17 = smov 0   ;;  %s1149_s18 = smov 0  }
   0x2   :  { %s1151_s19 = smov 0   ;;  %s1153_s20 = smov 0  }
   0x3   :  { %s1155_s21 = smov 0  }
   0x4 LB: > { %s26_s22 = sadd.s32 1, %s1107_s19  ;;  %s29_s23 = sadd.s32 1, %s1111_s20  ;;  %s1115_s21 = sphi %s1155_s21, %s14_s21   ;;  %s1111_s20 = sphi %s1153_s20, %s1377_s20   ;;  %s1107_s19 = sphi %s1151_s19, %s1376_s19   ;;  %s1103_s18 = sphi %s1149_s18, %s1375_s18   ;;  %s1099_s17 = sphi %s1147_s17, %s1374_s17   ;;  %s1095_s16 = sphi %s1145_s16, %s1373_s16   ;;  %s1091_s15 = sphi %s1143_s15, %s1372_s15  }
   0x5   : > { %p27_p0 = scmp.ge.s32.totalorder %s26_s22, 9  ;;  %p77_p1 = scmp.ne.s32.totalorder %s1095_s16, %s1091_s15 }
   0x6   : > { %p78_p2 = scmp.eq.s32.totalorder %s1115_s21, 0  ;;  %s70_s27 = sadd.s32 1, %s1095_s16 }
   0x7   : > { %s1379_s22 = smov (%p27_p0, %s26_s22), 0  ;;  %s1381_s23 = smov (!%p27_p0, %s29_s23), %s1111_s20 }
   0x8   : > { %p79_p3 = por %p78_p2, %p77_p1  ;;  %p31_p4 = scmp.ge.s32.totalorder %s1381_s23, 2 }
   0x9   : > { %s65_s24 = ssub.s32 %s1107_s19, %s1379_s22  ;;  %p900_p6 = scmp.ge.s32.totalorder %s1115_s21, 18 }
   0xa   : > { %s1383_s23 = smov (%p31_p4, %s1381_s23), 0 }
   0xb   : > { %s66_s25 = ssub.s32 %s1111_s20, %s1383_s23  ;;  %183 = sbr.rel (%p900_p6) target bundleno = 41 (0x29), region = 16 }
   0xc   : > { %s67_s26 = sor.u32 %s66_s25, %s65_s24 }
   0xd   : > { %p68_p5 = scmp.eq.s32.totalorder %s67_s26, 0 }
   0xf   : > { %s1194_s28 = scalar_select %p68_p5, %s1095_s16, %s70_s27  }
  0x12   : > { %198 = sbr.rel (!%p79_p3) target bundleno = 41 (0x29), region = 24  ;;  %s200_s29 = sand.u32 (%p79_p3), 1, %s1095_s16  }
  0x13   : > { %s902_s30 = sshll.u32 (%p79_p3), %s1111_s20, 1  ;;  %s901_s5 = sshll.u32 (%p79_p3), %s200_s29, 8 }
  0x14   : > { %s903_s6 = sshll.u32 (%p79_p3), %s1107_s19, 7  ;;  %s1208_s12 = scalar_lea.vmem (%p79_p3), [#allocation3], %s901_s5 }
  0x15   : > { %s205_s7 = sadd.s32 (%p79_p3), %s903_s6, %s902_s30 }
  0x16   : > { %s904_s8 = sshll.u32 (%p79_p3), %s205_s7, 2 }
  0x17   : > { %s1203_s11 = scalar_lea.vmem (%p79_p3), %s1368_s1, %s904_s8 }
  0x18   : > { %v297_v0 = vld [vmem:[%s1203_s11] sm:$0xff] (%p79_p3)  ;;  %v299_v1 = vld [vmem:[%s1203_s11 + $0x10] sm:$0xff] (%p79_p3) }
  0x19   : > { %v301_v2 = vld [vmem:[%s1203_s11 + $0x20] sm:$0xff]  ;;  %298 = vst [vmem:[%s1208_s12] sm:$0xff] %v297_v0  ;;  %300 = vst [vmem:[%s1208_s12 + $0x8] sm:$0xff] %v299_v1  ;;  %v303_v3 = vld [vmem:[%s1203_s11 + $0x30] sm:$0xff] }
  0x1a   : > { %302 = vst [vmem:[%s1208_s12 + $0x10] sm:$0xff] %v301_v2  ;;  %v305_v4 = vld [vmem:[%s1203_s11 + $0x40] sm:$0xff]  ;;  %v307_v5 = vld [vmem:[%s1203_s11 + $0x50] sm:$0xff]  ;;  %304 = vst [vmem:[%s1208_s12 + $0x18] sm:$0xff] %v303_v3 }
  0x1b   : > { %306 = vst [vmem:[%s1208_s12 + $0x20] sm:$0xff] %v305_v4  ;;  %308 = vst [vmem:[%s1208_s12 + $0x28] sm:$0xff] %v307_v5  ;;  %v309_v6 = vld [vmem:[%s1203_s11 + $0x60] sm:$0xff]  ;;  %v311_v7 = vld [vmem:[%s1203_s11 + $0x70] sm:$0xff] }
  0x1c   : > { %v313_v8 = vld [vmem:[%s1203_s11 + $0x80] sm:$0xff]  ;;  %310 = vst [vmem:[%s1208_s12 + $0x30] sm:$0xff] %v309_v6  ;;  %312 = vst [vmem:[%s1208_s12 + $0x38] sm:$0xff] %v311_v7  ;;  %v315_v9 = vld [vmem:[%s1203_s11 + $0x90] sm:$0xff] }
  0x1d   : > { %314 = vst [vmem:[%s1208_s12 + $0x40] sm:$0xff] %v313_v8  ;;  %v317_v10 = vld [vmem:[%s1203_s11 + $0xa0] sm:$0xff]  ;;  %v319_v11 = vld [vmem:[%s1203_s11 + $0xb0] sm:$0xff]  ;;  %316 = vst [vmem:[%s1208_s12 + $0x48] sm:$0xff] %v315_v9 }
  0x1e   : > { %318 = vst [vmem:[%s1208_s12 + $0x50] sm:$0xff] %v317_v10  ;;  %320 = vst [vmem:[%s1208_s12 + $0x58] sm:$0xff] %v319_v11  ;;  %v321_v12 = vld [vmem:[%s1203_s11 + $0xc0] sm:$0xff]  ;;  %v323_v13 = vld [vmem:[%s1203_s11 + $0xd0] sm:$0xff] }
  0x1f   : > { %v325_v14 = vld [vmem:[%s1203_s11 + $0xe0] sm:$0xff]  ;;  %322 = vst [vmem:[%s1208_s12 + $0x60] sm:$0xff] %v321_v12  ;;  %324 = vst [vmem:[%s1208_s12 + $0x68] sm:$0xff] %v323_v13  ;;  %v327_v15 = vld [vmem:[%s1203_s11 + $0xf0] sm:$0xff] }
  0x20   : > { %326 = vst [vmem:[%s1208_s12 + $0x70] sm:$0xff] %v325_v14  ;;  %v329_v16 = vld [vmem:[%s1203_s11 + $0x100] sm:$0xff]  ;;  %v331_v17 = vld [vmem:[%s1203_s11 + $0x110] sm:$0xff]  ;;  %328 = vst [vmem:[%s1208_s12 + $0x78] sm:$0xff] %v327_v15 }
  0x21   : > { %330 = vst [vmem:[%s1208_s12 + $0x80] sm:$0xff] %v329_v16  ;;  %332 = vst [vmem:[%s1208_s12 + $0x88] sm:$0xff] %v331_v17  ;;  %v333_v18 = vld [vmem:[%s1203_s11 + $0x120] sm:$0xff]  ;;  %v335_v19 = vld [vmem:[%s1203_s11 + $0x130] sm:$0xff] }
  0x22   : > { %v337_v20 = vld [vmem:[%s1203_s11 + $0x140] sm:$0xff]  ;;  %334 = vst [vmem:[%s1208_s12 + $0x90] sm:$0xff] %v333_v18  ;;  %336 = vst [vmem:[%s1208_s12 + $0x98] sm:$0xff] %v335_v19  ;;  %v339_v21 = vld [vmem:[%s1203_s11 + $0x150] sm:$0xff] }
  0x23   : > { %338 = vst [vmem:[%s1208_s12 + $0xa0] sm:$0xff] %v337_v20  ;;  %v341_v22 = vld [vmem:[%s1203_s11 + $0x160] sm:$0xff]  ;;  %v343_v23 = vld [vmem:[%s1203_s11 + $0x170] sm:$0xff]  ;;  %340 = vst [vmem:[%s1208_s12 + $0xa8] sm:$0xff] %v339_v21 }
  0x24   : > { %342 = vst [vmem:[%s1208_s12 + $0xb0] sm:$0xff] %v341_v22  ;;  %344 = vst [vmem:[%s1208_s12 + $0xb8] sm:$0xff] %v343_v23  ;;  %v345_v24 = vld [vmem:[%s1203_s11 + $0x180] sm:$0xff]  ;;  %v347_v25 = vld [vmem:[%s1203_s11 + $0x190] sm:$0xff] }
  0x25   : > { %v349_v26 = vld [vmem:[%s1203_s11 + $0x1a0] sm:$0xff]  ;;  %346 = vst [vmem:[%s1208_s12 + $0xc0] sm:$0xff] %v345_v24  ;;  %348 = vst [vmem:[%s1208_s12 + $0xc8] sm:$0xff] %v347_v25  ;;  %v351_v27 = vld [vmem:[%s1203_s11 + $0x1b0] sm:$0xff] }
  0x26   : > { %350 = vst [vmem:[%s1208_s12 + $0xd0] sm:$0xff] %v349_v26  ;;  %v353_v28 = vld [vmem:[%s1203_s11 + $0x1c0] sm:$0xff]  ;;  %v355_v29 = vld [vmem:[%s1203_s11 + $0x1d0] sm:$0xff]  ;;  %352 = vst [vmem:[%s1208_s12 + $0xd8] sm:$0xff] %v351_v27 }
  0x27   : > { %354 = vst [vmem:[%s1208_s12 + $0xe0] sm:$0xff] %v353_v28  ;;  %356 = vst [vmem:[%s1208_s12 + $0xe8] sm:$0xff] %v355_v29  ;;  %v357_v30 = vld [vmem:[%s1203_s11 + $0x1e0] sm:$0xff]  ;;  %v359_v31 = vld [vmem:[%s1203_s11 + $0x1f0] sm:$0xff] }
  0x28   : > { %358 = vst [vmem:[%s1208_s12 + $0xf0] sm:$0xff] %v357_v30  ;;  %360 = vst [vmem:[%s1208_s12 + $0xf8] sm:$0xff] %v359_v31 }
  0x29 PF: > { %p905_p7 = scmp.ge.s32.totalorder %s1115_s21, 1  ;;  %p381_p8 = scmp.lt.s32.totalorder %s1115_s21, 19 }
  0x2b   : > { %p382_p9 = pnand %p905_p7, %p381_p8 }
  0x2c   : > { %s388_s13 = sand.u32 (!%p382_p9), 1, %s1091_s15   ;;  %p434_p10 = scmp.lt.s32.totalorder (!%p382_p9), %s1099_s17, 8 }
  0x2d   : > { %385 = sbr.rel (%p382_p9) target bundleno = 357 (0x165), region = 70  ;;  %s906_s14 = sshll.u32 (!%p382_p9), %s388_s13, 8 }
  0x2e   : > { %s909_s24 = sshll.u32 (!%p382_p9), %s1103_s18, 1  ;;  %s1298_s13 = scalar_lea.vmem (!%p382_p9), [#allocation3], %s906_s14 }
  0x2f   : > { %p445_p11 = scmp.lt.s32.totalorder (!%p382_p9), %s909_s24, 3  ;;  %p913_p12 = scmp.ne.s32.totalorder (!%p382_p9), %s1099_s17, 0 }
  0x34   : > { %s435_s25 = scalar_select %p434_p10, %s1099_s17, 8 }
  0x35   : > { %s1385_s24 = smov (!%p445_p11, %s909_s24), 3  ;;  %467 = sbr.rel (%p913_p12) target bundleno = 60 (0x3c), region = 78 }
  0x36   : > { %s952_s26 = sshll.u32 %s435_s25, 3  ;;  %s447_s15 = scalar_lea.vmem %s1369_s2, %s1385_s24  ;;  %v1117_v32 = vmov (!%p913_p12), 0.0  }
  0x37   : > { %s1282_s30 = scalar_lea.vmem %s1367_s0, %s952_s26  ;;  %s452_s18 = scalar_lea.vmem %s1370_s3, %s1385_s24  ;;  %468 = vst [vmem:[#allocation2] sm:$0xff] (!%p913_p12), %v1117_v32  ;;  %469 = vst [vmem:[#allocation2 + $0x8] sm:$0xff] (!%p913_p12), %v1117_v32 }
  0x38   : > { %s912_s9 = sshll.u32 %s1385_s24, 2 }
  0x39   : > { %s1296_s12 = scalar_lea.vmem %s1371_s4, %s912_s9 }
  0x3c PF: > { %v1011_v33 = vld [vmem:[%s1298_s13 + $0x4] ss:$8 sps:$4 sm:$0xff]   ;;  %v1013_v34 = vld [vmem:[%s1298_s13] ss:$8 sps:$4 sm:$0xff]   ;;  %v1014_v35 = vld [vmem:[%s1298_s13 + $0x14] ss:$8 sps:$4 sm:$0xff]  }
  0x3d   : > { %672 = vmatprep.subr.bf16.mxu0 %v1011_v33  ;;  %v1016_v36 = vld [vmem:[%s1298_s13 + $0x10] ss:$8 sps:$4 sm:$0xff]   ;;  %v1017_v37 = vld [vmem:[%s1298_s13 + $0x24] ss:$8 sps:$4 sm:$0xff]   ;;  %v1019_v38 = vld [vmem:[%s1298_s13 + $0x20] ss:$8 sps:$4 sm:$0xff]  }
  0x3e   : > { %673 = vmatpush1.bf16.msra.mxu0 %v1013_v34  ;;  %v1020_v39 = vld [vmem:[%s1298_s13 + $0x34] ss:$8 sps:$4 sm:$0xff]   ;;  %v1022_v40 = vld [vmem:[%s1298_s13 + $0x30] ss:$8 sps:$4 sm:$0xff]   ;;  %v1023_v41 = vld [vmem:[%s1298_s13 + $0x44] ss:$8 sps:$4 sm:$0xff]  }
  0x3f   : > { %674 = vmatprep.subr.bf16.mxu0 %v1014_v35  ;;  %v1025_v42 = vld [vmem:[%s1298_s13 + $0x40] ss:$8 sps:$4 sm:$0xff]   ;;  %v1026_v43 = vld [vmem:[%s1298_s13 + $0x54] ss:$8 sps:$4 sm:$0xff]   ;;  %v1028_v44 = vld [vmem:[%s1298_s13 + $0x50] ss:$8 sps:$4 sm:$0xff]  }
  0x40   : > { %v1029_v45 = vld [vmem:[%s1298_s13 + $0x64] ss:$8 sps:$4 sm:$0xff]   ;;  %v472_v46 = vld [vmem:[%s1282_s30] sm:$0xff]  ;;  %v1031_v48 = vld [vmem:[%s1298_s13 + $0x60] ss:$8 sps:$4 sm:$0xff]   ;;  %p948_p13 = scmp.ne.s32.totalorder %s1099_s17, 8 }
  0x41   : > { %v915_v47 = vcombine.high %v472_v46, %v472_v46  ;;  %v1032_v49 = vld [vmem:[%s1298_s13 + $0x74] ss:$8 sps:$4 sm:$0xff]   ;;  %v1034_v50 = vld [vmem:[%s1298_s13 + $0x70] ss:$8 sps:$4 sm:$0xff]   ;;  %v1035_v51 = vld [vmem:[%s1298_s13 + $0x84] ss:$8 sps:$4 sm:$0xff]   ;;  %v914_v3 = vcombine.low %v472_v46, %v472_v46  ;;  %v725_v12 = vlaneseq (!%p948_p13) }
  0x42   : > { %675 = vmatpush1.bf16.msra.mxu0 %v1016_v36  ;;  %v1037_v52 = vld [vmem:[%s1298_s13 + $0x80] ss:$8 sps:$4 sm:$0xff]   ;;  %v1038_v53 = vld [vmem:[%s1298_s13 + $0x94] ss:$8 sps:$4 sm:$0xff]   ;;  %v1040_v54 = vld [vmem:[%s1298_s13 + $0x90] ss:$8 sps:$4 sm:$0xff]  }
  0x43   : > { %676 = vmatprep.subr.bf16.mxu0 %v1017_v37  ;;  %704 = vmatprep.mubr.bf16.mxu0 %v915_v47  ;;  %v1041_v55 = vld [vmem:[%s1298_s13 + $0xa4] ss:$8 sps:$4 sm:$0xff]   ;;  %v1043_v56 = vld [vmem:[%s1298_s13 + $0xa0] ss:$8 sps:$4 sm:$0xff]   ;;  %v1044_v57 = vld [vmem:[%s1298_s13 + $0xb4] ss:$8 sps:$4 sm:$0xff]  }
  0x44   : > { %v1046_v58 = vld [vmem:[%s1298_s13 + $0xb0] ss:$8 sps:$4 sm:$0xff]   ;;  %v1047_v59 = vld [vmem:[%s1298_s13 + $0xc4] ss:$8 sps:$4 sm:$0xff]   ;;  %v1049_v60 = vld [vmem:[%s1298_s13 + $0xc0] ss:$8 sps:$4 sm:$0xff]  }
  0x45   : > { %v1050_v61 = vld [vmem:[%s1298_s13 + $0xd4] ss:$8 sps:$4 sm:$0xff]   ;;  %v1052_v62 = vld [vmem:[%s1298_s13 + $0xd0] ss:$8 sps:$4 sm:$0xff]   ;;  %v1053_v63 = vld [vmem:[%s1298_s13 + $0xe4] ss:$8 sps:$4 sm:$0xff]  }
  0x46   : > { %677 = vmatpush1.bf16.msra.mxu0 %v1019_v38  ;;  %v1055_v0 = vld [vmem:[%s1298_s13 + $0xe0] ss:$8 sps:$4 sm:$0xff]   ;;  %v1056_v1 = vld [vmem:[%s1298_s13 + $0xf4] ss:$8 sps:$4 sm:$0xff]   ;;  %v1058_v2 = vld [vmem:[%s1298_s13 + $0xf0] ss:$8 sps:$4 sm:$0xff]  }
  0x47   : > { %678 = vmatprep.subr.bf16.mxu0 %v1020_v39  ;;  %v470_v4 = vld [vmem:[#allocation2] sm:$0xff]  ;;  %v471_v5 = vld [vmem:[#allocation2 + $0x8] sm:$0xff]  ;;  %v726_v13 = vshrl.u32 (!%p948_p13), %v725_v12, 7 }
  0x48   : > { %v723_v14 = vld [vmem:[%s447_s15] sm:$0x3] (!%p948_p13) }
  0x49   : > { %v737_v15 = vld [vmem:[%s452_s18] sm:$0x3] (!%p948_p13)  ;;  %v727_v16 = vsub.s32 (!%p948_p13), 0, %v726_v13  ;;  %v731_v17 = vsub.s32 (!%p948_p13), 1, %v726_v13 }
  0x4a   : > { %679 = vmatpush1.bf16.msra.mxu0 %v1022_v40 }
  0x4b   : > { %680 = vmatprep.subr.bf16.mxu0 %v1023_v41  ;;  %v728_v20 = vrot.slane (!%p948_p13), %v723_v14, %v727_v16  ;;  %v732_v21 = vrot.slane (!%p948_p13), %v723_v14, %v731_v17  ;;  %v742_v22 = vrot.slane (!%p948_p13), %v737_v15, %v727_v16  ;;  %v746_v23 = vrot.slane (!%p948_p13), %v737_v15, %v731_v17 }
  0x4e   : > { %681 = vmatpush1.bf16.msra.mxu0 %v1025_v42 }
  0x4f   : > { %682 = vmatprep.subr.bf16.mxu0 %v1026_v43 }
  0x52   : > { %683 = vmatpush1.bf16.msra.mxu0 %v1028_v44 }
  0x53   : > { %684 = vmatprep.subr.bf16.mxu0 %v1029_v45 }
  0x56   : > { %685 = vmatpush1.bf16.msra.mxu0 %v1031_v48 }
  0x57   : > { %686 = vmatprep.subr.bf16.mxu0 %v1032_v49 }
  0x5a   : > { %687 = vmatpush1.bf16.msra.mxu0 %v1034_v50 }
  0x5b   : > { %688 = vmatprep.subr.bf16.mxu0 %v1035_v51 }
  0x5e   : > { %689 = vmatpush1.bf16.msra.mxu0 %v1037_v52 }
  0x5f   : > { %690 = vmatprep.subr.bf16.mxu0 %v1038_v53 }
  0x62   : > { %691 = vmatpush1.bf16.msra.mxu0 %v1040_v54 }
  0x63   : > { %692 = vmatprep.subr.bf16.mxu0 %v1041_v55 }
  0x66   : > { %693 = vmatpush1.bf16.msra.mxu0 %v1043_v56 }
  0x67   : > { %694 = vmatprep.subr.bf16.mxu0 %v1044_v57 }
  0x6a   : > { %695 = vmatpush1.bf16.msra.mxu0 %v1046_v58 }
  0x6b   : > { %696 = vmatprep.subr.bf16.mxu0 %v1047_v59 }
  0x6e   : > { %697 = vmatpush1.bf16.msra.mxu0 %v1049_v60 }
  0x6f   : > { %698 = vmatprep.subr.bf16.mxu0 %v1050_v61 }
  0x72   : > { %699 = vmatpush1.bf16.msra.mxu0 %v1052_v62 }
  0x73   : > { %700 = vmatprep.subr.bf16.mxu0 %v1053_v63 }
  0x76   : > { %701 = vmatpush1.bf16.msra.mxu0 %v1055_v0 }
  0x77   : > { %702 = vmatprep.subr.bf16.mxu0 %v1056_v1 }
  0x7a   : > { %703 = vmatpush1.bf16.msra.mxu0 %v1058_v2 }
  0x7d   : > { %705 = vmatmul.mubr.bf16.vlgmr.msra.gmra.mrb[0].mxu0 %v914_v3 }
 0x14e   : > { %720 = sbr.rel (%p948_p13) target bundleno = 357 (0x165), region = 82 }
 0x150   : > { %v706_v6 = vpop.f32.mrb[0].mxu0 }
 0x151   : > { %v713_v7 = vadd.f32 %v706_v6, %v470_v4  ;;  %v708_v8 = vpop.f32.mrb[1].mxu0 }
 0x152   : > { %v714_v9 = vadd.f32 %v708_v8, %v471_v5  ;;  %v710_v10 = vpop.f32.mrb[2].mxu0 }
 0x153   : > { %715 = vst [vmem:[#allocation2] sm:$0xff] %v713_v7  ;;  %v711_v11 = vpop.f32.mrb[3].mxu0 }
 0x154   : > { %716 = vst [vmem:[#allocation2 + $0x8] sm:$0xff] %v714_v9 }
 0x15a   : > { %v721_v18 = vld [vmem:[#allocation2] sm:$0xff] }
 0x15b   : > { %v722_v19 = vld [vmem:[#allocation2 + $0x8] sm:$0xff]  ;;  %v735_v24 = vmul.f32 %v728_v20, %v721_v18 }
 0x15c   : > { %v736_v25 = vmul.f32 %v732_v21, %v722_v19 }
 0x15d   : > { %v749_v26 = vadd.f32 %v742_v22, %v735_v24 }
 0x15e   : > { %v750_v27 = vadd.f32 %v746_v23, %v736_v25 }
 0x15f   : > { %v751_v28 = vmax.f32 %v749_v26, 0.0 }
 0x160   : > { %v752_v29 = vmax.f32 %v750_v27, 0.0 }
 0x162   : > { %v953_v30 = vpack.c.bf16 %v752_v29, %v751_v28 }
 0x164   : > { %761 = vst [vmem:[%s1296_s12] sm:$0xff] %v953_v30 }
 0x165 PF: > { %s14_s21 = sadd.s32 1, %s1115_s21   ;;  %s1372_s15 = smov %s1095_s16 }
 0x166   : > { %p11_p0 = scmp.ge.s32.totalorder %s14_s21, 20   ;;  %s1373_s16 = smov %s1194_s28 }
 0x167   : > { %s1374_s17 = smov %s1107_s19  ;;  %s1375_s18 = smov %s1111_s20 }
 0x168   : > { %s1376_s19 = smov %s1379_s22  ;;  %s1377_s20 = smov %s1383_s23 }
 0x169   :  { %13 = sbr.rel (!%p11_p0) target bundleno = 4 (0x4), region = 126 }

// kernel: forward.68
= control target key start
LH: loop header
LB: loop body
LE: loop exit
PB: predicated region body
PF: predicated region fallthrough
CT: control target
= control target key end

     0   :  { %s1102_s15 = smov 0   ;;  %s1104_s16 = smov 0   ;;  %s1284_s0 = inlined_call_operand.vmem [shape: bf16[1,8,256], index: 0, kind: input, shape index: {}]   ;;  %s1285_s1 = inlined_call_operand.vmem [shape: bf16[1,256,512], index: 1, kind: input, shape index: {}]   ;;  %s1286_s2 = inlined_call_operand.vmem [shape: f32[1,512], index: 2, kind: input, shape index: {}]   ;;  %s1287_s3 = inlined_call_operand.vmem [shape: f32[1,512], index: 3, kind: input, shape index: {}]   ;;  %s1288_s4 = inlined_call_operand.vmem [shape: bf16[8,512], index: 4, kind: output, shape index: {}]  }
   0x1   :  { %s1106_s17 = smov 0   ;;  %s1108_s18 = smov 0  }
   0x2   :  { %s1110_s19 = smov 0  }
   0x3 LB: > { %s29_s20 = sadd.s32 1, %s1071_s18  ;;  %p77_p1 = scmp.ne.s32.totalorder %s1063_s16, %s1059_s15  ;;  %s1075_s19 = sphi %s1110_s19, %s14_s19   ;;  %s1071_s18 = sphi %s1108_s18, %s1292_s18   ;;  %s1067_s17 = sphi %s1106_s17, %s1291_s17   ;;  %s1063_s16 = sphi %s1104_s16, %s1290_s16   ;;  %s1059_s15 = sphi %s1102_s15, %s1289_s15  }
   0x4   : > { %p31_p0 = scmp.ge.s32.totalorder %s29_s20, 2  ;;  %p78_p2 = scmp.eq.s32.totalorder %s1075_s19, 0 }
   0x5   : > { %s70_s22 = sadd.s32 1, %s1063_s16  ;;  %p898_p5 = scmp.ge.s32.totalorder %s1075_s19, 2 }
   0x6   : > { %s1294_s20 = smov (%p31_p0, %s29_s20), 0  ;;  %p79_p3 = por %p78_p2, %p77_p1 }
   0x7   : > { %s66_s21 = ssub.s32 %s1071_s18, %s1294_s20  ;;  %195 = sbr.rel (%p898_p5) target bundleno = 34 (0x22), region = 20 }
   0x8   : > { %p68_p4 = scmp.eq.s32.totalorder %s66_s21, 0 }
   0xa   : > { %s1137_s23 = scalar_select %p68_p4, %s1063_s16, %s70_s22  }
   0xe   : > { %198 = sbr.rel (!%p79_p3) target bundleno = 34 (0x22), region = 24  ;;  %s200_s24 = sand.u32 (%p79_p3), 1, %s1063_s16  }
   0xf   : > { %s945_s25 = sshll.u32 (%p79_p3), %s1071_s18, 3  ;;  %s899_s26 = sshll.u32 (%p79_p3), %s200_s24, 8 }
  0x10   : > { %s1145_s29 = scalar_lea.vmem (%p79_p3), %s1285_s1, %s945_s25  ;;  %s1150_s30 = scalar_lea.vmem (%p79_p3), [#allocation3], %s899_s26 }
  0x11   : > { %v297_v0 = vld [vmem:[%s1145_s29] sm:$0xff] (%p79_p3)  ;;  %v299_v1 = vld [vmem:[%s1145_s29 + $0x10] sm:$0xff] (%p79_p3) }
  0x12   : > { %v301_v2 = vld [vmem:[%s1145_s29 + $0x20] sm:$0xff] (%p79_p3)  ;;  %298 = vst [vmem:[%s1150_s30] sm:$0xff] (%p79_p3), %v297_v0  ;;  %300 = vst [vmem:[%s1150_s30 + $0x8] sm:$0xff] (%p79_p3), %v299_v1  ;;  %v303_v3 = vld [vmem:[%s1145_s29 + $0x30] sm:$0xff] (%p79_p3) }
  0x13   : > { %302 = vst [vmem:[%s1150_s30 + $0x10] sm:$0xff] (%p79_p3), %v301_v2  ;;  %v305_v4 = vld [vmem:[%s1145_s29 + $0x40] sm:$0xff] (%p79_p3)  ;;  %v307_v5 = vld [vmem:[%s1145_s29 + $0x50] sm:$0xff] (%p79_p3)  ;;  %304 = vst [vmem:[%s1150_s30 + $0x18] sm:$0xff] (%p79_p3), %v303_v3 }
  0x14   : > { %306 = vst [vmem:[%s1150_s30 + $0x20] sm:$0xff] (%p79_p3), %v305_v4  ;;  %308 = vst [vmem:[%s1150_s30 + $0x28] sm:$0xff] (%p79_p3), %v307_v5  ;;  %v309_v6 = vld [vmem:[%s1145_s29 + $0x60] sm:$0xff] (%p79_p3)  ;;  %v311_v7 = vld [vmem:[%s1145_s29 + $0x70] sm:$0xff] (%p79_p3) }
  0x15   : > { %v313_v8 = vld [vmem:[%s1145_s29 + $0x80] sm:$0xff]  ;;  %310 = vst [vmem:[%s1150_s30 + $0x30] sm:$0xff] %v309_v6  ;;  %312 = vst [vmem:[%s1150_s30 + $0x38] sm:$0xff] %v311_v7  ;;  %v315_v9 = vld [vmem:[%s1145_s29 + $0x90] sm:$0xff] }
  0x16   : > { %314 = vst [vmem:[%s1150_s30 + $0x40] sm:$0xff] %v313_v8  ;;  %v317_v10 = vld [vmem:[%s1145_s29 + $0xa0] sm:$0xff]  ;;  %v319_v11 = vld [vmem:[%s1145_s29 + $0xb0] sm:$0xff]  ;;  %316 = vst [vmem:[%s1150_s30 + $0x48] sm:$0xff] %v315_v9 }
  0x17   : > { %318 = vst [vmem:[%s1150_s30 + $0x50] sm:$0xff] %v317_v10  ;;  %320 = vst [vmem:[%s1150_s30 + $0x58] sm:$0xff] %v319_v11  ;;  %v321_v12 = vld [vmem:[%s1145_s29 + $0xc0] sm:$0xff]  ;;  %v323_v13 = vld [vmem:[%s1145_s29 + $0xd0] sm:$0xff] }
  0x18   : > { %v325_v14 = vld [vmem:[%s1145_s29 + $0xe0] sm:$0xff]  ;;  %322 = vst [vmem:[%s1150_s30 + $0x60] sm:$0xff] %v321_v12  ;;  %324 = vst [vmem:[%s1150_s30 + $0x68] sm:$0xff] %v323_v13  ;;  %v327_v15 = vld [vmem:[%s1145_s29 + $0xf0] sm:$0xff] }
  0x19   : > { %326 = vst [vmem:[%s1150_s30 + $0x70] sm:$0xff] %v325_v14  ;;  %v329_v16 = vld [vmem:[%s1145_s29 + $0x100] sm:$0xff]  ;;  %v331_v17 = vld [vmem:[%s1145_s29 + $0x110] sm:$0xff]  ;;  %328 = vst [vmem:[%s1150_s30 + $0x78] sm:$0xff] %v327_v15 }
  0x1a   : > { %330 = vst [vmem:[%s1150_s30 + $0x80] sm:$0xff] %v329_v16  ;;  %332 = vst [vmem:[%s1150_s30 + $0x88] sm:$0xff] %v331_v17  ;;  %v333_v18 = vld [vmem:[%s1145_s29 + $0x120] sm:$0xff]  ;;  %v335_v19 = vld [vmem:[%s1145_s29 + $0x130] sm:$0xff] }
  0x1b   : > { %v337_v20 = vld [vmem:[%s1145_s29 + $0x140] sm:$0xff]  ;;  %334 = vst [vmem:[%s1150_s30 + $0x90] sm:$0xff] %v333_v18  ;;  %336 = vst [vmem:[%s1150_s30 + $0x98] sm:$0xff] %v335_v19  ;;  %v339_v21 = vld [vmem:[%s1145_s29 + $0x150] sm:$0xff] }
  0x1c   : > { %338 = vst [vmem:[%s1150_s30 + $0xa0] sm:$0xff] %v337_v20  ;;  %v341_v22 = vld [vmem:[%s1145_s29 + $0x160] sm:$0xff]  ;;  %v343_v23 = vld [vmem:[%s1145_s29 + $0x170] sm:$0xff]  ;;  %340 = vst [vmem:[%s1150_s30 + $0xa8] sm:$0xff] %v339_v21 }
  0x1d   : > { %342 = vst [vmem:[%s1150_s30 + $0xb0] sm:$0xff] %v341_v22  ;;  %344 = vst [vmem:[%s1150_s30 + $0xb8] sm:$0xff] %v343_v23  ;;  %v345_v24 = vld [vmem:[%s1145_s29 + $0x180] sm:$0xff]  ;;  %v347_v25 = vld [vmem:[%s1145_s29 + $0x190] sm:$0xff] }
  0x1e   : > { %v349_v26 = vld [vmem:[%s1145_s29 + $0x1a0] sm:$0xff]  ;;  %346 = vst [vmem:[%s1150_s30 + $0xc0] sm:$0xff] %v345_v24  ;;  %348 = vst [vmem:[%s1150_s30 + $0xc8] sm:$0xff] %v347_v25  ;;  %v351_v27 = vld [vmem:[%s1145_s29 + $0x1b0] sm:$0xff] }
  0x1f   : > { %350 = vst [vmem:[%s1150_s30 + $0xd0] sm:$0xff] %v349_v26  ;;  %v353_v28 = vld [vmem:[%s1145_s29 + $0x1c0] sm:$0xff]  ;;  %v355_v29 = vld [vmem:[%s1145_s29 + $0x1d0] sm:$0xff]  ;;  %352 = vst [vmem:[%s1150_s30 + $0xd8] sm:$0xff] %v351_v27 }
  0x20   : > { %354 = vst [vmem:[%s1150_s30 + $0xe0] sm:$0xff] %v353_v28  ;;  %356 = vst [vmem:[%s1150_s30 + $0xe8] sm:$0xff] %v355_v29  ;;  %v357_v30 = vld [vmem:[%s1145_s29 + $0x1e0] sm:$0xff]  ;;  %v359_v31 = vld [vmem:[%s1145_s29 + $0x1f0] sm:$0xff] }
  0x21   : > { %358 = vst [vmem:[%s1150_s30 + $0xf0] sm:$0xff] %v357_v30  ;;  %360 = vst [vmem:[%s1150_s30 + $0xf8] sm:$0xff] %v359_v31 }
  0x22 PF: > { %p902_p6 = scmp.ge.s32.totalorder %s1075_s19, 1  ;;  %p381_p7 = scmp.lt.s32.totalorder %s1075_s19, 3 }
  0x24   : > { %p382_p8 = pnand %p902_p6, %p381_p7 }
  0x25   : > { %s388_s5 = sand.u32 (!%p382_p8), 1, %s1059_s15   ;;  %v1219_v32 = vld [vmem:[%s1284_s0] sm:$0xff] (!%p382_p8)  ;;  %s904_s10 = sshll.u32 (!%p382_p8), %s1067_s17, 1  ;;  %v724_v3 = vlaneseq (!%p382_p8) }
  0x26   : > { %385 = sbr.rel (%p382_p8) target bundleno = 325 (0x145), region = 70  ;;  %s903_s8 = sshll.u32 (!%p382_p8), %s388_s5, 8  ;;  %v909_v33 = vcombine.high (!%p382_p8), %v1219_v32, %v1219_v32  ;;  %v908_v2 = vcombine.low (!%p382_p8), %v1219_v32, %v1219_v32 }
  0x27   : > { %s1223_s9 = scalar_lea.vmem (!%p382_p8), [#allocation3], %s903_s8  ;;  %p445_p9 = scmp.lt.s32.totalorder (!%p382_p8), %s904_s10, 3  ;;  %v725_v4 = vshrl.u32 (!%p382_p8), %v724_v3, 7 }
  0x28   : > { %v987_v34 = vld [vmem:[%s1223_s9 + $0x4] ss:$8 sps:$4 sm:$0xff] (!%p382_p8)   ;;  %704 = vmatprep.mubr.bf16.mxu0 (!%p382_p8), %v909_v33  ;;  %v989_v35 = vld [vmem:[%s1223_s9] ss:$8 sps:$4 sm:$0xff] (!%p382_p8)   ;;  %v990_v36 = vld [vmem:[%s1223_s9 + $0x14] ss:$8 sps:$4 sm:$0xff] (!%p382_p8)  }
  0x29   : > { %672 = vmatprep.subr.bf16.mxu0 (!%p382_p8), %v987_v34  ;;  %v992_v37 = vld [vmem:[%s1223_s9 + $0x10] ss:$8 sps:$4 sm:$0xff] (!%p382_p8)   ;;  %v993_v38 = vld [vmem:[%s1223_s9 + $0x24] ss:$8 sps:$4 sm:$0xff] (!%p382_p8)   ;;  %v995_v39 = vld [vmem:[%s1223_s9 + $0x20] ss:$8 sps:$4 sm:$0xff] (!%p382_p8)  }
  0x2a   : > { %673 = vmatpush1.bf16.msra.mxu0 (!%p382_p8), %v989_v35  ;;  %v996_v40 = vld [vmem:[%s1223_s9 + $0x34] ss:$8 sps:$4 sm:$0xff] (!%p382_p8)   ;;  %v998_v41 = vld [vmem:[%s1223_s9 + $0x30] ss:$8 sps:$4 sm:$0xff] (!%p382_p8)   ;;  %v999_v42 = vld [vmem:[%s1223_s9 + $0x44] ss:$8 sps:$4 sm:$0xff] (!%p382_p8)  }
  0x2b   : > { %674 = vmatprep.subr.bf16.mxu0 (!%p382_p8), %v990_v36  ;;  %v1001_v43 = vld [vmem:[%s1223_s9 + $0x40] ss:$8 sps:$4 sm:$0xff] (!%p382_p8)   ;;  %v1002_v44 = vld [vmem:[%s1223_s9 + $0x54] ss:$8 sps:$4 sm:$0xff] (!%p382_p8)   ;;  %v1004_v45 = vld [vmem:[%s1223_s9 + $0x50] ss:$8 sps:$4 sm:$0xff] (!%p382_p8)  }
  0x2c   : > { %v1005_v46 = vld [vmem:[%s1223_s9 + $0x64] ss:$8 sps:$4 sm:$0xff] (!%p382_p8)   ;;  %v1007_v47 = vld [vmem:[%s1223_s9 + $0x60] ss:$8 sps:$4 sm:$0xff] (!%p382_p8)   ;;  %v1008_v48 = vld [vmem:[%s1223_s9 + $0x74] ss:$8 sps:$4 sm:$0xff] (!%p382_p8)  }
  0x2d   : > { %v1010_v49 = vld [vmem:[%s1223_s9 + $0x70] ss:$8 sps:$4 sm:$0xff]   ;;  %v1011_v50 = vld [vmem:[%s1223_s9 + $0x84] ss:$8 sps:$4 sm:$0xff]   ;;  %v1013_v51 = vld [vmem:[%s1223_s9 + $0x80] ss:$8 sps:$4 sm:$0xff]  }
  0x2e   : > { %675 = vmatpush1.bf16.msra.mxu0 %v992_v37  ;;  %v1014_v52 = vld [vmem:[%s1223_s9 + $0x94] ss:$8 sps:$4 sm:$0xff]   ;;  %v1016_v53 = vld [vmem:[%s1223_s9 + $0x90] ss:$8 sps:$4 sm:$0xff]   ;;  %v1017_v54 = vld [vmem:[%s1223_s9 + $0xa4] ss:$8 sps:$4 sm:$0xff]  }
  0x2f   : > { %676 = vmatprep.subr.bf16.mxu0 %v993_v38  ;;  %v1019_v55 = vld [vmem:[%s1223_s9 + $0xa0] ss:$8 sps:$4 sm:$0xff]   ;;  %v1020_v56 = vld [vmem:[%s1223_s9 + $0xb4] ss:$8 sps:$4 sm:$0xff]   ;;  %v1022_v57 = vld [vmem:[%s1223_s9 + $0xb0] ss:$8 sps:$4 sm:$0xff]  }
  0x30   : > { %v1023_v58 = vld [vmem:[%s1223_s9 + $0xc4] ss:$8 sps:$4 sm:$0xff]   ;;  %v1025_v59 = vld [vmem:[%s1223_s9 + $0xc0] ss:$8 sps:$4 sm:$0xff]   ;;  %v1026_v60 = vld [vmem:[%s1223_s9 + $0xd4] ss:$8 sps:$4 sm:$0xff]  }
  0x31   : > { %v1028_v61 = vld [vmem:[%s1223_s9 + $0xd0] ss:$8 sps:$4 sm:$0xff]   ;;  %v1029_v62 = vld [vmem:[%s1223_s9 + $0xe4] ss:$8 sps:$4 sm:$0xff]   ;;  %v1031_v63 = vld [vmem:[%s1223_s9 + $0xe0] ss:$8 sps:$4 sm:$0xff]  }
  0x32   : > { %677 = vmatpush1.bf16.msra.mxu0 %v995_v39  ;;  %v1032_v0 = vld [vmem:[%s1223_s9 + $0xf4] ss:$8 sps:$4 sm:$0xff]   ;;  %v1034_v1 = vld [vmem:[%s1223_s9 + $0xf0] ss:$8 sps:$4 sm:$0xff]   ;;  %s1296_s10 = smov (!%p445_p9, %s904_s10), 3  ;;  %v726_v5 = vsub.s32 0, %v725_v4 }
  0x33   : > { %678 = vmatprep.subr.bf16.mxu0 %v996_v40  ;;  %s447_s13 = scalar_lea.vmem %s1286_s2, %s1296_s10  ;;  %s452_s21 = scalar_lea.vmem %s1287_s3, %s1296_s10  ;;  %v730_v7 = vsub.s32 1, %v725_v4 }
  0x34   : > { %v722_v6 = vld [vmem:[%s447_s13] sm:$0x3]  ;;  %s907_s17 = sshll.u32 %s1296_s10, 2 }
  0x35   : > { %v736_v8 = vld [vmem:[%s452_s21] sm:$0x3]  ;;  %v727_v9 = vrot.slane %v722_v6, %v726_v5  ;;  %v731_v10 = vrot.slane %v722_v6, %v730_v7  ;;  %s462_s25 = scalar_lea.vmem %s1288_s4, %s907_s17 }
  0x36   : > { %679 = vmatpush1.bf16.msra.mxu0 %v998_v41  ;;  %v741_v11 = vrot.slane %v736_v8, %v726_v5  ;;  %v745_v13 = vrot.slane %v736_v8, %v730_v7 }
  0x37   : > { %680 = vmatprep.subr.bf16.mxu0 %v999_v42 }
  0x3a   : > { %681 = vmatpush1.bf16.msra.mxu0 %v1001_v43 }
  0x3b   : > { %682 = vmatprep.subr.bf16.mxu0 %v1002_v44 }
  0x3e   : > { %683 = vmatpush1.bf16.msra.mxu0 %v1004_v45 }
  0x3f   : > { %684 = vmatprep.subr.bf16.mxu0 %v1005_v46 }
  0x42   : > { %685 = vmatpush1.bf16.msra.mxu0 %v1007_v47 }
  0x43   : > { %686 = vmatprep.subr.bf16.mxu0 %v1008_v48 }
  0x46   : > { %687 = vmatpush1.bf16.msra.mxu0 %v1010_v49 }
  0x47   : > { %688 = vmatprep.subr.bf16.mxu0 %v1011_v50 }
  0x4a   : > { %689 = vmatpush1.bf16.msra.mxu0 %v1013_v51 }
  0x4b   : > { %690 = vmatprep.subr.bf16.mxu0 %v1014_v52 }
  0x4e   : > { %691 = vmatpush1.bf16.msra.mxu0 %v1016_v53 }
  0x4f   : > { %692 = vmatprep.subr.bf16.mxu0 %v1017_v54 }
  0x52   : > { %693 = vmatpush1.bf16.msra.mxu0 %v1019_v55 }
  0x53   : > { %694 = vmatprep.subr.bf16.mxu0 %v1020_v56 }
  0x56   : > { %695 = vmatpush1.bf16.msra.mxu0 %v1022_v57 }
  0x57   : > { %696 = vmatprep.subr.bf16.mxu0 %v1023_v58 }
  0x5a   : > { %697 = vmatpush1.bf16.msra.mxu0 %v1025_v59 }
  0x5b   : > { %698 = vmatprep.subr.bf16.mxu0 %v1026_v60 }
  0x5e   : > { %699 = vmatpush1.bf16.msra.mxu0 %v1028_v61 }
  0x5f   : > { %700 = vmatprep.subr.bf16.mxu0 %v1029_v62 }
  0x62   : > { %701 = vmatpush1.bf16.msra.mxu0 %v1031_v63 }
  0x63   : > { %702 = vmatprep.subr.bf16.mxu0 %v1032_v0 }
  0x66   : > { %703 = vmatpush1.bf16.msra.mxu0 %v1034_v1 }
  0x69   : > { %705 = vmatmul.mubr.bf16.vlgmr.msra.gmra.mrb[0].mxu0 %v908_v2 }
 0x13c   : > { %v706_v12 = vpop.f32.mrb[0].mxu0 }
 0x13d   : > { %v734_v14 = vmul.f32 %v727_v9, %v706_v12  ;;  %v708_v15 = vpop.f32.mrb[1].mxu0 }
 0x13e   : > { %v735_v16 = vmul.f32 %v731_v10, %v708_v15  ;;  %v710_v17 = vpop.f32.mrb[2].mxu0 }
 0x13f   : > { %v748_v18 = vadd.f32 %v741_v11, %v734_v14  ;;  %v711_v19 = vpop.f32.mrb[3].mxu0 }
 0x140   : > { %v749_v20 = vadd.f32 %v745_v13, %v735_v16 }
 0x142   : > { %v946_v21 = vpack.c.bf16 %v749_v20, %v748_v18 }
 0x144   : > { %758 = vst [vmem:[%s462_s25] sm:$0xff] %v946_v21 }
 0x145 PF: > { %s14_s19 = sadd.s32 1, %s1075_s19   ;;  %s1289_s15 = smov %s1063_s16 }
 0x146   : > { %p11_p10 = scmp.ge.s32.totalorder %s14_s19, 4   ;;  %s1290_s16 = smov %s1137_s23 }
 0x147   : > { %s1291_s17 = smov %s1071_s18  ;;  %s1292_s18 = smov %s1294_s20 }
 0x148   :  { %13 = sbr.rel (!%p11_p10) target bundleno = 3 (0x3), region = 126 }

// kernel: forward.71
= control target key start
LH: loop header
LB: loop body
LE: loop exit
PB: predicated region body
PF: predicated region fallthrough
CT: control target
= control target key end

     0   :  { %s1596_s15 = smov 0   ;;  %s1598_s16 = smov 0   ;;  %s1917_s0 = inlined_call_operand.vmem [shape: bf16[9,8,512], index: 0, kind: input, shape index: {}]   ;;  %s1918_s1 = inlined_call_operand.vmem [shape: bf16[9,512,512], index: 1, kind: input, shape index: {}]   ;;  %s1919_s2 = inlined_call_operand.vmem [shape: f32[1,512], index: 2, kind: input, shape index: {}]   ;;  %s1920_s3 = inlined_call_operand.vmem [shape: f32[1,512], index: 3, kind: input, shape index: {}]   ;;  %s1921_s4 = inlined_call_operand.vmem [shape: bf16[8,512], index: 4, kind: output, shape index: {}]  }
   0x1   :  { %s1600_s17 = smov 0   ;;  %s1602_s18 = smov 0  }
   0x2   :  { %s1604_s19 = smov 0   ;;  %s1606_s20 = smov 0  }
   0x3   :  { %s1608_s21 = smov 0  }
   0x4 LB: > { %s26_s22 = sadd.s32 1, %s1560_s19  ;;  %s29_s23 = sadd.s32 1, %s1564_s20  ;;  %s1568_s21 = sphi %s1608_s21, %s14_s21   ;;  %s1564_s20 = sphi %s1606_s20, %s1927_s20   ;;  %s1560_s19 = sphi %s1604_s19, %s1926_s19   ;;  %s1556_s18 = sphi %s1602_s18, %s1925_s18   ;;  %s1552_s17 = sphi %s1600_s17, %s1924_s17   ;;  %s1548_s16 = sphi %s1598_s16, %s1923_s16   ;;  %s1544_s15 = sphi %s1596_s15, %s1922_s15  }
   0x5   : > { %p27_p0 = scmp.ge.s32.totalorder %s26_s22, 9  ;;  %p77_p1 = scmp.ne.s32.totalorder %s1548_s16, %s1544_s15 }
   0x6   : > { %p78_p2 = scmp.eq.s32.totalorder %s1568_s21, 0  ;;  %s70_s27 = sadd.s32 1, %s1548_s16 }
   0x7   : > { %s1929_s22 = smov (%p27_p0, %s26_s22), 0  ;;  %s1931_s23 = smov (!%p27_p0, %s29_s23), %s1564_s20 }
   0x8   : > { %p79_p3 = por %p78_p2, %p77_p1  ;;  %p31_p4 = scmp.ge.s32.totalorder %s1931_s23, 2 }
   0x9   : > { %s65_s24 = ssub.s32 %s1560_s19, %s1929_s22  ;;  %p1269_p6 = scmp.ge.s32.totalorder %s1568_s21, 18 }
   0xa   : > { %s1933_s23 = smov (%p31_p4, %s1931_s23), 0 }
   0xb   : > { %s66_s25 = ssub.s32 %s1564_s20, %s1933_s23  ;;  %183 = sbr.rel (%p1269_p6) target bundleno = 57 (0x39), region = 16 }
   0xc   : > { %s67_s26 = sor.u32 %s66_s25, %s65_s24 }
   0xd   : > { %p68_p5 = scmp.eq.s32.totalorder %s67_s26, 0 }
   0xf   : > { %s1647_s28 = scalar_select %p68_p5, %s1548_s16, %s70_s27  }
  0x12   : > { %198 = sbr.rel (!%p79_p3) target bundleno = 57 (0x39), region = 24  ;;  %s200_s29 = sand.u32 (%p79_p3), 1, %s1548_s16  }
  0x13   : > { %s1271_s30 = sshll.u32 (%p79_p3), %s1564_s20, 1  ;;  %s1270_s5 = sshll.u32 (%p79_p3), %s200_s29, 9 }
  0x14   : > { %s1272_s6 = sshll.u32 (%p79_p3), %s1560_s19, 8  ;;  %s1661_s12 = scalar_lea.vmem (%p79_p3), [#allocation3], %s1270_s5 }
  0x15   : > { %s205_s7 = sadd.s32 (%p79_p3), %s1272_s6, %s1271_s30 }
  0x16   : > { %s1273_s8 = sshll.u32 (%p79_p3), %s205_s7, 2 }
  0x17   : > { %s1656_s11 = scalar_lea.vmem (%p79_p3), %s1918_s1, %s1273_s8 }
  0x18   : > { %v361_v0 = vld [vmem:[%s1656_s11] sm:$0xff] (%p79_p3)  ;;  %v363_v1 = vld [vmem:[%s1656_s11 + $0x10] sm:$0xff] (%p79_p3) }
  0x19   : > { %v365_v2 = vld [vmem:[%s1656_s11 + $0x20] sm:$0xff]  ;;  %362 = vst [vmem:[%s1661_s12] sm:$0xff] %v361_v0  ;;  %364 = vst [vmem:[%s1661_s12 + $0x8] sm:$0xff] %v363_v1  ;;  %v367_v3 = vld [vmem:[%s1656_s11 + $0x30] sm:$0xff] }
  0x1a   : > { %366 = vst [vmem:[%s1661_s12 + $0x10] sm:$0xff] %v365_v2  ;;  %v369_v4 = vld [vmem:[%s1656_s11 + $0x40] sm:$0xff]  ;;  %v371_v5 = vld [vmem:[%s1656_s11 + $0x50] sm:$0xff]  ;;  %368 = vst [vmem:[%s1661_s12 + $0x18] sm:$0xff] %v367_v3 }
  0x1b   : > { %370 = vst [vmem:[%s1661_s12 + $0x20] sm:$0xff] %v369_v4  ;;  %372 = vst [vmem:[%s1661_s12 + $0x28] sm:$0xff] %v371_v5  ;;  %v373_v6 = vld [vmem:[%s1656_s11 + $0x60] sm:$0xff]  ;;  %v375_v7 = vld [vmem:[%s1656_s11 + $0x70] sm:$0xff] }
  0x1c   : > { %v377_v8 = vld [vmem:[%s1656_s11 + $0x80] sm:$0xff]  ;;  %374 = vst [vmem:[%s1661_s12 + $0x30] sm:$0xff] %v373_v6  ;;  %376 = vst [vmem:[%s1661_s12 + $0x38] sm:$0xff] %v375_v7  ;;  %v379_v9 = vld [vmem:[%s1656_s11 + $0x90] sm:$0xff] }
  0x1d   : > { %378 = vst [vmem:[%s1661_s12 + $0x40] sm:$0xff] %v377_v8  ;;  %v381_v10 = vld [vmem:[%s1656_s11 + $0xa0] sm:$0xff]  ;;  %v383_v11 = vld [vmem:[%s1656_s11 + $0xb0] sm:$0xff]  ;;  %380 = vst [vmem:[%s1661_s12 + $0x48] sm:$0xff] %v379_v9 }
  0x1e   : > { %382 = vst [vmem:[%s1661_s12 + $0x50] sm:$0xff] %v381_v10  ;;  %384 = vst [vmem:[%s1661_s12 + $0x58] sm:$0xff] %v383_v11  ;;  %v385_v12 = vld [vmem:[%s1656_s11 + $0xc0] sm:$0xff]  ;;  %v387_v13 = vld [vmem:[%s1656_s11 + $0xd0] sm:$0xff] }
  0x1f   : > { %v389_v14 = vld [vmem:[%s1656_s11 + $0xe0] sm:$0xff]  ;;  %386 = vst [vmem:[%s1661_s12 + $0x60] sm:$0xff] %v385_v12  ;;  %388 = vst [vmem:[%s1661_s12 + $0x68] sm:$0xff] %v387_v13  ;;  %v391_v15 = vld [vmem:[%s1656_s11 + $0xf0] sm:$0xff] }
  0x20   : > { %390 = vst [vmem:[%s1661_s12 + $0x70] sm:$0xff] %v389_v14  ;;  %v393_v16 = vld [vmem:[%s1656_s11 + $0x100] sm:$0xff]  ;;  %v395_v17 = vld [vmem:[%s1656_s11 + $0x110] sm:$0xff]  ;;  %392 = vst [vmem:[%s1661_s12 + $0x78] sm:$0xff] %v391_v15 }
  0x21   : > { %394 = vst [vmem:[%s1661_s12 + $0x80] sm:$0xff] %v393_v16  ;;  %396 = vst [vmem:[%s1661_s12 + $0x88] sm:$0xff] %v395_v17  ;;  %v397_v18 = vld [vmem:[%s1656_s11 + $0x120] sm:$0xff]  ;;  %v399_v19 = vld [vmem:[%s1656_s11 + $0x130] sm:$0xff] }
  0x22   : > { %v401_v20 = vld [vmem:[%s1656_s11 + $0x140] sm:$0xff]  ;;  %398 = vst [vmem:[%s1661_s12 + $0x90] sm:$0xff] %v397_v18  ;;  %400 = vst [vmem:[%s1661_s12 + $0x98] sm:$0xff] %v399_v19  ;;  %v403_v21 = vld [vmem:[%s1656_s11 + $0x150] sm:$0xff] }
  0x23   : > { %402 = vst [vmem:[%s1661_s12 + $0xa0] sm:$0xff] %v401_v20  ;;  %v405_v22 = vld [vmem:[%s1656_s11 + $0x160] sm:$0xff]  ;;  %v407_v23 = vld [vmem:[%s1656_s11 + $0x170] sm:$0xff]  ;;  %404 = vst [vmem:[%s1661_s12 + $0xa8] sm:$0xff] %v403_v21 }
  0x24   : > { %406 = vst [vmem:[%s1661_s12 + $0xb0] sm:$0xff] %v405_v22  ;;  %408 = vst [vmem:[%s1661_s12 + $0xb8] sm:$0xff] %v407_v23  ;;  %v409_v24 = vld [vmem:[%s1656_s11 + $0x180] sm:$0xff]  ;;  %v411_v25 = vld [vmem:[%s1656_s11 + $0x190] sm:$0xff] }
  0x25   : > { %v413_v26 = vld [vmem:[%s1656_s11 + $0x1a0] sm:$0xff]  ;;  %410 = vst [vmem:[%s1661_s12 + $0xc0] sm:$0xff] %v409_v24  ;;  %412 = vst [vmem:[%s1661_s12 + $0xc8] sm:$0xff] %v411_v25  ;;  %v415_v27 = vld [vmem:[%s1656_s11 + $0x1b0] sm:$0xff] }
  0x26   : > { %414 = vst [vmem:[%s1661_s12 + $0xd0] sm:$0xff] %v413_v26  ;;  %v417_v28 = vld [vmem:[%s1656_s11 + $0x1c0] sm:$0xff]  ;;  %v419_v29 = vld [vmem:[%s1656_s11 + $0x1d0] sm:$0xff]  ;;  %416 = vst [vmem:[%s1661_s12 + $0xd8] sm:$0xff] %v415_v27 }
  0x27   : > { %418 = vst [vmem:[%s1661_s12 + $0xe0] sm:$0xff] %v417_v28  ;;  %420 = vst [vmem:[%s1661_s12 + $0xe8] sm:$0xff] %v419_v29  ;;  %v421_v30 = vld [vmem:[%s1656_s11 + $0x1e0] sm:$0xff]  ;;  %v423_v31 = vld [vmem:[%s1656_s11 + $0x1f0] sm:$0xff] }
  0x28   : > { %v425_v32 = vld [vmem:[%s1656_s11 + $0x200] sm:$0xff]  ;;  %422 = vst [vmem:[%s1661_s12 + $0xf0] sm:$0xff] %v421_v30  ;;  %424 = vst [vmem:[%s1661_s12 + $0xf8] sm:$0xff] %v423_v31  ;;  %v427_v33 = vld [vmem:[%s1656_s11 + $0x210] sm:$0xff] }
  0x29   : > { %426 = vst [vmem:[%s1661_s12 + $0x100] sm:$0xff] %v425_v32  ;;  %v429_v34 = vld [vmem:[%s1656_s11 + $0x220] sm:$0xff]  ;;  %v431_v35 = vld [vmem:[%s1656_s11 + $0x230] sm:$0xff]  ;;  %428 = vst [vmem:[%s1661_s12 + $0x108] sm:$0xff] %v427_v33 }
  0x2a   : > { %430 = vst [vmem:[%s1661_s12 + $0x110] sm:$0xff] %v429_v34  ;;  %432 = vst [vmem:[%s1661_s12 + $0x118] sm:$0xff] %v431_v35  ;;  %v433_v36 = vld [vmem:[%s1656_s11 + $0x240] sm:$0xff]  ;;  %v435_v37 = vld [vmem:[%s1656_s11 + $0x250] sm:$0xff] }
  0x2b   : > { %v437_v38 = vld [vmem:[%s1656_s11 + $0x260] sm:$0xff]  ;;  %434 = vst [vmem:[%s1661_s12 + $0x120] sm:$0xff] %v433_v36  ;;  %436 = vst [vmem:[%s1661_s12 + $0x128] sm:$0xff] %v435_v37  ;;  %v439_v39 = vld [vmem:[%s1656_s11 + $0x270] sm:$0xff] }
  0x2c   : > { %438 = vst [vmem:[%s1661_s12 + $0x130] sm:$0xff] %v437_v38  ;;  %v441_v40 = vld [vmem:[%s1656_s11 + $0x280] sm:$0xff]  ;;  %v443_v41 = vld [vmem:[%s1656_s11 + $0x290] sm:$0xff]  ;;  %440 = vst [vmem:[%s1661_s12 + $0x138] sm:$0xff] %v439_v39 }
  0x2d   : > { %442 = vst [vmem:[%s1661_s12 + $0x140] sm:$0xff] %v441_v40  ;;  %444 = vst [vmem:[%s1661_s12 + $0x148] sm:$0xff] %v443_v41  ;;  %v445_v42 = vld [vmem:[%s1656_s11 + $0x2a0] sm:$0xff]  ;;  %v447_v43 = vld [vmem:[%s1656_s11 + $0x2b0] sm:$0xff] }
  0x2e   : > { %v449_v44 = vld [vmem:[%s1656_s11 + $0x2c0] sm:$0xff]  ;;  %446 = vst [vmem:[%s1661_s12 + $0x150] sm:$0xff] %v445_v42  ;;  %448 = vst [vmem:[%s1661_s12 + $0x158] sm:$0xff] %v447_v43  ;;  %v451_v45 = vld [vmem:[%s1656_s11 + $0x2d0] sm:$0xff] }
  0x2f   : > { %450 = vst [vmem:[%s1661_s12 + $0x160] sm:$0xff] %v449_v44  ;;  %v453_v46 = vld [vmem:[%s1656_s11 + $0x2e0] sm:$0xff]  ;;  %v455_v47 = vld [vmem:[%s1656_s11 + $0x2f0] sm:$0xff]  ;;  %452 = vst [vmem:[%s1661_s12 + $0x168] sm:$0xff] %v451_v45 }
  0x30   : > { %454 = vst [vmem:[%s1661_s12 + $0x170] sm:$0xff] %v453_v46  ;;  %456 = vst [vmem:[%s1661_s12 + $0x178] sm:$0xff] %v455_v47  ;;  %v457_v48 = vld [vmem:[%s1656_s11 + $0x300] sm:$0xff]  ;;  %v459_v49 = vld [vmem:[%s1656_s11 + $0x310] sm:$0xff] }
  0x31   : > { %v461_v50 = vld [vmem:[%s1656_s11 + $0x320] sm:$0xff]  ;;  %458 = vst [vmem:[%s1661_s12 + $0x180] sm:$0xff] %v457_v48  ;;  %460 = vst [vmem:[%s1661_s12 + $0x188] sm:$0xff] %v459_v49  ;;  %v463_v51 = vld [vmem:[%s1656_s11 + $0x330] sm:$0xff] }
  0x32   : > { %462 = vst [vmem:[%s1661_s12 + $0x190] sm:$0xff] %v461_v50  ;;  %v465_v52 = vld [vmem:[%s1656_s11 + $0x340] sm:$0xff]  ;;  %v467_v53 = vld [vmem:[%s1656_s11 + $0x350] sm:$0xff]  ;;  %464 = vst [vmem:[%s1661_s12 + $0x198] sm:$0xff] %v463_v51 }
  0x33   : > { %466 = vst [vmem:[%s1661_s12 + $0x1a0] sm:$0xff] %v465_v52  ;;  %468 = vst [vmem:[%s1661_s12 + $0x1a8] sm:$0xff] %v467_v53  ;;  %v469_v54 = vld [vmem:[%s1656_s11 + $0x360] sm:$0xff]  ;;  %v471_v55 = vld [vmem:[%s1656_s11 + $0x370] sm:$0xff] }
  0x34   : > { %v473_v56 = vld [vmem:[%s1656_s11 + $0x380] sm:$0xff]  ;;  %470 = vst [vmem:[%s1661_s12 + $0x1b0] sm:$0xff] %v469_v54  ;;  %472 = vst [vmem:[%s1661_s12 + $0x1b8] sm:$0xff] %v471_v55  ;;  %v475_v57 = vld [vmem:[%s1656_s11 + $0x390] sm:$0xff] }
  0x35   : > { %474 = vst [vmem:[%s1661_s12 + $0x1c0] sm:$0xff] %v473_v56  ;;  %v477_v58 = vld [vmem:[%s1656_s11 + $0x3a0] sm:$0xff]  ;;  %v479_v59 = vld [vmem:[%s1656_s11 + $0x3b0] sm:$0xff]  ;;  %476 = vst [vmem:[%s1661_s12 + $0x1c8] sm:$0xff] %v475_v57 }
  0x36   : > { %478 = vst [vmem:[%s1661_s12 + $0x1d0] sm:$0xff] %v477_v58  ;;  %480 = vst [vmem:[%s1661_s12 + $0x1d8] sm:$0xff] %v479_v59  ;;  %v481_v60 = vld [vmem:[%s1656_s11 + $0x3c0] sm:$0xff]  ;;  %v483_v61 = vld [vmem:[%s1656_s11 + $0x3d0] sm:$0xff] }
  0x37   : > { %v485_v62 = vld [vmem:[%s1656_s11 + $0x3e0] sm:$0xff]  ;;  %482 = vst [vmem:[%s1661_s12 + $0x1e0] sm:$0xff] %v481_v60  ;;  %484 = vst [vmem:[%s1661_s12 + $0x1e8] sm:$0xff] %v483_v61  ;;  %v487_v63 = vld [vmem:[%s1656_s11 + $0x3f0] sm:$0xff] }
  0x38   : > { %486 = vst [vmem:[%s1661_s12 + $0x1f0] sm:$0xff] %v485_v62  ;;  %488 = vst [vmem:[%s1661_s12 + $0x1f8] sm:$0xff] %v487_v63 }
  0x39 PF: > { %p1274_p7 = scmp.ge.s32.totalorder %s1568_s21, 1  ;;  %p509_p8 = scmp.lt.s32.totalorder %s1568_s21, 19 }
  0x3b   : > { %p510_p9 = pnand %p1274_p7, %p509_p8 }
  0x3c   : > { %s516_s13 = sand.u32 (!%p510_p9), 1, %s1544_s15   ;;  %p562_p10 = scmp.lt.s32.totalorder (!%p510_p9), %s1552_s17, 8 }
  0x3d   : > { %513 = sbr.rel (%p510_p9) target bundleno = 376 (0x178), region = 70  ;;  %s1275_s14 = sshll.u32 (!%p510_p9), %s516_s13, 9 }
  0x3e   : > { %s1278_s24 = sshll.u32 (!%p510_p9), %s1556_s18, 1  ;;  %s1815_s13 = scalar_lea.vmem (!%p510_p9), [#allocation3], %s1275_s14 }
  0x3f   : > { %p573_p11 = scmp.lt.s32.totalorder (!%p510_p9), %s1278_s24, 3  ;;  %p1282_p12 = scmp.ne.s32.totalorder (!%p510_p9), %s1552_s17, 0 }
  0x44   : > { %s563_s25 = scalar_select %p562_p10, %s1552_s17, 8 }
  0x45   : > { %s1935_s24 = smov (!%p573_p11, %s1278_s24), 3  ;;  %595 = sbr.rel (%p1282_p12) target bundleno = 76 (0x4c), region = 78 }
  0x46   : > { %s1355_s26 = sshll.u32 %s563_s25, 4  ;;  %s575_s15 = scalar_lea.vmem %s1919_s2, %s1935_s24  ;;  %v1570_v0 = vmov (!%p1282_p12), 0.0  }
  0x47   : > { %s1799_s30 = scalar_lea.vmem %s1917_s0, %s1355_s26  ;;  %s580_s18 = scalar_lea.vmem %s1920_s3, %s1935_s24  ;;  %596 = vst [vmem:[#allocation2] sm:$0xff] (!%p1282_p12), %v1570_v0  ;;  %597 = vst [vmem:[#allocation2 + $0x8] sm:$0xff] (!%p1282_p12), %v1570_v0 }
  0x48   : > { %s1281_s9 = sshll.u32 %s1935_s24, 2 }
  0x49   : > { %s1813_s12 = scalar_lea.vmem %s1921_s4, %s1281_s9 }
  0x4c PF: > { %v1414_v1 = vld [vmem:[%s1815_s13 + $0x4] ss:$8 sps:$4 sm:$0xff]   ;;  %v1418_v3 = vld [vmem:[%s1815_s13] ss:$8 sps:$4 sm:$0xff]   ;;  %v1420_v5 = vld [vmem:[%s1815_s13 + $0x14] ss:$8 sps:$4 sm:$0xff]  }
  0x4d   : > { %v1416_v2 = vld [vmem:[%s1815_s13 + $0x104] ss:$8 sps:$4 sm:$0xff]   ;;  %1000 = vmatprep.subr.bf16.mxu0 %v1414_v1  ;;  %v1419_v4 = vld [vmem:[%s1815_s13 + $0x100] ss:$8 sps:$4 sm:$0xff]   ;;  %v1422_v6 = vld [vmem:[%s1815_s13 + $0x114] ss:$8 sps:$4 sm:$0xff]  }
  0x4e   : > { %1041 = vmatprep.subr.bf16.mxu1 %v1416_v2  ;;  %1001 = vmatpush1.bf16.msra.mxu0 %v1418_v3  ;;  %v1424_v7 = vld [vmem:[%s1815_s13 + $0x10] ss:$8 sps:$4 sm:$0xff]   ;;  %v1426_v9 = vld [vmem:[%s1815_s13 + $0x24] ss:$8 sps:$4 sm:$0xff]   ;;  %v1430_v11 = vld [vmem:[%s1815_s13 + $0x20] ss:$8 sps:$4 sm:$0xff]  }
  0x4f   : > { %1042 = vmatpush1.bf16.msra.mxu1 %v1419_v4  ;;  %1002 = vmatprep.subr.bf16.mxu0 %v1420_v5  ;;  %v1425_v8 = vld [vmem:[%s1815_s13 + $0x110] ss:$8 sps:$4 sm:$0xff]   ;;  %v1428_v10 = vld [vmem:[%s1815_s13 + $0x124] ss:$8 sps:$4 sm:$0xff]   ;;  %v1431_v12 = vld [vmem:[%s1815_s13 + $0x120] ss:$8 sps:$4 sm:$0xff]  }
  0x50   : > { %1043 = vmatprep.subr.bf16.mxu1 %v1422_v6  ;;  %v1432_v13 = vld [vmem:[%s1815_s13 + $0x34] ss:$8 sps:$4 sm:$0xff]   ;;  %v1436_v15 = vld [vmem:[%s1815_s13 + $0x30] ss:$8 sps:$4 sm:$0xff]   ;;  %v1438_v17 = vld [vmem:[%s1815_s13 + $0x44] ss:$8 sps:$4 sm:$0xff]  }
  0x51   : > { %v1434_v14 = vld [vmem:[%s1815_s13 + $0x134] ss:$8 sps:$4 sm:$0xff]   ;;  %v1437_v16 = vld [vmem:[%s1815_s13 + $0x130] ss:$8 sps:$4 sm:$0xff]   ;;  %v1440_v18 = vld [vmem:[%s1815_s13 + $0x144] ss:$8 sps:$4 sm:$0xff]  }
  0x52   : > { %1003 = vmatpush1.bf16.msra.mxu0 %v1424_v7  ;;  %v1442_v19 = vld [vmem:[%s1815_s13 + $0x40] ss:$8 sps:$4 sm:$0xff]   ;;  %v1444_v21 = vld [vmem:[%s1815_s13 + $0x54] ss:$8 sps:$4 sm:$0xff]   ;;  %v1448_v23 = vld [vmem:[%s1815_s13 + $0x50] ss:$8 sps:$4 sm:$0xff]  }
  0x53   : > { %1044 = vmatpush1.bf16.msra.mxu1 %v1425_v8  ;;  %1004 = vmatprep.subr.bf16.mxu0 %v1426_v9  ;;  %v1443_v20 = vld [vmem:[%s1815_s13 + $0x140] ss:$8 sps:$4 sm:$0xff]   ;;  %v1446_v22 = vld [vmem:[%s1815_s13 + $0x154] ss:$8 sps:$4 sm:$0xff]   ;;  %v1449_v24 = vld [vmem:[%s1815_s13 + $0x150] ss:$8 sps:$4 sm:$0xff]  }
  0x54   : > { %1045 = vmatprep.subr.bf16.mxu1 %v1428_v10  ;;  %v1450_v25 = vld [vmem:[%s1815_s13 + $0x64] ss:$8 sps:$4 sm:$0xff]   ;;  %v1454_v27 = vld [vmem:[%s1815_s13 + $0x60] ss:$8 sps:$4 sm:$0xff]   ;;  %v1456_v29 = vld [vmem:[%s1815_s13 + $0x74] ss:$8 sps:$4 sm:$0xff]  }
  0x55   : > { %v1452_v26 = vld [vmem:[%s1815_s13 + $0x164] ss:$8 sps:$4 sm:$0xff]   ;;  %v1455_v28 = vld [vmem:[%s1815_s13 + $0x160] ss:$8 sps:$4 sm:$0xff]   ;;  %v1458_v30 = vld [vmem:[%s1815_s13 + $0x174] ss:$8 sps:$4 sm:$0xff]  }
  0x56   : > { %1005 = vmatpush1.bf16.msra.mxu0 %v1430_v11  ;;  %v1460_v31 = vld [vmem:[%s1815_s13 + $0x70] ss:$8 sps:$4 sm:$0xff]   ;;  %v1462_v33 = vld [vmem:[%s1815_s13 + $0x84] ss:$8 sps:$4 sm:$0xff]   ;;  %v1466_v35 = vld [vmem:[%s1815_s13 + $0x80] ss:$8 sps:$4 sm:$0xff]  }
  0x57   : > { %1046 = vmatpush1.bf16.msra.mxu1 %v1431_v12  ;;  %1006 = vmatprep.subr.bf16.mxu0 %v1432_v13  ;;  %v1461_v32 = vld [vmem:[%s1815_s13 + $0x170] ss:$8 sps:$4 sm:$0xff]   ;;  %v1464_v34 = vld [vmem:[%s1815_s13 + $0x184] ss:$8 sps:$4 sm:$0xff]   ;;  %v1467_v36 = vld [vmem:[%s1815_s13 + $0x180] ss:$8 sps:$4 sm:$0xff]  }
  0x58   : > { %1047 = vmatprep.subr.bf16.mxu1 %v1434_v14  ;;  %v1468_v37 = vld [vmem:[%s1815_s13 + $0x94] ss:$8 sps:$4 sm:$0xff]   ;;  %v1472_v39 = vld [vmem:[%s1815_s13 + $0x90] ss:$8 sps:$4 sm:$0xff]   ;;  %v1474_v41 = vld [vmem:[%s1815_s13 + $0xa4] ss:$8 sps:$4 sm:$0xff]  }
  0x59   : > { %v1470_v38 = vld [vmem:[%s1815_s13 + $0x194] ss:$8 sps:$4 sm:$0xff]   ;;  %v1473_v40 = vld [vmem:[%s1815_s13 + $0x190] ss:$8 sps:$4 sm:$0xff]   ;;  %v1476_v42 = vld [vmem:[%s1815_s13 + $0x1a4] ss:$8 sps:$4 sm:$0xff]  }
  0x5a   : > { %1007 = vmatpush1.bf16.msra.mxu0 %v1436_v15  ;;  %v1478_v43 = vld [vmem:[%s1815_s13 + $0xa0] ss:$8 sps:$4 sm:$0xff]   ;;  %v1480_v45 = vld [vmem:[%s1815_s13 + $0xb4] ss:$8 sps:$4 sm:$0xff]   ;;  %v1484_v50 = vld [vmem:[%s1815_s13 + $0xb0] ss:$8 sps:$4 sm:$0xff]  }
  0x5b   : > { %1048 = vmatpush1.bf16.msra.mxu1 %v1437_v16  ;;  %1008 = vmatprep.subr.bf16.mxu0 %v1438_v17  ;;  %v1479_v44 = vld [vmem:[%s1815_s13 + $0x1a0] ss:$8 sps:$4 sm:$0xff]   ;;  %v1482_v46 = vld [vmem:[%s1815_s13 + $0x1b4] ss:$8 sps:$4 sm:$0xff]   ;;  %v1485_v51 = vld [vmem:[%s1815_s13 + $0x1b0] ss:$8 sps:$4 sm:$0xff]  }
  0x5c   : > { %1049 = vmatprep.subr.bf16.mxu1 %v1440_v18  ;;  %v600_v47 = vld [vmem:[%s1799_s30] sm:$0xff]  ;;  %v601_v49 = vld [vmem:[%s1799_s30 + $0x8] sm:$0xff]  ;;  %v1486_v53 = vld [vmem:[%s1815_s13 + $0xc4] ss:$8 sps:$4 sm:$0xff]   ;;  %p1351_p13 = scmp.ne.s32.totalorder %s1552_s17, 8 }
  0x5d   : > { %v1284_v48 = vcombine.high %v600_v47, %v600_v47  ;;  %v1286_v52 = vcombine.high %v601_v49, %v601_v49  ;;  %v1488_v54 = vld [vmem:[%s1815_s13 + $0x1c4] ss:$8 sps:$4 sm:$0xff]   ;;  %v1490_v55 = vld [vmem:[%s1815_s13 + $0xc0] ss:$8 sps:$4 sm:$0xff]   ;;  %v1492_v57 = vld [vmem:[%s1815_s13 + $0xd4] ss:$8 sps:$4 sm:$0xff]   ;;  %v1283_v5 = vcombine.low %v600_v47, %v600_v47  ;;  %v1285_v6 = vcombine.low %v601_v49, %v601_v49 }
  0x5e   : > { %1009 = vmatpush1.bf16.msra.mxu0 %v1442_v19  ;;  %v1491_v56 = vld [vmem:[%s1815_s13 + $0x1c0] ss:$8 sps:$4 sm:$0xff]   ;;  %v1494_v58 = vld [vmem:[%s1815_s13 + $0x1d4] ss:$8 sps:$4 sm:$0xff]   ;;  %v1496_v59 = vld [vmem:[%s1815_s13 + $0xd0] ss:$8 sps:$4 sm:$0xff]  }
  0x5f   : > { %1050 = vmatpush1.bf16.msra.mxu1 %v1443_v20  ;;  %1010 = vmatprep.subr.bf16.mxu0 %v1444_v21  ;;  %v1497_v60 = vld [vmem:[%s1815_s13 + $0x1d0] ss:$8 sps:$4 sm:$0xff]   ;;  %v1498_v61 = vld [vmem:[%s1815_s13 + $0xe4] ss:$8 sps:$4 sm:$0xff]   ;;  %v1502_v63 = vld [vmem:[%s1815_s13 + $0xe0] ss:$8 sps:$4 sm:$0xff]   ;;  %v1094_v21 = vlaneseq (!%p1351_p13) }
  0x60   : > { %1051 = vmatprep.subr.bf16.mxu1 %v1446_v22  ;;  %1032 = vmatprep.mubr.bf16.mxu0 %v1284_v48  ;;  %v1500_v62 = vld [vmem:[%s1815_s13 + $0x1e4] ss:$8 sps:$4 sm:$0xff]   ;;  %v1503_v0 = vld [vmem:[%s1815_s13 + $0x1e0] ss:$8 sps:$4 sm:$0xff]   ;;  %v1504_v1 = vld [vmem:[%s1815_s13 + $0xf4] ss:$8 sps:$4 sm:$0xff]  }
  0x61   : > { %1073 = vmatprep.mubr.bf16.mxu1 %v1286_v52  ;;  %v1506_v2 = vld [vmem:[%s1815_s13 + $0x1f4] ss:$8 sps:$4 sm:$0xff]   ;;  %v1508_v3 = vld [vmem:[%s1815_s13 + $0xf0] ss:$8 sps:$4 sm:$0xff]   ;;  %v1095_v22 = vshrl.u32 (!%p1351_p13), %v1094_v21, 7 }
  0x62   : > { %1011 = vmatpush1.bf16.msra.mxu0 %v1448_v23  ;;  %v1509_v4 = vld [vmem:[%s1815_s13 + $0x1f0] ss:$8 sps:$4 sm:$0xff]  }
  0x63   : > { %1052 = vmatpush1.bf16.msra.mxu1 %v1449_v24  ;;  %1012 = vmatprep.subr.bf16.mxu0 %v1450_v25  ;;  %v598_v8 = vld [vmem:[#allocation2] sm:$0xff]  ;;  %v599_v12 = vld [vmem:[#allocation2 + $0x8] sm:$0xff]  ;;  %v1096_v25 = vsub.s32 (!%p1351_p13), 0, %v1095_v22 }
  0x64   : > { %1053 = vmatprep.subr.bf16.mxu1 %v1452_v26  ;;  %v1092_v23 = vld [vmem:[%s575_s15] sm:$0x3] (!%p1351_p13)  ;;  %v1100_v26 = vsub.s32 (!%p1351_p13), 1, %v1095_v22 }
  0x65   : > { %v1106_v24 = vld [vmem:[%s580_s18] sm:$0x3] (!%p1351_p13) }
  0x66   : > { %1013 = vmatpush1.bf16.msra.mxu0 %v1454_v27 }
  0x67   : > { %1054 = vmatpush1.bf16.msra.mxu1 %v1455_v28  ;;  %1014 = vmatprep.subr.bf16.mxu0 %v1456_v29  ;;  %v1097_v29 = vrot.slane (!%p1351_p13), %v1092_v23, %v1096_v25 }
  0x68   : > { %1055 = vmatprep.subr.bf16.mxu1 %v1458_v30  ;;  %v1101_v30 = vrot.slane (!%p1351_p13), %v1092_v23, %v1100_v26 }
  0x6a   : > { %1015 = vmatpush1.bf16.msra.mxu0 %v1460_v31  ;;  %v1111_v31 = vrot.slane (!%p1351_p13), %v1106_v24, %v1096_v25 }
  0x6b   : > { %1056 = vmatpush1.bf16.msra.mxu1 %v1461_v32  ;;  %1016 = vmatprep.subr.bf16.mxu0 %v1462_v33  ;;  %v1115_v32 = vrot.slane (!%p1351_p13), %v1106_v24, %v1100_v26 }
  0x6c   : > { %1057 = vmatprep.subr.bf16.mxu1 %v1464_v34 }
  0x6e   : > { %1017 = vmatpush1.bf16.msra.mxu0 %v1466_v35 }
  0x6f   : > { %1058 = vmatpush1.bf16.msra.mxu1 %v1467_v36  ;;  %1018 = vmatprep.subr.bf16.mxu0 %v1468_v37 }
  0x70   : > { %1059 = vmatprep.subr.bf16.mxu1 %v1470_v38 }
  0x72   : > { %1019 = vmatpush1.bf16.msra.mxu0 %v1472_v39 }
  0x73   : > { %1060 = vmatpush1.bf16.msra.mxu1 %v1473_v40  ;;  %1020 = vmatprep.subr.bf16.mxu0 %v1474_v41 }
  0x74   : > { %1061 = vmatprep.subr.bf16.mxu1 %v1476_v42 }
  0x76   : > { %1021 = vmatpush1.bf16.msra.mxu0 %v1478_v43 }
  0x77   : > { %1062 = vmatpush1.bf16.msra.mxu1 %v1479_v44  ;;  %1022 = vmatprep.subr.bf16.mxu0 %v1480_v45 }
  0x78   : > { %1063 = vmatprep.subr.bf16.mxu1 %v1482_v46 }
  0x7a   : > { %1023 = vmatpush1.bf16.msra.mxu0 %v1484_v50 }
  0x7b   : > { %1064 = vmatpush1.bf16.msra.mxu1 %v1485_v51  ;;  %1024 = vmatprep.subr.bf16.mxu0 %v1486_v53 }
  0x7c   : > { %1065 = vmatprep.subr.bf16.mxu1 %v1488_v54 }
  0x7e   : > { %1025 = vmatpush1.bf16.msra.mxu0 %v1490_v55 }
  0x7f   : > { %1066 = vmatpush1.bf16.msra.mxu1 %v1491_v56  ;;  %1026 = vmatprep.subr.bf16.mxu0 %v1492_v57 }
  0x80   : > { %1067 = vmatprep.subr.bf16.mxu1 %v1494_v58 }
  0x82   : > { %1027 = vmatpush1.bf16.msra.mxu0 %v1496_v59 }
  0x83   : > { %1068 = vmatpush1.bf16.msra.mxu1 %v1497_v60  ;;  %1028 = vmatprep.subr.bf16.mxu0 %v1498_v61 }
  0x84   : > { %1069 = vmatprep.subr.bf16.mxu1 %v1500_v62 }
  0x86   : > { %1029 = vmatpush1.bf16.msra.mxu0 %v1502_v63 }
  0x87   : > { %1070 = vmatpush1.bf16.msra.mxu1 %v1503_v0  ;;  %1030 = vmatprep.subr.bf16.mxu0 %v1504_v1 }
  0x88   : > { %1071 = vmatprep.subr.bf16.mxu1 %v1506_v2 }
  0x8a   : > { %1031 = vmatpush1.bf16.msra.mxu0 %v1508_v3 }
  0x8b   : > { %1072 = vmatpush1.bf16.msra.mxu1 %v1509_v4 }
  0x8d   : > { %1033 = vmatmul.mubr.bf16.vlgmr.msra.gmra.mrb[0].mxu0 %v1283_v5 }
  0x8e   : > { %1074 = vmatmul.mubr.bf16.vlgmr.msra.gmra.mrb[0].mxu1 %v1285_v6 }
 0x160   : > { %v1034_v7 = vpop.f32.mrb[0].mxu0 }
 0x161   : > { %v1075_v9 = vpop.f32.mrb[0].mxu1  ;;  %v1036_v11 = vpop.f32.mrb[1].mxu0  ;;  %1089 = sbr.rel (%p1351_p13) target bundleno = 376 (0x178), region = 82 }
 0x162   : > { %v1076_v10 = vadd.f32 %v1075_v9, %v1034_v7  ;;  %v1077_v13 = vpop.f32.mrb[1].mxu1  ;;  %v1038_v15 = vpop.f32.mrb[2].mxu0 }
 0x163   : > { %v1078_v14 = vadd.f32 %v1077_v13, %v1036_v11  ;;  %v1079_v16 = vpop.f32.mrb[2].mxu1  ;;  %v1039_v18 = vpop.f32.mrb[3].mxu0 }
 0x164   : > { %v1082_v17 = vadd.f32 %v1076_v10, %v598_v8  ;;  %v1080_v19 = vpop.f32.mrb[3].mxu1 }
 0x165   : > { %v1083_v20 = vadd.f32 %v1078_v14, %v599_v12 }
 0x166   : > { %1084 = vst [vmem:[#allocation2] sm:$0xff] %v1082_v17 }
 0x167   : > { %1085 = vst [vmem:[#allocation2 + $0x8] sm:$0xff] %v1083_v20 }
 0x16d   : > { %v1090_v27 = vld [vmem:[#allocation2] sm:$0xff] }
 0x16e   : > { %v1091_v28 = vld [vmem:[#allocation2 + $0x8] sm:$0xff]  ;;  %v1104_v33 = vmul.f32 %v1097_v29, %v1090_v27 }
 0x16f   : > { %v1105_v34 = vmul.f32 %v1101_v30, %v1091_v28 }
 0x170   : > { %v1118_v35 = vadd.f32 %v1111_v31, %v1104_v33 }
 0x171   : > { %v1119_v36 = vadd.f32 %v1115_v32, %v1105_v34 }
 0x172   : > { %v1120_v37 = vmax.f32 %v1118_v35, 0.0 }
 0x173   : > { %v1121_v38 = vmax.f32 %v1119_v36, 0.0 }
 0x175   : > { %v1356_v39 = vpack.c.bf16 %v1121_v38, %v1120_v37 }
 0x177   : > { %1130 = vst [vmem:[%s1813_s12] sm:$0xff] %v1356_v39 }
 0x178 PF: > { %s14_s21 = sadd.s32 1, %s1568_s21   ;;  %s1922_s15 = smov %s1548_s16 }
 0x179   : > { %p11_p0 = scmp.ge.s32.totalorder %s14_s21, 20   ;;  %s1923_s16 = smov %s1647_s28 }
 0x17a   : > { %s1924_s17 = smov %s1560_s19  ;;  %s1925_s18 = smov %s1564_s20 }
 0x17b   : > { %s1926_s19 = smov %s1929_s22  ;;  %s1927_s20 = smov %s1933_s23 }
 0x17c   :  { %13 = sbr.rel (!%p11_p0) target bundleno = 4 (0x4), region = 126 }

// kernel: forward.70
= control target key start
LH: loop header
LB: loop body
LE: loop exit
PB: predicated region body
PF: predicated region fallthrough
CT: control target
= control target key end

     0   :  { %s2016_s0 = inlined_call_operand.vmem [shape: bf16[9,8,512], index: 0, kind: input, shape index: {}]   ;;  %s2017_s1 = inlined_call_operand.vmem [shape: bf16[9,512,512], index: 1, kind: input, shape index: {}]   ;;  %s2018_s2 = inlined_call_operand.vmem [shape: f32[1,512], index: 2, kind: input, shape index: {}]   ;;  %s2019_s3 = inlined_call_operand.vmem [shape: f32[1,512], index: 3, kind: input, shape index: {}]   ;;  %s2020_s4 = inlined_call_operand.vmem [shape: bf16[8,512], index: 4, kind: input, shape index: {}]   ;;  %s2021_s5 = inlined_call_operand.vmem [shape: bf16[8,512], index: 5, kind: output, shape index: {}]  }
   0x1   :  { %2022 = sst [smem:[#allocation4_spill]] %s2017_s1 }
   0x2   :  { %s1689_s18 = smov 0   ;;  %s1691_s19 = smov 0  }
   0x3   :  { %s1693_s20 = smov 0   ;;  %s1695_s21 = smov 0  }
   0x4   :  { %s1697_s22 = smov 0   ;;  %s1699_s23 = smov 0  }
   0x5   :  { %s1701_s24 = smov 0  }
   0x6 LB: > { %s27_s25 = sadd.s32 1, %s1648_s22  ;;  %s30_s26 = sadd.s32 1, %s1652_s23  ;;  %s1656_s24 = sphi %s1701_s24, %s15_s24   ;;  %s1652_s23 = sphi %s1699_s23, %s2029_s23   ;;  %s1648_s22 = sphi %s1697_s22, %s2028_s22   ;;  %s1644_s21 = sphi %s1695_s21, %s2027_s21   ;;  %s1640_s20 = sphi %s1693_s20, %s2026_s20   ;;  %s1636_s19 = sphi %s1691_s19, %s2025_s19   ;;  %s1632_s18 = sphi %s1689_s18, %s2024_s18  }
   0x7   : > { %p28_p0 = scmp.ge.s32.totalorder %s27_s25, 9  ;;  %p78_p1 = scmp.ne.s32.totalorder %s1636_s19, %s1632_s18 }
   0x8   : > { %p79_p2 = scmp.eq.s32.totalorder %s1656_s24, 0  ;;  %s71_s30 = sadd.s32 1, %s1636_s19 }
   0x9   : > { %s2031_s25 = smov (%p28_p0, %s27_s25), 0  ;;  %s2033_s26 = smov (!%p28_p0, %s30_s26), %s1652_s23 }
   0xa   : > { %p80_p3 = por %p79_p2, %p78_p1  ;;  %p32_p4 = scmp.ge.s32.totalorder %s2033_s26, 2 }
   0xb   : > { %s66_s27 = ssub.s32 %s1648_s22, %s2031_s25  ;;  %p1355_p6 = scmp.ge.s32.totalorder %s1656_s24, 18 }
   0xc   : > { %s2035_s26 = smov (%p32_p4, %s2033_s26), 0 }
   0xd   : > { %s67_s28 = ssub.s32 %s1652_s23, %s2035_s26  ;;  %212 = sbr.rel (%p1355_p6) target bundleno = 62 (0x3e), region = 16 }
   0xe   : > { %s68_s29 = sor.u32 %s67_s28, %s66_s27 }
   0xf   : > { %p69_p5 = scmp.eq.s32.totalorder %s68_s29, 0 }
  0x11   : > { %s1740_s6 = scalar_select %p69_p5, %s1636_s19, %s71_s30  }
  0x14   : > { %227 = sbr.rel (!%p80_p3) target bundleno = 62 (0x3e), region = 24  ;;  %s229_s7 = sand.u32 (%p80_p3), 1, %s1636_s19  }
  0x15   : > { %s1357_s8 = sshll.u32 (%p80_p3), %s1652_s23, 1  ;;  %s1356_s9 = sshll.u32 (%p80_p3), %s229_s7, 9 }
  0x16   : > { %s1358_s10 = sshll.u32 (%p80_p3), %s1648_s22, 8  ;;  %s2023_s1 = sld [smem:[#allocation4_spill]] (%p80_p3) }
  0x17   : > { %s234_s11 = sadd.s32 (%p80_p3), %s1358_s10, %s1357_s8  ;;  %s1754_s16 = scalar_lea.vmem (%p80_p3), [#allocation3], %s1356_s9 }
  0x18   : > { %s1359_s12 = sshll.u32 (%p80_p3), %s234_s11, 2 }
  0x1c   : > { %s1749_s15 = scalar_lea.vmem %s2023_s1, %s1359_s12 }
  0x1d   : > { %v390_v0 = vld [vmem:[%s1749_s15] sm:$0xff]  ;;  %v392_v1 = vld [vmem:[%s1749_s15 + $0x10] sm:$0xff] }
  0x1e   : > { %v394_v2 = vld [vmem:[%s1749_s15 + $0x20] sm:$0xff]  ;;  %391 = vst [vmem:[%s1754_s16] sm:$0xff] %v390_v0  ;;  %393 = vst [vmem:[%s1754_s16 + $0x8] sm:$0xff] %v392_v1  ;;  %v396_v3 = vld [vmem:[%s1749_s15 + $0x30] sm:$0xff] }
  0x1f   : > { %395 = vst [vmem:[%s1754_s16 + $0x10] sm:$0xff] %v394_v2  ;;  %v398_v4 = vld [vmem:[%s1749_s15 + $0x40] sm:$0xff]  ;;  %v400_v5 = vld [vmem:[%s1749_s15 + $0x50] sm:$0xff]  ;;  %397 = vst [vmem:[%s1754_s16 + $0x18] sm:$0xff] %v396_v3 }
  0x20   : > { %399 = vst [vmem:[%s1754_s16 + $0x20] sm:$0xff] %v398_v4  ;;  %401 = vst [vmem:[%s1754_s16 + $0x28] sm:$0xff] %v400_v5  ;;  %v402_v6 = vld [vmem:[%s1749_s15 + $0x60] sm:$0xff]  ;;  %v404_v7 = vld [vmem:[%s1749_s15 + $0x70] sm:$0xff] }
  0x21   : > { %v406_v8 = vld [vmem:[%s1749_s15 + $0x80] sm:$0xff]  ;;  %403 = vst [vmem:[%s1754_s16 + $0x30] sm:$0xff] %v402_v6  ;;  %405 = vst [vmem:[%s1754_s16 + $0x38] sm:$0xff] %v404_v7  ;;  %v408_v9 = vld [vmem:[%s1749_s15 + $0x90] sm:$0xff] }
  0x22   : > { %407 = vst [vmem:[%s1754_s16 + $0x40] sm:$0xff] %v406_v8  ;;  %v410_v10 = vld [vmem:[%s1749_s15 + $0xa0] sm:$0xff]  ;;  %v412_v11 = vld [vmem:[%s1749_s15 + $0xb0] sm:$0xff]  ;;  %409 = vst [vmem:[%s1754_s16 + $0x48] sm:$0xff] %v408_v9 }
  0x23   : > { %411 = vst [vmem:[%s1754_s16 + $0x50] sm:$0xff] %v410_v10  ;;  %413 = vst [vmem:[%s1754_s16 + $0x58] sm:$0xff] %v412_v11  ;;  %v414_v12 = vld [vmem:[%s1749_s15 + $0xc0] sm:$0xff]  ;;  %v416_v13 = vld [vmem:[%s1749_s15 + $0xd0] sm:$0xff] }
  0x24   : > { %v418_v14 = vld [vmem:[%s1749_s15 + $0xe0] sm:$0xff]  ;;  %415 = vst [vmem:[%s1754_s16 + $0x60] sm:$0xff] %v414_v12  ;;  %417 = vst [vmem:[%s1754_s16 + $0x68] sm:$0xff] %v416_v13  ;;  %v420_v15 = vld [vmem:[%s1749_s15 + $0xf0] sm:$0xff] }
  0x25   : > { %419 = vst [vmem:[%s1754_s16 + $0x70] sm:$0xff] %v418_v14  ;;  %v422_v16 = vld [vmem:[%s1749_s15 + $0x100] sm:$0xff]  ;;  %v424_v17 = vld [vmem:[%s1749_s15 + $0x110] sm:$0xff]  ;;  %421 = vst [vmem:[%s1754_s16 + $0x78] sm:$0xff] %v420_v15 }
  0x26   : > { %423 = vst [vmem:[%s1754_s16 + $0x80] sm:$0xff] %v422_v16  ;;  %425 = vst [vmem:[%s1754_s16 + $0x88] sm:$0xff] %v424_v17  ;;  %v426_v18 = vld [vmem:[%s1749_s15 + $0x120] sm:$0xff]  ;;  %v428_v19 = vld [vmem:[%s1749_s15 + $0x130] sm:$0xff] }
  0x27   : > { %v430_v20 = vld [vmem:[%s1749_s15 + $0x140] sm:$0xff]  ;;  %427 = vst [vmem:[%s1754_s16 + $0x90] sm:$0xff] %v426_v18  ;;  %429 = vst [vmem:[%s1754_s16 + $0x98] sm:$0xff] %v428_v19  ;;  %v432_v21 = vld [vmem:[%s1749_s15 + $0x150] sm:$0xff] }
  0x28   : > { %431 = vst [vmem:[%s1754_s16 + $0xa0] sm:$0xff] %v430_v20  ;;  %v434_v22 = vld [vmem:[%s1749_s15 + $0x160] sm:$0xff]  ;;  %v436_v23 = vld [vmem:[%s1749_s15 + $0x170] sm:$0xff]  ;;  %433 = vst [vmem:[%s1754_s16 + $0xa8] sm:$0xff] %v432_v21 }
  0x29   : > { %435 = vst [vmem:[%s1754_s16 + $0xb0] sm:$0xff] %v434_v22  ;;  %437 = vst [vmem:[%s1754_s16 + $0xb8] sm:$0xff] %v436_v23  ;;  %v438_v24 = vld [vmem:[%s1749_s15 + $0x180] sm:$0xff]  ;;  %v440_v25 = vld [vmem:[%s1749_s15 + $0x190] sm:$0xff] }
  0x2a   : > { %v442_v26 = vld [vmem:[%s1749_s15 + $0x1a0] sm:$0xff]  ;;  %439 = vst [vmem:[%s1754_s16 + $0xc0] sm:$0xff] %v438_v24  ;;  %441 = vst [vmem:[%s1754_s16 + $0xc8] sm:$0xff] %v440_v25  ;;  %v444_v27 = vld [vmem:[%s1749_s15 + $0x1b0] sm:$0xff] }
  0x2b   : > { %443 = vst [vmem:[%s1754_s16 + $0xd0] sm:$0xff] %v442_v26  ;;  %v446_v28 = vld [vmem:[%s1749_s15 + $0x1c0] sm:$0xff]  ;;  %v448_v29 = vld [vmem:[%s1749_s15 + $0x1d0] sm:$0xff]  ;;  %445 = vst [vmem:[%s1754_s16 + $0xd8] sm:$0xff] %v444_v27 }
  0x2c   : > { %447 = vst [vmem:[%s1754_s16 + $0xe0] sm:$0xff] %v446_v28  ;;  %449 = vst [vmem:[%s1754_s16 + $0xe8] sm:$0xff] %v448_v29  ;;  %v450_v30 = vld [vmem:[%s1749_s15 + $0x1e0] sm:$0xff]  ;;  %v452_v31 = vld [vmem:[%s1749_s15 + $0x1f0] sm:$0xff] }
  0x2d   : > { %v454_v32 = vld [vmem:[%s1749_s15 + $0x200] sm:$0xff]  ;;  %451 = vst [vmem:[%s1754_s16 + $0xf0] sm:$0xff] %v450_v30  ;;  %453 = vst [vmem:[%s1754_s16 + $0xf8] sm:$0xff] %v452_v31  ;;  %v456_v33 = vld [vmem:[%s1749_s15 + $0x210] sm:$0xff] }
  0x2e   : > { %455 = vst [vmem:[%s1754_s16 + $0x100] sm:$0xff] %v454_v32  ;;  %v458_v34 = vld [vmem:[%s1749_s15 + $0x220] sm:$0xff]  ;;  %v460_v35 = vld [vmem:[%s1749_s15 + $0x230] sm:$0xff]  ;;  %457 = vst [vmem:[%s1754_s16 + $0x108] sm:$0xff] %v456_v33 }
  0x2f   : > { %459 = vst [vmem:[%s1754_s16 + $0x110] sm:$0xff] %v458_v34  ;;  %461 = vst [vmem:[%s1754_s16 + $0x118] sm:$0xff] %v460_v35  ;;  %v462_v36 = vld [vmem:[%s1749_s15 + $0x240] sm:$0xff]  ;;  %v464_v37 = vld [vmem:[%s1749_s15 + $0x250] sm:$0xff] }
  0x30   : > { %v466_v38 = vld [vmem:[%s1749_s15 + $0x260] sm:$0xff]  ;;  %463 = vst [vmem:[%s1754_s16 + $0x120] sm:$0xff] %v462_v36  ;;  %465 = vst [vmem:[%s1754_s16 + $0x128] sm:$0xff] %v464_v37  ;;  %v468_v39 = vld [vmem:[%s1749_s15 + $0x270] sm:$0xff] }
  0x31   : > { %467 = vst [vmem:[%s1754_s16 + $0x130] sm:$0xff] %v466_v38  ;;  %v470_v40 = vld [vmem:[%s1749_s15 + $0x280] sm:$0xff]  ;;  %v472_v41 = vld [vmem:[%s1749_s15 + $0x290] sm:$0xff]  ;;  %469 = vst [vmem:[%s1754_s16 + $0x138] sm:$0xff] %v468_v39 }
  0x32   : > { %471 = vst [vmem:[%s1754_s16 + $0x140] sm:$0xff] %v470_v40  ;;  %473 = vst [vmem:[%s1754_s16 + $0x148] sm:$0xff] %v472_v41  ;;  %v474_v42 = vld [vmem:[%s1749_s15 + $0x2a0] sm:$0xff]  ;;  %v476_v43 = vld [vmem:[%s1749_s15 + $0x2b0] sm:$0xff] }
  0x33   : > { %v478_v44 = vld [vmem:[%s1749_s15 + $0x2c0] sm:$0xff]  ;;  %475 = vst [vmem:[%s1754_s16 + $0x150] sm:$0xff] %v474_v42  ;;  %477 = vst [vmem:[%s1754_s16 + $0x158] sm:$0xff] %v476_v43  ;;  %v480_v45 = vld [vmem:[%s1749_s15 + $0x2d0] sm:$0xff] }
  0x34   : > { %479 = vst [vmem:[%s1754_s16 + $0x160] sm:$0xff] %v478_v44  ;;  %v482_v46 = vld [vmem:[%s1749_s15 + $0x2e0] sm:$0xff]  ;;  %v484_v47 = vld [vmem:[%s1749_s15 + $0x2f0] sm:$0xff]  ;;  %481 = vst [vmem:[%s1754_s16 + $0x168] sm:$0xff] %v480_v45 }
  0x35   : > { %483 = vst [vmem:[%s1754_s16 + $0x170] sm:$0xff] %v482_v46  ;;  %485 = vst [vmem:[%s1754_s16 + $0x178] sm:$0xff] %v484_v47  ;;  %v486_v48 = vld [vmem:[%s1749_s15 + $0x300] sm:$0xff]  ;;  %v488_v49 = vld [vmem:[%s1749_s15 + $0x310] sm:$0xff] }
  0x36   : > { %v490_v50 = vld [vmem:[%s1749_s15 + $0x320] sm:$0xff]  ;;  %487 = vst [vmem:[%s1754_s16 + $0x180] sm:$0xff] %v486_v48  ;;  %489 = vst [vmem:[%s1754_s16 + $0x188] sm:$0xff] %v488_v49  ;;  %v492_v51 = vld [vmem:[%s1749_s15 + $0x330] sm:$0xff] }
  0x37   : > { %491 = vst [vmem:[%s1754_s16 + $0x190] sm:$0xff] %v490_v50  ;;  %v494_v52 = vld [vmem:[%s1749_s15 + $0x340] sm:$0xff]  ;;  %v496_v53 = vld [vmem:[%s1749_s15 + $0x350] sm:$0xff]  ;;  %493 = vst [vmem:[%s1754_s16 + $0x198] sm:$0xff] %v492_v51 }
  0x38   : > { %495 = vst [vmem:[%s1754_s16 + $0x1a0] sm:$0xff] %v494_v52  ;;  %497 = vst [vmem:[%s1754_s16 + $0x1a8] sm:$0xff] %v496_v53  ;;  %v498_v54 = vld [vmem:[%s1749_s15 + $0x360] sm:$0xff]  ;;  %v500_v55 = vld [vmem:[%s1749_s15 + $0x370] sm:$0xff] }
  0x39   : > { %v502_v56 = vld [vmem:[%s1749_s15 + $0x380] sm:$0xff]  ;;  %499 = vst [vmem:[%s1754_s16 + $0x1b0] sm:$0xff] %v498_v54  ;;  %501 = vst [vmem:[%s1754_s16 + $0x1b8] sm:$0xff] %v500_v55  ;;  %v504_v57 = vld [vmem:[%s1749_s15 + $0x390] sm:$0xff] }
  0x3a   : > { %503 = vst [vmem:[%s1754_s16 + $0x1c0] sm:$0xff] %v502_v56  ;;  %v506_v58 = vld [vmem:[%s1749_s15 + $0x3a0] sm:$0xff]  ;;  %v508_v59 = vld [vmem:[%s1749_s15 + $0x3b0] sm:$0xff]  ;;  %505 = vst [vmem:[%s1754_s16 + $0x1c8] sm:$0xff] %v504_v57 }
  0x3b   : > { %507 = vst [vmem:[%s1754_s16 + $0x1d0] sm:$0xff] %v506_v58  ;;  %509 = vst [vmem:[%s1754_s16 + $0x1d8] sm:$0xff] %v508_v59  ;;  %v510_v60 = vld [vmem:[%s1749_s15 + $0x3c0] sm:$0xff]  ;;  %v512_v61 = vld [vmem:[%s1749_s15 + $0x3d0] sm:$0xff] }
  0x3c   : > { %v514_v62 = vld [vmem:[%s1749_s15 + $0x3e0] sm:$0xff]  ;;  %511 = vst [vmem:[%s1754_s16 + $0x1e0] sm:$0xff] %v510_v60  ;;  %513 = vst [vmem:[%s1754_s16 + $0x1e8] sm:$0xff] %v512_v61  ;;  %v516_v63 = vld [vmem:[%s1749_s15 + $0x3f0] sm:$0xff] }
  0x3d   : > { %515 = vst [vmem:[%s1754_s16 + $0x1f0] sm:$0xff] %v514_v62  ;;  %517 = vst [vmem:[%s1754_s16 + $0x1f8] sm:$0xff] %v516_v63 }
  0x3e PF: > { %p1360_p7 = scmp.ge.s32.totalorder %s1656_s24, 1  ;;  %p551_p8 = scmp.lt.s32.totalorder %s1656_s24, 19 }
  0x40   : > { %p552_p9 = pnand %p1360_p7, %p551_p8 }
  0x41   : > { %s558_s17 = sand.u32 (!%p552_p9), 1, %s1632_s18   ;;  %p615_p10 = scmp.lt.s32.totalorder (!%p552_p9), %s1640_s20, 8 }
  0x42   : > { %555 = sbr.rel (%p552_p9) target bundleno = 383 (0x17f), region = 74  ;;  %s1361_s27 = sshll.u32 (!%p552_p9), %s558_s17, 9 }
  0x43   : > { %s1364_s28 = sshll.u32 (!%p552_p9), %s1644_s21, 1  ;;  %p1370_p12 = scmp.ne.s32.totalorder (!%p552_p9), %s1640_s20, 0 }
  0x44   : > { %p626_p11 = scmp.lt.s32.totalorder (!%p552_p9), %s1364_s28, 3 }
  0x49   : > { %s616_s29 = scalar_select %p615_p10, %s1640_s20, 8 }
  0x4a   : > { %s2037_s28 = smov (!%p626_p11, %s1364_s28), 3  ;;  %658 = sbr.rel (%p1370_p12) target bundleno = 81 (0x51), region = 82 }
  0x4b   : > { %s1443_s30 = sshll.u32 %s616_s29, 4  ;;  %s628_s18 = scalar_lea.vmem %s2018_s2, %s2037_s28  ;;  %v1658_v0 = vmov (!%p1370_p12), 0.0  }
  0x4c   : > { %s1892_s9 = scalar_lea.vmem %s2016_s0, %s1443_s30  ;;  %s633_s21 = scalar_lea.vmem %s2019_s3, %s2037_s28  ;;  %659 = vst [vmem:[#allocation2] sm:$0xff] (!%p1370_p12), %v1658_v0  ;;  %660 = vst [vmem:[#allocation2 + $0x8] sm:$0xff] (!%p1370_p12), %v1658_v0 }
  0x4d   : > { %s1367_s14 = sshll.u32 %s2037_s28, 2  ;;  %s1913_s30 = scalar_lea.vmem [#allocation3], %s1361_s27 }
  0x4e   : > { %s1906_s17 = scalar_lea.vmem %s2020_s4, %s1367_s14  ;;  %s1911_s7 = scalar_lea.vmem %s2021_s5, %s1367_s14 }
  0x51 PF: > { %v1502_v1 = vld [vmem:[%s1913_s30 + $0x4] ss:$8 sps:$4 sm:$0xff]   ;;  %v1506_v3 = vld [vmem:[%s1913_s30] ss:$8 sps:$4 sm:$0xff]   ;;  %v1508_v5 = vld [vmem:[%s1913_s30 + $0x14] ss:$8 sps:$4 sm:$0xff]  }
  0x52   : > { %v1504_v2 = vld [vmem:[%s1913_s30 + $0x104] ss:$8 sps:$4 sm:$0xff]   ;;  %1063 = vmatprep.subr.bf16.mxu0 %v1502_v1  ;;  %v1507_v4 = vld [vmem:[%s1913_s30 + $0x100] ss:$8 sps:$4 sm:$0xff]   ;;  %v1510_v6 = vld [vmem:[%s1913_s30 + $0x114] ss:$8 sps:$4 sm:$0xff]  }
  0x53   : > { %1104 = vmatprep.subr.bf16.mxu1 %v1504_v2  ;;  %1064 = vmatpush1.bf16.msra.mxu0 %v1506_v3  ;;  %v1512_v7 = vld [vmem:[%s1913_s30 + $0x10] ss:$8 sps:$4 sm:$0xff]   ;;  %v1514_v9 = vld [vmem:[%s1913_s30 + $0x24] ss:$8 sps:$4 sm:$0xff]   ;;  %v1518_v11 = vld [vmem:[%s1913_s30 + $0x20] ss:$8 sps:$4 sm:$0xff]  }
  0x54   : > { %1105 = vmatpush1.bf16.msra.mxu1 %v1507_v4  ;;  %1065 = vmatprep.subr.bf16.mxu0 %v1508_v5  ;;  %v1513_v8 = vld [vmem:[%s1913_s30 + $0x110] ss:$8 sps:$4 sm:$0xff]   ;;  %v1516_v10 = vld [vmem:[%s1913_s30 + $0x124] ss:$8 sps:$4 sm:$0xff]   ;;  %v1519_v12 = vld [vmem:[%s1913_s30 + $0x120] ss:$8 sps:$4 sm:$0xff]  }
  0x55   : > { %1106 = vmatprep.subr.bf16.mxu1 %v1510_v6  ;;  %v1520_v13 = vld [vmem:[%s1913_s30 + $0x34] ss:$8 sps:$4 sm:$0xff]   ;;  %v1524_v15 = vld [vmem:[%s1913_s30 + $0x30] ss:$8 sps:$4 sm:$0xff]   ;;  %v1526_v17 = vld [vmem:[%s1913_s30 + $0x44] ss:$8 sps:$4 sm:$0xff]  }
  0x56   : > { %v1522_v14 = vld [vmem:[%s1913_s30 + $0x134] ss:$8 sps:$4 sm:$0xff]   ;;  %v1525_v16 = vld [vmem:[%s1913_s30 + $0x130] ss:$8 sps:$4 sm:$0xff]   ;;  %v1528_v18 = vld [vmem:[%s1913_s30 + $0x144] ss:$8 sps:$4 sm:$0xff]  }
  0x57   : > { %1066 = vmatpush1.bf16.msra.mxu0 %v1512_v7  ;;  %v1530_v19 = vld [vmem:[%s1913_s30 + $0x40] ss:$8 sps:$4 sm:$0xff]   ;;  %v1532_v21 = vld [vmem:[%s1913_s30 + $0x54] ss:$8 sps:$4 sm:$0xff]   ;;  %v1536_v23 = vld [vmem:[%s1913_s30 + $0x50] ss:$8 sps:$4 sm:$0xff]  }
  0x58   : > { %1107 = vmatpush1.bf16.msra.mxu1 %v1513_v8  ;;  %1067 = vmatprep.subr.bf16.mxu0 %v1514_v9  ;;  %v1531_v20 = vld [vmem:[%s1913_s30 + $0x140] ss:$8 sps:$4 sm:$0xff]   ;;  %v1534_v22 = vld [vmem:[%s1913_s30 + $0x154] ss:$8 sps:$4 sm:$0xff]   ;;  %v1537_v24 = vld [vmem:[%s1913_s30 + $0x150] ss:$8 sps:$4 sm:$0xff]  }
  0x59   : > { %1108 = vmatprep.subr.bf16.mxu1 %v1516_v10  ;;  %v1538_v25 = vld [vmem:[%s1913_s30 + $0x64] ss:$8 sps:$4 sm:$0xff]   ;;  %v1542_v27 = vld [vmem:[%s1913_s30 + $0x60] ss:$8 sps:$4 sm:$0xff]   ;;  %v1544_v29 = vld [vmem:[%s1913_s30 + $0x74] ss:$8 sps:$4 sm:$0xff]  }
  0x5a   : > { %v1540_v26 = vld [vmem:[%s1913_s30 + $0x164] ss:$8 sps:$4 sm:$0xff]   ;;  %v1543_v28 = vld [vmem:[%s1913_s30 + $0x160] ss:$8 sps:$4 sm:$0xff]   ;;  %v1546_v30 = vld [vmem:[%s1913_s30 + $0x174] ss:$8 sps:$4 sm:$0xff]  }
  0x5b   : > { %1068 = vmatpush1.bf16.msra.mxu0 %v1518_v11  ;;  %v1548_v31 = vld [vmem:[%s1913_s30 + $0x70] ss:$8 sps:$4 sm:$0xff]   ;;  %v1550_v33 = vld [vmem:[%s1913_s30 + $0x84] ss:$8 sps:$4 sm:$0xff]   ;;  %v1554_v35 = vld [vmem:[%s1913_s30 + $0x80] ss:$8 sps:$4 sm:$0xff]  }
  0x5c   : > { %1109 = vmatpush1.bf16.msra.mxu1 %v1519_v12  ;;  %1069 = vmatprep.subr.bf16.mxu0 %v1520_v13  ;;  %v1549_v32 = vld [vmem:[%s1913_s30 + $0x170] ss:$8 sps:$4 sm:$0xff]   ;;  %v1552_v34 = vld [vmem:[%s1913_s30 + $0x184] ss:$8 sps:$4 sm:$0xff]   ;;  %v1555_v36 = vld [vmem:[%s1913_s30 + $0x180] ss:$8 sps:$4 sm:$0xff]  }
  0x5d   : > { %1110 = vmatprep.subr.bf16.mxu1 %v1522_v14  ;;  %v1556_v37 = vld [vmem:[%s1913_s30 + $0x94] ss:$8 sps:$4 sm:$0xff]   ;;  %v1560_v39 = vld [vmem:[%s1913_s30 + $0x90] ss:$8 sps:$4 sm:$0xff]   ;;  %v1562_v41 = vld [vmem:[%s1913_s30 + $0xa4] ss:$8 sps:$4 sm:$0xff]  }
  0x5e   : > { %v1558_v38 = vld [vmem:[%s1913_s30 + $0x194] ss:$8 sps:$4 sm:$0xff]   ;;  %v1561_v40 = vld [vmem:[%s1913_s30 + $0x190] ss:$8 sps:$4 sm:$0xff]   ;;  %v1564_v42 = vld [vmem:[%s1913_s30 + $0x1a4] ss:$8 sps:$4 sm:$0xff]  }
  0x5f   : > { %1070 = vmatpush1.bf16.msra.mxu0 %v1524_v15  ;;  %v1566_v43 = vld [vmem:[%s1913_s30 + $0xa0] ss:$8 sps:$4 sm:$0xff]   ;;  %v1568_v45 = vld [vmem:[%s1913_s30 + $0xb4] ss:$8 sps:$4 sm:$0xff]   ;;  %v1572_v50 = vld [vmem:[%s1913_s30 + $0xb0] ss:$8 sps:$4 sm:$0xff]  }
  0x60   : > { %1111 = vmatpush1.bf16.msra.mxu1 %v1525_v16  ;;  %1071 = vmatprep.subr.bf16.mxu0 %v1526_v17  ;;  %v1567_v44 = vld [vmem:[%s1913_s30 + $0x1a0] ss:$8 sps:$4 sm:$0xff]   ;;  %v1570_v46 = vld [vmem:[%s1913_s30 + $0x1b4] ss:$8 sps:$4 sm:$0xff]   ;;  %v1573_v51 = vld [vmem:[%s1913_s30 + $0x1b0] ss:$8 sps:$4 sm:$0xff]  }
  0x61   : > { %1112 = vmatprep.subr.bf16.mxu1 %v1528_v18  ;;  %v663_v47 = vld [vmem:[%s1892_s9] sm:$0xff]  ;;  %v664_v49 = vld [vmem:[%s1892_s9 + $0x8] sm:$0xff]  ;;  %v1574_v53 = vld [vmem:[%s1913_s30 + $0xc4] ss:$8 sps:$4 sm:$0xff]   ;;  %p1439_p13 = scmp.ne.s32.totalorder %s1640_s20, 8 }
  0x62   : > { %v1372_v48 = vcombine.high %v663_v47, %v663_v47  ;;  %v1374_v52 = vcombine.high %v664_v49, %v664_v49  ;;  %v1576_v54 = vld [vmem:[%s1913_s30 + $0x1c4] ss:$8 sps:$4 sm:$0xff]   ;;  %v1578_v55 = vld [vmem:[%s1913_s30 + $0xc0] ss:$8 sps:$4 sm:$0xff]   ;;  %v1580_v57 = vld [vmem:[%s1913_s30 + $0xd4] ss:$8 sps:$4 sm:$0xff]   ;;  %v1371_v5 = vcombine.low %v663_v47, %v663_v47  ;;  %v1373_v6 = vcombine.low %v664_v49, %v664_v49 }
  0x63   : > { %1072 = vmatpush1.bf16.msra.mxu0 %v1530_v19  ;;  %v1579_v56 = vld [vmem:[%s1913_s30 + $0x1c0] ss:$8 sps:$4 sm:$0xff]   ;;  %v1582_v58 = vld [vmem:[%s1913_s30 + $0x1d4] ss:$8 sps:$4 sm:$0xff]   ;;  %v1584_v59 = vld [vmem:[%s1913_s30 + $0xd0] ss:$8 sps:$4 sm:$0xff]  }
  0x64   : > { %1113 = vmatpush1.bf16.msra.mxu1 %v1531_v20  ;;  %1073 = vmatprep.subr.bf16.mxu0 %v1532_v21  ;;  %v1585_v60 = vld [vmem:[%s1913_s30 + $0x1d0] ss:$8 sps:$4 sm:$0xff]   ;;  %v1586_v61 = vld [vmem:[%s1913_s30 + $0xe4] ss:$8 sps:$4 sm:$0xff]   ;;  %v1590_v63 = vld [vmem:[%s1913_s30 + $0xe0] ss:$8 sps:$4 sm:$0xff]   ;;  %v1157_v21 = vlaneseq (!%p1439_p13) }
  0x65   : > { %1114 = vmatprep.subr.bf16.mxu1 %v1534_v22  ;;  %1095 = vmatprep.mubr.bf16.mxu0 %v1372_v48  ;;  %v1588_v62 = vld [vmem:[%s1913_s30 + $0x1e4] ss:$8 sps:$4 sm:$0xff]   ;;  %v1591_v0 = vld [vmem:[%s1913_s30 + $0x1e0] ss:$8 sps:$4 sm:$0xff]   ;;  %v1592_v1 = vld [vmem:[%s1913_s30 + $0xf4] ss:$8 sps:$4 sm:$0xff]  }
  0x66   : > { %1136 = vmatprep.mubr.bf16.mxu1 %v1374_v52  ;;  %v1594_v2 = vld [vmem:[%s1913_s30 + $0x1f4] ss:$8 sps:$4 sm:$0xff]   ;;  %v1596_v3 = vld [vmem:[%s1913_s30 + $0xf0] ss:$8 sps:$4 sm:$0xff]   ;;  %v1158_v22 = vshrl.u32 (!%p1439_p13), %v1157_v21, 7 }
  0x67   : > { %1074 = vmatpush1.bf16.msra.mxu0 %v1536_v23  ;;  %v1597_v4 = vld [vmem:[%s1913_s30 + $0x1f0] ss:$8 sps:$4 sm:$0xff]  }
  0x68   : > { %1115 = vmatpush1.bf16.msra.mxu1 %v1537_v24  ;;  %1075 = vmatprep.subr.bf16.mxu0 %v1538_v25  ;;  %v661_v8 = vld [vmem:[#allocation2] sm:$0xff]  ;;  %v662_v12 = vld [vmem:[#allocation2 + $0x8] sm:$0xff]  ;;  %v1159_v25 = vsub.s32 (!%p1439_p13), 0, %v1158_v22 }
  0x69   : > { %1116 = vmatprep.subr.bf16.mxu1 %v1540_v26  ;;  %v1155_v23 = vld [vmem:[%s628_s18] sm:$0x3] (!%p1439_p13)  ;;  %v1163_v26 = vsub.s32 (!%p1439_p13), 1, %v1158_v22 }
  0x6a   : > { %v1169_v24 = vld [vmem:[%s633_s21] sm:$0x3] (!%p1439_p13) }
  0x6b   : > { %1076 = vmatpush1.bf16.msra.mxu0 %v1542_v27 }
  0x6c   : > { %1117 = vmatpush1.bf16.msra.mxu1 %v1543_v28  ;;  %1077 = vmatprep.subr.bf16.mxu0 %v1544_v29  ;;  %v1183_v29 = vld [vmem:[%s1906_s17] sm:$0xff] (!%p1439_p13) }
  0x6d   : > { %1118 = vmatprep.subr.bf16.mxu1 %v1546_v30  ;;  %v1160_v30 = vrot.slane (!%p1439_p13), %v1155_v23, %v1159_v25 }
  0x6f   : > { %1078 = vmatpush1.bf16.msra.mxu0 %v1548_v31  ;;  %v1164_v31 = vrot.slane (!%p1439_p13), %v1155_v23, %v1163_v26 }
  0x70   : > { %1119 = vmatpush1.bf16.msra.mxu1 %v1549_v32  ;;  %1079 = vmatprep.subr.bf16.mxu0 %v1550_v33  ;;  %v1174_v32 = vrot.slane (!%p1439_p13), %v1169_v24, %v1159_v25  ;;  %v1178_v33 = vrot.slane (!%p1439_p13), %v1169_v24, %v1163_v26 }
  0x71   : > { %1120 = vmatprep.subr.bf16.mxu1 %v1552_v34 }
  0x73   : > { %1080 = vmatpush1.bf16.msra.mxu0 %v1554_v35 }
  0x74   : > { %1121 = vmatpush1.bf16.msra.mxu1 %v1555_v36  ;;  %1081 = vmatprep.subr.bf16.mxu0 %v1556_v37  ;;  %v1184_v36 = vunpack.c.l.bf16 (!%p1439_p13), %v1183_v29  ;;  %v1185_v37 = vunpack.c.h.bf16 (!%p1439_p13), %v1183_v29 }
  0x75   : > { %1122 = vmatprep.subr.bf16.mxu1 %v1558_v38 }
  0x77   : > { %1082 = vmatpush1.bf16.msra.mxu0 %v1560_v39 }
  0x78   : > { %1123 = vmatpush1.bf16.msra.mxu1 %v1561_v40  ;;  %1083 = vmatprep.subr.bf16.mxu0 %v1562_v41 }
  0x79   : > { %1124 = vmatprep.subr.bf16.mxu1 %v1564_v42 }
  0x7b   : > { %1084 = vmatpush1.bf16.msra.mxu0 %v1566_v43 }
  0x7c   : > { %1125 = vmatpush1.bf16.msra.mxu1 %v1567_v44  ;;  %1085 = vmatprep.subr.bf16.mxu0 %v1568_v45 }
  0x7d   : > { %1126 = vmatprep.subr.bf16.mxu1 %v1570_v46 }
  0x7f   : > { %1086 = vmatpush1.bf16.msra.mxu0 %v1572_v50 }
  0x80   : > { %1127 = vmatpush1.bf16.msra.mxu1 %v1573_v51  ;;  %1087 = vmatprep.subr.bf16.mxu0 %v1574_v53 }
  0x81   : > { %1128 = vmatprep.subr.bf16.mxu1 %v1576_v54 }
  0x83   : > { %1088 = vmatpush1.bf16.msra.mxu0 %v1578_v55 }
  0x84   : > { %1129 = vmatpush1.bf16.msra.mxu1 %v1579_v56  ;;  %1089 = vmatprep.subr.bf16.mxu0 %v1580_v57 }
  0x85   : > { %1130 = vmatprep.subr.bf16.mxu1 %v1582_v58 }
  0x87   : > { %1090 = vmatpush1.bf16.msra.mxu0 %v1584_v59 }
  0x88   : > { %1131 = vmatpush1.bf16.msra.mxu1 %v1585_v60  ;;  %1091 = vmatprep.subr.bf16.mxu0 %v1586_v61 }
  0x89   : > { %1132 = vmatprep.subr.bf16.mxu1 %v1588_v62 }
  0x8b   : > { %1092 = vmatpush1.bf16.msra.mxu0 %v1590_v63 }
  0x8c   : > { %1133 = vmatpush1.bf16.msra.mxu1 %v1591_v0  ;;  %1093 = vmatprep.subr.bf16.mxu0 %v1592_v1 }
  0x8d   : > { %1134 = vmatprep.subr.bf16.mxu1 %v1594_v2 }
  0x8f   : > { %1094 = vmatpush1.bf16.msra.mxu0 %v1596_v3 }
  0x90   : > { %1135 = vmatpush1.bf16.msra.mxu1 %v1597_v4 }
  0x92   : > { %1096 = vmatmul.mubr.bf16.vlgmr.msra.gmra.mrb[0].mxu0 %v1371_v5 }
  0x93   : > { %1137 = vmatmul.mubr.bf16.vlgmr.msra.gmra.mrb[0].mxu1 %v1373_v6 }
 0x165   : > { %v1097_v7 = vpop.f32.mrb[0].mxu0 }
 0x166   : > { %v1138_v9 = vpop.f32.mrb[0].mxu1  ;;  %v1099_v11 = vpop.f32.mrb[1].mxu0  ;;  %1152 = sbr.rel (%p1439_p13) target bundleno = 383 (0x17f), region = 86 }
 0x167   : > { %v1139_v10 = vadd.f32 %v1138_v9, %v1097_v7  ;;  %v1140_v13 = vpop.f32.mrb[1].mxu1  ;;  %v1101_v15 = vpop.f32.mrb[2].mxu0 }
 0x168   : > { %v1141_v14 = vadd.f32 %v1140_v13, %v1099_v11  ;;  %v1142_v16 = vpop.f32.mrb[2].mxu1  ;;  %v1102_v18 = vpop.f32.mrb[3].mxu0 }
 0x169   : > { %v1145_v17 = vadd.f32 %v1139_v10, %v661_v8  ;;  %v1143_v19 = vpop.f32.mrb[3].mxu1 }
 0x16a   : > { %v1146_v20 = vadd.f32 %v1141_v14, %v662_v12 }
 0x16b   : > { %1147 = vst [vmem:[#allocation2] sm:$0xff] %v1145_v17 }
 0x16c   : > { %1148 = vst [vmem:[#allocation2 + $0x8] sm:$0xff] %v1146_v20 }
 0x172   : > { %v1153_v27 = vld [vmem:[#allocation2] sm:$0xff] }
 0x173   : > { %v1154_v28 = vld [vmem:[#allocation2 + $0x8] sm:$0xff]  ;;  %v1167_v34 = vmul.f32 %v1160_v30, %v1153_v27 }
 0x174   : > { %v1168_v35 = vmul.f32 %v1164_v31, %v1154_v28 }
 0x175   : > { %v1181_v38 = vadd.f32 %v1174_v32, %v1167_v34 }
 0x176   : > { %v1182_v39 = vadd.f32 %v1178_v33, %v1168_v35 }
 0x177   : > { %v1186_v40 = vadd.f32 %v1184_v36, %v1181_v38 }
 0x178   : > { %v1187_v41 = vadd.f32 %v1185_v37, %v1182_v39 }
 0x179   : > { %v1188_v42 = vmax.f32 %v1186_v40, 0.0 }
 0x17a   : > { %v1189_v43 = vmax.f32 %v1187_v41, 0.0 }
 0x17c   : > { %v1444_v44 = vpack.c.bf16 %v1189_v43, %v1188_v42 }
 0x17e   : > { %1198 = vst [vmem:[%s1911_s7] sm:$0xff] %v1444_v44 }
 0x17f PF: > { %s15_s24 = sadd.s32 1, %s1656_s24   ;;  %s2024_s18 = smov %s1636_s19 }
 0x180   : > { %p12_p0 = scmp.ge.s32.totalorder %s15_s24, 20   ;;  %s2025_s19 = smov %s1740_s6 }
 0x181   : > { %s2026_s20 = smov %s1648_s22  ;;  %s2027_s21 = smov %s1652_s23 }
 0x182   : > { %s2028_s22 = smov %s2031_s25  ;;  %s2029_s23 = smov %s2035_s26 }
 0x183   :  { %14 = sbr.rel (!%p12_p0) target bundleno = 6 (0x6), region = 133 }

// kernel: forward.75
= control target key start
LH: loop header
LB: loop body
LE: loop exit
PB: predicated region body
PF: predicated region fallthrough
CT: control target
= control target key end

     0   :  { %vm33_vm0 = vcmask 1043456   ;;  %s757_s0 = inlined_call_operand.vmem [shape: bf16[2,4,512], index: 0, kind: input, shape index: {}]   ;;  %s758_s1 = inlined_call_operand.vmem [shape: f32[512,128], index: 1, kind: input, shape index: {}]   ;;  %s759_s2 = inlined_call_operand.vmem [shape: f32[1,128], index: 2, kind: input, shape index: {}]   ;;  %s760_s3 = inlined_call_operand.hbm [shape: f32[2,128], index: 3, kind: output, shape index: {}]  }
   0x1   :  { %v115_v0 = vld [vmem:[%s758_s1 + $0x80] sm:$0xff]  ;;  %v116_v1 = vld [vmem:[%s758_s1 + $0x88] sm:$0xff]  ;;  %v117_v11 = vld [vmem:[%s758_s1 + $0x90] sm:$0xff] }
   0x2   :  { %v99_v2 = vld [vmem:[%s758_s1] sm:$0xff]  ;;  %v413_v3 = vpack.c.bf16 %v116_v1, %v115_v0  ;;  %v100_v4 = vld [vmem:[%s758_s1 + $0x8] sm:$0xff]  ;;  %v118_v13 = vld [vmem:[%s758_s1 + $0x98] sm:$0xff] }
   0x3   :  { %v147_v5 = vld [vmem:[%s758_s1 + $0x180] sm:$0xff]  ;;  %v148_v6 = vld [vmem:[%s758_s1 + $0x188] sm:$0xff]  ;;  %v415_v7 = vpack.c.bf16 %v100_v4, %v99_v2  ;;  %v101_v14 = vld [vmem:[%s758_s1 + $0x10] sm:$0xff]  ;;  %v417_v16 = vpack.c.bf16 %v118_v13, %v117_v11 }
   0x4   :  { %v445_v8 = vpack.c.bf16 %v148_v6, %v147_v5  ;;  %v131_v9 = vld [vmem:[%s758_s1 + $0x100] sm:$0xff]  ;;  %v132_v10 = vld [vmem:[%s758_s1 + $0x108] sm:$0xff]  ;;  %414 = vmatprep.subr.bf16.mxu0 %v413_v3  ;;  %v102_v15 = vld [vmem:[%s758_s1 + $0x18] sm:$0xff] }
   0x5   :  { %v447_v12 = vpack.c.bf16 %v132_v10, %v131_v9  ;;  %416 = vmatpush3.bf16.msra.mxu0 %v415_v7  ;;  %v419_v17 = vpack.c.bf16 %v102_v15, %v101_v14  ;;  %v149_v18 = vld [vmem:[%s758_s1 + $0x190] sm:$0xff]  ;;  %v150_v19 = vld [vmem:[%s758_s1 + $0x198] sm:$0xff]  ;;  %v119_v23 = vld [vmem:[%s758_s1 + $0xa0] sm:$0xff] }
   0x6   :  { %446 = vmatprep.subr.bf16.mxu1 %v445_v8  ;;  %v133_v20 = vld [vmem:[%s758_s1 + $0x110] sm:$0xff]  ;;  %v449_v21 = vpack.c.bf16 %v150_v19, %v149_v18  ;;  %v134_v22 = vld [vmem:[%s758_s1 + $0x118] sm:$0xff]  ;;  %v120_v24 = vld [vmem:[%s758_s1 + $0xa8] sm:$0xff]  ;;  %418 = vmatprep.subr.bf16.mxu0 %v417_v16 }
   0x7   :  { %448 = vmatpush3.bf16.msra.mxu1 %v447_v12  ;;  %v451_v25 = vpack.c.bf16 %v134_v22, %v133_v20  ;;  %v421_v26 = vpack.c.bf16 %v120_v24, %v119_v23  ;;  %v103_v27 = vld [vmem:[%s758_s1 + $0x20] sm:$0xff]  ;;  %v104_v28 = vld [vmem:[%s758_s1 + $0x28] sm:$0xff]  ;;  %v121_v35 = vld [vmem:[%s758_s1 + $0xb0] sm:$0xff] }
   0x8   :  { %v151_v29 = vld [vmem:[%s758_s1 + $0x1a0] sm:$0xff]  ;;  %450 = vmatprep.subr.bf16.mxu1 %v449_v21  ;;  %v152_v30 = vld [vmem:[%s758_s1 + $0x1a8] sm:$0xff]  ;;  %v423_v33 = vpack.c.bf16 %v104_v28, %v103_v27  ;;  %v122_v36 = vld [vmem:[%s758_s1 + $0xb8] sm:$0xff] }
   0x9   :  { %v135_v31 = vld [vmem:[%s758_s1 + $0x120] sm:$0xff]  ;;  %v136_v32 = vld [vmem:[%s758_s1 + $0x128] sm:$0xff]  ;;  %420 = vmatpush3.bf16.msra.mxu0 %v419_v17  ;;  %v453_v34 = vpack.c.bf16 %v152_v30, %v151_v29  ;;  %v105_v37 = vld [vmem:[%s758_s1 + $0x30] sm:$0xff]  ;;  %v425_v39 = vpack.c.bf16 %v122_v36, %v121_v35 }
   0xa   :  { %422 = vmatprep.subr.bf16.mxu0 %v421_v26  ;;  %v455_v38 = vpack.c.bf16 %v136_v32, %v135_v31  ;;  %v106_v40 = vld [vmem:[%s758_s1 + $0x38] sm:$0xff]  ;;  %v153_v41 = vld [vmem:[%s758_s1 + $0x1b0] sm:$0xff]  ;;  %v123_v46 = vld [vmem:[%s758_s1 + $0xc0] sm:$0xff] }
   0xb   :  { %452 = vmatpush3.bf16.msra.mxu1 %v451_v25  ;;  %v154_v42 = vld [vmem:[%s758_s1 + $0x1b8] sm:$0xff]  ;;  %v137_v44 = vld [vmem:[%s758_s1 + $0x130] sm:$0xff]  ;;  %v124_v47 = vld [vmem:[%s758_s1 + $0xc8] sm:$0xff]  ;;  %v427_v48 = vpack.c.bf16 %v106_v40, %v105_v37 }
   0xc   :  { %454 = vmatprep.subr.bf16.mxu1 %v453_v34  ;;  %v457_v43 = vpack.c.bf16 %v154_v42, %v153_v41  ;;  %v138_v45 = vld [vmem:[%s758_s1 + $0x138] sm:$0xff]  ;;  %v107_v49 = vld [vmem:[%s758_s1 + $0x40] sm:$0xff]  ;;  %v156_v51 = vld [vmem:[%s758_s1 + $0x1c8] sm:$0xff]  ;;  %v429_v53 = vpack.c.bf16 %v124_v47, %v123_v46 }
   0xd   :  { %424 = vmatpush3.bf16.msra.mxu0 %v423_v33  ;;  %v155_v50 = vld [vmem:[%s758_s1 + $0x1c0] sm:$0xff]  ;;  %v459_v52 = vpack.c.bf16 %v138_v45, %v137_v44  ;;  %v108_v54 = vld [vmem:[%s758_s1 + $0x48] sm:$0xff]  ;;  %v125_v58 = vld [vmem:[%s758_s1 + $0xd0] sm:$0xff] }
   0xe   :  { %426 = vmatprep.subr.bf16.mxu0 %v425_v39  ;;  %v139_v55 = vld [vmem:[%s758_s1 + $0x140] sm:$0xff]  ;;  %v140_v56 = vld [vmem:[%s758_s1 + $0x148] sm:$0xff]  ;;  %v461_v57 = vpack.c.bf16 %v156_v51, %v155_v50  ;;  %v126_v59 = vld [vmem:[%s758_s1 + $0xd8] sm:$0xff]  ;;  %v431_v2 = vpack.c.bf16 %v108_v54, %v107_v49 }
   0xf   :  { %456 = vmatpush3.bf16.msra.mxu1 %v455_v38  ;;  %v157_v60 = vld [vmem:[%s758_s1 + $0x1d0] sm:$0xff]  ;;  %v110_v62 = vld [vmem:[%s758_s1 + $0x58] sm:$0xff]  ;;  %v127_v3 = vld [vmem:[%s758_s1 + $0xe0] sm:$0xff]  ;;  %v463_v6 = vpack.c.bf16 %v140_v56, %v139_v55  ;;  %v433_v7 = vpack.c.bf16 %v126_v59, %v125_v58 }
  0x10   :  { %458 = vmatprep.subr.bf16.mxu1 %v457_v43  ;;  %v109_v61 = vld [vmem:[%s758_s1 + $0x50] sm:$0xff]  ;;  %v158_v63 = vld [vmem:[%s758_s1 + $0x1d8] sm:$0xff]  ;;  %v128_v4 = vld [vmem:[%s758_s1 + $0xe8] sm:$0xff] }
  0x11   :  { %v141_v0 = vld [vmem:[%s758_s1 + $0x150] sm:$0xff]  ;;  %v142_v1 = vld [vmem:[%s758_s1 + $0x158] sm:$0xff]  ;;  %428 = vmatpush3.bf16.msra.mxu0 %v427_v48  ;;  %v111_v5 = vld [vmem:[%s758_s1 + $0x60] sm:$0xff]  ;;  %v465_v11 = vpack.c.bf16 %v158_v63, %v157_v60  ;;  %v435_v18 = vpack.c.bf16 %v110_v62, %v109_v61  ;;  %v437_v20 = vpack.c.bf16 %v128_v4, %v127_v3 }
  0x12   :  { %430 = vmatprep.subr.bf16.mxu0 %v429_v53  ;;  %v112_v8 = vld [vmem:[%s758_s1 + $0x68] sm:$0xff]  ;;  %v159_v9 = vld [vmem:[%s758_s1 + $0x1e0] sm:$0xff]  ;;  %v129_v14 = vld [vmem:[%s758_s1 + $0xf0] sm:$0xff]  ;;  %v467_v19 = vpack.c.bf16 %v142_v1, %v141_v0 }
  0x13   :  { %460 = vmatpush3.bf16.msra.mxu1 %v459_v52  ;;  %v160_v10 = vld [vmem:[%s758_s1 + $0x1e8] sm:$0xff]  ;;  %v143_v12 = vld [vmem:[%s758_s1 + $0x160] sm:$0xff]  ;;  %v130_v15 = vld [vmem:[%s758_s1 + $0xf8] sm:$0xff]  ;;  %v439_v24 = vpack.c.bf16 %v112_v8, %v111_v5 }
  0x14   :  { %462 = vmatprep.subr.bf16.mxu1 %v461_v57  ;;  %v144_v13 = vld [vmem:[%s758_s1 + $0x168] sm:$0xff]  ;;  %v700_v16 = vld [vmem:[%s758_s1 + $0x70] sm:$0xff]  ;;  %v705_v17 = vld [vmem:[%s758_s1 + $0x78] sm:$0xff]  ;;  %v469_v25 = vpack.c.bf16 %v160_v10, %v159_v9  ;;  %v441_v30 = vpack.c.bf16 %v130_v15, %v129_v14 }
  0x15   :  { %432 = vmatpush3.bf16.msra.mxu0 %v431_v2  ;;  %v161_v21 = vld [vmem:[%s758_s1 + $0x1f0] sm:$0xff]  ;;  %v162_v22 = vld [vmem:[%s758_s1 + $0x1f8] sm:$0xff]  ;;  %v471_v26 = vpack.c.bf16 %v144_v13, %v143_v12  ;;  %v15_v28 = vld [vmem:[%s757_s0] sm:$0xff] }
  0x16   :  { %v716_v23 = vld [vmem:[%s758_s1 + $0x170] sm:$0xff]  ;;  %434 = vmatprep.subr.bf16.mxu0 %v433_v7  ;;  %v146_v27 = vld [vmem:[%s758_s1 + $0x178] sm:$0xff]  ;;  %v16_v29 = vld [vmem:[%s757_s0 + $0x8] sm:$0xff]  ;;  %v17_v31 = vunpack.c.l.bf16 %v15_v28  ;;  %v18_v33 = vunpack.c.h.bf16 %v15_v28 }
  0x17   :  { %464 = vmatpush3.bf16.msra.mxu1 %v463_v6  ;;  %v19_v32 = vunpack.c.l.bf16 %v16_v29 }
  0x18   :  { %466 = vmatprep.subr.bf16.mxu1 %v465_v11 }
  0x19   :  { %8 = vsyncpa [#allocation3], 0  ;;  %v443_v34 = vpack.c.bf16 %v705_v17, %v700_v16  ;;  %v473_v35 = vpack.c.bf16 %v162_v22, %v161_v21  ;;  %v475_v36 = vpack.c.bf16 %v146_v27, %v716_v23  ;;  %v20_v37 = vunpack.c.h.bf16 %v16_v29  ;;  %436 = vmatpush3.bf16.msra.mxu0 %v435_v18  ;;  %s502_s9 = smov [#allocation2]  }
  0x1a   :  { %v25_v38 = vcombine.high %v17_v31, %v17_v31  ;;  %v27_v39 = vcombine.high %v19_v32, %v19_v32  ;;  %v34_v40 = vsel %vm33_vm0, %v17_v31, 0.0  ;;  %v62_v41 = vsel %vm33_vm0, %v19_v32, 0.0  ;;  %438 = vmatprep.subr.bf16.mxu0 %v437_v20  ;;  %s334_s10 = sshll.u32 %s502_s9, 4  ;;  %s335_s10 = int_to_ptr.vmem [resolvable:$true] %s334_s10 }
  0x1b   :  { %468 = vmatpush3.bf16.msra.mxu1 %v467_v19  ;;  %v35_v42 = vrot.slane %v34_v40, 4  ;;  %v63_v43 = vrot.slane %v62_v41, 4  ;;  %v26_v44 = vcombine.high %v18_v33, %v18_v33  ;;  %v28_v45 = vcombine.high %v20_v37, %v20_v37  ;;  %s478_s11 = scalar_lea.vmem %s335_s10, 32  ;;  %p483_p1 = scmp.lt.s32.totalorder %s335_s10, %s335_s10 }
  0x1c   :  { %470 = vmatprep.subr.bf16.mxu1 %v469_v25  ;;  %v41_v46 = vsel %vm33_vm0, %v25_v38, 0.0  ;;  %v69_v47 = vsel %vm33_vm0, %v27_v39, 0.0  ;;  %v48_v48 = vsel %vm33_vm0, %v18_v33, 0.0  ;;  %v76_v49 = vsel %vm33_vm0, %v20_v37, 0.0  ;;  %p479_p0 = scmp.ne.s32.totalorder %s335_s10, %s478_s11  ;;  %p484_p2 = scmp.lt.s32.totalorder %s478_s11, %s478_s11 }
  0x1d   :  { %v42_v50 = vrot.slane %v41_v46, 4  ;;  %v70_v51 = vrot.slane %v69_v47, 4  ;;  %v36_v52 = vadd.f32 %v35_v42, %v34_v40  ;;  %v64_v53 = vadd.f32 %v63_v43, %v62_v41  ;;  %440 = vmatpush3.bf16.msra.mxu0 %v439_v24 }
  0x1e   :  { %vm178_vm1 = vcmask 1041409   ;;  %v55_v54 = vsel %vm33_vm0, %v26_v44, 0.0  ;;  %v83_v55 = vsel %vm33_vm0, %v28_v45, 0.0  ;;  %v49_v56 = vrot.slane %v48_v48, 4  ;;  %442 = vmatprep.subr.bf16.mxu0 %v441_v30  ;;  %p485_p3 = por %p484_p2, %p483_p1 }
  0x1f   :  { %v77_v57 = vrot.slane %v76_v49, 4  ;;  %472 = vmatpush3.bf16.msra.mxu1 %v471_v26  ;;  %v43_v58 = vadd.f32 %v42_v50, %v41_v46  ;;  %v71_v59 = vadd.f32 %v70_v51, %v69_v47  ;;  %v37_v60 = vrot.slane %v36_v52, 2  ;;  %v342_v47 = vld [vmem:[%s759_s2] ss:$0 sm:$0xff] }
  0x20   :  { %v65_v61 = vrot.slane %v64_v53, 2  ;;  %474 = vmatprep.subr.bf16.mxu1 %v473_v35  ;;  %v56_v62 = vrot.slane %v55_v54, 4  ;;  %v84_v63 = vrot.slane %v83_v55, 4  ;;  %v50_v0 = vadd.f32 %v49_v56, %v48_v48  ;;  %p486_p4 = pnand %p485_p3, %p479_p0 }
  0x21   :  { %v78_v1 = vadd.f32 %v77_v57, %v76_v49  ;;  %v44_v2 = vrot.slane %v43_v58, 2  ;;  %v72_v3 = vrot.slane %v71_v59, 2  ;;  %v38_v4 = vadd.f32 %v37_v60, %v36_v52  ;;  %444 = vmatpush3.bf16.msra.mxu0 %v443_v34 }
  0x22   :  { %v66_v5 = vadd.f32 %v65_v61, %v64_v53  ;;  %v57_v6 = vadd.f32 %v56_v62, %v55_v54  ;;  %v85_v7 = vadd.f32 %v84_v63, %v83_v55  ;;  %v51_v8 = vrot.slane %v50_v0, 2 }
  0x23   :  { %v79_v9 = vrot.slane %v78_v1, 2  ;;  %476 = vmatpush3.bf16.msra.mxu1 %v475_v36  ;;  %v45_v10 = vadd.f32 %v44_v2, %v43_v58  ;;  %v73_v11 = vadd.f32 %v72_v3, %v71_v59  ;;  %v39_v12 = vrot.slane %v38_v4, 1 }
  0x24   :  { %v67_v13 = vrot.slane %v66_v5, 1  ;;  %v58_v14 = vrot.slane %v57_v6, 2  ;;  %v86_v15 = vrot.slane %v85_v7, 2  ;;  %v52_v16 = vadd.f32 %v51_v8, %v50_v0 }
  0x25   :  { %v80_v17 = vadd.f32 %v79_v9, %v78_v1  ;;  %v46_v18 = vrot.slane %v45_v10, 1  ;;  %v74_v19 = vrot.slane %v73_v11, 1  ;;  %v40_v20 = vadd.f32 %v39_v12, %v38_v4 }
  0x26   :  { %v68_v21 = vadd.f32 %v67_v13, %v66_v5  ;;  %v59_v22 = vadd.f32 %v58_v14, %v57_v6  ;;  %v87_v23 = vadd.f32 %v86_v15, %v85_v7  ;;  %v53_v24 = vrot.slane %v52_v16, 1 }
  0x27   :  { %v81_v25 = vrot.slane %v80_v17, 1  ;;  %v47_v26 = vadd.f32 %v46_v18, %v45_v10  ;;  %v75_v27 = vadd.f32 %v74_v19, %v73_v11  ;;  %v91_v28 = vmul.f32 0.25, %v40_v20 }
  0x28   :  { %v95_v29 = vmul.f32 0.25, %v68_v21  ;;  %v60_v30 = vrot.slane %v59_v22, 1  ;;  %v88_v31 = vrot.slane %v87_v23, 1  ;;  %v54_v32 = vadd.f32 %v53_v24, %v52_v16 }
  0x29   :  { %v82_v33 = vadd.f32 %v81_v25, %v80_v17  ;;  %v92_v34 = vmul.f32 0.25, %v47_v26  ;;  %v96_v35 = vmul.f32 0.25, %v75_v27 }
  0x2a   :  { %v179_v36 = vsel %vm178_vm1, %v95_v29, %v91_v28  ;;  %v61_v37 = vadd.f32 %v60_v30, %v59_v22  ;;  %v89_v38 = vadd.f32 %v88_v31, %v87_v23  ;;  %v93_v39 = vmul.f32 0.25, %v54_v32 }
  0x2b   :  { %v97_v40 = vmul.f32 0.25, %v82_v33  ;;  %v180_v41 = vsel %vm178_vm1, %v96_v35, %v92_v34 }
  0x2c   :  { %251 = vmatprep.mubr.f32.mxu0 %v180_v41  ;;  %v94_v42 = vmul.f32 0.25, %v61_v37  ;;  %v98_v43 = vmul.f32 0.25, %v89_v38 }
  0x2d   :  { %252 = vmatmul.mubr.f32.vlgmr.msra.gmra.mrb[0].mxu0 %v179_v36  ;;  %v181_v44 = vsel %vm178_vm1, %v97_v40, %v93_v39 }
  0x2e   :  { %v182_v45 = vsel %vm178_vm1, %v98_v43, %v94_v42 }
  0x2f   :  { %321 = vmatprep.mubr.f32.mxu1 %v182_v45 }
  0x30   :  { %322 = vmatmul.mubr.f32.vlgmr.msra.gmra.mrb[0].mxu1 %v181_v44 }
 0x100   :  { %v375_v46 = vpop.f32.mrb[0].mxu0 }
 0x101   :  { %v376_v48 = vpop.f32.mrb[1].mxu0 }
 0x102   :  { %v377_v49 = vadd.f32 %v376_v48, %v375_v46 }
 0x103   :  { %v410_v50 = vpop.f32.mrb[0].mxu1 }
 0x104   :  { %v254_v51 = vadd.f32 %v377_v49, %v342_v47  ;;  %v411_v52 = vpop.f32.mrb[1].mxu1 }
 0x105   :  { %v412_v53 = vadd.f32 %v411_v52, %v410_v50 }
 0x107   :  { %v324_v54 = vadd.f32 %v412_v53, %v254_v51 }
 0x109   :  { %327 = vst [vmem:[#allocation2] sm:$0x3] %v324_v54 }
 0x10a   :  { %489 = shalt.err (!%p486_p4)
}
 0x10b   :  { %s490_s13 = scalar_lea.hbm %s760_s3, 32 }
 0x10c   :  { %p491_p5 = scmp.ne.s32.totalorder %s760_s3, %s490_s13  ;;  %p494_p6 = scmp.lt.u32.totalorder %s490_s13, %s760_s3 }
 0x10e   :  { %p496_p7 = pnand %p494_p6, %p491_p5 }
 0x110   :  { %499 = shalt.err (!%p496_p7)
}
 0x111   :  { %337 = dma.vmem_to_hbm [thread:$0]  %s335_s10, 32, %s760_s3, [#allocation3]  }
 0x112   :  { %500 = dma.done.wait [#allocation3], 32  }
 0x113   :  { %501 = vsyncadd [#allocation3], 4294967264 }
 0x114   :  { %341 = vsyncpa [#allocation3], 1 }

</bundles_post_ra>
